<compile_context>
chip_gen: v5e
topology: v5e:2x2
jax: 0.10.0
libtpu: 0.0.40
codegen_flags: <defaults>
</compile_context>

<pallas_src>
import numpy as np
import jax
import jax.numpy as jnp
from jax.experimental import pallas as pl
from jax.experimental.pallas import tpu as pltpu


def _round_up(a, m):
    return (a + m - 1) // m * m


def make_aspp_kernel(H, W, Cin, dilations, pad_h, pad_wl, pad_w, Hp, Wp):
    HW = H * W
    bf = jnp.bfloat16

    def kernel(x_ref, rb_ref, w_a0_ref, b_a0_ref, dw_ref, b_dw_ref,
               w_pw_ref, b_pw_ref, w_fb_ref, o_ref, xp_ref, acc_ref):
        x = x_ref[0]                                   # (H, W, Cin) f32
        x_b = x.astype(bf)
        xf_b = x_b.reshape(HW, Cin)                    # free when W % 16 == 0 (bf16)

        # Zero-padded bf16 copy of the image for the dilated depthwise taps.
        # Only the border strips are zeroed: the interior is fully
        # overwritten every grid step (saves ~H*W*Cin of vst/VALU memset and
        # stays correct under megacore sharding).
        if pad_h > 0:
            xp_ref[0:pad_h, :, :] = jnp.zeros((pad_h, Wp, Cin), bf)
            xp_ref[pad_h + H:Hp, :, :] = jnp.zeros((Hp - pad_h - H, Wp, Cin), bf)
        if pad_wl > 0:
            xp_ref[pad_h:pad_h + H, 0:pad_wl, :] = jnp.zeros((H, pad_wl, Cin), bf)
        if Wp - pad_wl - W > 0:
            xp_ref[pad_h:pad_h + H, pad_wl + W:Wp, :] = (
                jnp.zeros((H, Wp - pad_wl - W, Cin), bf))
        xp_ref[pad_h:pad_h + H, pad_wl:pad_wl + W, :] = x_b

        # --- aspp0: 1x1 conv (BN folded) -> bias -> ReLU, then its slice of
        # the fusion 1x1 conv accumulated straight into acc_ref (no concat).
        x0 = jnp.dot(xf_b, w_a0_ref[...], preferred_element_type=jnp.float32)
        x0 = jnp.maximum(x0 + b_a0_ref[...], 0.0)
        acc_ref[...] = jnp.dot(x0.astype(bf), w_fb_ref[0],
                               preferred_element_type=jnp.float32)

        dw_all = dw_ref[...]                           # (3, 9, Cin) bf16, BN folded
        b_dw_all = b_dw_ref[...]                       # (3, Cin)  f32
        b_pw_all = b_pw_ref[...]                       # (3, Cpad) f32

        for i, d in enumerate(dilations):
            # Depthwise 3x3, dilation=d, padding=d, groups=Cin via statically
            # shifted windows of the padded copy.  Taps whose offset falls
            # completely outside the image only read the zero border and are
            # skipped at trace time.
            used_ky = [ky for ky in range(3) if abs((ky - 1) * d) < H]
            used_kx = [kx for kx in range(3) if abs((kx - 1) * d) < W]
            # TODO(synk): on v5e, swap the sublane-misaligned kx windows for
            # one aligned full-width slab per ky + pltpu.roll (XLU offload).
            ky_parts = []
            for ky in used_ky:
                oy = pad_h + (ky - 1) * d
                part = None
                for kx in used_kx:
                    ox = pad_wl + (kx - 1) * d
                    t = ky * 3 + kx
                    wt = dw_all[i, t:t + 1, :]                  # (1, Cin) bf16
                    win = xp_ref[oy:oy + H, ox:ox + W, :]       # (H, W, Cin) bf16
                    prod = win * wt                             # bf16 VALU MAC
                    part = prod if part is None else part + prod
                ky_parts.append(part)
            dw_acc = ky_parts[0]                 # shallow summation tree keeps
            for p in ky_parts[1:]:               # bf16 rounding depth <= 4
                dw_acc = dw_acc + p

            h = dw_acc.reshape(HW, Cin)                         # bf16
            h = jnp.maximum(h + b_dw_all[i:i + 1, :], 0.0)      # f32 bias + ReLU
            xi = jnp.dot(h.astype(bf), w_pw_ref[i],
                         preferred_element_type=jnp.float32)
            xi = jnp.maximum(xi + b_pw_all[i:i + 1, :], 0.0)
            acc_ref[...] += jnp.dot(xi.astype(bf), w_fb_ref[i + 1],
                                    preferred_element_type=jnp.float32)

        # --- per-image fusion bias row (image-pooling branch + fusion BN
        # bias, computed in the wrapper), final ReLU, lane-dense flat store.
        y = jnp.maximum(acc_ref[...] + rb_ref[0], 0.0)
        # TODO(synk): Dropout2d(p=0.1) is identity in eval mode; training-mode
        # per-channel dropout (pltpu.prng_*) is not implemented here.
        o_ref[0] = y.astype(o_ref.dtype)

    return kernel


def aspp_pallas(x_nchw, params, dilations, out_dtype=jnp.float32):
    # out_dtype=jnp.bfloat16 halves the HBM writeback if the consumer allows.
    x = jnp.transpose(x_nchw, (0, 2, 3, 1)).astype(jnp.float32)        # -> NHWC
    N, H, W, Cin = x.shape
    Cout = params["w_a0"].shape[1]
    Cpad = _round_up(Cout, 128)            # lane-dense branch / output channels
    HW = H * W

    max_d = max(dilations)
    pad_h = min(max_d, H - 1)              # rows beyond this are never read
    pad_w = min(max_d, W - 1)
    pad_wl = _round_up(pad_w, 16)          # bf16 sublane-aligned interior column
    Hp = H + 2 * pad_h
    Wp = pad_wl + W + pad_w

    # ---- fold eval-mode BN scales into conv weights; pad channel blocks to
    # ---- a multiple of 128 lanes (host side, one-off) ----
    def pad_cols(a):
        return jnp.pad(a, [(0, 0)] * (a.ndim - 1) + [(0, Cpad - a.shape[-1])])

    w_a0 = pad_cols(params["w_a0"] * params["sb_a0"][0:1, :]).astype(jnp.bfloat16)
    b_a0 = pad_cols(params["sb_a0"][1:2, :])                           # (1, Cpad)
    dw = (params["dw"] * params["sb_dw"][:, 0:1, :]).astype(jnp.bfloat16)  # (3,9,Cin)
    b_dw = params["sb_dw"][:, 1, :]                                    # (3, Cin)
    w_pw = pad_cols(params["w_pw"] * params["sb_pw"][:, 0:1, :]).astype(jnp.bfloat16)
    b_pw = pad_cols(params["sb_pw"][:, 1, :])                          # (3, Cpad)

    w_f = params["w_f"] * params["sb_f"][0:1, :]                       # (5*Cout, Cout)
    w_f = jnp.pad(w_f, ((0, 0), (0, Cpad - Cout)))                     # (5*Cout, Cpad)
    b_f = jnp.pad(params["sb_f"][1:2, :], ((0, 0), (0, Cpad - Cout)))  # (1, Cpad)
    w_f_pool = w_f[0:Cout]                                             # (Cout, Cpad) f32
    # Fusion weight split per branch (x0, x1, x2, x3), rows padded to Cpad.
    w_fb = jnp.stack(
        [jnp.pad(w_f[(j + 1) * Cout:(j + 2) * Cout],
                 ((0, Cpad - Cout), (0, 0))) for j in range(4)],
        axis=0).astype(jnp.bfloat16)                                   # (4, Cpad, Cpad)

    # ---- image-pooling branch hoisted to the wrapper (f32): GAP -> 1x1 conv
    # -> BN -> ReLU; bilinear upsample of a 1x1 map (align_corners=True) is a
    # broadcast, so its fusion contribution is a per-image bias row.
    gap = jnp.mean(x, axis=(1, 2))                                     # (N, Cin)
    pool = jnp.maximum((gap @ params["w_pool"]) * params["sb_pool"][0]
                       + params["sb_pool"][1], 0.0)                    # (N, Cout)
    rb = (pool @ w_f_pool + b_f).reshape(N, 1, Cpad)                   # (N,1,Cpad) f32

    kernel = make_aspp_kernel(H, W, Cin, dilations, pad_h, pad_wl, pad_w, Hp, Wp)

    def full(shape):
        return pl.BlockSpec(shape, lambda n, _nd=len(shape): (0,) * _nd)

    # TODO(synk): for realistic shapes (H*W*Cin >> VMEM) add a spatial
    # row-block grid axis with a +/-max_d-row halo (manual DMA of the halo);
    # the GAP is already hoisted so only the depthwise halo is needed.
    in_specs = [
        pl.BlockSpec((1, H, W, Cin), lambda n: (n, 0, 0, 0)),   # image (one DMA)
        pl.BlockSpec((1, 1, Cpad), lambda n: (n, 0, 0)),        # fusion bias row
        full((Cin, Cpad)), full((1, Cpad)),                     # aspp0 conv / bias
        full((3, 9, Cin)), full((3, Cin)),                      # depthwise w / bias
        full((3, Cin, Cpad)), full((3, Cpad)),                  # pointwise w / bias
        full((4, Cpad, Cpad)),                                  # fusion w per branch
    ]
    out_specs = pl.BlockSpec((1, HW, Cpad), lambda n: (n, 0, 0))

    # Derive the VMEM budget from the device (64 MiB on v7x, 128 on v5e/v6e)
    # with headroom, instead of requesting all of physical VMEM.
    try:
        vmem_cap = int(pltpu.get_tpu_info().vmem_capacity_bytes)
    except Exception:
        vmem_cap = 64 * 1024 * 1024
    vmem_limit = max(32 * 1024 * 1024, vmem_cap - 16 * 1024 * 1024)

    out = pl.pallas_call(
        kernel,
        out_shape=jax.ShapeDtypeStruct((N, HW, Cpad), out_dtype),
        grid=(N,),
        in_specs=in_specs,
        out_specs=out_specs,
        scratch_shapes=[pltpu.VMEM((Hp, Wp, Cin), jnp.bfloat16),   # padded image
                        pltpu.VMEM((HW, Cpad), jnp.float32)],      # fusion accumulator
        compiler_params=pltpu.CompilerParams(
            dimension_semantics=("parallel",),
            vmem_limit_bytes=vmem_limit),
    )(x, rb, w_a0, b_a0, dw, b_dw, w_pw, b_pw, w_fb)

    out = out.reshape(N, H, W, Cpad)[..., :Cout].astype(jnp.float32)
    return jnp.transpose(out, (0, 3, 1, 2))                           # -> NCHW


# ---------------------------------------------------------------------------
# Deterministic synthetic parameters (BN as eval-mode per-channel scale/bias).
# ---------------------------------------------------------------------------
def make_params(key, cin, cout):
    it = iter(jax.random.split(key, 64))

    def w(shape, fan_in):
        return jax.random.normal(next(it), shape, jnp.float32) / np.sqrt(fan_in)

    def bn_sb(c):
        gamma = jax.random.uniform(next(it), (c,), jnp.float32, 0.5, 1.5)
        beta = 0.1 * jax.random.normal(next(it), (c,), jnp.float32)
        mean = 0.1 * jax.random.normal(next(it), (c,), jnp.float32)
        var = jax.random.uniform(next(it), (c,), jnp.float32, 0.5, 1.5)
        s = gamma * jax.lax.rsqrt(var + 1e-5)
        b = beta - mean * s
        return jnp.stack([s, b], axis=0)            # (2, c)

    return {
        "w_a0": w((cin, cout), cin), "sb_a0": bn_sb(cout),
        "w_pool": w((cin, cout), cin), "sb_pool": bn_sb(cout),
        "dw": w((3, 9, cin), 9.0),                               # dw[i, ky*3+kx, c]
        "sb_dw": jnp.stack([bn_sb(cin) for _ in range(3)], axis=0),
        "w_pw": w((3, cin, cout), cin),
        "sb_pw": jnp.stack([bn_sb(cout) for _ in range(3)], axis=0),
        "w_f": w((5 * cout, cout), 5 * cout), "sb_f": bn_sb(cout),
    }


# ---------------------------------------------------------------------------
# Plain-JAX reference (independent f32 path via lax.conv_general_dilated).
# ---------------------------------------------------------------------------
def aspp_reference(x_nchw, params, dilations):
    x = jnp.transpose(x_nchw, (0, 2, 3, 1)).astype(jnp.float32)
    N, H, W, Cin = x.shape
    Cout = params["w_a0"].shape[1]

    def affine_relu(z, sb):
        return jnp.maximum(z * sb[0] + sb[1], 0.0)

    gap = jnp.mean(x, axis=(1, 2))                                    # (N, Cin)
    pool = affine_relu(gap @ params["w_pool"], params["sb_pool"])     # (N, Cout)
    pool = jnp.broadcast_to(pool[:, None, None, :], (N, H, W, Cout))  # bilinear(1x1->HxW)
    x0 = affine_relu(jnp.einsum("nhwc,cd->nhwd", x, params["w_a0"]),
                     params["sb_a0"])
    branches = [pool, x0]
    for i, d in enumerate(dilations):
        rhs = params["dw"][i].reshape(3, 3, Cin)[:, :, None, :]       # HWIO, groups=Cin
        h = jax.lax.conv_general_dilated(
            x, rhs, window_strides=(1, 1), padding=[(d, d), (d, d)],
            rhs_dilation=(d, d), dimension_numbers=("NHWC", "HWIO", "NHWC"),
            feature_group_count=Cin)
        h = affine_relu(h, params["sb_dw"][i])
        xi = affine_relu(jnp.einsum("nhwc,cd->nhwd", h, params["w_pw"][i]),
                         params["sb_pw"][i])
        branches.append(xi)
    cat = jnp.concatenate(branches, axis=-1)
    y = affine_relu(jnp.einsum("nhwc,cd->nhwd", cat, params["w_f"]),
                    params["sb_f"])
    return jnp.transpose(y, (0, 3, 1, 2))


if __name__ == "__main__":
    N, Cin, Cout, H, W = 2, 16, 8, 16, 16
    output_stride = 8
    dilations = (12, 24, 36) if output_stride == 8 else (6, 12, 18)

    key = jax.random.PRNGKey(0)
    k_x, k_p = jax.random.split(key)
    x = jax.random.normal(k_x, (N, Cin, H, W), jnp.float32)   # NCHW like PyTorch
    params = make_params(k_p, Cin, Cout)

    out = jax.block_until_ready(aspp_pallas(x, params, dilations))
    ref = jax.block_until_ready(aspp_reference(x, params, dilations))

    assert out.shape == (N, Cout, H, W)
    # Tolerance accounts for bf16 MXU operands and the bf16 depthwise
    # multiply-accumulate (the reference path is f32 end-to-end).
    np.testing.assert_allclose(np.asarray(out), np.asarray(ref),
                               rtol=5e-2, atol=5e-2)
    print("KERNEL_OK")
</pallas_src>

<mosaic_0001>
module attributes {stable_mosaic.version = 11 : i64} {
  func.func @kernel(%arg0: i32, %arg1: memref<1x16x16x16xf32, #tpu.memory_space<vmem>>, %arg2: memref<1x1x128xf32, #tpu.memory_space<vmem>>, %arg3: memref<16x128xbf16, #tpu.memory_space<vmem>>, %arg4: memref<1x128xf32, #tpu.memory_space<vmem>>, %arg5: memref<3x9x16xbf16, #tpu.memory_space<vmem>>, %arg6: memref<3x16xf32, #tpu.memory_space<vmem>>, %arg7: memref<3x16x128xbf16, #tpu.memory_space<vmem>>, %arg8: memref<3x128xf32, #tpu.memory_space<vmem>>, %arg9: memref<4x128x128xbf16, #tpu.memory_space<vmem>>, %arg10: memref<1x256x128xf32, #tpu.memory_space<vmem>>, %arg11: memref<46x47x16xbf16, #tpu.memory_space<vmem>>, %arg12: memref<256x128xf32, #tpu.memory_space<vmem>>) attributes {dimension_semantics = [#tpu.dimension_semantics<parallel>], iteration_bounds = array<i64: 2>, scalar_prefetch = 0 : i64, scratch_operands = 2 : i64, tpu.core_type = #tpu.core_type<tc>, window_params = [{transform_indices = @transform_0, window_bounds = array<i64: 1, 16, 16, 16>}, {transform_indices = @transform_1, window_bounds = array<i64: 1, 1, 128>}, {pipeline_mode = #tpu.pipeline_mode<synchronous>, transform_indices = @transform_2, window_bounds = array<i64: 16, 128>}, {pipeline_mode = #tpu.pipeline_mode<synchronous>, transform_indices = @transform_3, window_bounds = array<i64: 1, 128>}, {pipeline_mode = #tpu.pipeline_mode<synchronous>, transform_indices = @transform_4, window_bounds = array<i64: 3, 9, 16>}, {pipeline_mode = #tpu.pipeline_mode<synchronous>, transform_indices = @transform_5, window_bounds = array<i64: 3, 16>}, {pipeline_mode = #tpu.pipeline_mode<synchronous>, transform_indices = @transform_6, window_bounds = array<i64: 3, 16, 128>}, {pipeline_mode = #tpu.pipeline_mode<synchronous>, transform_indices = @transform_7, window_bounds = array<i64: 3, 128>}, {pipeline_mode = #tpu.pipeline_mode<synchronous>, transform_indices = @transform_8, window_bounds = array<i64: 4, 128, 128>}, {transform_indices = @transform_9, window_bounds = array<i64: 1, 256, 128>}]} {
    %c0 = arith.constant 0 : index
    %c0_0 = arith.constant 0 : index
    %c0_1 = arith.constant 0 : index
    %c0_2 = arith.constant 0 : index
    %0 = vector.load %arg1[%c0, %c0_0, %c0_1, %c0_2] : memref<1x16x16x16xf32, #tpu.memory_space<vmem>>, vector<1x16x16x16xf32>
    %1 = vector.shape_cast %0 : vector<1x16x16x16xf32> to vector<16x16x16xf32>
    %2 = arith.truncf %1 : vector<16x16x16xf32> to vector<16x16x16xbf16>
    %3 = vector.shape_cast %2 : vector<16x16x16xbf16> to vector<256x16xbf16>
    %cst = arith.constant 0.000000e+00 : bf16
    %4 = vector.broadcast %cst : bf16 to vector<15x47x16xbf16>
    %c0_3 = arith.constant 0 : index
    %c0_4 = arith.constant 0 : index
    %c0_5 = arith.constant 0 : index
    %5 = vector.load %arg11[%c0_3, %c0_4, %c0_5] : memref<46x47x16xbf16, #tpu.memory_space<vmem>>, vector<15x47x16xbf16>
    tpu.vector_store %arg11[%c0_3, %c0_4, %c0_5], %4 {strides = array<i32>} : memref<46x47x16xbf16, #tpu.memory_space<vmem>>, vector<15x47x16xbf16>,
    %cst_6 = arith.constant 0.000000e+00 : bf16
    %6 = vector.broadcast %cst_6 : bf16 to vector<15x47x16xbf16>
    %c31 = arith.constant 31 : index
    %c0_7 = arith.constant 0 : index
    %c0_8 = arith.constant 0 : index
    %7 = vector.load %arg11[%c31, %c0_7, %c0_8] : memref<46x47x16xbf16, #tpu.memory_space<vmem>>, vector<15x47x16xbf16>
    tpu.vector_store %arg11[%c31, %c0_7, %c0_8], %6 {strides = array<i32>} : memref<46x47x16xbf16, #tpu.memory_space<vmem>>, vector<15x47x16xbf16>,
    %cst_9 = arith.constant 0.000000e+00 : bf16
    %8 = vector.broadcast %cst_9 : bf16 to vector<16x16x16xbf16>
    %c15 = arith.constant 15 : index
    %c0_10 = arith.constant 0 : index
    %c0_11 = arith.constant 0 : index
    %9 = vector.load %arg11[%c15, %c0_10, %c0_11] : memref<46x47x16xbf16, #tpu.memory_space<vmem>>, vector<16x16x16xbf16>
    tpu.vector_store %arg11[%c15, %c0_10, %c0_11], %8 {strides = array<i32>} : memref<46x47x16xbf16, #tpu.memory_space<vmem>>, vector<16x16x16xbf16>,
    %cst_12 = arith.constant 0.000000e+00 : bf16
    %10 = vector.broadcast %cst_12 : bf16 to vector<16x15x16xbf16>
    %c15_13 = arith.constant 15 : index
    %c32 = arith.constant 32 : index
    %c0_14 = arith.constant 0 : index
    %11 = vector.load %arg11[%c15_13, %c32, %c0_14] : memref<46x47x16xbf16, #tpu.memory_space<vmem>>, vector<16x15x16xbf16>
    tpu.vector_store %arg11[%c15_13, %c32, %c0_14], %10 {strides = array<i32>} : memref<46x47x16xbf16, #tpu.memory_space<vmem>>, vector<16x15x16xbf16>,
    %c15_15 = arith.constant 15 : index
    %c16 = arith.constant 16 : index
    %c0_16 = arith.constant 0 : index
    %12 = vector.load %arg11[%c15_15, %c16, %c0_16] : memref<46x47x16xbf16, #tpu.memory_space<vmem>>, vector<16x16x16xbf16>
    tpu.vector_store %arg11[%c15_15, %c16, %c0_16], %2 {strides = array<i32>} : memref<46x47x16xbf16, #tpu.memory_space<vmem>>, vector<16x16x16xbf16>,
    %c0_17 = arith.constant 0 : index
    %c0_18 = arith.constant 0 : index
    %13 = vector.load %arg3[%c0_17, %c0_18] : memref<16x128xbf16, #tpu.memory_space<vmem>>, vector<16x128xbf16>
    %cst_19 = arith.constant dense<0.000000e+00> : vector<256x128xf32>
    %14 = tpu.matmul %3, %13, %cst_19 {dimension_numbers = #tpu.dot_dimension_numbers<[1], [0], [0], [1], [0, 0, 1, 1], [], []>} : vector<256x16xbf16>, vector<16x128xbf16>, vector<256x128xf32> -> vector<256x128xf32>
    %c0_20 = arith.constant 0 : index
    %c0_21 = arith.constant 0 : index
    %15 = vector.load %arg4[%c0_20, %c0_21] : memref<1x128xf32, #tpu.memory_space<vmem>>, vector<1x128xf32>
    %16 = vector.broadcast %15 : vector<1x128xf32> to vector<256x128xf32>
    %17 = arith.addf %14, %16 : vector<256x128xf32>
    %cst_22 = arith.constant 0.000000e+00 : f32
    %18 = vector.broadcast %cst_22 : f32 to vector<256x128xf32>
    %19 = arith.maximumf %17, %18 : vector<256x128xf32>
    %20 = arith.truncf %19 : vector<256x128xf32> to vector<256x128xbf16>
    %c0_23 = arith.constant 0 : index
    %c0_24 = arith.constant 0 : index
    %c0_25 = arith.constant 0 : index
    %21 = vector.load %arg9[%c0_23, %c0_24, %c0_25] : memref<4x128x128xbf16, #tpu.memory_space<vmem>>, vector<1x128x128xbf16>
    %22 = vector.shape_cast %21 : vector<1x128x128xbf16> to vector<128x128xbf16>
    %cst_26 = arith.constant dense<0.000000e+00> : vector<256x128xf32>
    %23 = tpu.matmul %20, %22, %cst_26 {dimension_numbers = #tpu.dot_dimension_numbers<[1], [0], [0], [1], [0, 0, 1, 1], [], []>} : vector<256x128xbf16>, vector<128x128xbf16>, vector<256x128xf32> -> vector<256x128xf32>
    %c0_27 = arith.constant 0 : index
    %c0_28 = arith.constant 0 : index
    %24 = vector.load %arg12[%c0_27, %c0_28] : memref<256x128xf32, #tpu.memory_space<vmem>>, vector<256x128xf32>
    tpu.vector_store %arg12[%c0_27, %c0_28], %23 {strides = array<i32>} : memref<256x128xf32, #tpu.memory_space<vmem>>, vector<256x128xf32>,
    %c0_29 = arith.constant 0 : index
    %c0_30 = arith.constant 0 : index
    %c0_31 = arith.constant 0 : index
    %25 = vector.load %arg5[%c0_29, %c0_30, %c0_31] : memref<3x9x16xbf16, #tpu.memory_space<vmem>>, vector<3x9x16xbf16>
    %c0_32 = arith.constant 0 : index
    %c0_33 = arith.constant 0 : index
    %26 = vector.load %arg6[%c0_32, %c0_33] : memref<3x16xf32, #tpu.memory_space<vmem>>, vector<3x16xf32>
    %c0_34 = arith.constant 0 : index
    %c0_35 = arith.constant 0 : index
    %27 = vector.load %arg8[%c0_34, %c0_35] : memref<3x128xf32, #tpu.memory_space<vmem>>, vector<3x128xf32>
    %28 = vector.extract_strided_slice %25 {offsets = [0, 0, 0], sizes = [1, 1, 16], strides = [1, 1, 1]} : vector<3x9x16xbf16> to vector<1x1x16xbf16>
    %29 = vector.shape_cast %28 : vector<1x1x16xbf16> to vector<1x16xbf16>
    %c3 = arith.constant 3 : index
    %c4 = arith.constant 4 : index
    %c0_36 = arith.constant 0 : index
    %30 = vector.load %arg11[%c3, %c4, %c0_36] : memref<46x47x16xbf16, #tpu.memory_space<vmem>>, vector<16x16x16xbf16>
    %31 = vector.shape_cast %29 : vector<1x16xbf16> to vector<1x1x16xbf16>
    %32 = vector.broadcast %31 : vector<1x1x16xbf16> to vector<16x16x16xbf16>
    %33 = arith.mulf %30, %32 : vector<16x16x16xbf16>
    %34 = vector.extract_strided_slice %25 {offsets = [0, 1, 0], sizes = [1, 1, 16], strides = [1, 1, 1]} : vector<3x9x16xbf16> to vector<1x1x16xbf16>
    %35 = vector.shape_cast %34 : vector<1x1x16xbf16> to vector<1x16xbf16>
    %c3_37 = arith.constant 3 : index
    %c16_38 = arith.constant 16 : index
    %c0_39 = arith.constant 0 : index
    %36 = vector.load %arg11[%c3_37, %c16_38, %c0_39] : memref<46x47x16xbf16, #tpu.memory_space<vmem>>, vector<16x16x16xbf16>
    %37 = vector.shape_cast %35 : vector<1x16xbf16> to vector<1x1x16xbf16>
    %38 = vector.broadcast %37 : vector<1x1x16xbf16> to vector<16x16x16xbf16>
    %39 = arith.mulf %36, %38 : vector<16x16x16xbf16>
    %40 = arith.addf %33, %39 : vector<16x16x16xbf16>
    %41 = vector.extract_strided_slice %25 {offsets = [0, 2, 0], sizes = [1, 1, 16], strides = [1, 1, 1]} : vector<3x9x16xbf16> to vector<1x1x16xbf16>
    %42 = vector.shape_cast %41 : vector<1x1x16xbf16> to vector<1x16xbf16>
    %c3_40 = arith.constant 3 : index
    %c28 = arith.constant 28 : index
    %c0_41 = arith.constant 0 : index
    %43 = vector.load %arg11[%c3_40, %c28, %c0_41] : memref<46x47x16xbf16, #tpu.memory_space<vmem>>, vector<16x16x16xbf16>
    %44 = vector.shape_cast %42 : vector<1x16xbf16> to vector<1x1x16xbf16>
    %45 = vector.broadcast %44 : vector<1x1x16xbf16> to vector<16x16x16xbf16>
    %46 = arith.mulf %43, %45 : vector<16x16x16xbf16>
    %47 = arith.addf %40, %46 : vector<16x16x16xbf16>
    %48 = vector.extract_strided_slice %25 {offsets = [0, 3, 0], sizes = [1, 1, 16], strides = [1, 1, 1]} : vector<3x9x16xbf16> to vector<1x1x16xbf16>
    %49 = vector.shape_cast %48 : vector<1x1x16xbf16> to vector<1x16xbf16>
    %c15_42 = arith.constant 15 : index
    %c4_43 = arith.constant 4 : index
    %c0_44 = arith.constant 0 : index
    %50 = vector.load %arg11[%c15_42, %c4_43, %c0_44] : memref<46x47x16xbf16, #tpu.memory_space<vmem>>, vector<16x16x16xbf16>
    %51 = vector.shape_cast %49 : vector<1x16xbf16> to vector<1x1x16xbf16>
    %52 = vector.broadcast %51 : vector<1x1x16xbf16> to vector<16x16x16xbf16>
    %53 = arith.mulf %50, %52 : vector<16x16x16xbf16>
    %54 = vector.extract_strided_slice %25 {offsets = [0, 4, 0], sizes = [1, 1, 16], strides = [1, 1, 1]} : vector<3x9x16xbf16> to vector<1x1x16xbf16>
    %55 = vector.shape_cast %54 : vector<1x1x16xbf16> to vector<1x16xbf16>
    %c15_45 = arith.constant 15 : index
    %c16_46 = arith.constant 16 : index
    %c0_47 = arith.constant 0 : index
    %56 = vector.load %arg11[%c15_45, %c16_46, %c0_47] : memref<46x47x16xbf16, #tpu.memory_space<vmem>>, vector<16x16x16xbf16>
    %57 = vector.shape_cast %55 : vector<1x16xbf16> to vector<1x1x16xbf16>
    %58 = vector.broadcast %57 : vector<1x1x16xbf16> to vector<16x16x16xbf16>
    %59 = arith.mulf %56, %58 : vector<16x16x16xbf16>
    %60 = arith.addf %53, %59 : vector<16x16x16xbf16>
    %61 = vector.extract_strided_slice %25 {offsets = [0, 5, 0], sizes = [1, 1, 16], strides = [1, 1, 1]} : vector<3x9x16xbf16> to vector<1x1x16xbf16>
    %62 = vector.shape_cast %61 : vector<1x1x16xbf16> to vector<1x16xbf16>
    %c15_48 = arith.constant 15 : index
    %c28_49 = arith.constant 28 : index
    %c0_50 = arith.constant 0 : index
    %63 = vector.load %arg11[%c15_48, %c28_49, %c0_50] : memref<46x47x16xbf16, #tpu.memory_space<vmem>>, vector<16x16x16xbf16>
    %64 = vector.shape_cast %62 : vector<1x16xbf16> to vector<1x1x16xbf16>
    %65 = vector.broadcast %64 : vector<1x1x16xbf16> to vector<16x16x16xbf16>
    %66 = arith.mulf %63, %65 : vector<16x16x16xbf16>
    %67 = arith.addf %60, %66 : vector<16x16x16xbf16>
    %68 = vector.extract_strided_slice %25 {offsets = [0, 6, 0], sizes = [1, 1, 16], strides = [1, 1, 1]} : vector<3x9x16xbf16> to vector<1x1x16xbf16>
    %69 = vector.shape_cast %68 : vector<1x1x16xbf16> to vector<1x16xbf16>
    %c27 = arith.constant 27 : index
    %c4_51 = arith.constant 4 : index
    %c0_52 = arith.constant 0 : index
    %70 = vector.load %arg11[%c27, %c4_51, %c0_52] : memref<46x47x16xbf16, #tpu.memory_space<vmem>>, vector<16x16x16xbf16>
    %71 = vector.shape_cast %69 : vector<1x16xbf16> to vector<1x1x16xbf16>
    %72 = vector.broadcast %71 : vector<1x1x16xbf16> to vector<16x16x16xbf16>
    %73 = arith.mulf %70, %72 : vector<16x16x16xbf16>
    %74 = vector.extract_strided_slice %25 {offsets = [0, 7, 0], sizes = [1, 1, 16], strides = [1, 1, 1]} : vector<3x9x16xbf16> to vector<1x1x16xbf16>
    %75 = vector.shape_cast %74 : vector<1x1x16xbf16> to vector<1x16xbf16>
    %c27_53 = arith.constant 27 : index
    %c16_54 = arith.constant 16 : index
    %c0_55 = arith.constant 0 : index
    %76 = vector.load %arg11[%c27_53, %c16_54, %c0_55] : memref<46x47x16xbf16, #tpu.memory_space<vmem>>, vector<16x16x16xbf16>
    %77 = vector.shape_cast %75 : vector<1x16xbf16> to vector<1x1x16xbf16>
    %78 = vector.broadcast %77 : vector<1x1x16xbf16> to vector<16x16x16xbf16>
    %79 = arith.mulf %76, %78 : vector<16x16x16xbf16>
    %80 = arith.addf %73, %79 : vector<16x16x16xbf16>
    %81 = vector.extract_strided_slice %25 {offsets = [0, 8, 0], sizes = [1, 1, 16], strides = [1, 1, 1]} : vector<3x9x16xbf16> to vector<1x1x16xbf16>
    %82 = vector.shape_cast %81 : vector<1x1x16xbf16> to vector<1x16xbf16>
    %c27_56 = arith.constant 27 : index
    %c28_57 = arith.constant 28 : index
    %c0_58 = arith.constant 0 : index
    %83 = vector.load %arg11[%c27_56, %c28_57, %c0_58] : memref<46x47x16xbf16, #tpu.memory_space<vmem>>, vector<16x16x16xbf16>
    %84 = vector.shape_cast %82 : vector<1x16xbf16> to vector<1x1x16xbf16>
    %85 = vector.broadcast %84 : vector<1x1x16xbf16> to vector<16x16x16xbf16>
    %86 = arith.mulf %83, %85 : vector<16x16x16xbf16>
    %87 = arith.addf %80, %86 : vector<16x16x16xbf16>
    %88 = arith.addf %47, %67 : vector<16x16x16xbf16>
    %89 = arith.addf %88, %87 : vector<16x16x16xbf16>
    %90 = vector.shape_cast %89 : vector<16x16x16xbf16> to vector<256x16xbf16>
    %91 = vector.extract_strided_slice %26 {offsets = [0, 0], sizes = [1, 16], strides = [1, 1]} : vector<3x16xf32> to vector<1x16xf32>
    %92 = arith.extf %90 : vector<256x16xbf16> to vector<256x16xf32>
    %93 = vector.broadcast %91 : vector<1x16xf32> to vector<256x16xf32>
    %94 = arith.addf %92, %93 : vector<256x16xf32>
    %cst_59 = arith.constant 0.000000e+00 : f32
    %95 = vector.broadcast %cst_59 : f32 to vector<256x16xf32>
    %96 = arith.maximumf %94, %95 : vector<256x16xf32>
    %97 = arith.truncf %96 : vector<256x16xf32> to vector<256x16xbf16>
    %c0_60 = arith.constant 0 : index
    %c0_61 = arith.constant 0 : index
    %c0_62 = arith.constant 0 : index
    %98 = vector.load %arg7[%c0_60, %c0_61, %c0_62] : memref<3x16x128xbf16, #tpu.memory_space<vmem>>, vector<1x16x128xbf16>
    %99 = vector.shape_cast %98 : vector<1x16x128xbf16> to vector<16x128xbf16>
    %cst_63 = arith.constant dense<0.000000e+00> : vector<256x128xf32>
    %100 = tpu.matmul %97, %99, %cst_63 {dimension_numbers = #tpu.dot_dimension_numbers<[1], [0], [0], [1], [0, 0, 1, 1], [], []>} : vector<256x16xbf16>, vector<16x128xbf16>, vector<256x128xf32> -> vector<256x128xf32>
    %101 = vector.extract_strided_slice %27 {offsets = [0, 0], sizes = [1, 128], strides = [1, 1]} : vector<3x128xf32> to vector<1x128xf32>
    %102 = vector.broadcast %101 : vector<1x128xf32> to vector<256x128xf32>
    %103 = arith.addf %100, %102 : vector<256x128xf32>
    %cst_64 = arith.constant 0.000000e+00 : f32
    %104 = vector.broadcast %cst_64 : f32 to vector<256x128xf32>
    %105 = arith.maximumf %103, %104 : vector<256x128xf32>
    %c0_65 = arith.constant 0 : index
    %c0_66 = arith.constant 0 : index
    %106 = vector.load %arg12[%c0_65, %c0_66] : memref<256x128xf32, #tpu.memory_space<vmem>>, vector<256x128xf32>
    %107 = arith.truncf %105 : vector<256x128xf32> to vector<256x128xbf16>
    %c1 = arith.constant 1 : index
    %c0_67 = arith.constant 0 : index
    %c0_68 = arith.constant 0 : index
    %108 = vector.load %arg9[%c1, %c0_67, %c0_68] : memref<4x128x128xbf16, #tpu.memory_space<vmem>>, vector<1x128x128xbf16>
    %109 = vector.shape_cast %108 : vector<1x128x128xbf16> to vector<128x128xbf16>
    %cst_69 = arith.constant dense<0.000000e+00> : vector<256x128xf32>
    %110 = tpu.matmul %107, %109, %cst_69 {dimension_numbers = #tpu.dot_dimension_numbers<[1], [0], [0], [1], [0, 0, 1, 1], [], []>} : vector<256x128xbf16>, vector<128x128xbf16>, vector<256x128xf32> -> vector<256x128xf32>
    %111 = arith.addf %106, %110 : vector<256x128xf32>
    %c0_70 = arith.constant 0 : index
    %c0_71 = arith.constant 0 : index
    %112 = vector.load %arg12[%c0_70, %c0_71] : memref<256x128xf32, #tpu.memory_space<vmem>>, vector<256x128xf32>
    tpu.vector_store %arg12[%c0_70, %c0_71], %111 {strides = array<i32>} : memref<256x128xf32, #tpu.memory_space<vmem>>, vector<256x128xf32>,
    %113 = vector.extract_strided_slice %25 {offsets = [1, 4, 0], sizes = [1, 1, 16], strides = [1, 1, 1]} : vector<3x9x16xbf16> to vector<1x1x16xbf16>
    %114 = vector.shape_cast %113 : vector<1x1x16xbf16> to vector<1x16xbf16>
    %c15_72 = arith.constant 15 : index
    %c16_73 = arith.constant 16 : index
    %c0_74 = arith.constant 0 : index
    %115 = vector.load %arg11[%c15_72, %c16_73, %c0_74] : memref<46x47x16xbf16, #tpu.memory_space<vmem>>, vector<16x16x16xbf16>
    %116 = vector.shape_cast %114 : vector<1x16xbf16> to vector<1x1x16xbf16>
    %117 = vector.broadcast %116 : vector<1x1x16xbf16> to vector<16x16x16xbf16>
    %118 = arith.mulf %115, %117 : vector<16x16x16xbf16>
    %119 = vector.shape_cast %118 : vector<16x16x16xbf16> to vector<256x16xbf16>
    %120 = vector.extract_strided_slice %26 {offsets = [1, 0], sizes = [1, 16], strides = [1, 1]} : vector<3x16xf32> to vector<1x16xf32>
    %121 = arith.extf %119 : vector<256x16xbf16> to vector<256x16xf32>
    %122 = vector.broadcast %120 : vector<1x16xf32> to vector<256x16xf32>
    %123 = arith.addf %121, %122 : vector<256x16xf32>
    %cst_75 = arith.constant 0.000000e+00 : f32
    %124 = vector.broadcast %cst_75 : f32 to vector<256x16xf32>
    %125 = arith.maximumf %123, %124 : vector<256x16xf32>
    %126 = arith.truncf %125 : vector<256x16xf32> to vector<256x16xbf16>
    %c1_76 = arith.constant 1 : index
    %c0_77 = arith.constant 0 : index
    %c0_78 = arith.constant 0 : index
    %127 = vector.load %arg7[%c1_76, %c0_77, %c0_78] : memref<3x16x128xbf16, #tpu.memory_space<vmem>>, vector<1x16x128xbf16>
    %128 = vector.shape_cast %127 : vector<1x16x128xbf16> to vector<16x128xbf16>
    %cst_79 = arith.constant dense<0.000000e+00> : vector<256x128xf32>
    %129 = tpu.matmul %126, %128, %cst_79 {dimension_numbers = #tpu.dot_dimension_numbers<[1], [0], [0], [1], [0, 0, 1, 1], [], []>} : vector<256x16xbf16>, vector<16x128xbf16>, vector<256x128xf32> -> vector<256x128xf32>
    %130 = vector.extract_strided_slice %27 {offsets = [1, 0], sizes = [1, 128], strides = [1, 1]} : vector<3x128xf32> to vector<1x128xf32>
    %131 = vector.broadcast %130 : vector<1x128xf32> to vector<256x128xf32>
    %132 = arith.addf %129, %131 : vector<256x128xf32>
    %cst_80 = arith.constant 0.000000e+00 : f32
    %133 = vector.broadcast %cst_80 : f32 to vector<256x128xf32>
    %134 = arith.maximumf %132, %133 : vector<256x128xf32>
    %c0_81 = arith.constant 0 : index
    %c0_82 = arith.constant 0 : index
    %135 = vector.load %arg12[%c0_81, %c0_82] : memref<256x128xf32, #tpu.memory_space<vmem>>, vector<256x128xf32>
    %136 = arith.truncf %134 : vector<256x128xf32> to vector<256x128xbf16>
    %c2 = arith.constant 2 : index
    %c0_83 = arith.constant 0 : index
    %c0_84 = arith.constant 0 : index
    %137 = vector.load %arg9[%c2, %c0_83, %c0_84] : memref<4x128x128xbf16, #tpu.memory_space<vmem>>, vector<1x128x128xbf16>
    %138 = vector.shape_cast %137 : vector<1x128x128xbf16> to vector<128x128xbf16>
    %cst_85 = arith.constant dense<0.000000e+00> : vector<256x128xf32>
    %139 = tpu.matmul %136, %138, %cst_85 {dimension_numbers = #tpu.dot_dimension_numbers<[1], [0], [0], [1], [0, 0, 1, 1], [], []>} : vector<256x128xbf16>, vector<128x128xbf16>, vector<256x128xf32> -> vector<256x128xf32>
    %140 = arith.addf %135, %139 : vector<256x128xf32>
    %c0_86 = arith.constant 0 : index
    %c0_87 = arith.constant 0 : index
    %141 = vector.load %arg12[%c0_86, %c0_87] : memref<256x128xf32, #tpu.memory_space<vmem>>, vector<256x128xf32>
    tpu.vector_store %arg12[%c0_86, %c0_87], %140 {strides = array<i32>} : memref<256x128xf32, #tpu.memory_space<vmem>>, vector<256x128xf32>,
    %142 = vector.extract_strided_slice %25 {offsets = [2, 4, 0], sizes = [1, 1, 16], strides = [1, 1, 1]} : vector<3x9x16xbf16> to vector<1x1x16xbf16>
    %143 = vector.shape_cast %142 : vector<1x1x16xbf16> to vector<1x16xbf16>
    %c15_88 = arith.constant 15 : index
    %c16_89 = arith.constant 16 : index
    %c0_90 = arith.constant 0 : index
    %144 = vector.load %arg11[%c15_88, %c16_89, %c0_90] : memref<46x47x16xbf16, #tpu.memory_space<vmem>>, vector<16x16x16xbf16>
    %145 = vector.shape_cast %143 : vector<1x16xbf16> to vector<1x1x16xbf16>
    %146 = vector.broadcast %145 : vector<1x1x16xbf16> to vector<16x16x16xbf16>
    %147 = arith.mulf %144, %146 : vector<16x16x16xbf16>
    %148 = vector.shape_cast %147 : vector<16x16x16xbf16> to vector<256x16xbf16>
    %149 = vector.extract_strided_slice %26 {offsets = [2, 0], sizes = [1, 16], strides = [1, 1]} : vector<3x16xf32> to vector<1x16xf32>
    %150 = arith.extf %148 : vector<256x16xbf16> to vector<256x16xf32>
    %151 = vector.broadcast %149 : vector<1x16xf32> to vector<256x16xf32>
    %152 = arith.addf %150, %151 : vector<256x16xf32>
    %cst_91 = arith.constant 0.000000e+00 : f32
    %153 = vector.broadcast %cst_91 : f32 to vector<256x16xf32>
    %154 = arith.maximumf %152, %153 : vector<256x16xf32>
    %155 = arith.truncf %154 : vector<256x16xf32> to vector<256x16xbf16>
    %c2_92 = arith.constant 2 : index
    %c0_93 = arith.constant 0 : index
    %c0_94 = arith.constant 0 : index
    %156 = vector.load %arg7[%c2_92, %c0_93, %c0_94] : memref<3x16x128xbf16, #tpu.memory_space<vmem>>, vector<1x16x128xbf16>
    %157 = vector.shape_cast %156 : vector<1x16x128xbf16> to vector<16x128xbf16>
    %cst_95 = arith.constant dense<0.000000e+00> : vector<256x128xf32>
    %158 = tpu.matmul %155, %157, %cst_95 {dimension_numbers = #tpu.dot_dimension_numbers<[1], [0], [0], [1], [0, 0, 1, 1], [], []>} : vector<256x16xbf16>, vector<16x128xbf16>, vector<256x128xf32> -> vector<256x128xf32>
    %159 = vector.extract_strided_slice %27 {offsets = [2, 0], sizes = [1, 128], strides = [1, 1]} : vector<3x128xf32> to vector<1x128xf32>
    %160 = vector.broadcast %159 : vector<1x128xf32> to vector<256x128xf32>
    %161 = arith.addf %158, %160 : vector<256x128xf32>
    %cst_96 = arith.constant 0.000000e+00 : f32
    %162 = vector.broadcast %cst_96 : f32 to vector<256x128xf32>
    %163 = arith.maximumf %161, %162 : vector<256x128xf32>
    %c0_97 = arith.constant 0 : index
    %c0_98 = arith.constant 0 : index
    %164 = vector.load %arg12[%c0_97, %c0_98] : memref<256x128xf32, #tpu.memory_space<vmem>>, vector<256x128xf32>
    %165 = arith.truncf %163 : vector<256x128xf32> to vector<256x128xbf16>
    %c3_99 = arith.constant 3 : index
    %c0_100 = arith.constant 0 : index
    %c0_101 = arith.constant 0 : index
    %166 = vector.load %arg9[%c3_99, %c0_100, %c0_101] : memref<4x128x128xbf16, #tpu.memory_space<vmem>>, vector<1x128x128xbf16>
    %167 = vector.shape_cast %166 : vector<1x128x128xbf16> to vector<128x128xbf16>
    %cst_102 = arith.constant dense<0.000000e+00> : vector<256x128xf32>
    %168 = tpu.matmul %165, %167, %cst_102 {dimension_numbers = #tpu.dot_dimension_numbers<[1], [0], [0], [1], [0, 0, 1, 1], [], []>} : vector<256x128xbf16>, vector<128x128xbf16>, vector<256x128xf32> -> vector<256x128xf32>
    %169 = arith.addf %164, %168 : vector<256x128xf32>
    %c0_103 = arith.constant 0 : index
    %c0_104 = arith.constant 0 : index
    %170 = vector.load %arg12[%c0_103, %c0_104] : memref<256x128xf32, #tpu.memory_space<vmem>>, vector<256x128xf32>
    tpu.vector_store %arg12[%c0_103, %c0_104], %169 {strides = array<i32>} : memref<256x128xf32, #tpu.memory_space<vmem>>, vector<256x128xf32>,
    %c0_105 = arith.constant 0 : index
    %c0_106 = arith.constant 0 : index
    %171 = vector.load %arg12[%c0_105, %c0_106] : memref<256x128xf32, #tpu.memory_space<vmem>>, vector<256x128xf32>
    %c0_107 = arith.constant 0 : index
    %c0_108 = arith.constant 0 : index
    %c0_109 = arith.constant 0 : index
    %172 = vector.load %arg2[%c0_107, %c0_108, %c0_109] : memref<1x1x128xf32, #tpu.memory_space<vmem>>, vector<1x1x128xf32>
    %173 = vector.shape_cast %172 : vector<1x1x128xf32> to vector<1x128xf32>
    %174 = vector.broadcast %173 : vector<1x128xf32> to vector<256x128xf32>
    %175 = arith.addf %171, %174 : vector<256x128xf32>
    %cst_110 = arith.constant 0.000000e+00 : f32
    %176 = vector.broadcast %cst_110 : f32 to vector<256x128xf32>
    %177 = arith.maximumf %175, %176 : vector<256x128xf32>
    %c0_111 = arith.constant 0 : index
    %c0_112 = arith.constant 0 : index
    %c0_113 = arith.constant 0 : index
    %178 = vector.load %arg10[%c0_111, %c0_112, %c0_113] : memref<1x256x128xf32, #tpu.memory_space<vmem>>, vector<1x256x128xf32>
    %179 = vector.shape_cast %178 : vector<1x256x128xf32> to vector<256x128xf32>
    %180 = vector.shape_cast %177 : vector<256x128xf32> to vector<1x256x128xf32>
    tpu.vector_store %arg10[%c0_111, %c0_112, %c0_113], %180 {strides = array<i32>} : memref<1x256x128xf32, #tpu.memory_space<vmem>>, vector<1x256x128xf32>,
    return
  }
  func.func @transform_0(%arg0: i32) -> (i32, i32, i32, i32) {
    %c0_i32 = arith.constant 0 : i32
    %c0_i32_0 = arith.constant 0 : i32
    %c0_i32_1 = arith.constant 0 : i32
    %c0_i32_2 = arith.constant 0 : i32
    return %arg0, %c0_i32, %c0_i32_0, %c0_i32_1 : i32, i32, i32, i32
  }
  func.func @transform_1(%arg0: i32) -> (i32, i32, i32) {
    %c0_i32 = arith.constant 0 : i32
    %c0_i32_0 = arith.constant 0 : i32
    %c0_i32_1 = arith.constant 0 : i32
    return %arg0, %c0_i32, %c0_i32_0 : i32, i32, i32
  }
  func.func @transform_2(%arg0: i32) -> (i32, i32) {
    %c0_i32 = arith.constant 0 : i32
    %c0_i32_0 = arith.constant 0 : i32
    %c0_i32_1 = arith.constant 0 : i32
    return %c0_i32, %c0_i32_0 : i32, i32
  }
  func.func @transform_3(%arg0: i32) -> (i32, i32) {
    %c0_i32 = arith.constant 0 : i32
    %c0_i32_0 = arith.constant 0 : i32
    %c0_i32_1 = arith.constant 0 : i32
    return %c0_i32, %c0_i32_0 : i32, i32
  }
  func.func @transform_4(%arg0: i32) -> (i32, i32, i32) {
    %c0_i32 = arith.constant 0 : i32
    %c0_i32_0 = arith.constant 0 : i32
    %c0_i32_1 = arith.constant 0 : i32
    %c0_i32_2 = arith.constant 0 : i32
    return %c0_i32, %c0_i32_0, %c0_i32_1 : i32, i32, i32
  }
  func.func @transform_5(%arg0: i32) -> (i32, i32) {
    %c0_i32 = arith.constant 0 : i32
    %c0_i32_0 = arith.constant 0 : i32
    %c0_i32_1 = arith.constant 0 : i32
    return %c0_i32, %c0_i32_0 : i32, i32
  }
  func.func @transform_6(%arg0: i32) -> (i32, i32, i32) {
    %c0_i32 = arith.constant 0 : i32
    %c0_i32_0 = arith.constant 0 : i32
    %c0_i32_1 = arith.constant 0 : i32
    %c0_i32_2 = arith.constant 0 : i32
    return %c0_i32, %c0_i32_0, %c0_i32_1 : i32, i32, i32
  }
  func.func @transform_7(%arg0: i32) -> (i32, i32) {
    %c0_i32 = arith.constant 0 : i32
    %c0_i32_0 = arith.constant 0 : i32
    %c0_i32_1 = arith.constant 0 : i32
    return %c0_i32, %c0_i32_0 : i32, i32
  }
  func.func @transform_8(%arg0: i32) -> (i32, i32, i32) {
    %c0_i32 = arith.constant 0 : i32
    %c0_i32_0 = arith.constant 0 : i32
    %c0_i32_1 = arith.constant 0 : i32
    %c0_i32_2 = arith.constant 0 : i32
    return %c0_i32, %c0_i32_0, %c0_i32_1 : i32, i32, i32
  }
  func.func @transform_9(%arg0: i32) -> (i32, i32, i32) {
    %c0_i32 = arith.constant 0 : i32
    %c0_i32_0 = arith.constant 0 : i32
    %c0_i32_1 = arith.constant 0 : i32
    return %arg0, %c0_i32, %c0_i32_0 : i32, i32, i32
  }
}

</mosaic_0001>

<bundles_post_ra>
// kernel: tpu_custom_call.1
= control target key start
LH: loop header
LB: loop body
LE: loop exit
PB: predicated region body
PF: predicated region fallthrough
CT: control target
= control target key end

     0   :  { %s10744_s0 = inlined_call_operand.hbm [shape: f32[2,16,16,16], index: 0, kind: input, shape index: {}]   ;;  %s10745_s1 = inlined_call_operand.vmem [shape: f32[2,1,128], index: 1, kind: input, shape index: {}]   ;;  %s10746_s2 = inlined_call_operand.vmem [shape: bf16[16,128], index: 2, kind: input, shape index: {}]   ;;  %s10747_s3 = inlined_call_operand.vmem [shape: f32[1,128], index: 3, kind: input, shape index: {}]   ;;  %s10748_s4 = inlined_call_operand.vmem [shape: bf16[3,9,16], index: 4, kind: input, shape index: {}]   ;;  %s10749_s5 = inlined_call_operand.vmem [shape: f32[3,16], index: 5, kind: input, shape index: {}]   ;;  %s10750_s6 = inlined_call_operand.vmem [shape: bf16[3,16,128], index: 6, kind: input, shape index: {}]   ;;  %s10751_s7 = inlined_call_operand.vmem [shape: f32[3,128], index: 7, kind: input, shape index: {}]   ;;  %s10752_s8 = inlined_call_operand.hbm [shape: bf16[4,128,128], index: 8, kind: input, shape index: {}]   ;;  %s10753_s9 = inlined_call_operand.hbm [shape: f32[2,256,128], index: 9, kind: output, shape index: {}]  }
   0x1   :  { %10779 = sst [smem:[#allocation30_spill]] %s10752_s8 }
   0x2   :  { %14 = vsyncpa [#allocation5], 0 }
   0x3   :  { %16 = vsyncpa [#allocation5 + $0x1], 0 }
   0x4   :  { %17 = vsyncpa [#allocation8], 0 }
   0x5   :  { %18 = vsyncpa [#allocation6], 0 }
   0x6   :  { %20 = vsyncpa [#allocation6 + $0x1], 0  ;;  %s8048_s30 = smov 0   ;;  %s8050_s10 = smov 0  }
   0x7   :  { %s8052_s11 = smov 0   ;;  %s8054_s12 = smov 0  }
   0x8 LB: > { %10780 = sst [smem:[#allocation13_spill]] %s7984_s11  ;;  %s8069_s13 = sadd.s32 4294967295, %s7988_s12   ;;  %s7988_s12 = sphi %s8054_s12, %s10851_s12   ;;  %s7984_s11 = sphi %s8052_s11, %s10848_s11   ;;  %s7980_s10 = sphi %s8050_s10, %s10850_s10   ;;  %s7976_s30 = sphi %s8048_s30, %s10849_s30  }
   0x9   : > { %s7104_s14 = sadd.s32 4294967294, %s7988_s12   ;;  %p46_p0 = scmp.ne.s32.totalorder %s7980_s10, %s7976_s30 }
   0xa   : > { %p47_p1 = scmp.eq.s32.totalorder %s8069_s13, 0  ;;  %p243_p2 = scmp.eq.s32.totalorder %s8069_s13, 1 }
   0xb   : > { %p249_p3 = scmp.eq.s32.totalorder %s7104_s14, 1  ;;  %p7105_p5 = scmp.ge.s32.totalorder %s7988_s12, 1 }
   0xc   : > { %p8078_p4 = por %p47_p1, %p46_p0  ;;  %p256_p7 = scmp.lt.s32.totalorder %s7988_s12, 3 }
   0xd   : > { %p8083_p6 = por %p249_p3, %p46_p0  ;;  %s10783_s8 = sld [smem:[#allocation30_spill]] }
   0xe   : > { %p8091_p8 = pnand %p7105_p5, %p256_p7  ;;  %s7990_s21 = smov [#allocation7]  }
   0xf   : > { %s287_s22 = sshll.u32 %s7990_s21, 4  ;;  %s8101_s23 = sadd.s32 1, %s7988_s12   ;;  %s288_s22 = int_to_ptr.vmem [resolvable:$true] %s287_s22 }
  0x10   : > { %p7794_p9 = pneg %p8091_p8  ;;  %s7991_s24 = smov 64  }
  0x11   : > { %s7992_s25 = smov 4   ;;  %s30_s26 = ssub.s32 %s7988_s12, %s8101_s23 }
  0x12   : > { %p7795_p10 = pnand %p7794_p9, %p47_p1  ;;  %s33_s27 = sadd.s32 1, %s7984_s11 }
  0x13   : > { %s285_s19 = sshll.u32 %s10783_s8, 4  ;;  %p31_p12 = scmp.eq.s32.totalorder %s30_s26, 0  ;;  %s286_s19 = int_to_ptr.hbm [resolvable:$true] %s285_s19 }
  0x14   : > { %7797 = dma.hbm_to_vmem [thread:$0]  (!%p7795_p10), %s286_s19, 4096, %s288_s22, [#allocation8], %s7991_s24, %s7991_s24, %s7992_s25  }
  0x15   : > { %p40_p13 = scmp.ne.s32.totalorder %s7984_s11, %s7980_s10  ;;  %p41_p0 = scmp.eq.s32.totalorder %s7988_s12, 0 }
  0x16   : > { %p7807_p3 = scmp.lt.s32.totalorder %s7988_s12, 2  ;;  %s301_s14 = sand.u32 1, %s7984_s11  }
  0x17   : > { %s8111_s28 = scalar_select %p31_p12, %s7984_s11, %s33_s27  }
  0x18   : > { %p42_p5 = por %p41_p0, %p40_p13  ;;  %p8115_p7 = por %p243_p2, %p40_p13 }
  0x19   : > { %10785 = sst [smem:[#allocation14_spill]] %s8111_s28  ;;  %s7348_s17 = sshll.u32 %s7988_s12, 8 }
  0x1a   : > { %s7108_s18 = sshll.u32 %s301_s14, 8  ;;  %s310_s22 = scalar_lea.hbm %s10744_s0, %s7348_s17 }
  0x1b   : > { %s311_s24 = sshll.u32 %s310_s22, 4  ;;  %s305_s25 = scalar_lea.vmem [#allocation4], %s7108_s18  ;;  %s312_s24 = int_to_ptr.hbm [resolvable:$true] %s311_s24 }
  0x1c   : > { %s313_s26 = sshll.u32 %s305_s25, 4  ;;  %p8126_p9 = pnand %p7807_p3, %p42_p5  ;;  %s314_s26 = int_to_ptr.vmem [resolvable:$true] %s313_s26 }
  0x1d   : > { %s302_s8 = scalar_lea.sflag [#allocation5], %s301_s14  ;;  %s7888_s28 = sshra.s32 %s312_s24, 4  ;;  %s7889_s28 = int_to_ptr.hbm [resolvable:$true] %s7888_s28 }
  0x1e   : > { %s7890_s11 = scalar_lea.hbm %s7889_s28, 256  ;;  %p7892_p10 = pneg %p8126_p9 }
  0x1f   : > { %p7891_p2 = scmp.ne.s32.totalorder %s7889_s28, %s7890_s11  ;;  %s7895_s21 = scalar_lea.hbm %s10744_s0, 512 }
  0x20   : > { %p7896_p0 = scmp.lt.s32.totalorder %s7889_s28, %s10744_s0  ;;  %p7897_p3 = scmp.lt.s32.totalorder %s7895_s21, %s7890_s11 }
  0x21   : > { %p7893_p12 = pnand %p7892_p10, %p7891_p2 }
  0x22   : > { %p7898_p5 = por %p7897_p3, %p7896_p0 }
  0x23   : > { %p7894_p13 = pneg %p7893_p12 }
  0x25   : > { %p7899_p11 = pnand %p7898_p5, %p7894_p13 }
  0x27   : > { %7902 = shalt.err (!%p7899_p11)
}
  0x28   : > { %s7993_s14 = smov 128   ;;  %s7994_s25 = smov 8  }
  0x29   : > { %7801 = dma.hbm_to_vmem [thread:$0]  (!%p8126_p9), %s312_s24, 4096, %s314_s26, %s302_s8, %s7993_s14, %s7993_s14, %s7994_s25  }
  0x2a   : > { %331 = sbr.rel (%p8091_p8) target bundleno = 1642 (0x66a), region = 56 }
  0x2f   : > { %s8143_s17 = sand.u32 1, %s7980_s10  }
  0x30   : > { %s7112_s28 = sshll.u32 %s8143_s17, 8  ;;  %s334_s11 = scalar_lea.sflag [#allocation5], %s8143_s17 }
  0x31   : > { %s8149_s18 = scalar_lea.vmem [#allocation4], %s7112_s28 }
  0x32   : > { %7963 = dma.done.wait (%p8078_p4), %s334_s11, 4096  }
  0x33   : > { %7965 = vsyncadd (%p8078_p4), %s334_s11, 4294963200 }
  0x34   : > { %7967 = dma.done.wait (%p47_p1), [#allocation8], 4096  }
  0x35   : > { %7969 = vsyncadd (%p47_p1), [#allocation8], 4294963200  ;;  %vm449_vm0 = vcmask 125952   ;;  %vm456_vm1 = vsmask.f32 3328  ;;  %v7995_v13 = vmov 0  }
  0x36   : > { %vm8160_vm2 = vmand %vm449_vm0, %vm456_vm1  ;;  %v458_v1 = vld [vmem:[#allocation2 + $0x14] sm:$0xf]  ;;  %v466_v2 = vld [vmem:[#allocation2 + $0x2c] sm:$0xf]  ;;  %477 = vst.msk [vmem:[#allocation2 + $0x48] sm:$0xf] %vm449_vm0, %v7995_v13 }
  0x37   : > { %v459_v3 = vsel %vm8160_vm2, 0, %v458_v1  ;;  %v467_v4 = vsel %vm8160_vm2, 0, %v466_v2  ;;  %v474_v5 = vld [vmem:[#allocation2 + $0x44] sm:$0xf]  ;;  %v675_v7 = vld [vmem:[#allocation2 + $0x41c] sm:$0xf] }
  0x38   : > { %460 = vst [vmem:[#allocation2 + $0x14] sm:$0xf] %v459_v3  ;;  %v475_v6 = vsel %vm8160_vm2, 0, %v474_v5  ;;  %v676_v8 = vsel %vm8160_vm2, 0, %v675_v7  ;;  %v683_v9 = vld [vmem:[#allocation2 + $0x434] sm:$0xf] }
  0x39   : > { %468 = vst [vmem:[#allocation2 + $0x2c] sm:$0xf] %v467_v4  ;;  %v684_v10 = vsel %vm8160_vm2, 0, %v683_v9  ;;  %v691_v11 = vld [vmem:[#allocation2 + $0x44c] sm:$0xf]  ;;  %v7349_v14 = vld [vmem:[%s10746_s2] sm:$0xff] }
  0x3a   : > { %476 = vst [vmem:[#allocation2 + $0x44] sm:$0xf] %v475_v6  ;;  %v692_v12 = vsel %vm8160_vm2, 0, %v691_v11  ;;  %971 = vmatpush.bf16.msra.mxu0 %v7349_v14  ;;  %v385_v15 = vld [vmem:[%s8149_s18] sm:$0xff]  ;;  %v386_v16 = vld [vmem:[%s8149_s18 + $0x8] sm:$0xff]  ;;  %vm915_vm3 = vcmask 130048  }
  0x3b   : > { %677 = vst [vmem:[#allocation2 + $0x41c] sm:$0xf] %v676_v8  ;;  %v8449_v17 = vpack.c.bf16 %v385_v15, %v385_v15  ;;  %v8451_v18 = vpack.c.bf16 %v386_v16, %v386_v16  ;;  %v387_v22 = vld [vmem:[%s8149_s18 + $0x10] sm:$0xff]  ;;  %v388_v23 = vld [vmem:[%s8149_s18 + $0x18] sm:$0xff]  ;;  %v389_v24 = vld [vmem:[%s8149_s18 + $0x20] sm:$0xff]  ;;  %vm1735_vm4 = vcmask 1043456  }
  0x3c   : > { %685 = vst [vmem:[#allocation2 + $0x434] sm:$0xf] %v684_v10  ;;  %v390_v25 = vld [vmem:[%s8149_s18 + $0x28] sm:$0xff]  ;;  %v7358_v26 = vld [vmem:[%s10750_s6] sm:$0xff]  ;;  %v8484_v28 = vpack.c.bf16 %v387_v22, %v387_v22  ;;  %v8486_v29 = vpack.c.bf16 %v388_v23, %v388_v23  ;;  %v392_v30 = vld [vmem:[%s8149_s18 + $0x38] sm:$0xff]  ;;  %v8494_v32 = vpack.c.bf16 %v389_v24, %v389_v24  ;;  %vm4778_vm5 = vcmask 1041408  }
  0x3d   : > { %693 = vst [vmem:[#allocation2 + $0x44c] sm:$0xf] %v692_v12  ;;  %v861_v19 = vunpack.c.l.b16 %v8449_v17  ;;  %v862_v20 = vunpack.c.l.b16 %v8451_v18  ;;  %v391_v27 = vld [vmem:[%s8149_s18 + $0x30] sm:$0xff]  ;;  %5102 = vmatpush.bf16.msra.mxu2 %v7358_v26  ;;  %v8496_v33 = vpack.c.bf16 %v390_v25, %v390_v25  ;;  %v8504_v36 = vpack.c.bf16 %v392_v30, %v392_v30  ;;  %v409_v37 = vld [vmem:[%s8149_s18 + $0xc0] sm:$0xff]  ;;  %v410_v43 = vld [vmem:[%s8149_s18 + $0xc8] sm:$0xff]  ;;  %p381_p1 = scmp.lt.s32.totalorder %s8069_s13, 1 }
  0x3e   : > { %478 = vst.msk [vmem:[#allocation2 + $0x4c] sm:$0xf] %vm449_vm0, %v7995_v13  ;;  %v1286_v31 = vld [vmem:[%s10748_s4] sm:$0xf]  ;;  %v8500_v35 = vpack.c.bf16 %v391_v27, %v391_v27  ;;  %v863_v39 = vunpack.c.l.b16 %v8484_v28  ;;  %v864_v40 = vunpack.c.l.b16 %v8486_v29  ;;  %v865_v41 = vunpack.c.l.b16 %v8494_v32  ;;  %v8524_v47 = vld [vmem:[#allocation2 + $0x5c] sm:$0xf] }
  0x3f   : > { %479 = vst.msk [vmem:[#allocation2 + $0x50] sm:$0xf] %vm449_vm0, %v7995_v13  ;;  %v893_v21 = vpack.c.b16 %v862_v20, %v861_v19  ;;  %v1522_v34 = vshrl.u32 %v1286_v31, 16  ;;  %v866_v42 = vunpack.c.l.b16 %v8496_v33  ;;  %v8522_v46 = vpack.c.bf16 %v409_v37, %v409_v37  ;;  %v8537_v56 = vld [vmem:[#allocation2 + $0x17c] sm:$0xf]  ;;  %s10467_s22 = scalar_select %p381_p1, %s8069_s13, 1 }
  0x40   : > { %480 = vst.msk [vmem:[#allocation2 + $0x54] sm:$0xf] %vm449_vm0, %v7995_v13  ;;  %v867_v45 = vunpack.c.l.b16 %v8500_v35  ;;  %v8526_v48 = vpack.i.b16 %v1286_v31, %v1286_v31  ;;  %v868_v50 = vunpack.c.l.b16 %v8504_v36  ;;  %v894_v54 = vpack.c.b16 %v864_v40, %v863_v39  ;;  %v1293_v7 = vld [vmem:[#allocation2 + $0x48] sm:$0xc]  ;;  %v8575_v24 = vld [vmem:[#allocation2 + $0x29c] sm:$0xf] }
  0x41   : > { %481 = vst.msk [vmem:[#allocation2 + $0x58] sm:$0xf] %vm449_vm0, %v7995_v13  ;;  %7119 = vmatmul.msk.bf16.vlgmr.msra.gmra.mxu0 %vm915_vm3, %v893_v21  ;;  %v8507_v38 = vpack.i.b16 %v1522_v34, %v1522_v34  ;;  %v8535_v55 = vpack.c.bf16 %v410_v43, %v410_v43  ;;  %v8543_v59 = vpack.c.b16 %v866_v42, %v865_v41  ;;  %v483_v60 = vsel %vm8160_vm2, 0, %v8524_v47  ;;  %s383_s11 = scalar_lea.vmem %s10745_s1, %s10467_s22  ;;  %s10585_s20 = scalar_lea.vmem [#allocation9], %s7112_s28 }
  0x42   : > { %485 = vst.msk [vmem:[#allocation2 + $0x60] sm:$0xf] %vm449_vm0, %v7995_v13  ;;  %v1344_v57 = vperm.slane %v8526_v48, 0  ;;  %v2540_v5 = vperm.slane %v8526_v48, 2  ;;  %v8559_v6 = vpack.c.b16 %v868_v50, %v867_v45  ;;  %v729_v12 = vsel %vm8160_vm2, 0, %v8537_v56  ;;  %s7385_s28 = sshll.u32 %s8069_s13, 8 }
  0x43   : > { %486 = vst.msk [vmem:[#allocation2 + $0x64] sm:$0xf] %vm449_vm0, %v7995_v13  ;;  %v1525_v44 = vperm.slane %v8507_v38, 0  ;;  %v2362_v58 = vperm.slane %v8507_v38, 1  ;;  %v1345_v14 = vunpack.c.l.bf16 %v1293_v7  ;;  %v1976_v37 = vperm.slane %v8526_v48, 1  ;;  %s7008_s27 = scalar_lea.hbm %s10753_s9, %s7385_s28  ;;  %s6997_s13 = scalar_lea.sflag [#allocation6], %s8143_s17 }
  0x44   : > { %487 = vst.msk [vmem:[#allocation2 + $0x68] sm:$0xf] %vm449_vm0, %v7995_v13  ;;  %v8552_v2 = vunpack.c.l.bf16 %v1344_v57  ;;  %v8579_v30 = vunpack.c.l.bf16 %v2540_v5  ;;  %vm4779_vm6 = vcmask 1045508   ;;  %s7011_s21 = sshll.u32 %s7008_s27, 4  ;;  %s7012_s21 = int_to_ptr.hbm [resolvable:$true] %s7011_s21 }
  0x45   : > { %488 = vst.msk [vmem:[#allocation2 + $0x6c] sm:$0xf] %vm449_vm0, %v7995_v13  ;;  %v8531_v53 = vunpack.c.l.bf16 %v1525_v44  ;;  %v1294_v61 = vld [vmem:[#allocation2 + $0x4c] sm:$0xf]  ;;  %v8554_v4 = vunpack.c.l.bf16 %v2362_v58  ;;  %vm8788_vm7 = vmor %vm4778_vm5, %vm4779_vm6  ;;  %s7932_s19 = sshra.s32 %s7012_s21, 4  ;;  %s7933_s19 = int_to_ptr.hbm [resolvable:$true] %s7932_s19 }
  0x46   : > { %489 = vst.msk [vmem:[#allocation2 + $0x70] sm:$0xf] %vm449_vm0, %v7995_v13  ;;  %v1346_v1 = vunpack.c.l.bf16 %v1294_v61  ;;  %v1295_v8 = vld [vmem:[#allocation2 + $0x50] sm:$0x3]  ;;  %v1394_v25 = vmul.f32 %v8552_v2, %v1345_v14  ;;  %s7934_s22 = scalar_lea.hbm %s7933_s19, 256  ;;  %p7939_p9 = scmp.lt.s32.totalorder %s7933_s19, %s10753_s9 }
  0x47   : > { %493 = vst.msk [vmem:[#allocation2 + $0x78] sm:$0xf] %vm449_vm0, %v7995_v13  ;;  %v7706_v49 = vld [vmem:[#allocation2 + $0x50] sm:$0xff]   ;;  %v1347_v15 = vunpack.c.l.bf16 %v1295_v8  ;;  %p7935_p4 = scmp.ne.s32.totalorder %s7933_s19, %s7934_s22 }
  0x48   : > { %494 = vst.msk [vmem:[#allocation2 + $0x7c] sm:$0xf] %vm449_vm0, %v7995_v13  ;;  %v7388_v51 = vunpack.c.l.bf16 %v7706_v49  ;;  %v7389_v52 = vunpack.c.h.bf16 %v7706_v49  ;;  %v1395_v16 = vmul.f32 %v8552_v2, %v1346_v1  ;;  %v1442_v39 = vpack.c.bf16 %v1394_v25, %v1394_v25  ;;  %v1928_v42 = vld [vmem:[#allocation2 + $0x54] sm:$0xc]  ;;  %v1929_v43 = vld [vmem:[#allocation2 + $0x58] sm:$0xf] }
  0x49   : > { %495 = vst.msk [vmem:[#allocation2 + $0x80] sm:$0xf] %vm449_vm0, %v7995_v13  ;;  %v1396_v26 = vmul.f32 %v8552_v2, %v1347_v15  ;;  %v1977_v49 = vunpack.c.l.bf16 %v1928_v42  ;;  %v1978_v50 = vunpack.c.l.bf16 %v1929_v43  ;;  %v2990_v1 = vperm.slane %v8507_v38, 2  ;;  %p7936_p8 = pnand %p7935_p4, %p8115_p7 }
  0x4a   : > { %496 = vst.msk [vmem:[#allocation2 + $0x84] sm:$0xf] %vm449_vm0, %v7995_v13  ;;  %v1559_v62 = vmul.f32 %v7388_v51, %v8531_v53  ;;  %v1560_v63 = vmul.f32 %v7389_v52, %v8531_v53  ;;  %v1443_v27 = vpack.c.bf16 %v1395_v16, %v1395_v16  ;;  %v8590_v51 = vunpack.c.l.bf16 %v1976_v37 }
  0x4b   : > { %497 = vst.msk [vmem:[#allocation2 + $0x88] sm:$0xf] %vm449_vm0, %v7995_v13  ;;  %v1444_v40 = vpack.c.bf16 %v1396_v26, %v1396_v26  ;;  %v777_v52 = vsel %vm8160_vm2, 0, %v8575_v24  ;;  %v8614_v25 = vunpack.c.l.bf16 %v2990_v1  ;;  %v8646_v1 = vld [vmem:[#allocation2 + $0x194] sm:$0xf]  ;;  %p7937_p11 = pneg %p7936_p8 }
  0x4c   : > { %501 = vst.msk [vmem:[#allocation2 + $0x90] sm:$0xf] %vm449_vm0, %v7995_v13  ;;  %v1591_v9 = vpack.c.bf16 %v1559_v62, %v1559_v62  ;;  %v1592_v10 = vpack.c.bf16 %v1560_v63, %v1560_v63  ;;  %v1624_v41 = vunpack.c.l.bf16 %v1443_v27  ;;  %v2026_v62 = vmul.f32 %v8590_v51, %v1977_v49  ;;  %v8632_v49 = vld [vmem:[#allocation2 + $0x74] sm:$0xf] }
  0x4d   : > { %502 = vst.msk [vmem:[#allocation2 + $0x94] sm:$0xf] %vm449_vm0, %v7995_v13  ;;  %v1625_v57 = vunpack.c.l.bf16 %v1444_v40  ;;  %v2027_v63 = vmul.f32 %v8590_v51, %v1978_v50  ;;  %v3377_v27 = vperm.slane %v8526_v48, 3  ;;  %v411_v48 = vld [vmem:[%s8149_s18 + $0xd0] sm:$0xff] }
  0x4e   : > { %503 = vst.msk [vmem:[#allocation2 + $0x98] sm:$0xf] %vm449_vm0, %v7995_v13  ;;  %v1671_v20 = vunpack.c.l.bf16 %v1591_v9  ;;  %v1672_v21 = vunpack.c.l.bf16 %v1592_v10 }
  0x4f   : > { %504 = vst.msk [vmem:[#allocation2 + $0x9c] sm:$0xf] %vm449_vm0, %v7995_v13  ;;  %v2075_v14 = vpack.c.bf16 %v2027_v63, %v2027_v63  ;;  %v8628_v43 = vunpack.c.l.bf16 %v3377_v27 }
  0x50   : > { %505 = vst.msk [vmem:[#allocation2 + $0xa0] sm:$0xf] %vm449_vm0, %v7995_v13  ;;  %v1736_v31 = vrot.slane %v1671_v20, 4  ;;  %v1737_v34 = vrot.slane %v1672_v21, 4 }
  0x51   : > { %509 = vst.msk [vmem:[#allocation2 + $0xa8] sm:$0xf] %vm449_vm0, %v7995_v13  ;;  %7120 = vmatmul.msk.bf16.gmra.mxu0 %vm915_vm3, %v894_v54  ;;  %v1623_v54 = vunpack.c.l.bf16 %v1442_v39  ;;  %v2171_v26 = vunpack.c.l.bf16 %v2075_v14  ;;  %v1296_v14 = vld [vmem:[#allocation2 + $0x60] sm:$0xc] }
  0x52   : > { %510 = vst.msk [vmem:[#allocation2 + $0xac] sm:$0xf] %vm449_vm0, %v7995_v13  ;;  %v1738_v45 = vsel %vm1735_vm4, %v1736_v31, %v1737_v34  ;;  %v1834_v7 = vadd.f32 %v1737_v34, %v1625_v57  ;;  %v1297_v57 = vld [vmem:[#allocation2 + $0x64] sm:$0xf] }
  0x53   : > { %511 = vst.msk [vmem:[#allocation2 + $0xb0] sm:$0xf] %vm449_vm0, %v7995_v13  ;;  %v1833_v58 = vadd.f32 %v1738_v45, %v1624_v41  ;;  %v1832_v5 = vadd.f32 %v1736_v31, %v1623_v54  ;;  %v412_v45 = vld [vmem:[%s8149_s18 + $0xd8] sm:$0xff] }
  0x54   : > { %512 = vst.msk [vmem:[#allocation2 + $0xb4] sm:$0xf] %vm449_vm0, %v7995_v13  ;;  %v1882_v21 = vpack.c.bf16 %v1834_v7, %v1834_v7  ;;  %v1349_v7 = vunpack.c.l.bf16 %v1297_v57 }
  0x55   : > { %513 = vst.msk [vmem:[#allocation2 + $0xb8] sm:$0xf] %vm449_vm0, %v7995_v13  ;;  %v1881_v8 = vpack.c.bf16 %v1833_v58, %v1833_v58  ;;  %v1880_v20 = vpack.c.bf16 %v1832_v5, %v1832_v5  ;;  %v8652_v5 = vpack.c.bf16 %v412_v45, %v412_v45 }
  0x56   : > { %517 = vst.msk [vmem:[#allocation2 + $0xc0] sm:$0xf] %vm449_vm0, %v7995_v13 }
  0x57   : > { %518 = vst.msk [vmem:[#allocation2 + $0xc4] sm:$0xf] %vm449_vm0, %v7995_v13  ;;  %v2122_v34 = vunpack.c.l.bf16 %v1880_v20 }
  0x58   : > { %519 = vst.msk [vmem:[#allocation2 + $0xc8] sm:$0xf] %vm449_vm0, %v7995_v13 }
  0x59   : > { %520 = vst.msk [vmem:[#allocation2 + $0xcc] sm:$0xf] %vm449_vm0, %v7995_v13 }
  0x5a   : > { %521 = vst.msk [vmem:[#allocation2 + $0xd0] sm:$0xf] %vm449_vm0, %v7995_v13 }
  0x5b   : > { %525 = vst.msk [vmem:[#allocation2 + $0xd8] sm:$0xf] %vm449_vm0, %v7995_v13 }
  0x5c   : > { %526 = vst.msk [vmem:[#allocation2 + $0xdc] sm:$0xf] %vm449_vm0, %v7995_v13 }
  0x5d   : > { %527 = vst.msk [vmem:[#allocation2 + $0xe0] sm:$0xf] %vm449_vm0, %v7995_v13 }
  0x5e   : > { %528 = vst.msk [vmem:[#allocation2 + $0xe4] sm:$0xf] %vm449_vm0, %v7995_v13 }
  0x5f   : > { %529 = vst.msk [vmem:[#allocation2 + $0xe8] sm:$0xf] %vm449_vm0, %v7995_v13 }
  0x60   : > { %533 = vst.msk [vmem:[#allocation2 + $0xf0] sm:$0xf] %vm449_vm0, %v7995_v13 }
  0x61   : > { %534 = vst.msk [vmem:[#allocation2 + $0xf4] sm:$0xf] %vm449_vm0, %v7995_v13  ;;  %7121 = vmatmul.msk.bf16.gmra.mxu0 %vm915_vm3, %v8543_v59 }
  0x62   : > { %535 = vst.msk [vmem:[#allocation2 + $0xf8] sm:$0xf] %vm449_vm0, %v7995_v13 }
  0x63   : > { %536 = vst.msk [vmem:[#allocation2 + $0xfc] sm:$0xf] %vm449_vm0, %v7995_v13 }
  0x64   : > { %537 = vst.msk [vmem:[#allocation2 + $0x100] sm:$0xf] %vm449_vm0, %v7995_v13 }
  0x65   : > { %541 = vst.msk [vmem:[#allocation2 + $0x108] sm:$0xf] %vm449_vm0, %v7995_v13 }
  0x66   : > { %542 = vst.msk [vmem:[#allocation2 + $0x10c] sm:$0xf] %vm449_vm0, %v7995_v13 }
  0x67   : > { %543 = vst.msk [vmem:[#allocation2 + $0x110] sm:$0xf] %vm449_vm0, %v7995_v13 }
  0x68   : > { %544 = vst.msk [vmem:[#allocation2 + $0x114] sm:$0xf] %vm449_vm0, %v7995_v13 }
  0x69   : > { %545 = vst.msk [vmem:[#allocation2 + $0x118] sm:$0xf] %vm449_vm0, %v7995_v13 }
  0x6a   : > { %549 = vst.msk [vmem:[#allocation2 + $0x120] sm:$0xf] %vm449_vm0, %v7995_v13 }
  0x6b   : > { %550 = vst.msk [vmem:[#allocation2 + $0x124] sm:$0xf] %vm449_vm0, %v7995_v13 }
  0x6c   : > { %551 = vst.msk [vmem:[#allocation2 + $0x128] sm:$0xf] %vm449_vm0, %v7995_v13 }
  0x6d   : > { %552 = vst.msk [vmem:[#allocation2 + $0x12c] sm:$0xf] %vm449_vm0, %v7995_v13 }
  0x6e   : > { %553 = vst.msk [vmem:[#allocation2 + $0x130] sm:$0xf] %vm449_vm0, %v7995_v13 }
  0x6f   : > { %557 = vst.msk [vmem:[#allocation2 + $0x138] sm:$0xf] %vm449_vm0, %v7995_v13 }
  0x70   : > { %558 = vst.msk [vmem:[#allocation2 + $0x13c] sm:$0xf] %vm449_vm0, %v7995_v13 }
  0x71   : > { %559 = vst.msk [vmem:[#allocation2 + $0x140] sm:$0xf] %vm449_vm0, %v7995_v13  ;;  %7122 = vmatmul.msk.bf16.gmra.mxu0 %vm915_vm3, %v8559_v6 }
  0x72   : > { %560 = vst.msk [vmem:[#allocation2 + $0x144] sm:$0xf] %vm449_vm0, %v7995_v13 }
  0x73   : > { %561 = vst.msk [vmem:[#allocation2 + $0x148] sm:$0xf] %vm449_vm0, %v7995_v13 }
  0x74   : > { %565 = vst.msk [vmem:[#allocation2 + $0x150] sm:$0xf] %vm449_vm0, %v7995_v13 }
  0x75   : > { %566 = vst.msk [vmem:[#allocation2 + $0x154] sm:$0xf] %vm449_vm0, %v7995_v13 }
  0x76   : > { %567 = vst.msk [vmem:[#allocation2 + $0x158] sm:$0xf] %vm449_vm0, %v7995_v13 }
  0x77   : > { %568 = vst.msk [vmem:[#allocation2 + $0x15c] sm:$0xf] %vm449_vm0, %v7995_v13 }
  0x78   : > { %569 = vst.msk [vmem:[#allocation2 + $0x160] sm:$0xf] %vm449_vm0, %v7995_v13 }
  0x79   : > { %574 = vst.msk [vmem:[#allocation2 + $0x2e8] sm:$0xf] %vm449_vm0, %v7995_v13 }
  0x7a   : > { %575 = vst.msk [vmem:[#allocation2 + $0x2ec] sm:$0xf] %vm449_vm0, %v7995_v13 }
  0x7b   : > { %576 = vst.msk [vmem:[#allocation2 + $0x2f0] sm:$0xf] %vm449_vm0, %v7995_v13 }
  0x7c   : > { %577 = vst.msk [vmem:[#allocation2 + $0x2f4] sm:$0xf] %vm449_vm0, %v7995_v13 }
  0x7d   : > { %578 = vst.msk [vmem:[#allocation2 + $0x2f8] sm:$0xf] %vm449_vm0, %v7995_v13 }
  0x7e   : > { %582 = vst.msk [vmem:[#allocation2 + $0x300] sm:$0xf] %vm449_vm0, %v7995_v13 }
  0x7f   : > { %583 = vst.msk [vmem:[#allocation2 + $0x304] sm:$0xf] %vm449_vm0, %v7995_v13 }
  0x80   : > { %584 = vst.msk [vmem:[#allocation2 + $0x308] sm:$0xf] %vm449_vm0, %v7995_v13 }
  0x81   : > { %585 = vst.msk [vmem:[#allocation2 + $0x30c] sm:$0xf] %vm449_vm0, %v7995_v13 }
  0x82   : > { %586 = vst.msk [vmem:[#allocation2 + $0x310] sm:$0xf] %vm449_vm0, %v7995_v13 }
  0x83   : > { %590 = vst.msk [vmem:[#allocation2 + $0x318] sm:$0xf] %vm449_vm0, %v7995_v13 }
  0x84   : > { %591 = vst.msk [vmem:[#allocation2 + $0x31c] sm:$0xf] %vm449_vm0, %v7995_v13 }
  0x85   : > { %592 = vst.msk [vmem:[#allocation2 + $0x320] sm:$0xf] %vm449_vm0, %v7995_v13 }
  0x86   : > { %593 = vst.msk [vmem:[#allocation2 + $0x324] sm:$0xf] %vm449_vm0, %v7995_v13 }
  0x87   : > { %594 = vst.msk [vmem:[#allocation2 + $0x328] sm:$0xf] %vm449_vm0, %v7995_v13 }
  0x88   : > { %598 = vst.msk [vmem:[#allocation2 + $0x330] sm:$0xf] %vm449_vm0, %v7995_v13 }
  0x89   : > { %599 = vst.msk [vmem:[#allocation2 + $0x334] sm:$0xf] %vm449_vm0, %v7995_v13 }
  0x8a   : > { %600 = vst.msk [vmem:[#allocation2 + $0x338] sm:$0xf] %vm449_vm0, %v7995_v13 }
  0x8b   : > { %601 = vst.msk [vmem:[#allocation2 + $0x33c] sm:$0xf] %vm449_vm0, %v7995_v13 }
  0x8c   : > { %602 = vst.msk [vmem:[#allocation2 + $0x340] sm:$0xf] %vm449_vm0, %v7995_v13 }
  0x8d   : > { %606 = vst.msk [vmem:[#allocation2 + $0x348] sm:$0xf] %vm449_vm0, %v7995_v13 }
  0x8e   : > { %607 = vst.msk [vmem:[#allocation2 + $0x34c] sm:$0xf] %vm449_vm0, %v7995_v13 }
  0x8f   : > { %608 = vst.msk [vmem:[#allocation2 + $0x350] sm:$0xf] %vm449_vm0, %v7995_v13 }
  0x90   : > { %609 = vst.msk [vmem:[#allocation2 + $0x354] sm:$0xf] %vm449_vm0, %v7995_v13 }
  0x91   : > { %610 = vst.msk [vmem:[#allocation2 + $0x358] sm:$0xf] %vm449_vm0, %v7995_v13 }
  0x92   : > { %614 = vst.msk [vmem:[#allocation2 + $0x360] sm:$0xf] %vm449_vm0, %v7995_v13 }
  0x93   : > { %615 = vst.msk [vmem:[#allocation2 + $0x364] sm:$0xf] %vm449_vm0, %v7995_v13 }
  0x94   : > { %616 = vst.msk [vmem:[#allocation2 + $0x368] sm:$0xf] %vm449_vm0, %v7995_v13 }
  0x95   : > { %617 = vst.msk [vmem:[#allocation2 + $0x36c] sm:$0xf] %vm449_vm0, %v7995_v13 }
  0x96   : > { %618 = vst.msk [vmem:[#allocation2 + $0x370] sm:$0xf] %vm449_vm0, %v7995_v13 }
  0x97   : > { %622 = vst.msk [vmem:[#allocation2 + $0x378] sm:$0xf] %vm449_vm0, %v7995_v13 }
  0x98   : > { %623 = vst.msk [vmem:[#allocation2 + $0x37c] sm:$0xf] %vm449_vm0, %v7995_v13 }
  0x99   : > { %624 = vst.msk [vmem:[#allocation2 + $0x380] sm:$0xf] %vm449_vm0, %v7995_v13 }
  0x9a   : > { %625 = vst.msk [vmem:[#allocation2 + $0x384] sm:$0xf] %vm449_vm0, %v7995_v13 }
  0x9b   : > { %626 = vst.msk [vmem:[#allocation2 + $0x388] sm:$0xf] %vm449_vm0, %v7995_v13 }
  0x9c   : > { %630 = vst.msk [vmem:[#allocation2 + $0x390] sm:$0xf] %vm449_vm0, %v7995_v13 }
  0x9d   : > { %631 = vst.msk [vmem:[#allocation2 + $0x394] sm:$0xf] %vm449_vm0, %v7995_v13 }
  0x9e   : > { %632 = vst.msk [vmem:[#allocation2 + $0x398] sm:$0xf] %vm449_vm0, %v7995_v13 }
  0x9f   : > { %633 = vst.msk [vmem:[#allocation2 + $0x39c] sm:$0xf] %vm449_vm0, %v7995_v13 }
  0xa0   : > { %634 = vst.msk [vmem:[#allocation2 + $0x3a0] sm:$0xf] %vm449_vm0, %v7995_v13 }
  0xa1   : > { %638 = vst.msk [vmem:[#allocation2 + $0x3a8] sm:$0xf] %vm449_vm0, %v7995_v13 }
  0xa2   : > { %639 = vst.msk [vmem:[#allocation2 + $0x3ac] sm:$0xf] %vm449_vm0, %v7995_v13 }
  0xa3   : > { %640 = vst.msk [vmem:[#allocation2 + $0x3b0] sm:$0xf] %vm449_vm0, %v7995_v13 }
  0xa4   : > { %641 = vst.msk [vmem:[#allocation2 + $0x3b4] sm:$0xf] %vm449_vm0, %v7995_v13 }
  0xa5   : > { %642 = vst.msk [vmem:[#allocation2 + $0x3b8] sm:$0xf] %vm449_vm0, %v7995_v13 }
  0xa6   : > { %646 = vst.msk [vmem:[#allocation2 + $0x3c0] sm:$0xf] %vm449_vm0, %v7995_v13 }
  0xa7   : > { %647 = vst.msk [vmem:[#allocation2 + $0x3c4] sm:$0xf] %vm449_vm0, %v7995_v13 }
  0xa8   : > { %648 = vst.msk [vmem:[#allocation2 + $0x3c8] sm:$0xf] %vm449_vm0, %v7995_v13 }
  0xa9   : > { %649 = vst.msk [vmem:[#allocation2 + $0x3cc] sm:$0xf] %vm449_vm0, %v7995_v13 }
  0xaa   : > { %650 = vst.msk [vmem:[#allocation2 + $0x3d0] sm:$0xf] %vm449_vm0, %v7995_v13 }
  0xab   : > { %654 = vst.msk [vmem:[#allocation2 + $0x3d8] sm:$0xf] %vm449_vm0, %v7995_v13 }
  0xac   : > { %655 = vst.msk [vmem:[#allocation2 + $0x3dc] sm:$0xf] %vm449_vm0, %v7995_v13 }
  0xad   : > { %656 = vst.msk [vmem:[#allocation2 + $0x3e0] sm:$0xf] %vm449_vm0, %v7995_v13 }
  0xae   : > { %657 = vst.msk [vmem:[#allocation2 + $0x3e4] sm:$0xf] %vm449_vm0, %v7995_v13 }
  0xaf   : > { %658 = vst.msk [vmem:[#allocation2 + $0x3e8] sm:$0xf] %vm449_vm0, %v7995_v13 }
  0xb0   : > { %662 = vst.msk [vmem:[#allocation2 + $0x3f0] sm:$0xf] %vm449_vm0, %v7995_v13 }
  0xb1   : > { %663 = vst.msk [vmem:[#allocation2 + $0x3f4] sm:$0xf] %vm449_vm0, %v7995_v13 }
  0xb2   : > { %664 = vst.msk [vmem:[#allocation2 + $0x3f8] sm:$0xf] %vm449_vm0, %v7995_v13 }
  0xb3   : > { %665 = vst.msk [vmem:[#allocation2 + $0x3fc] sm:$0xf] %vm449_vm0, %v7995_v13 }
  0xb4   : > { %666 = vst.msk [vmem:[#allocation2 + $0x400] sm:$0xf] %vm449_vm0, %v7995_v13 }
  0xb5   : > { %695 = vst.msk [vmem:[#allocation2 + $0x168] sm:$0xf] %vm449_vm0, %v7995_v13 }
  0xb6   : > { %696 = vst.msk [vmem:[#allocation2 + $0x16c] sm:$0xf] %vm449_vm0, %v7995_v13 }
  0xb7   : > { %697 = vst.msk [vmem:[#allocation2 + $0x180] sm:$0xf] %vm449_vm0, %v7995_v13 }
  0xb8   : > { %698 = vst.msk [vmem:[#allocation2 + $0x184] sm:$0xf] %vm449_vm0, %v7995_v13 }
  0xb9   : > { %699 = vst.msk [vmem:[#allocation2 + $0x198] sm:$0xf] %vm449_vm0, %v7995_v13 }
  0xba   : > { %700 = vst.msk [vmem:[#allocation2 + $0x19c] sm:$0xf] %vm449_vm0, %v7995_v13 }
  0xbb   : > { %701 = vst.msk [vmem:[#allocation2 + $0x1b0] sm:$0xf] %vm449_vm0, %v7995_v13 }
  0xbc   : > { %702 = vst.msk [vmem:[#allocation2 + $0x1b4] sm:$0xf] %vm449_vm0, %v7995_v13  ;;  %v2314_v19 = vld [vmem:[#allocation2 + $0x168] sm:$0xc] }
  0xbd   : > { %703 = vst.msk [vmem:[#allocation2 + $0x1c8] sm:$0xf] %vm449_vm0, %v7995_v13  ;;  %v2315_v3 = vld [vmem:[#allocation2 + $0x16c] sm:$0xf]  ;;  %v2363_v22 = vunpack.c.l.bf16 %v2314_v19 }
  0xbe   : > { %704 = vst.msk [vmem:[#allocation2 + $0x1cc] sm:$0xf] %vm449_vm0, %v7995_v13  ;;  %v2364_v11 = vunpack.c.l.bf16 %v2315_v3  ;;  %v3555_v3 = vperm.slane %v8507_v38, 3  ;;  %v1287_v38 = vld [vmem:[%s10748_s4 + $0x4] sm:$0x1] }
  0xbf   : > { %705 = vst.msk [vmem:[#allocation2 + $0x1e0] sm:$0xf] %vm449_vm0, %v7995_v13  ;;  %v2412_v44 = vmul.f32 %v8554_v4, %v2363_v22  ;;  %v2123_v22 = vunpack.c.l.bf16 %v1881_v8 }
  0xc0   : > { %706 = vst.msk [vmem:[#allocation2 + $0x1e4] sm:$0xf] %vm449_vm0, %v7995_v13  ;;  %v8570_v23 = vmul.f32 %v8554_v4, %v2364_v11  ;;  %v2074_v11 = vpack.c.bf16 %v2026_v62, %v2026_v62  ;;  %v8622_v40 = vunpack.c.l.bf16 %v3555_v3  ;;  %v8650_v3 = vpack.c.bf16 %v411_v48, %v411_v48 }
  0xc1   : > { %707 = vst.msk [vmem:[#allocation2 + $0x1f8] sm:$0xf] %vm449_vm0, %v7995_v13  ;;  %v2460_v9 = vpack.c.bf16 %v2412_v44, %v2412_v44  ;;  %v2219_v41 = vadd.f32 %v2171_v26, %v2123_v22  ;;  %v4006_v44 = vpack.i.b16 %v1287_v38, %v1287_v38  ;;  %v7707_v38 = vld [vmem:[#allocation2 + $0x68] sm:$0xff]  }
  0xc2   : > { %708 = vst.msk [vmem:[#allocation2 + $0x1fc] sm:$0xf] %vm449_vm0, %v7995_v13  ;;  %v2461_v15 = vpack.c.bf16 %v8570_v23, %v8570_v23  ;;  %v2170_v23 = vunpack.c.l.bf16 %v2074_v11 }
  0xc3   : > { %709 = vst.msk [vmem:[#allocation2 + $0x210] sm:$0xf] %vm449_vm0, %v7995_v13  ;;  %v8626_v42 = vunpack.c.l.bf16 %v2460_v9  ;;  %v2267_v58 = vpack.c.bf16 %v2219_v41, %v2219_v41  ;;  %v4008_v63 = vperm.slane %v4006_v44, 0  ;;  %v7392_v41 = vunpack.c.l.bf16 %v7707_v38 }
  0xc4   : > { %710 = vst.msk [vmem:[#allocation2 + $0x214] sm:$0xf] %vm449_vm0, %v7995_v13  ;;  %v8638_v50 = vadd.f32 %v2170_v23, %v2122_v34  ;;  %v8640_v54 = vunpack.c.l.bf16 %v2461_v15 }
  0xc5   : > { %711 = vst.msk [vmem:[#allocation2 + $0x228] sm:$0xf] %vm449_vm0, %v7995_v13  ;;  %v8659_v11 = vunpack.c.l.bf16 %v4008_v63  ;;  %v8673_v22 = vunpack.c.l.bf16 %v2267_v58  ;;  %v1561_v57 = vmul.f32 %v7392_v41, %v8531_v53 }
  0xc6   : > { %712 = vst.msk [vmem:[#allocation2 + $0x22c] sm:$0xf] %vm449_vm0, %v7995_v13  ;;  %v2266_v15 = vpack.c.bf16 %v8638_v50, %v8638_v50  ;;  %v780_v50 = vld [vmem:[#allocation2 + $0x2b4] sm:$0xf] }
  0xc7   : > { %713 = vst.msk [vmem:[#allocation2 + $0x240] sm:$0xf] %vm449_vm0, %v7995_v13  ;;  %v1593_v63 = vpack.c.bf16 %v1561_v57, %v1561_v57 }
  0xc8   : > { %714 = vst.msk [vmem:[#allocation2 + $0x244] sm:$0xf] %vm449_vm0, %v7995_v13 }
  0xc9   : > { %715 = vst.msk [vmem:[#allocation2 + $0x258] sm:$0xf] %vm449_vm0, %v7995_v13 }
  0xca   : > { %716 = vst.msk [vmem:[#allocation2 + $0x25c] sm:$0xf] %vm449_vm0, %v7995_v13 }
  0xcb   : > { %717 = vst.msk [vmem:[#allocation2 + $0x270] sm:$0xf] %vm449_vm0, %v7995_v13 }
  0xcc   : > { %718 = vst.msk [vmem:[#allocation2 + $0x274] sm:$0xf] %vm449_vm0, %v7995_v13 }
  0xcd   : > { %719 = vst.msk [vmem:[#allocation2 + $0x288] sm:$0xf] %vm449_vm0, %v7995_v13 }
  0xce   : > { %720 = vst.msk [vmem:[#allocation2 + $0x28c] sm:$0xf] %vm449_vm0, %v7995_v13 }
  0xcf   : > { %721 = vst.msk [vmem:[#allocation2 + $0x2a0] sm:$0xf] %vm449_vm0, %v7995_v13 }
  0xd0   : > { %722 = vst.msk [vmem:[#allocation2 + $0x2a4] sm:$0xf] %vm449_vm0, %v7995_v13 }
  0xd1   : > { %723 = vst.msk [vmem:[#allocation2 + $0x2b8] sm:$0xf] %vm449_vm0, %v7995_v13 }
  0xd2   : > { %724 = vst.msk [vmem:[#allocation2 + $0x2bc] sm:$0xf] %vm449_vm0, %v7995_v13 }
  0xd3   : > { %725 = vst.msk [vmem:[#allocation2 + $0x2d0] sm:$0xf] %vm449_vm0, %v7995_v13 }
  0xd4   : > { %726 = vst.msk [vmem:[#allocation2 + $0x2d4] sm:$0xf] %vm449_vm0, %v7995_v13  ;;  %v3329_v10 = vld [vmem:[#allocation2 + $0x288] sm:$0xc] }
  0xd5   : > { %727 = vst.msk [vmem:[#allocation2 + $0x178] sm:$0xf] %vm449_vm0, %v7995_v13  ;;  %v3330_v19 = vld [vmem:[#allocation2 + $0x28c] sm:$0xf]  ;;  %v3378_v31 = vunpack.c.l.bf16 %v3329_v10 }
  0xd6   : > { %731 = vst.msk [vmem:[#allocation2 + $0x190] sm:$0xf] %vm449_vm0, %v7995_v13  ;;  %v3379_v39 = vunpack.c.l.bf16 %v3330_v19 }
  0xd7   : > { %735 = vst.msk [vmem:[#allocation2 + $0x1a8] sm:$0xf] %vm449_vm0, %v7995_v13 }
  0xd8   : > { %739 = vst.msk [vmem:[#allocation2 + $0x1c0] sm:$0xf] %vm449_vm0, %v7995_v13  ;;  %v3428_v62 = vmul.f32 %v8628_v43, %v3379_v39 }
  0xd9   : > { %743 = vst.msk [vmem:[#allocation2 + $0x1d8] sm:$0xf] %vm449_vm0, %v7995_v13 }
  0xda   : > { %747 = vst.msk [vmem:[#allocation2 + $0x1f0] sm:$0xf] %vm449_vm0, %v7995_v13  ;;  %v3476_v9 = vpack.c.bf16 %v3428_v62, %v3428_v62  ;;  %v781_v62 = vsel %vm8160_vm2, 0, %v780_v50 }
  0xdb   : > { %751 = vst.msk [vmem:[#allocation2 + $0x208] sm:$0xf] %vm449_vm0, %v7995_v13 }
  0xdc   : > { %755 = vst.msk [vmem:[#allocation2 + $0x220] sm:$0xf] %vm449_vm0, %v7995_v13  ;;  %v2943_v61 = vld [vmem:[#allocation2 + $0x178] sm:$0xf]  ;;  %v8682_v26 = vunpack.c.l.bf16 %v3476_v9  ;;  %v8712_v9 = vld [vmem:[#allocation2 + $0x6c] sm:$0xc] }
  0xdd   : > { %759 = vst.msk [vmem:[#allocation2 + $0x238] sm:$0xf] %vm449_vm0, %v7995_v13  ;;  %v2992_v16 = vunpack.c.l.bf16 %v2943_v61  ;;  %v3427_v61 = vmul.f32 %v8628_v43, %v3378_v31 }
  0xde   : > { %763 = vst.msk [vmem:[#allocation2 + $0x250] sm:$0xf] %vm449_vm0, %v7995_v13 }
  0xdf   : > { %767 = vst.msk [vmem:[#allocation2 + $0x268] sm:$0xf] %vm449_vm0, %v7995_v13  ;;  %v3041_v37 = vmul.f32 %v8614_v25, %v2992_v16  ;;  %v3475_v8 = vpack.c.bf16 %v3427_v61, %v3427_v61  ;;  %v1348_v16 = vunpack.c.l.bf16 %v1296_v14 }
  0xe0   : > { %771 = vst.msk [vmem:[#allocation2 + $0x280] sm:$0xf] %vm449_vm0, %v7995_v13 }
  0xe1   : > { %775 = vst.msk [vmem:[#allocation2 + $0x298] sm:$0xf] %vm449_vm0, %v7995_v13  ;;  %v8680_v23 = vunpack.c.l.bf16 %v3475_v8 }
  0xe2   : > { %779 = vst.msk [vmem:[#allocation2 + $0x2b0] sm:$0xf] %vm449_vm0, %v7995_v13 }
  0xe3   : > { %783 = vst.msk [vmem:[#allocation2 + $0x2c8] sm:$0xf] %vm449_vm0, %v7995_v13 }
  0xe4   : > { %787 = vst.msk [vmem:[#allocation2 + $0x2e0] sm:$0xf] %vm449_vm0, %v7995_v13  ;;  %v8636_v13 = vunpack.c.l.bf16 %v1882_v21 }
  0xe5   : > { %791 = vst.msk [vmem:[#allocation2 + $0x170] sm:$0xf] %vm449_vm0, %v8449_v17  ;;  %v3089_v17 = vpack.c.bf16 %v3041_v37, %v3041_v37 }
  0xe6   : > { %792 = vst.msk [vmem:[#allocation2 + $0x174] sm:$0xf] %vm449_vm0, %v8451_v18 }
  0xe7   : > { %793 = vst.msk [vmem:[#allocation2 + $0x188] sm:$0xf] %vm449_vm0, %v8484_v28  ;;  %v491_v28 = vsel %vm8160_vm2, 0, %v8632_v49  ;;  %v8670_v20 = vunpack.c.l.bf16 %v3089_v17 }
  0xe8   : > { %794 = vst.msk [vmem:[#allocation2 + $0x18c] sm:$0xf] %vm449_vm0, %v8486_v29  ;;  %v3958_v18 = vld [vmem:[#allocation2 + $0x298] sm:$0xf]  ;;  %v1298_v29 = vld [vmem:[#allocation2 + $0x68] sm:$0x3] }
  0xe9   : > { %795 = vst.msk [vmem:[#allocation2 + $0x1a0] sm:$0xf] %vm449_vm0, %v8494_v32  ;;  %v4010_v10 = vunpack.c.l.bf16 %v3958_v18  ;;  %v1350_v19 = vunpack.c.l.bf16 %v1298_v29  ;;  %v1398_v32 = vmul.f32 %v8552_v2, %v1349_v7 }
  0xea   : > { %796 = vst.msk [vmem:[#allocation2 + $0x1a4] sm:$0xf] %vm449_vm0, %v8496_v33  ;;  %v733_v33 = vsel %vm8160_vm2, 0, %v8646_v1 }
  0xeb   : > { %797 = vst.msk [vmem:[#allocation2 + $0x1b8] sm:$0xf] %vm449_vm0, %v8500_v35  ;;  %v4059_v21 = vmul.f32 %v8659_v11, %v4010_v10  ;;  %v1397_v35 = vmul.f32 %v8552_v2, %v1348_v16  ;;  %v1399_v27 = vmul.f32 %v8552_v2, %v1350_v19  ;;  %v1446_v39 = vpack.c.bf16 %v1398_v32, %v1398_v32 }
  0xec   : > { %798 = vst.msk [vmem:[#allocation2 + $0x1bc] sm:$0xf] %vm449_vm0, %v8504_v36  ;;  %v2316_v59 = vld [vmem:[#allocation2 + $0x170] sm:$0x3]  ;;  %v7393_v36 = vunpack.c.h.bf16 %v7707_v38 }
  0xed   : > { %484 = vst [vmem:[#allocation2 + $0x5c] sm:$0xf] %v483_v60  ;;  %v2365_v31 = vunpack.c.l.bf16 %v2316_v59  ;;  %v7722_v34 = vld [vmem:[#allocation2 + $0x170] sm:$0xff]   ;;  %v4107_v49 = vpack.c.bf16 %v4059_v21, %v4059_v21  ;;  %v1445_v60 = vpack.c.bf16 %v1397_v35, %v1397_v35  ;;  %v1447_v17 = vpack.c.bf16 %v1399_v27, %v1399_v27  ;;  %v8726_v59 = vld [vmem:[#allocation2 + $0x180] sm:$0xc] }
  0xee   : > { %v2942_v37 = vld [vmem:[#allocation2 + $0x174] sm:$0xc]  ;;  %730 = vst [vmem:[#allocation2 + $0x17c] sm:$0xf] %v729_v12  ;;  %v7452_v44 = vunpack.c.l.bf16 %v7722_v34  ;;  %v7453_v48 = vunpack.c.h.bf16 %v7722_v34  ;;  %v1562_v61 = vmul.f32 %v7393_v36, %v8531_v53  ;;  %v8718_v16 = vunpack.c.l.bf16 %v1446_v39 }
  0xef   : > { %v2991_v45 = vunpack.c.l.bf16 %v2942_v37  ;;  %778 = vst [vmem:[#allocation2 + $0x29c] sm:$0xf] %v777_v52  ;;  %v2414_v47 = vmul.f32 %v8554_v4, %v2365_v31  ;;  %v8708_v52 = vunpack.c.l.bf16 %v2266_v15  ;;  %v8714_v14 = vunpack.c.l.bf16 %v4107_v49  ;;  %v8720_v15 = vld [vmem:[#allocation2 + $0x70] sm:$0xf] }
  0xf0   : > { %815 = vst.msk [vmem:[#allocation2 + $0x290] sm:$0xf] %vm449_vm0, %v8522_v46  ;;  %v2574_v56 = vmul.f32 %v7452_v44, %v8579_v30  ;;  %v2575_v12 = vmul.f32 %v7453_v48, %v8579_v30  ;;  %v1594_v8 = vpack.c.bf16 %v1562_v61, %v1562_v61  ;;  %v8716_v29 = vunpack.c.l.bf16 %v1445_v60 }
  0xf1   : > { %v3040_v58 = vmul.f32 %v8614_v25, %v2991_v45  ;;  %816 = vst.msk [vmem:[#allocation2 + $0x294] sm:$0xf] %vm449_vm0, %v8535_v55  ;;  %v2462_v24 = vpack.c.bf16 %v2414_v47, %v2414_v47  ;;  %v8722_v21 = vunpack.c.l.bf16 %v1447_v17  ;;  %v1980_v34 = vunpack.c.l.bf16 %v8712_v9 }
  0xf2   : > { %v2606_v1 = vpack.c.bf16 %v2574_v56, %v2574_v56  ;;  %v2607_v18 = vpack.c.bf16 %v2575_v12, %v2575_v12  ;;  %492 = vst [vmem:[#allocation2 + $0x74] sm:$0xf] %v491_v28  ;;  %v8724_v28 = vunpack.c.l.bf16 %v1593_v63  ;;  %v1981_v44 = vunpack.c.l.bf16 %v8720_v15 }
  0xf3   : > { %v3088_v7 = vpack.c.bf16 %v3040_v58, %v3040_v58  ;;  %v2640_v10 = vunpack.c.l.bf16 %v2462_v24  ;;  %734 = vst [vmem:[#allocation2 + $0x194] sm:$0xf] %v733_v33  ;;  %v8730_v33 = vunpack.c.l.bf16 %v1594_v8  ;;  %v2366_v47 = vunpack.c.l.bf16 %v8726_v59 }
  0xf4   : > { %v1930_v19 = vld [vmem:[#allocation2 + $0x5c] sm:$0x3]  ;;  %v2686_v32 = vunpack.c.l.bf16 %v2606_v1  ;;  %v2687_v38 = vunpack.c.l.bf16 %v2607_v18  ;;  %782 = vst [vmem:[#allocation2 + $0x2b4] sm:$0xf] %v781_v62  ;;  %v1739_v50 = vrot.slane %v8724_v28, 4 }
  0xf5   : > { %v1979_v35 = vunpack.c.l.bf16 %v1930_v19  ;;  %v2944_v27 = vld [vmem:[#allocation2 + $0x17c] sm:$0x3]  ;;  %v3184_v31 = vunpack.c.l.bf16 %v3088_v7  ;;  %817 = vst.msk [vmem:[#allocation2 + $0x2a8] sm:$0xf] %vm449_vm0, %v8650_v3 }
  0xf6   : > { %v2750_v37 = vrot.slane %v2686_v32, 4  ;;  %v2751_v39 = vrot.slane %v2687_v38, 4  ;;  %v2993_v41 = vunpack.c.l.bf16 %v2944_v27  ;;  %v3959_v36 = vld [vmem:[#allocation2 + $0x29c] sm:$0x3]  ;;  %818 = vst.msk [vmem:[#allocation2 + $0x2ac] sm:$0xf] %vm449_vm0, %v8652_v5 }
  0xf7   : > { %v2028_v48 = vmul.f32 %v8590_v51, %v1979_v35  ;;  %v3331_v45 = vld [vmem:[#allocation2 + $0x290] sm:$0x3]  ;;  %v4011_v49 = vunpack.c.l.bf16 %v3959_v36 }
  0xf8   : > { %v2752_v60 = vsel %vm1735_vm4, %v2750_v37, %v2751_v39  ;;  %v2846_v17 = vadd.f32 %v2750_v37, %v8626_v42  ;;  %v2848_v57 = vadd.f32 %v2751_v39, %v2640_v10  ;;  %v3042_v56 = vmul.f32 %v8614_v25, %v2993_v41  ;;  %v7738_v12 = vld [vmem:[#allocation2 + $0x290] sm:$0xff]  }
  0xf9   : > { %v2076_v58 = vpack.c.bf16 %v2028_v48, %v2028_v48  ;;  %v2847_v61 = vadd.f32 %v2752_v60, %v8640_v54  ;;  %v3380_v24 = vunpack.c.l.bf16 %v3331_v45  ;;  %v7516_v62 = vunpack.c.l.bf16 %v7738_v12  ;;  %v3957_v32 = vld [vmem:[#allocation2 + $0x294] sm:$0xc] }
  0xfa   : > { %v2894_v63 = vpack.c.bf16 %v2846_v17, %v2846_v17  ;;  %v2896_v1 = vpack.c.bf16 %v2848_v57, %v2848_v57  ;;  %v3090_v18 = vpack.c.bf16 %v3042_v56, %v3042_v56  ;;  %v7517_v7 = vunpack.c.h.bf16 %v7738_v12 }
  0xfb   : > { %v2172_v8 = vunpack.c.l.bf16 %v2076_v58  ;;  %v2895_v19 = vpack.c.bf16 %v2847_v61, %v2847_v61  ;;  %v3429_v42 = vmul.f32 %v8628_v43, %v3380_v24  ;;  %v3589_v10 = vmul.f32 %v7516_v62, %v8622_v40 }
  0xfc   : > { %v3136_v38 = vunpack.c.l.bf16 %v2894_v63  ;;  %v3138_v35 = vunpack.c.l.bf16 %v2896_v1  ;;  %v3186_v27 = vunpack.c.l.bf16 %v3090_v18  ;;  %v3590_v54 = vmul.f32 %v7517_v7, %v8622_v40 }
  0xfd   : > { %v2220_v37 = vadd.f32 %v2172_v8, %v8636_v13  ;;  %v3137_v39 = vunpack.c.l.bf16 %v2895_v19  ;;  %v3477_v6 = vpack.c.bf16 %v3429_v42, %v3429_v42  ;;  %v3621_v41 = vpack.c.bf16 %v3589_v10, %v3589_v10  ;;  %v1290_v13 = vld [vmem:[%s10749_s5] sm:$0x7] }
  0xfe   : > { %v3232_v36 = vadd.f32 %v3184_v31, %v3136_v38  ;;  %v3234_v48 = vadd.f32 %v3186_v27, %v3138_v35  ;;  %v3622_v45 = vpack.c.bf16 %v3590_v54, %v3590_v54  ;;  %v4009_v60 = vunpack.c.l.bf16 %v3957_v32 }
  0xff   : > { %v2268_v17 = vpack.c.bf16 %v2220_v37, %v2220_v37  ;;  %v3233_v57 = vadd.f32 %v8670_v20, %v3137_v39  ;;  %v3655_v56 = vunpack.c.l.bf16 %v3477_v6  ;;  %v3701_v12 = vunpack.c.l.bf16 %v3621_v41 }
 0x100   : > { %v3280_v58 = vpack.c.bf16 %v3232_v36, %v3232_v36  ;;  %v3282_v61 = vpack.c.bf16 %v3234_v48, %v3234_v48  ;;  %v3702_v24 = vunpack.c.l.bf16 %v3622_v45  ;;  %v4058_v62 = vmul.f32 %v8659_v11, %v4009_v60  ;;  %v393_v36 = vld [vmem:[%s8149_s18 + $0x40] sm:$0xff] }
 0x101   : > { %v3281_v63 = vpack.c.bf16 %v3233_v57, %v3233_v57  ;;  %v3765_v1 = vrot.slane %v3701_v12, 4  ;;  %v4060_v31 = vmul.f32 %v8659_v11, %v4011_v49  ;;  %v4348_v18 = vunpack.c.l.bf16 %v2268_v17  ;;  %v394_v17 = vld [vmem:[%s8149_s18 + $0x48] sm:$0xff] }
 0x102   : > { %v3766_v7 = vrot.slane %v3702_v24, 4  ;;  %v4106_v8 = vpack.c.bf16 %v4058_v62, %v4058_v62  ;;  %v4394_v20 = vunpack.c.l.bf16 %v3280_v58  ;;  %v4396_v19 = vunpack.c.l.bf16 %v3282_v61 }
 0x103   : > { %v3861_v42 = vadd.f32 %v3765_v1, %v8680_v23  ;;  %v4108_v10 = vpack.c.bf16 %v4060_v31, %v4060_v31  ;;  %v4395_v32 = vunpack.c.l.bf16 %v3281_v63  ;;  %v1740_v38 = vrot.slane %v8730_v33, 4 }
 0x104   : > { %v3767_v35 = vsel %vm1735_vm4, %v3765_v1, %v3766_v7  ;;  %v3863_v27 = vadd.f32 %v3766_v7, %v3655_v56  ;;  %v4442_v54 = vadd.f32 %v4394_v20, %v8708_v52  ;;  %v8759_v37 = vperm.slane %v1290_v13, 0  ;;  %v1933_v1 = vld [vmem:[#allocation2 + $0x74] sm:$0x3] }
 0x105   : > { %v3862_v49 = vadd.f32 %v3767_v35, %v8682_v26  ;;  %v3909_v39 = vpack.c.bf16 %v3861_v42, %v3861_v42  ;;  %v4202_v6 = vunpack.c.l.bf16 %v4106_v8  ;;  %v4443_v41 = vadd.f32 %v4395_v32, %v8673_v22 }
 0x106   : > { %v3911_v23 = vpack.c.bf16 %v3863_v27, %v3863_v27  ;;  %v4204_v48 = vunpack.c.l.bf16 %v4108_v10  ;;  %v4444_v45 = vadd.f32 %v4396_v19, %v4348_v18  ;;  %v4490_v60 = vpack.c.bf16 %v4442_v54, %v4442_v54 }
 0x107   : > { %v3910_v33 = vpack.c.bf16 %v3862_v49, %v3862_v49  ;;  %v4154_v57 = vunpack.c.l.bf16 %v3909_v39  ;;  %v4491_v12 = vpack.c.bf16 %v4443_v41, %v4443_v41  ;;  %v8765_v56 = vperm.slane %v1290_v13, 1 }
 0x108   : > { %v4156_v52 = vunpack.c.l.bf16 %v3911_v23  ;;  %v4492_v58 = vpack.c.bf16 %v4444_v45, %v4444_v45  ;;  %v4538_v61 = vunpack.c.l.bf16 %v4490_v60  ;;  %v425_v24 = vpack.c.bf16 %v393_v36, %v393_v36 }
 0x109   : > { %v4155_v26 = vunpack.c.l.bf16 %v3910_v33  ;;  %v4250_v62 = vadd.f32 %v4202_v6, %v4154_v57  ;;  %v4539_v63 = vunpack.c.l.bf16 %v4491_v12  ;;  %v426_v22 = vpack.c.bf16 %v394_v17, %v394_v17 }
 0x10a   : > { %v4252_v31 = vadd.f32 %v4204_v48, %v4156_v52  ;;  %v4540_v18 = vunpack.c.l.bf16 %v4492_v58  ;;  %799 = vst.msk [vmem:[#allocation2 + $0x1d0] sm:$0xf] %vm449_vm0, %v425_v24  ;;  %v869_v7 = vunpack.c.l.b16 %v425_v24  ;;  %v1741_v13 = vsel %vm1735_vm4, %v1739_v50, %v1740_v38 }
 0x10b   : > { %v4251_v8 = vadd.f32 %v8714_v14, %v4155_v26  ;;  %v4298_v20 = vpack.c.bf16 %v4250_v62, %v4250_v62  ;;  %800 = vst.msk [vmem:[#allocation2 + $0x1d4] sm:$0xf] %vm449_vm0, %v426_v22  ;;  %v870_v19 = vunpack.c.l.b16 %v426_v22  ;;  %v1835_v42 = vadd.f32 %v1739_v50, %v8716_v29  ;;  %v7723_v62 = vld [vmem:[#allocation2 + $0x188] sm:$0xff]  }
 0x10c   : > { %v4300_v10 = vpack.c.bf16 %v4252_v31, %v4252_v31  ;;  %v1836_v32 = vadd.f32 %v1741_v13, %v8718_v16  ;;  %v1837_v35 = vadd.f32 %v1740_v38, %v8722_v21  ;;  %v1982_v27 = vunpack.c.l.bf16 %v1933_v1  ;;  %v2318_v21 = vld [vmem:[#allocation2 + $0x184] sm:$0xf] }
 0x10d   : > { %v4299_v54 = vpack.c.bf16 %v4251_v8, %v4251_v8  ;;  %v4586_v49 = vunpack.c.l.bf16 %v4298_v20  ;;  %v897_v39 = vpack.c.b16 %v870_v19, %v869_v7  ;;  %v1883_v6 = vpack.c.bf16 %v1835_v42, %v1835_v42 }
 0x10e   : > { %v4588_v41 = vunpack.c.l.bf16 %v4300_v10  ;;  %v1884_v14 = vpack.c.bf16 %v1836_v32, %v1836_v32  ;;  %v1885_v36 = vpack.c.bf16 %v1837_v35, %v1837_v35  ;;  %v2029_v23 = vmul.f32 %v8590_v51, %v1980_v34  ;;  %v2319_v34 = vld [vmem:[#allocation2 + $0x188] sm:$0x3]  ;;  %v2945_v35 = vld [vmem:[#allocation2 + $0x18c] sm:$0xc] }
 0x10f   : > { %v4587_v48 = vunpack.c.l.bf16 %v4299_v54  ;;  %v4634_v28 = vadd.f32 %v4586_v49, %v4538_v61  ;;  %7123 = vmatmul.msk.bf16.gmra.mxu0 %vm915_vm3, %v897_v39  ;;  %v2030_v29 = vmul.f32 %v8590_v51, %v1981_v44  ;;  %v2031_v16 = vmul.f32 %v8590_v51, %v1982_v27 }
 0x110   : > { %v4636_v50 = vadd.f32 %v4588_v41, %v4540_v18  ;;  %v2077_v38 = vpack.c.bf16 %v2029_v23, %v2029_v23  ;;  %v2125_v45 = vunpack.c.l.bf16 %v1883_v6  ;;  %v2126_v60 = vunpack.c.l.bf16 %v1884_v14  ;;  %v2946_v14 = vld [vmem:[#allocation2 + $0x190] sm:$0xf] }
 0x111   : > { %v4635_v17 = vadd.f32 %v4587_v48, %v4539_v63  ;;  %v4682_v33 = vpack.c.bf16 %v4634_v28, %v4634_v28  ;;  %v2078_v9 = vpack.c.bf16 %v2030_v29, %v2030_v29  ;;  %v2079_v57 = vpack.c.bf16 %v2031_v16, %v2031_v16 }
 0x112   : > { %v4684_v12 = vpack.c.bf16 %v4636_v50, %v4636_v50  ;;  %v2127_v52 = vunpack.c.l.bf16 %v1885_v36  ;;  %v2173_v58 = vunpack.c.l.bf16 %v2077_v38  ;;  %v2367_v61 = vunpack.c.l.bf16 %v2318_v21  ;;  %v2947_v36 = vld [vmem:[#allocation2 + $0x194] sm:$0x3] }
 0x113   : > { %v4683_v24 = vpack.c.bf16 %v4635_v17, %v4635_v17  ;;  %v7167_v15 = vrot.slane %v4682_v33, 10  ;;  %v2174_v26 = vunpack.c.l.bf16 %v2078_v9  ;;  %v2175_v44 = vunpack.c.l.bf16 %v2079_v57  ;;  %v3333_v57 = vld [vmem:[#allocation2 + $0x2a4] sm:$0xf] }
 0x114   : > { %v4786_v63 = vrot.slane %v4684_v12, 6  ;;  %v8792_v1 = vadd.f32 %v2173_v58, %v2125_v45  ;;  %v2368_v31 = vunpack.c.l.bf16 %v2319_v34  ;;  %v2415_v18 = vmul.f32 %v8554_v4, %v2366_v47  ;;  %v3332_v45 = vld [vmem:[#allocation2 + $0x2a0] sm:$0xc] }
 0x115   : > { %v4783_v7 = vrot.slane %v4683_v24, 6  ;;  %v8797_v13 = vadd.f32 %v2174_v26, %v2126_v60  ;;  %v8799_v8 = vadd.f32 %v2175_v44, %v2127_v52  ;;  %v2416_v20 = vmul.f32 %v8554_v4, %v2367_v61  ;;  %v3334_v61 = vld [vmem:[#allocation2 + $0x2a8] sm:$0x3] }
 0x116   : > { %v2269_v19 = vpack.c.bf16 %v8792_v1, %v8792_v1  ;;  %v2417_v42 = vmul.f32 %v8554_v4, %v2368_v31  ;;  %v2463_v10 = vpack.c.bf16 %v2415_v18, %v2415_v18  ;;  %v7456_v32 = vunpack.c.l.bf16 %v7723_v62 }
 0x117   : > { %v4784_v59 = vsel %vm8788_vm7, %v7167_v15, %v4783_v7  ;;  %v4785_v27 = vrot.slane %v4783_v7, 4  ;;  %v2270_v47 = vpack.c.bf16 %v8797_v13, %v8797_v13  ;;  %v2271_v54 = vpack.c.bf16 %v8799_v8, %v8799_v8 }
 0x118   : > { %v4925_v49 = vunpack.c.l.bf16 %v4784_v59  ;;  %v2464_v39 = vpack.c.bf16 %v2416_v20, %v2416_v20  ;;  %v2465_v6 = vpack.c.bf16 %v2417_v42, %v2417_v42  ;;  %v7457_v41 = vunpack.c.h.bf16 %v7723_v62 }
 0x119   : > { %v4787_v23 = vsel %vm8788_vm7, %v4785_v27, %v4786_v63  ;;  %v2576_v48 = vmul.f32 %v7456_v32, %v8579_v30  ;;  %v2641_v28 = vunpack.c.l.bf16 %v2463_v10  ;;  %v2994_v29 = vunpack.c.l.bf16 %v2945_v35 }
 0x11a   : > { %v4926_v16 = vunpack.c.l.bf16 %v4787_v23  ;;  %v4958_v21 = vadd.f32 %v8759_v37, %v4925_v49  ;;  %v2577_v50 = vmul.f32 %v7457_v41, %v8579_v30  ;;  %v2642_v38 = vunpack.c.l.bf16 %v2464_v39  ;;  %v7739_v49 = vld [vmem:[#allocation2 + $0x2a8] sm:$0xff]  }
 0x11b   : > { %v2608_v60 = vpack.c.bf16 %v2576_v48, %v2576_v48  ;;  %v2643_v17 = vunpack.c.l.bf16 %v2465_v6  ;;  %v2995_v33 = vunpack.c.l.bf16 %v2946_v14  ;;  %v2996_v9 = vunpack.c.l.bf16 %v2947_v36 }
 0x11c   : > { %v4959_v34 = vadd.f32 %v8759_v37, %v4926_v16  ;;  %v4990_v12 = vmax.f32 %v4958_v21, 0.0  ;;  %v2609_v52 = vpack.c.bf16 %v2577_v50, %v2577_v50  ;;  %v3043_v58 = vmul.f32 %v8614_v25, %v2994_v29 }
 0x11d   : > { %v2688_v24 = vunpack.c.l.bf16 %v2608_v60  ;;  %v3044_v15 = vmul.f32 %v8614_v25, %v2995_v33  ;;  %v3045_v26 = vmul.f32 %v8614_v25, %v2996_v9  ;;  %v3381_v44 = vunpack.c.l.bf16 %v3332_v45  ;;  %v3960_v60 = vld [vmem:[#allocation2 + $0x2ac] sm:$0xc] }
 0x11e   : > { %v4991_v62 = vmax.f32 %v4959_v34, 0.0  ;;  %v2689_v63 = vunpack.c.l.bf16 %v2609_v52  ;;  %v3091_v31 = vpack.c.bf16 %v3043_v58, %v3043_v58  ;;  %v3382_v18 = vunpack.c.l.bf16 %v3333_v57  ;;  %v3961_v34 = vld [vmem:[#allocation2 + $0x2b0] sm:$0xf] }
 0x11f   : > { %v2753_v7 = vrot.slane %v2688_v24, 4  ;;  %v3092_v20 = vpack.c.bf16 %v3044_v15, %v3044_v15  ;;  %v3093_v42 = vpack.c.bf16 %v3045_v26, %v3045_v26  ;;  %v3383_v10 = vunpack.c.l.bf16 %v3334_v61  ;;  %v3962_v24 = vld [vmem:[#allocation2 + $0x2b4] sm:$0x3] }
 0x120   : > { %v5022_v32 = vpack.c.bf16 %v4991_v62, %v4990_v12  ;;  %v2754_v35 = vrot.slane %v2689_v63, 4  ;;  %v3187_v59 = vunpack.c.l.bf16 %v3091_v31  ;;  %v3430_v27 = vmul.f32 %v8628_v43, %v3381_v44 }
 0x121   : > { %v2849_v39 = vadd.f32 %v2753_v7, %v2641_v28  ;;  %v3188_v6 = vunpack.c.l.bf16 %v3092_v20  ;;  %v3189_v41 = vunpack.c.l.bf16 %v3093_v42  ;;  %v3431_v14 = vmul.f32 %v8628_v43, %v3382_v18 }
 0x122   : > { %7187 = vmatmul.msk.bf16.vlgmr.msra.gmra.mxu2 %vm915_vm3, %v5022_v32  ;;  %v2755_v36 = vsel %vm1735_vm4, %v2753_v7, %v2754_v35  ;;  %v2851_v23 = vadd.f32 %v2754_v35, %v2643_v17  ;;  %v3432_v48 = vmul.f32 %v8628_v43, %v3383_v10  ;;  %v3478_v29 = vpack.c.bf16 %v3430_v27, %v3430_v27 }
 0x123   : > { %v2850_v16 = vadd.f32 %v2755_v36, %v2642_v38  ;;  %v2897_v21 = vpack.c.bf16 %v2849_v39, %v2849_v39  ;;  %v3479_v50 = vpack.c.bf16 %v3431_v14, %v3431_v14  ;;  %v7520_v45 = vunpack.c.l.bf16 %v7739_v49 }
 0x124   : > { %v2899_v33 = vpack.c.bf16 %v2851_v23, %v2851_v23  ;;  %v3480_v9 = vpack.c.bf16 %v3432_v48, %v3432_v48  ;;  %v7521_v28 = vunpack.c.h.bf16 %v7739_v49  ;;  %v3656_v57 = vunpack.c.l.bf16 %v3478_v29 }
 0x125   : > { %v2898_v12 = vpack.c.bf16 %v2850_v16, %v2850_v16  ;;  %v3139_v52 = vunpack.c.l.bf16 %v2897_v21  ;;  %v3591_v58 = vmul.f32 %v7520_v45, %v8622_v40  ;;  %v3657_v61 = vunpack.c.l.bf16 %v3479_v50 }
 0x126   : > { %v3141_v17 = vunpack.c.l.bf16 %v2899_v33  ;;  %v3592_v15 = vmul.f32 %v7521_v28, %v8622_v40  ;;  %v3658_v26 = vunpack.c.l.bf16 %v3480_v9  ;;  %v4012_v38 = vunpack.c.l.bf16 %v3960_v60  ;;  %v395_v9 = vld [vmem:[%s8149_s18 + $0x50] sm:$0xff]  ;;  %v396_v28 = vld [vmem:[%s8149_s18 + $0x58] sm:$0xff] }
 0x127   : > { %v3140_v44 = vunpack.c.l.bf16 %v2898_v12  ;;  %v3235_v62 = vadd.f32 %v3187_v59, %v3139_v52  ;;  %v3623_v63 = vpack.c.bf16 %v3591_v58, %v3591_v58  ;;  %v4013_v31 = vunpack.c.l.bf16 %v3961_v34 }
 0x128   : > { %v3237_v18 = vadd.f32 %v3189_v41, %v3141_v17  ;;  %v3624_v7 = vpack.c.bf16 %v3592_v15, %v3592_v15  ;;  %v4014_v20 = vunpack.c.l.bf16 %v3962_v24  ;;  %v4061_v42 = vmul.f32 %v8659_v11, %v4012_v38 }
 0x129   : > { %v3236_v10 = vadd.f32 %v3188_v6, %v3140_v44  ;;  %v3283_v32 = vpack.c.bf16 %v3235_v62, %v3235_v62  ;;  %v3703_v35 = vunpack.c.l.bf16 %v3623_v63  ;;  %v4062_v27 = vmul.f32 %v8659_v11, %v4013_v31  ;;  %v413_v62 = vld [vmem:[%s8149_s18 + $0xe0] sm:$0xff] }
 0x12a   : > { %v3285_v49 = vpack.c.bf16 %v3237_v18, %v3237_v18  ;;  %v3704_v39 = vunpack.c.l.bf16 %v3624_v7  ;;  %v4063_v14 = vmul.f32 %v8659_v11, %v4014_v20  ;;  %v4109_v36 = vpack.c.bf16 %v4061_v42, %v4061_v42  ;;  %v498_v7 = vld [vmem:[#allocation2 + $0x8c] sm:$0xf] }
 0x12b   : > { %v3284_v59 = vpack.c.bf16 %v3236_v10, %v3236_v10  ;;  %v3768_v23 = vrot.slane %v3703_v35, 4  ;;  %v4110_v48 = vpack.c.bf16 %v4062_v27, %v4062_v27  ;;  %v4349_v41 = vunpack.c.l.bf16 %v2269_v19  ;;  %v736_v35 = vld [vmem:[#allocation2 + $0x1ac] sm:$0xf] }
 0x12c   : > { %v3769_v29 = vrot.slane %v3704_v39, 4  ;;  %v4111_v6 = vpack.c.bf16 %v4063_v14, %v4063_v14  ;;  %v4205_v16 = vunpack.c.l.bf16 %v4109_v36  ;;  %v4350_v21 = vunpack.c.l.bf16 %v2270_v47  ;;  %v784_v27 = vld [vmem:[#allocation2 + $0x2cc] sm:$0xf] }
 0x12d   : > { %v3864_v50 = vadd.f32 %v3768_v23, %v3656_v57  ;;  %v4206_v45 = vunpack.c.l.bf16 %v4110_v48  ;;  %v4351_v60 = vunpack.c.l.bf16 %v2271_v54  ;;  %v4397_v33 = vunpack.c.l.bf16 %v3283_v32 }
 0x12e   : > { %v3770_v34 = vsel %vm1735_vm4, %v3768_v23, %v3769_v29  ;;  %v3866_v1 = vadd.f32 %v3769_v29, %v3658_v26  ;;  %v4207_v19 = vunpack.c.l.bf16 %v4111_v6  ;;  %v4398_v12 = vunpack.c.l.bf16 %v3284_v59  ;;  %v1299_v59 = vld [vmem:[#allocation2 + $0x78] sm:$0xc]  ;;  %v1300_v23 = vld [vmem:[#allocation2 + $0x7c] sm:$0xf] }
 0x12f   : > { %v3865_v52 = vadd.f32 %v3770_v34, %v3657_v61  ;;  %v3912_v58 = vpack.c.bf16 %v3864_v50, %v3864_v50  ;;  %v4399_v24 = vunpack.c.l.bf16 %v3285_v49  ;;  %v4445_v13 = vadd.f32 %v4397_v33, %v4349_v41  ;;  %v414_v61 = vld [vmem:[%s8149_s18 + $0xe8] sm:$0xff] }
 0x130   : > { %v3914_v47 = vpack.c.bf16 %v3866_v1, %v3866_v1  ;;  %v4446_v57 = vadd.f32 %v4398_v12, %v4350_v21  ;;  %v427_v17 = vpack.c.bf16 %v395_v9, %v395_v9  ;;  %v428_v15 = vpack.c.bf16 %v396_v28, %v396_v28  ;;  %v1301_v21 = vld [vmem:[#allocation2 + $0x80] sm:$0x3] }
 0x131   : > { %v3913_v8 = vpack.c.bf16 %v3865_v52, %v3865_v52  ;;  %v4157_v54 = vunpack.c.l.bf16 %v3912_v58  ;;  %v4447_v38 = vadd.f32 %v4399_v24, %v4351_v60  ;;  %v4493_v44 = vpack.c.bf16 %v4445_v13, %v4445_v13 }
 0x132   : > { %v4159_v63 = vunpack.c.l.bf16 %v3914_v47  ;;  %v4494_v31 = vpack.c.bf16 %v4446_v57, %v4446_v57  ;;  %801 = vst.msk [vmem:[#allocation2 + $0x1e8] sm:$0xf] %vm449_vm0, %v427_v17  ;;  %v871_v26 = vunpack.c.l.b16 %v427_v17  ;;  %v872_v18 = vunpack.c.l.b16 %v428_v15 }
 0x133   : > { %v4158_v20 = vunpack.c.l.bf16 %v3913_v8  ;;  %v4253_v42 = vadd.f32 %v4205_v16, %v4157_v54  ;;  %v4495_v10 = vpack.c.bf16 %v4447_v38, %v4447_v38  ;;  %v4541_v32 = vunpack.c.l.bf16 %v4493_v44  ;;  %802 = vst.msk [vmem:[#allocation2 + $0x1ec] sm:$0xf] %vm449_vm0, %v428_v15  ;;  %v7708_v16 = vld [vmem:[#allocation2 + $0x80] sm:$0xff]  }
 0x134   : > { %v4255_v49 = vadd.f32 %v4207_v19, %v4159_v63  ;;  %v4542_v39 = vunpack.c.l.bf16 %v4494_v31  ;;  %v898_v14 = vpack.c.b16 %v872_v18, %v871_v26  ;;  %v8846_v36 = vpack.c.bf16 %v413_v62, %v413_v62 }
 0x135   : > { %v4254_v48 = vadd.f32 %v4206_v45, %v4158_v20  ;;  %v4301_v41 = vpack.c.bf16 %v4253_v42, %v4253_v42  ;;  %v4543_v29 = vunpack.c.l.bf16 %v4495_v10  ;;  %v8848_v6 = vpack.c.bf16 %v414_v61, %v414_v61  ;;  %v1935_v20 = vld [vmem:[#allocation2 + $0x88] sm:$0xf] }
 0x136   : > { %v4303_v50 = vpack.c.bf16 %v4255_v49, %v4255_v49  ;;  %7124 = vmatmul.msk.bf16.gmra.mxu0 %vm915_vm3, %v898_v14  ;;  %v499_v60 = vsel %vm8160_vm2, 0, %v498_v7  ;;  %v737_v33 = vsel %vm8160_vm2, 0, %v736_v35  ;;  %v785_v9 = vsel %vm8160_vm2, 0, %v784_v27  ;;  %819 = vst.msk [vmem:[#allocation2 + $0x2c0] sm:$0xf] %vm449_vm0, %v8846_v36 }
 0x137   : > { %v4302_v45 = vpack.c.bf16 %v4254_v48, %v4254_v48  ;;  %v4589_v28 = vunpack.c.l.bf16 %v4301_v41  ;;  %500 = vst [vmem:[#allocation2 + $0x8c] sm:$0xf] %v499_v60  ;;  %v1351_v34 = vunpack.c.l.bf16 %v1299_v59  ;;  %v1352_v1 = vunpack.c.l.bf16 %v1300_v23  ;;  %v1934_v7 = vld [vmem:[#allocation2 + $0x84] sm:$0xc]  ;;  %v2320_v27 = vld [vmem:[#allocation2 + $0x198] sm:$0xc] }
 0x138   : > { %v4591_v19 = vunpack.c.l.bf16 %v4303_v50  ;;  %738 = vst [vmem:[#allocation2 + $0x1ac] sm:$0xf] %v737_v33  ;;  %v1353_v12 = vunpack.c.l.bf16 %v1301_v21  ;;  %v7396_v52 = vunpack.c.l.bf16 %v7708_v16  ;;  %v7397_v58 = vunpack.c.h.bf16 %v7708_v16  ;;  %v2321_v49 = vld [vmem:[#allocation2 + $0x19c] sm:$0xf] }
 0x139   : > { %v4590_v24 = vunpack.c.l.bf16 %v4302_v45  ;;  %v4637_v13 = vadd.f32 %v4589_v28, %v4541_v32  ;;  %786 = vst [vmem:[#allocation2 + $0x2cc] sm:$0xf] %v785_v9  ;;  %v1400_v47 = vmul.f32 %v8552_v2, %v1351_v34  ;;  %v1401_v57 = vmul.f32 %v8552_v2, %v1352_v1 }
 0x13a   : > { %v4639_v17 = vadd.f32 %v4591_v19, %v4543_v29  ;;  %820 = vst.msk [vmem:[#allocation2 + $0x2c4] sm:$0xf] %vm449_vm0, %v8848_v6  ;;  %v1402_v15 = vmul.f32 %v8552_v2, %v1353_v12  ;;  %v1563_v8 = vmul.f32 %v7396_v52, %v8531_v53  ;;  %v1564_v54 = vmul.f32 %v7397_v58, %v8531_v53 }
 0x13b   : > { %v4638_v38 = vadd.f32 %v4590_v24, %v4542_v39  ;;  %v4685_v44 = vpack.c.bf16 %v4637_v13, %v4637_v13  ;;  %v1448_v62 = vpack.c.bf16 %v1400_v47, %v1400_v47  ;;  %v1449_v63 = vpack.c.bf16 %v1401_v57, %v1401_v57 }
 0x13c   : > { %v4687_v31 = vpack.c.bf16 %v4639_v17, %v4639_v17  ;;  %v1450_v26 = vpack.c.bf16 %v1402_v15, %v1402_v15  ;;  %v1595_v18 = vpack.c.bf16 %v1563_v8, %v1563_v8  ;;  %v1596_v61 = vpack.c.bf16 %v1564_v54, %v1564_v54 }
 0x13d   : > { %v4686_v42 = vpack.c.bf16 %v4638_v38, %v4638_v38  ;;  %v7168_v10 = vrot.slane %v4685_v44, 10  ;;  %v1629_v32 = vunpack.c.l.bf16 %v1448_v62  ;;  %v1630_v35 = vunpack.c.l.bf16 %v1449_v63  ;;  %v2322_v38 = vld [vmem:[#allocation2 + $0x1a0] sm:$0x3] }
 0x13e   : > { %v4793_v14 = vrot.slane %v4687_v31, 6  ;;  %v1631_v59 = vunpack.c.l.bf16 %v1450_v26  ;;  %v1675_v23 = vunpack.c.l.bf16 %v1595_v18  ;;  %v1676_v48 = vunpack.c.l.bf16 %v1596_v61  ;;  %v1936_v39 = vld [vmem:[#allocation2 + $0x8c] sm:$0x3] }
 0x13f   : > { %v4790_v41 = vrot.slane %v4686_v42, 6  ;;  %v1983_v29 = vunpack.c.l.bf16 %v1934_v7  ;;  %v1984_v21 = vunpack.c.l.bf16 %v1935_v20  ;;  %v1985_v16 = vunpack.c.l.bf16 %v1936_v39  ;;  %v7724_v20 = vld [vmem:[#allocation2 + $0x1a0] sm:$0xff]  }
 0x140   : > { %v1742_v50 = vrot.slane %v1675_v23, 4  ;;  %v1743_v60 = vrot.slane %v1676_v48, 4  ;;  %v2369_v33 = vunpack.c.l.bf16 %v2320_v27  ;;  %v2370_v9 = vunpack.c.l.bf16 %v2321_v49 }
 0x141   : > { %v4791_v45 = vsel %vm8788_vm7, %v7168_v10, %v4790_v41  ;;  %v4792_v28 = vrot.slane %v4790_v41, 4  ;;  %v2032_v34 = vmul.f32 %v8590_v51, %v1983_v29  ;;  %v2033_v1 = vmul.f32 %v8590_v51, %v1984_v21  ;;  %v2948_v29 = vld [vmem:[#allocation2 + $0x1a4] sm:$0xc] }
 0x142   : > { %v4927_v19 = vunpack.c.l.bf16 %v4791_v45  ;;  %v1744_v12 = vsel %vm1735_vm4, %v1742_v50, %v1743_v60  ;;  %v1838_v52 = vadd.f32 %v1742_v50, %v1629_v32  ;;  %v1840_v58 = vadd.f32 %v1743_v60, %v1631_v59  ;;  %v2949_v45 = vld [vmem:[#allocation2 + $0x1a8] sm:$0xf] }
 0x143   : > { %v4794_v24 = vsel %vm8788_vm7, %v4792_v28, %v4793_v14  ;;  %v1839_v13 = vadd.f32 %v1744_v12, %v1630_v35  ;;  %v2034_v47 = vmul.f32 %v8590_v51, %v1985_v16  ;;  %v2080_v57 = vpack.c.bf16 %v2032_v34, %v2032_v34  ;;  %v2950_v28 = vld [vmem:[#allocation2 + $0x1ac] sm:$0x3]  ;;  %v3336_v12 = vld [vmem:[#allocation2 + $0x2bc] sm:$0xf] }
 0x144   : > { %v4928_v17 = vunpack.c.l.bf16 %v4794_v24  ;;  %v4960_v15 = vadd.f32 %v8759_v37, %v4927_v19  ;;  %v1886_v8 = vpack.c.bf16 %v1838_v52, %v1838_v52  ;;  %v1888_v54 = vpack.c.bf16 %v1840_v58, %v1840_v58  ;;  %v3335_v19 = vld [vmem:[#allocation2 + $0x2b8] sm:$0xc] }
 0x145   : > { %v1887_v44 = vpack.c.bf16 %v1839_v13, %v1839_v13  ;;  %v2081_v62 = vpack.c.bf16 %v2033_v1, %v2033_v1  ;;  %v2082_v63 = vpack.c.bf16 %v2034_v47, %v2034_v47  ;;  %v2176_v31 = vunpack.c.l.bf16 %v2080_v57  ;;  %v3337_v47 = vld [vmem:[#allocation2 + $0x2c0] sm:$0x3] }
 0x146   : > { %v4961_v26 = vadd.f32 %v8759_v37, %v4928_v17  ;;  %v4992_v18 = vmax.f32 %v4960_v15, 0.0  ;;  %v2128_v61 = vunpack.c.l.bf16 %v1886_v8  ;;  %v2130_v7 = vunpack.c.l.bf16 %v1888_v54 }
 0x147   : > { %v2129_v42 = vunpack.c.l.bf16 %v1887_v44  ;;  %v2177_v10 = vunpack.c.l.bf16 %v2081_v62  ;;  %v2178_v32 = vunpack.c.l.bf16 %v2082_v63  ;;  %v2371_v35 = vunpack.c.l.bf16 %v2322_v38 }
 0x148   : > { %v4993_v27 = vmax.f32 %v4961_v26, 0.0  ;;  %v8876_v49 = vadd.f32 %v2176_v31, %v2128_v61  ;;  %v2418_v14 = vmul.f32 %v8554_v4, %v2369_v33  ;;  %v2419_v59 = vmul.f32 %v8554_v4, %v2370_v9 }
 0x149   : > { %v8880_v23 = vadd.f32 %v2177_v10, %v2129_v42  ;;  %v8882_v48 = vadd.f32 %v2178_v32, %v2130_v7  ;;  %v2420_v39 = vmul.f32 %v8554_v4, %v2371_v35  ;;  %v7460_v41 = vunpack.c.l.bf16 %v7724_v20 }
 0x14a   : > { %v5023_v21 = vpack.c.bf16 %v4993_v27, %v4992_v18  ;;  %v2272_v16 = vpack.c.bf16 %v8876_v49, %v8876_v49  ;;  %v2466_v50 = vpack.c.bf16 %v2418_v14, %v2418_v14  ;;  %v2467_v60 = vpack.c.bf16 %v2419_v59, %v2419_v59  ;;  %v7740_v14 = vld [vmem:[#allocation2 + $0x2c0] sm:$0xff]  }
 0x14b   : > { %v2273_v33 = vpack.c.bf16 %v8880_v23, %v8880_v23  ;;  %v2274_v9 = vpack.c.bf16 %v8882_v48, %v8882_v48  ;;  %v2468_v34 = vpack.c.bf16 %v2420_v39, %v2420_v39  ;;  %v7461_v1 = vunpack.c.h.bf16 %v7724_v20 }
 0x14c   : > { %7188 = vmatmul.msk.bf16.gmra.mxu2 %vm915_vm3, %v5023_v21  ;;  %v2578_v52 = vmul.f32 %v7460_v41, %v8579_v30  ;;  %v2644_v58 = vunpack.c.l.bf16 %v2466_v50  ;;  %v2645_v24 = vunpack.c.l.bf16 %v2467_v60  ;;  %v2997_v13 = vunpack.c.l.bf16 %v2948_v29 }
 0x14d   : > { %v2579_v57 = vmul.f32 %v7461_v1, %v8579_v30  ;;  %v2646_v17 = vunpack.c.l.bf16 %v2468_v34  ;;  %v2998_v15 = vunpack.c.l.bf16 %v2949_v45  ;;  %v2999_v8 = vunpack.c.l.bf16 %v2950_v28 }
 0x14e   : > { %v2610_v54 = vpack.c.bf16 %v2578_v52, %v2578_v52  ;;  %v3046_v38 = vmul.f32 %v8614_v25, %v2997_v13  ;;  %v3384_v44 = vunpack.c.l.bf16 %v3335_v19  ;;  %v3385_v62 = vunpack.c.l.bf16 %v3336_v12  ;;  %v3963_v12 = vld [vmem:[#allocation2 + $0x2c4] sm:$0xc]  ;;  %v3964_v52 = vld [vmem:[#allocation2 + $0x2c8] sm:$0xf]  ;;  %v3965_v13 = vld [vmem:[#allocation2 + $0x2cc] sm:$0x3] }
 0x14f   : > { %v2611_v63 = vpack.c.bf16 %v2579_v57, %v2579_v57  ;;  %v3047_v31 = vmul.f32 %v8614_v25, %v2998_v15  ;;  %v3048_v26 = vmul.f32 %v8614_v25, %v2999_v8  ;;  %v3386_v18 = vunpack.c.l.bf16 %v3337_v47 }
 0x150   : > { %v2690_v61 = vunpack.c.l.bf16 %v2610_v54  ;;  %v3094_v7 = vpack.c.bf16 %v3046_v38, %v3046_v38  ;;  %v3433_v20 = vmul.f32 %v8628_v43, %v3384_v44  ;;  %v3434_v42 = vmul.f32 %v8628_v43, %v3385_v62 }
 0x151   : > { %v2691_v10 = vunpack.c.l.bf16 %v2611_v63  ;;  %v3095_v32 = vpack.c.bf16 %v3047_v31, %v3047_v31  ;;  %v3096_v35 = vpack.c.bf16 %v3048_v26, %v3048_v26  ;;  %v3435_v27 = vmul.f32 %v8628_v43, %v3386_v18 }
 0x152   : > { %v2756_v59 = vrot.slane %v2690_v61, 4  ;;  %v3190_v39 = vunpack.c.l.bf16 %v3094_v7  ;;  %v3481_v41 = vpack.c.bf16 %v3433_v20, %v3433_v20  ;;  %v3482_v29 = vpack.c.bf16 %v3434_v42, %v3434_v42 }
 0x153   : > { %v2757_v21 = vrot.slane %v2691_v10, 4  ;;  %v3191_v50 = vunpack.c.l.bf16 %v3095_v32  ;;  %v3192_v60 = vunpack.c.l.bf16 %v3096_v35  ;;  %v3483_v45 = vpack.c.bf16 %v3435_v27, %v3435_v27 }
 0x154   : > { %v2852_v28 = vadd.f32 %v2756_v59, %v2644_v58  ;;  %v7524_v34 = vunpack.c.l.bf16 %v7740_v14  ;;  %v7525_v1 = vunpack.c.h.bf16 %v7740_v14  ;;  %v3659_v19 = vunpack.c.l.bf16 %v3481_v41 }
 0x155   : > { %v2758_v47 = vsel %vm1735_vm4, %v2756_v59, %v2757_v21  ;;  %v2854_v57 = vadd.f32 %v2757_v21, %v2646_v17  ;;  %v3660_v15 = vunpack.c.l.bf16 %v3482_v29  ;;  %v3661_v8 = vunpack.c.l.bf16 %v3483_v45 }
 0x156   : > { %v2853_v54 = vadd.f32 %v2758_v47, %v2645_v24  ;;  %v2900_v38 = vpack.c.bf16 %v2852_v28, %v2852_v28  ;;  %v3593_v44 = vmul.f32 %v7524_v34, %v8622_v40  ;;  %v3594_v62 = vmul.f32 %v7525_v1, %v8622_v40 }
 0x157   : > { %v2902_v63 = vpack.c.bf16 %v2854_v57, %v2854_v57  ;;  %v4015_v31 = vunpack.c.l.bf16 %v3963_v12  ;;  %v4016_v58 = vunpack.c.l.bf16 %v3964_v52  ;;  %v4017_v26 = vunpack.c.l.bf16 %v3965_v13 }
 0x158   : > { %v2901_v18 = vpack.c.bf16 %v2853_v54, %v2853_v54  ;;  %v3142_v61 = vunpack.c.l.bf16 %v2900_v38  ;;  %v3625_v7 = vpack.c.bf16 %v3593_v44, %v3593_v44  ;;  %v3626_v20 = vpack.c.bf16 %v3594_v62, %v3594_v62  ;;  %v397_v44 = vld [vmem:[%s8149_s18 + $0x60] sm:$0xff] }
 0x159   : > { %v3144_v42 = vunpack.c.l.bf16 %v2902_v63  ;;  %v4064_v10 = vmul.f32 %v8659_v11, %v4015_v31  ;;  %v4065_v17 = vmul.f32 %v8659_v11, %v4016_v58  ;;  %v4066_v24 = vmul.f32 %v8659_v11, %v4017_v26 }
 0x15a   : > { %v3143_v32 = vunpack.c.l.bf16 %v2901_v18  ;;  %v3238_v35 = vadd.f32 %v3190_v39, %v3142_v61  ;;  %v3705_v27 = vunpack.c.l.bf16 %v3625_v7  ;;  %v3706_v14 = vunpack.c.l.bf16 %v3626_v20 }
 0x15b   : > { %v3240_v59 = vadd.f32 %v3192_v60, %v3144_v42  ;;  %v4112_v41 = vpack.c.bf16 %v4064_v10, %v4064_v10  ;;  %v4113_v29 = vpack.c.bf16 %v4065_v17, %v4065_v17  ;;  %v4114_v21 = vpack.c.bf16 %v4066_v24, %v4066_v24  ;;  %v398_v60 = vld [vmem:[%s8149_s18 + $0x68] sm:$0xff]  ;;  %v415_v10 = vld [vmem:[%s8149_s18 + $0xf0] sm:$0xff] }
 0x15c   : > { %v3239_v45 = vadd.f32 %v3191_v50, %v3143_v32  ;;  %v3286_v28 = vpack.c.bf16 %v3238_v35, %v3238_v35  ;;  %v3771_v34 = vrot.slane %v3705_v27, 4  ;;  %v3772_v1 = vrot.slane %v3706_v14, 4  ;;  %v416_v27 = vld [vmem:[%s8149_s18 + $0xf8] sm:$0xff]  ;;  %v506_v14 = vld [vmem:[#allocation2 + $0xa4] sm:$0xf] }
 0x15d   : > { %v3288_v12 = vpack.c.bf16 %v3240_v59, %v3240_v59  ;;  %v4208_v52 = vunpack.c.l.bf16 %v4112_v41  ;;  %v4209_v13 = vunpack.c.l.bf16 %v4113_v29  ;;  %v4210_v47 = vunpack.c.l.bf16 %v4114_v21 }
 0x15e   : > { %v3287_v57 = vpack.c.bf16 %v3239_v45, %v3239_v45  ;;  %v3773_v54 = vsel %vm1735_vm4, %v3771_v34, %v3772_v1  ;;  %v3867_v39 = vadd.f32 %v3771_v34, %v3659_v19  ;;  %v3869_v38 = vadd.f32 %v3772_v1, %v3661_v8  ;;  %v740_v45 = vld [vmem:[#allocation2 + $0x1c4] sm:$0xf] }
 0x15f   : > { %v3868_v62 = vadd.f32 %v3773_v54, %v3660_v15  ;;  %v4352_v50 = vunpack.c.l.bf16 %v2272_v16  ;;  %v4353_v63 = vunpack.c.l.bf16 %v2273_v33  ;;  %v4354_v31 = vunpack.c.l.bf16 %v2274_v9  ;;  %v1302_v54 = vld [vmem:[#allocation2 + $0x90] sm:$0xc] }
 0x160   : > { %v3915_v58 = vpack.c.bf16 %v3867_v39, %v3867_v39  ;;  %v3917_v26 = vpack.c.bf16 %v3869_v38, %v3869_v38  ;;  %v4400_v19 = vunpack.c.l.bf16 %v3286_v28  ;;  %v4401_v8 = vunpack.c.l.bf16 %v3287_v57  ;;  %v788_v28 = vld [vmem:[#allocation2 + $0x2e4] sm:$0xf] }
 0x161   : > { %v3916_v18 = vpack.c.bf16 %v3868_v62, %v3868_v62  ;;  %v4402_v61 = vunpack.c.l.bf16 %v3288_v12  ;;  %v429_v15 = vpack.c.bf16 %v397_v44, %v397_v44  ;;  %v430_v7 = vpack.c.bf16 %v398_v60, %v398_v60  ;;  %v7709_v60 = vld [vmem:[#allocation2 + $0x98] sm:$0xff]  }
 0x162   : > { %v4160_v49 = vunpack.c.l.bf16 %v3915_v58  ;;  %v4162_v20 = vunpack.c.l.bf16 %v3917_v26  ;;  %v4448_v16 = vadd.f32 %v4400_v19, %v4352_v50  ;;  %v4449_v42 = vadd.f32 %v4401_v8, %v4353_v63 }
 0x163   : > { %v4161_v23 = vunpack.c.l.bf16 %v3916_v18  ;;  %v4450_v33 = vadd.f32 %v4402_v61, %v4354_v31  ;;  %803 = vst.msk [vmem:[#allocation2 + $0x200] sm:$0xf] %vm449_vm0, %v429_v15  ;;  %v873_v48 = vunpack.c.l.b16 %v429_v15  ;;  %v874_v9 = vunpack.c.l.b16 %v430_v7 }
 0x164   : > { %v4256_v17 = vadd.f32 %v4208_v52, %v4160_v49  ;;  %v4258_v24 = vadd.f32 %v4210_v47, %v4162_v20  ;;  %v4496_v32 = vpack.c.bf16 %v4448_v16, %v4448_v16  ;;  %v4497_v35 = vpack.c.bf16 %v4449_v42, %v4449_v42  ;;  %804 = vst.msk [vmem:[#allocation2 + $0x204] sm:$0xf] %vm449_vm0, %v430_v7  ;;  %v1303_v52 = vld [vmem:[#allocation2 + $0x94] sm:$0xf]  ;;  %v1304_v47 = vld [vmem:[#allocation2 + $0x98] sm:$0x3] }
 0x165   : > { %v4257_v59 = vadd.f32 %v4209_v13, %v4161_v23  ;;  %v4498_v41 = vpack.c.bf16 %v4450_v33, %v4450_v33  ;;  %v899_v29 = vpack.c.b16 %v874_v9, %v873_v48  ;;  %v8922_v21 = vpack.c.bf16 %v415_v10, %v415_v10 }
 0x166   : > { %v4304_v34 = vpack.c.bf16 %v4256_v17, %v4256_v17  ;;  %v4306_v1 = vpack.c.bf16 %v4258_v24, %v4258_v24  ;;  %v4544_v12 = vunpack.c.l.bf16 %v4496_v32  ;;  %v4545_v57 = vunpack.c.l.bf16 %v4497_v35  ;;  %v1937_v35 = vld [vmem:[#allocation2 + $0x9c] sm:$0xc] }
 0x167   : > { %v4305_v39 = vpack.c.bf16 %v4257_v59, %v4257_v59  ;;  %v4546_v38 = vunpack.c.l.bf16 %v4498_v41  ;;  %7125 = vmatmul.msk.bf16.gmra.mxu0 %vm915_vm3, %v899_v29  ;;  %v8925_v44 = vpack.c.bf16 %v416_v27, %v416_v27  ;;  %v507_v13 = vsel %vm8160_vm2, 0, %v506_v14  ;;  %821 = vst.msk [vmem:[#allocation2 + $0x2d8] sm:$0xf] %vm449_vm0, %v8922_v21  ;;  %v1938_v27 = vld [vmem:[#allocation2 + $0xa0] sm:$0xf] }
 0x168   : > { %v4592_v62 = vunpack.c.l.bf16 %v4304_v34  ;;  %v4594_v50 = vunpack.c.l.bf16 %v4306_v1  ;;  %508 = vst [vmem:[#allocation2 + $0xa4] sm:$0xf] %v507_v13  ;;  %v741_v63 = vsel %vm8160_vm2, 0, %v740_v45  ;;  %v789_v31 = vsel %vm8160_vm2, 0, %v788_v28  ;;  %v2323_v45 = vld [vmem:[#allocation2 + $0x1b0] sm:$0xc] }
 0x169   : > { %v4593_v58 = vunpack.c.l.bf16 %v4305_v39  ;;  %742 = vst [vmem:[#allocation2 + $0x1c4] sm:$0xf] %v741_v63  ;;  %v1354_v26 = vunpack.c.l.bf16 %v1302_v54  ;;  %v1355_v19 = vunpack.c.l.bf16 %v1303_v52  ;;  %v1356_v8 = vunpack.c.l.bf16 %v1304_v47 }
 0x16a   : > { %v4640_v18 = vadd.f32 %v4592_v62, %v4544_v12  ;;  %v4642_v61 = vadd.f32 %v4594_v50, %v4546_v38  ;;  %790 = vst [vmem:[#allocation2 + $0x2e4] sm:$0xf] %v789_v31  ;;  %v7400_v15 = vunpack.c.l.bf16 %v7709_v60  ;;  %v7401_v7 = vunpack.c.h.bf16 %v7709_v60  ;;  %v2324_v38 = vld [vmem:[#allocation2 + $0x1b4] sm:$0xf] }
 0x16b   : > { %v4641_v49 = vadd.f32 %v4593_v58, %v4545_v57  ;;  %822 = vst.msk [vmem:[#allocation2 + $0x2dc] sm:$0xf] %vm449_vm0, %v8925_v44  ;;  %v1403_v20 = vmul.f32 %v8552_v2, %v1354_v26  ;;  %v1404_v16 = vmul.f32 %v8552_v2, %v1355_v19  ;;  %v1405_v42 = vmul.f32 %v8552_v2, %v1356_v8 }
 0x16c   : > { %v4688_v10 = vpack.c.bf16 %v4640_v18, %v4640_v18  ;;  %v4690_v23 = vpack.c.bf16 %v4642_v61, %v4642_v61  ;;  %v1565_v33 = vmul.f32 %v7400_v15, %v8531_v53  ;;  %v1566_v48 = vmul.f32 %v7401_v7, %v8531_v53 }
 0x16d   : > { %v4689_v9 = vpack.c.bf16 %v4641_v49, %v4641_v49  ;;  %v1451_v17 = vpack.c.bf16 %v1403_v20, %v1403_v20  ;;  %v1452_v24 = vpack.c.bf16 %v1404_v16, %v1404_v16  ;;  %v1453_v32 = vpack.c.bf16 %v1405_v42, %v1405_v42 }
 0x16e   : > { %v7169_v14 = vrot.slane %v4688_v10, 10  ;;  %v4800_v59 = vrot.slane %v4690_v23, 6  ;;  %v1597_v41 = vpack.c.bf16 %v1565_v33, %v1565_v33  ;;  %v1598_v29 = vpack.c.bf16 %v1566_v48, %v1566_v48  ;;  %v2325_v33 = vld [vmem:[#allocation2 + $0x1b8] sm:$0x3] }
 0x16f   : > { %v4797_v28 = vrot.slane %v4689_v9, 6  ;;  %v1632_v34 = vunpack.c.l.bf16 %v1451_v17  ;;  %v1633_v1 = vunpack.c.l.bf16 %v1452_v24  ;;  %v1634_v12 = vunpack.c.l.bf16 %v1453_v32  ;;  %v1939_v57 = vld [vmem:[#allocation2 + $0xa4] sm:$0x3] }
 0x170   : > { %v1677_v54 = vunpack.c.l.bf16 %v1597_v41  ;;  %v1678_v52 = vunpack.c.l.bf16 %v1598_v29  ;;  %v1986_v47 = vunpack.c.l.bf16 %v1937_v35  ;;  %v1987_v39 = vunpack.c.l.bf16 %v1938_v27 }
 0x171   : > { %v4798_v13 = vsel %vm8788_vm7, %v7169_v14, %v4797_v28  ;;  %v4799_v60 = vrot.slane %v4797_v28, 4  ;;  %v1988_v62 = vunpack.c.l.bf16 %v1939_v57  ;;  %v2372_v50 = vunpack.c.l.bf16 %v2323_v45 }
 0x172   : > { %v4929_v63 = vunpack.c.l.bf16 %v4798_v13  ;;  %v1745_v31 = vrot.slane %v1677_v54, 4  ;;  %v1746_v58 = vrot.slane %v1678_v52, 4  ;;  %v2035_v26 = vmul.f32 %v8590_v51, %v1986_v47 }
 0x173   : > { %v4801_v19 = vsel %vm8788_vm7, %v4799_v60, %v4800_v59  ;;  %v2036_v8 = vmul.f32 %v8590_v51, %v1987_v39  ;;  %v2037_v18 = vmul.f32 %v8590_v51, %v1988_v62  ;;  %v2373_v61 = vunpack.c.l.bf16 %v2324_v38  ;;  %v7725_v59 = vld [vmem:[#allocation2 + $0x1b8] sm:$0xff]  }
 0x174   : > { %v4930_v15 = vunpack.c.l.bf16 %v4801_v19  ;;  %v4962_v7 = vadd.f32 %v8759_v37, %v4929_v63  ;;  %v1747_v49 = vsel %vm1735_vm4, %v1745_v31, %v1746_v58  ;;  %v1841_v20 = vadd.f32 %v1745_v31, %v1632_v34  ;;  %v2951_v63 = vld [vmem:[#allocation2 + $0x1bc] sm:$0xc]  ;;  %v2952_v31 = vld [vmem:[#allocation2 + $0x1c0] sm:$0xf] }
 0x175   : > { %v1842_v16 = vadd.f32 %v1747_v49, %v1633_v1  ;;  %v1843_v42 = vadd.f32 %v1746_v58, %v1634_v12  ;;  %v2083_v10 = vpack.c.bf16 %v2035_v26, %v2035_v26  ;;  %v2084_v23 = vpack.c.bf16 %v2036_v8, %v2036_v8  ;;  %v2953_v8 = vld [vmem:[#allocation2 + $0x1c4] sm:$0x3] }
 0x176   : > { %v4963_v48 = vadd.f32 %v8759_v37, %v4930_v15  ;;  %v4994_v9 = vmax.f32 %v4962_v7, 0.0  ;;  %v1889_v17 = vpack.c.bf16 %v1841_v20, %v1841_v20  ;;  %v2085_v24 = vpack.c.bf16 %v2037_v18, %v2037_v18  ;;  %v3338_v18 = vld [vmem:[#allocation2 + $0x2d0] sm:$0xc] }
 0x177   : > { %v1890_v32 = vpack.c.bf16 %v1842_v16, %v1842_v16  ;;  %v1891_v35 = vpack.c.bf16 %v1843_v42, %v1843_v42  ;;  %v2179_v27 = vunpack.c.l.bf16 %v2083_v10  ;;  %v2180_v14 = vunpack.c.l.bf16 %v2084_v23  ;;  %v3340_v16 = vld [vmem:[#allocation2 + $0x2d8] sm:$0x3] }
 0x178   : > { %v4995_v41 = vmax.f32 %v4963_v48, 0.0  ;;  %v2131_v29 = vunpack.c.l.bf16 %v1889_v17  ;;  %v2181_v45 = vunpack.c.l.bf16 %v2085_v24  ;;  %v2374_v28 = vunpack.c.l.bf16 %v2325_v33 }
 0x179   : > { %v2132_v34 = vunpack.c.l.bf16 %v1890_v32  ;;  %v2133_v1 = vunpack.c.l.bf16 %v1891_v35  ;;  %v2421_v12 = vmul.f32 %v8554_v4, %v2372_v50  ;;  %v2422_v57 = vmul.f32 %v8554_v4, %v2373_v61  ;;  %v3339_v61 = vld [vmem:[#allocation2 + $0x2d4] sm:$0xf] }
 0x17a   : > { %v5024_v54 = vpack.c.bf16 %v4995_v41, %v4994_v9  ;;  %v8954_v52 = vadd.f32 %v2179_v27, %v2131_v29  ;;  %v2423_v47 = vmul.f32 %v8554_v4, %v2374_v28  ;;  %v7464_v39 = vunpack.c.l.bf16 %v7725_v59 }
 0x17b   : > { %v8957_v38 = vadd.f32 %v2180_v14, %v2132_v34  ;;  %v8959_v13 = vadd.f32 %v2181_v45, %v2133_v1  ;;  %v2469_v60 = vpack.c.bf16 %v2421_v12, %v2421_v12  ;;  %v2470_v62 = vpack.c.bf16 %v2422_v57, %v2422_v57  ;;  %v7741_v57 = vld [vmem:[#allocation2 + $0x2d8] sm:$0xff]  }
 0x17c   : > { %7189 = vmatmul.msk.bf16.gmra.mxu2 %vm915_vm3, %v5024_v54  ;;  %v2275_v50 = vpack.c.bf16 %v8954_v52, %v8954_v52  ;;  %v2471_v58 = vpack.c.bf16 %v2423_v47, %v2423_v47  ;;  %v7465_v26 = vunpack.c.h.bf16 %v7725_v59  ;;  %v2580_v19 = vmul.f32 %v7464_v39, %v8579_v30 }
 0x17d   : > { %v2276_v15 = vpack.c.bf16 %v8957_v38, %v8957_v38  ;;  %v2277_v7 = vpack.c.bf16 %v8959_v13, %v8959_v13  ;;  %v2647_v49 = vunpack.c.l.bf16 %v2469_v60  ;;  %v2648_v20 = vunpack.c.l.bf16 %v2470_v62 }
 0x17e   : > { %v2581_v42 = vmul.f32 %v7465_v26, %v8579_v30  ;;  %v2612_v10 = vpack.c.bf16 %v2580_v19, %v2580_v19  ;;  %v2649_v23 = vunpack.c.l.bf16 %v2471_v58  ;;  %v3000_v33 = vunpack.c.l.bf16 %v2951_v63 }
 0x17f   : > { %v3001_v48 = vunpack.c.l.bf16 %v2952_v31  ;;  %v3002_v9 = vunpack.c.l.bf16 %v2953_v8  ;;  %v3387_v17 = vunpack.c.l.bf16 %v3338_v18  ;;  %v3388_v24 = vunpack.c.l.bf16 %v3339_v61  ;;  %v3966_v61 = vld [vmem:[#allocation2 + $0x2dc] sm:$0xc] }
 0x180   : > { %v2613_v32 = vpack.c.bf16 %v2581_v42, %v2581_v42  ;;  %v2692_v35 = vunpack.c.l.bf16 %v2612_v10  ;;  %v3049_v27 = vmul.f32 %v8614_v25, %v3000_v33  ;;  %v3389_v14 = vunpack.c.l.bf16 %v3340_v16 }
 0x181   : > { %v3050_v59 = vmul.f32 %v8614_v25, %v3001_v48  ;;  %v3051_v41 = vmul.f32 %v8614_v25, %v3002_v9  ;;  %v3436_v29 = vmul.f32 %v8628_v43, %v3387_v17  ;;  %v3437_v45 = vmul.f32 %v8628_v43, %v3388_v24  ;;  %v3967_v48 = vld [vmem:[#allocation2 + $0x2e0] sm:$0xf] }
 0x182   : > { %v2693_v28 = vunpack.c.l.bf16 %v2613_v32  ;;  %v2759_v34 = vrot.slane %v2692_v35, 4  ;;  %v3097_v1 = vpack.c.bf16 %v3049_v27, %v3049_v27  ;;  %v3438_v12 = vmul.f32 %v8628_v43, %v3389_v14 }
 0x183   : > { %v3098_v54 = vpack.c.bf16 %v3050_v59, %v3050_v59  ;;  %v3099_v47 = vpack.c.bf16 %v3051_v41, %v3051_v41  ;;  %v3484_v39 = vpack.c.bf16 %v3436_v29, %v3436_v29  ;;  %v3485_v60 = vpack.c.bf16 %v3437_v45, %v3437_v45 }
 0x184   : > { %v2760_v62 = vrot.slane %v2693_v28, 4  ;;  %v2855_v63 = vadd.f32 %v2759_v34, %v2647_v49  ;;  %v3193_v31 = vunpack.c.l.bf16 %v3097_v1  ;;  %v3486_v58 = vpack.c.bf16 %v3438_v12, %v3438_v12  ;;  %v3968_v49 = vld [vmem:[#allocation2 + $0x2e4] sm:$0x3] }
 0x185   : > { %v3194_v26 = vunpack.c.l.bf16 %v3098_v54  ;;  %v3195_v19 = vunpack.c.l.bf16 %v3099_v47  ;;  %v7528_v8 = vunpack.c.l.bf16 %v7741_v57  ;;  %v7529_v18 = vunpack.c.h.bf16 %v7741_v57 }
 0x186   : > { %v2761_v16 = vsel %vm1735_vm4, %v2759_v34, %v2760_v62  ;;  %v2857_v42 = vadd.f32 %v2760_v62, %v2649_v23  ;;  %v2903_v10 = vpack.c.bf16 %v2855_v63, %v2855_v63  ;;  %v3662_v33 = vunpack.c.l.bf16 %v3484_v39 }
 0x187   : > { %v2856_v9 = vadd.f32 %v2761_v16, %v2648_v20  ;;  %v3595_v17 = vmul.f32 %v7528_v8, %v8622_v40  ;;  %v3596_v24 = vmul.f32 %v7529_v18, %v8622_v40  ;;  %v3663_v32 = vunpack.c.l.bf16 %v3485_v60  ;;  %v7357_v16 = vld [vmem:[#allocation7 + $0x38] sm:$0xff] }
 0x188   : > { %v2905_v35 = vpack.c.bf16 %v2857_v42, %v2857_v42  ;;  %v3145_v27 = vunpack.c.l.bf16 %v2903_v10  ;;  %v3664_v14 = vunpack.c.l.bf16 %v3486_v58  ;;  %v4018_v59 = vunpack.c.l.bf16 %v3966_v61  ;;  %1165 = vmatpush.bf16.msra.mxu1 %v7357_v16  ;;  %v1305_v16 = vld [vmem:[#allocation2 + $0xa8] sm:$0xc] }
 0x189   : > { %v2904_v41 = vpack.c.bf16 %v2856_v9, %v2856_v9  ;;  %v3627_v29 = vpack.c.bf16 %v3595_v17, %v3595_v17  ;;  %v3628_v45 = vpack.c.bf16 %v3596_v24, %v3596_v24  ;;  %v4019_v28 = vunpack.c.l.bf16 %v3967_v48 }
 0x18a   : > { %v3147_v34 = vunpack.c.l.bf16 %v2905_v35  ;;  %v3241_v23 = vadd.f32 %v3193_v31, %v3145_v27  ;;  %v4020_v1 = vunpack.c.l.bf16 %v3968_v49  ;;  %v4067_v12 = vmul.f32 %v8659_v11, %v4018_v59  ;;  %v399_v49 = vld [vmem:[%s8149_s18 + $0x70] sm:$0xff] }
 0x18b   : > { %v3146_v20 = vunpack.c.l.bf16 %v2904_v41  ;;  %v3707_v57 = vunpack.c.l.bf16 %v3627_v29  ;;  %v3708_v54 = vunpack.c.l.bf16 %v3628_v45  ;;  %v4068_v47 = vmul.f32 %v8659_v11, %v4019_v28  ;;  %v400_v29 = vld [vmem:[%s8149_s18 + $0x78] sm:$0xff] }
 0x18c   : > { %v3243_v39 = vadd.f32 %v3195_v19, %v3147_v34  ;;  %v3289_v60 = vpack.c.bf16 %v3241_v23, %v3241_v23  ;;  %v4069_v62 = vmul.f32 %v8659_v11, %v4020_v1  ;;  %v4115_v63 = vpack.c.bf16 %v4067_v12, %v4067_v12 }
 0x18d   : > { %v3242_v58 = vadd.f32 %v3194_v26, %v3146_v20  ;;  %v3774_v8 = vrot.slane %v3707_v57, 4  ;;  %v3775_v18 = vrot.slane %v3708_v54, 4  ;;  %v4116_v61 = vpack.c.bf16 %v4068_v47, %v4068_v47  ;;  %v7356_v26 = vld [vmem:[#allocation7 + $0x30] sm:$0xff]  ;;  %v514_v57 = vld [vmem:[#allocation2 + $0xbc] sm:$0xf] }
 0x18e   : > { %v3291_v31 = vpack.c.bf16 %v3243_v39, %v3243_v39  ;;  %v4117_v42 = vpack.c.bf16 %v4069_v62, %v4069_v62  ;;  %v4211_v10 = vunpack.c.l.bf16 %v4115_v63  ;;  %v4355_v48 = vunpack.c.l.bf16 %v2275_v50  ;;  %1166 = vmatpush.bf16.msra.mxu1 %v7356_v26  ;;  %v579_v62 = vld [vmem:[#allocation2 + $0x2fc] sm:$0xf] }
 0x18f   : > { %v3290_v9 = vpack.c.bf16 %v3242_v58, %v3242_v58  ;;  %v3776_v19 = vsel %vm1735_vm4, %v3774_v8, %v3775_v18  ;;  %v3870_v17 = vadd.f32 %v3774_v8, %v3662_v33  ;;  %v3872_v24 = vadd.f32 %v3775_v18, %v3664_v14 }
 0x190   : > { %v3871_v35 = vadd.f32 %v3776_v19, %v3663_v32  ;;  %v4212_v27 = vunpack.c.l.bf16 %v4116_v61  ;;  %v4213_v59 = vunpack.c.l.bf16 %v4117_v42  ;;  %v4356_v41 = vunpack.c.l.bf16 %v2276_v15  ;;  %v744_v61 = vld [vmem:[#allocation2 + $0x1dc] sm:$0xf] }
 0x191   : > { %v3918_v45 = vpack.c.bf16 %v3870_v17, %v3870_v17  ;;  %v3920_v28 = vpack.c.bf16 %v3872_v24, %v3872_v24  ;;  %v4357_v52 = vunpack.c.l.bf16 %v2277_v7  ;;  %v4403_v50 = vunpack.c.l.bf16 %v3289_v60  ;;  %v1307_v17 = vld [vmem:[#allocation2 + $0xb0] sm:$0x3] }
 0x192   : > { %v3919_v33 = vpack.c.bf16 %v3871_v35, %v3871_v35  ;;  %v4404_v14 = vunpack.c.l.bf16 %v3290_v9  ;;  %v4405_v34 = vunpack.c.l.bf16 %v3291_v31  ;;  %v431_v23 = vpack.c.bf16 %v399_v49, %v399_v49  ;;  %v7710_v31 = vld [vmem:[#allocation2 + $0xb0] sm:$0xff]  }
 0x193   : > { %v4163_v1 = vunpack.c.l.bf16 %v3918_v45  ;;  %v4165_v32 = vunpack.c.l.bf16 %v3920_v28  ;;  %v4451_v12 = vadd.f32 %v4403_v50, %v4355_v48  ;;  %v432_v20 = vpack.c.bf16 %v400_v29, %v400_v29 }
 0x194   : > { %v4164_v38 = vunpack.c.l.bf16 %v3919_v33  ;;  %v4452_v15 = vadd.f32 %v4404_v14, %v4356_v41  ;;  %v4453_v54 = vadd.f32 %v4405_v34, %v4357_v52  ;;  %805 = vst.msk [vmem:[#allocation2 + $0x218] sm:$0xf] %vm449_vm0, %v431_v23  ;;  %v875_v47 = vunpack.c.l.b16 %v431_v23 }
 0x195   : > { %v4259_v39 = vadd.f32 %v4211_v10, %v4163_v1  ;;  %v4261_v13 = vadd.f32 %v4213_v59, %v4165_v32  ;;  %v4499_v7 = vpack.c.bf16 %v4451_v12, %v4451_v12  ;;  %806 = vst.msk [vmem:[#allocation2 + $0x21c] sm:$0xf] %vm449_vm0, %v432_v20  ;;  %v876_v60 = vunpack.c.l.b16 %v432_v20  ;;  %v1306_v10 = vld [vmem:[#allocation2 + $0xac] sm:$0xf] }
 0x196   : > { %v4260_v63 = vadd.f32 %v4212_v27, %v4164_v38  ;;  %v4500_v58 = vpack.c.bf16 %v4452_v15, %v4452_v15  ;;  %v4501_v8 = vpack.c.bf16 %v4453_v54, %v4453_v54  ;;  %v515_v18 = vsel %vm8160_vm2, 0, %v514_v57 }
 0x197   : > { %v4307_v42 = vpack.c.bf16 %v4259_v39, %v4259_v39  ;;  %v4309_v48 = vpack.c.bf16 %v4261_v13, %v4261_v13  ;;  %v4547_v9 = vunpack.c.l.bf16 %v4499_v7  ;;  %v900_v19 = vpack.c.b16 %v876_v60, %v875_v47  ;;  %516 = vst [vmem:[#allocation2 + $0xbc] sm:$0xf] %v515_v18  ;;  %v1940_v60 = vld [vmem:[#allocation2 + $0xb4] sm:$0xc] }
 0x198   : > { %v4308_v24 = vpack.c.bf16 %v4260_v63, %v4260_v63  ;;  %v4548_v49 = vunpack.c.l.bf16 %v4500_v58  ;;  %v4549_v26 = vunpack.c.l.bf16 %v4501_v8  ;;  %v580_v35 = vsel %vm8160_vm2, 0, %v579_v62  ;;  %v1941_v62 = vld [vmem:[#allocation2 + $0xb8] sm:$0xf] }
 0x199   : > { %v4595_v27 = vunpack.c.l.bf16 %v4307_v42  ;;  %v4597_v59 = vunpack.c.l.bf16 %v4309_v48  ;;  %7126 = vmatmul.msk.bf16.gmra.mxu0 %vm915_vm3, %v900_v19  ;;  %581 = vst [vmem:[#allocation2 + $0x2fc] sm:$0xf] %v580_v35  ;;  %v745_v41 = vsel %vm8160_vm2, 0, %v744_v61  ;;  %v1357_v29 = vunpack.c.l.bf16 %v1305_v16  ;;  %v2326_v16 = vld [vmem:[#allocation2 + $0x1c8] sm:$0xc] }
 0x19a   : > { %v4596_v45 = vunpack.c.l.bf16 %v4308_v24  ;;  %746 = vst [vmem:[#allocation2 + $0x1dc] sm:$0xf] %v745_v41  ;;  %v1358_v28 = vunpack.c.l.bf16 %v1306_v10  ;;  %v1359_v52 = vunpack.c.l.bf16 %v1307_v17  ;;  %v7404_v50 = vunpack.c.l.bf16 %v7710_v31 }
 0x19b   : > { %v4643_v33 = vadd.f32 %v4595_v27, %v4547_v9  ;;  %v4645_v14 = vadd.f32 %v4597_v59, %v4549_v26  ;;  %v1406_v34 = vmul.f32 %v8552_v2, %v1357_v29  ;;  %v7405_v23 = vunpack.c.h.bf16 %v7710_v31 }
 0x19c   : > { %v4644_v1 = vadd.f32 %v4596_v45, %v4548_v49  ;;  %v1407_v32 = vmul.f32 %v8552_v2, %v1358_v28  ;;  %v1408_v12 = vmul.f32 %v8552_v2, %v1359_v52  ;;  %v1567_v20 = vmul.f32 %v7404_v50, %v8531_v53  ;;  %v2327_v49 = vld [vmem:[#allocation2 + $0x1cc] sm:$0xf] }
 0x19d   : > { %v4691_v57 = vpack.c.bf16 %v4643_v33, %v4643_v33  ;;  %v4693_v38 = vpack.c.bf16 %v4645_v14, %v4645_v14  ;;  %v1454_v15 = vpack.c.bf16 %v1406_v34, %v1406_v34  ;;  %v1568_v54 = vmul.f32 %v7405_v23, %v8531_v53 }
 0x19e   : > { %v4692_v47 = vpack.c.bf16 %v4644_v1, %v4644_v1  ;;  %v1455_v39 = vpack.c.bf16 %v1407_v32, %v1407_v32  ;;  %v1456_v13 = vpack.c.bf16 %v1408_v12, %v1408_v12  ;;  %v1599_v7 = vpack.c.bf16 %v1567_v20, %v1567_v20  ;;  %v1942_v63 = vld [vmem:[#allocation2 + $0xbc] sm:$0x3] }
 0x19f   : > { %v7170_v58 = vrot.slane %v4691_v57, 10  ;;  %v4807_v8 = vrot.slane %v4693_v38, 6  ;;  %v1600_v18 = vpack.c.bf16 %v1568_v54, %v1568_v54  ;;  %v1635_v61 = vunpack.c.l.bf16 %v1454_v15  ;;  %v2328_v15 = vld [vmem:[#allocation2 + $0x1d0] sm:$0x3] }
 0x1a0   : > { %v4804_v31 = vrot.slane %v4692_v47, 6  ;;  %v1636_v42 = vunpack.c.l.bf16 %v1455_v39  ;;  %v1637_v48 = vunpack.c.l.bf16 %v1456_v13  ;;  %v1679_v9 = vunpack.c.l.bf16 %v1599_v7 }
 0x1a1   : > { %v1680_v19 = vunpack.c.l.bf16 %v1600_v18  ;;  %v1989_v10 = vunpack.c.l.bf16 %v1940_v60  ;;  %v1990_v17 = vunpack.c.l.bf16 %v1941_v62  ;;  %v1991_v24 = vunpack.c.l.bf16 %v1942_v63 }
 0x1a2   : > { %v4805_v26 = vsel %vm8788_vm7, %v7170_v58, %v4804_v31  ;;  %v4806_v35 = vrot.slane %v4804_v31, 4  ;;  %v1748_v27 = vrot.slane %v1679_v9, 4  ;;  %v2375_v59 = vunpack.c.l.bf16 %v2326_v16  ;;  %v7726_v58 = vld [vmem:[#allocation2 + $0x1d0] sm:$0xff]  }
 0x1a3   : > { %v4931_v41 = vunpack.c.l.bf16 %v4805_v26  ;;  %v1749_v29 = vrot.slane %v1680_v19, 4  ;;  %v2038_v45 = vmul.f32 %v8590_v51, %v1989_v10  ;;  %v2039_v28 = vmul.f32 %v8590_v51, %v1990_v17 }
 0x1a4   : > { %v4808_v52 = vsel %vm8788_vm7, %v4806_v35, %v4807_v8  ;;  %v1844_v50 = vadd.f32 %v1748_v27, %v1635_v61  ;;  %v2040_v33 = vmul.f32 %v8590_v51, %v1991_v24  ;;  %v2376_v14 = vunpack.c.l.bf16 %v2327_v49  ;;  %v2954_v49 = vld [vmem:[#allocation2 + $0x1d4] sm:$0xc] }
 0x1a5   : > { %v4932_v34 = vunpack.c.l.bf16 %v4808_v52  ;;  %v4964_v23 = vadd.f32 %v8759_v37, %v4931_v41  ;;  %v1750_v1 = vsel %vm1735_vm4, %v1748_v27, %v1749_v29  ;;  %v1846_v32 = vadd.f32 %v1749_v29, %v1637_v48  ;;  %v2955_v29 = vld [vmem:[#allocation2 + $0x1d8] sm:$0xf] }
 0x1a6   : > { %v1845_v12 = vadd.f32 %v1750_v1, %v1636_v42  ;;  %v1892_v20 = vpack.c.bf16 %v1844_v50, %v1844_v50  ;;  %v2086_v57 = vpack.c.bf16 %v2038_v45, %v2038_v45  ;;  %v2087_v38 = vpack.c.bf16 %v2039_v28, %v2039_v28  ;;  %v2956_v50 = vld [vmem:[#allocation2 + $0x1dc] sm:$0x3] }
 0x1a7   : > { %v4965_v54 = vadd.f32 %v8759_v37, %v4932_v34  ;;  %v4996_v47 = vmax.f32 %v4964_v23, 0.0  ;;  %v1894_v39 = vpack.c.bf16 %v1846_v32, %v1846_v32  ;;  %v2088_v13 = vpack.c.bf16 %v2040_v33, %v2040_v33  ;;  %v3341_v33 = vld [vmem:[#allocation2 + $0x2e8] sm:$0xc] }
 0x1a8   : > { %v1893_v7 = vpack.c.bf16 %v1845_v12, %v1845_v12  ;;  %v2134_v60 = vunpack.c.l.bf16 %v1892_v20  ;;  %v2182_v62 = vunpack.c.l.bf16 %v2086_v57  ;;  %v2183_v63 = vunpack.c.l.bf16 %v2087_v38  ;;  %v3343_v12 = vld [vmem:[#allocation2 + $0x2f0] sm:$0x3] }
 0x1a9   : > { %v4997_v8 = vmax.f32 %v4965_v54, 0.0  ;;  %v2136_v18 = vunpack.c.l.bf16 %v1894_v39  ;;  %v2184_v61 = vunpack.c.l.bf16 %v2088_v13  ;;  %v2377_v16 = vunpack.c.l.bf16 %v2328_v15 }
 0x1aa   : > { %v2135_v31 = vunpack.c.l.bf16 %v1893_v7  ;;  %v9018_v42 = vadd.f32 %v2182_v62, %v2134_v60  ;;  %v2424_v48 = vmul.f32 %v8554_v4, %v2375_v59  ;;  %v2425_v9 = vmul.f32 %v8554_v4, %v2376_v14  ;;  %v3342_v14 = vld [vmem:[#allocation2 + $0x2ec] sm:$0xf] }
 0x1ab   : > { %v5025_v19 = vpack.c.bf16 %v4997_v8, %v4996_v47  ;;  %v9022_v10 = vadd.f32 %v2184_v61, %v2136_v18  ;;  %v2426_v17 = vmul.f32 %v8554_v4, %v2377_v16  ;;  %v7468_v24 = vunpack.c.l.bf16 %v7726_v58 }
 0x1ac   : > { %v9025_v26 = vadd.f32 %v2183_v63, %v2135_v31  ;;  %v2278_v35 = vpack.c.bf16 %v9018_v42, %v9018_v42  ;;  %v2472_v27 = vpack.c.bf16 %v2424_v48, %v2424_v48  ;;  %v2473_v41 = vpack.c.bf16 %v2425_v9, %v2425_v9 }
 0x1ad   : > { %7190 = vmatmul.msk.bf16.gmra.mxu2 %vm915_vm3, %v5025_v19  ;;  %v2280_v59 = vpack.c.bf16 %v9022_v10, %v9022_v10  ;;  %v2474_v45 = vpack.c.bf16 %v2426_v17, %v2426_v17  ;;  %v7469_v28 = vunpack.c.h.bf16 %v7726_v58  ;;  %v2582_v52 = vmul.f32 %v7468_v24, %v8579_v30  ;;  %v7742_v19 = vld [vmem:[#allocation2 + $0x2f0] sm:$0xff]  }
 0x1ae   : > { %v2279_v34 = vpack.c.bf16 %v9025_v26, %v9025_v26  ;;  %v2650_v23 = vunpack.c.l.bf16 %v2472_v27  ;;  %v2651_v1 = vunpack.c.l.bf16 %v2473_v41  ;;  %v3003_v32 = vunpack.c.l.bf16 %v2954_v49 }
 0x1af   : > { %v2583_v20 = vmul.f32 %v7469_v28, %v8579_v30  ;;  %v2614_v57 = vpack.c.bf16 %v2582_v52, %v2582_v52  ;;  %v2652_v38 = vunpack.c.l.bf16 %v2474_v45  ;;  %v3004_v15 = vunpack.c.l.bf16 %v2955_v29 }
 0x1b0   : > { %v3005_v54 = vunpack.c.l.bf16 %v2956_v50  ;;  %v3052_v47 = vmul.f32 %v8614_v25, %v3003_v32  ;;  %v3390_v39 = vunpack.c.l.bf16 %v3341_v33  ;;  %v3391_v13 = vunpack.c.l.bf16 %v3342_v14  ;;  %v3969_v32 = vld [vmem:[#allocation2 + $0x2f4] sm:$0xc] }
 0x1b1   : > { %v2615_v7 = vpack.c.bf16 %v2583_v20, %v2583_v20  ;;  %v2694_v60 = vunpack.c.l.bf16 %v2614_v57  ;;  %v3053_v62 = vmul.f32 %v8614_v25, %v3004_v15  ;;  %v3392_v63 = vunpack.c.l.bf16 %v3343_v12  ;;  %v3970_v12 = vld [vmem:[#allocation2 + $0x2f8] sm:$0xf] }
 0x1b2   : > { %v3054_v58 = vmul.f32 %v8614_v25, %v3005_v54  ;;  %v3100_v8 = vpack.c.bf16 %v3052_v47, %v3052_v47  ;;  %v3439_v18 = vmul.f32 %v8628_v43, %v3390_v39  ;;  %v3440_v61 = vmul.f32 %v8628_v43, %v3391_v13  ;;  %v3971_v47 = vld [vmem:[#allocation2 + $0x2fc] sm:$0x3] }
 0x1b3   : > { %v2695_v16 = vunpack.c.l.bf16 %v2615_v7  ;;  %v2762_v31 = vrot.slane %v2694_v60, 4  ;;  %v3101_v48 = vpack.c.bf16 %v3053_v62, %v3053_v62  ;;  %v3441_v9 = vmul.f32 %v8628_v43, %v3392_v63 }
 0x1b4   : > { %v3102_v17 = vpack.c.bf16 %v3054_v58, %v3054_v58  ;;  %v3196_v24 = vunpack.c.l.bf16 %v3100_v8  ;;  %v3487_v49 = vpack.c.bf16 %v3439_v18, %v3439_v18  ;;  %v3488_v27 = vpack.c.bf16 %v3440_v61, %v3440_v61 }
 0x1b5   : > { %v2763_v41 = vrot.slane %v2695_v16, 4  ;;  %v2858_v29 = vadd.f32 %v2762_v31, %v2650_v23  ;;  %v3197_v45 = vunpack.c.l.bf16 %v3101_v48  ;;  %v3489_v28 = vpack.c.bf16 %v3441_v9, %v3441_v9 }
 0x1b6   : > { %v3198_v52 = vunpack.c.l.bf16 %v3102_v17  ;;  %v7532_v50 = vunpack.c.l.bf16 %v7742_v19  ;;  %v7533_v33 = vunpack.c.h.bf16 %v7742_v19  ;;  %v3665_v14 = vunpack.c.l.bf16 %v3487_v49 }
 0x1b7   : > { %v2764_v20 = vsel %vm1735_vm4, %v2762_v31, %v2763_v41  ;;  %v2860_v57 = vadd.f32 %v2763_v41, %v2652_v38  ;;  %v2906_v15 = vpack.c.bf16 %v2858_v29, %v2858_v29  ;;  %v3666_v54 = vunpack.c.l.bf16 %v3488_v27 }
 0x1b8   : > { %v2859_v39 = vadd.f32 %v2764_v20, %v2651_v1  ;;  %v3597_v13 = vmul.f32 %v7532_v50, %v8622_v40  ;;  %v3598_v7 = vmul.f32 %v7533_v33, %v8622_v40  ;;  %v3667_v23 = vunpack.c.l.bf16 %v3489_v28  ;;  %v7355_v20 = vld [vmem:[#allocation7 + $0x28] sm:$0xff] }
 0x1b9   : > { %v2908_v60 = vpack.c.bf16 %v2860_v57, %v2860_v57  ;;  %v3148_v62 = vunpack.c.l.bf16 %v2906_v15  ;;  %v4021_v63 = vunpack.c.l.bf16 %v3969_v32  ;;  %v4022_v58 = vunpack.c.l.bf16 %v3970_v12  ;;  %1167 = vmatpush.bf16.msra.mxu1 %v7355_v20 }
 0x1ba   : > { %v2907_v8 = vpack.c.bf16 %v2859_v39, %v2859_v39  ;;  %v3629_v18 = vpack.c.bf16 %v3597_v13, %v3597_v13  ;;  %v3630_v61 = vpack.c.bf16 %v3598_v7, %v3598_v7  ;;  %v4023_v16 = vunpack.c.l.bf16 %v3971_v47 }
 0x1bb   : > { %v3150_v48 = vunpack.c.l.bf16 %v2908_v60  ;;  %v3244_v31 = vadd.f32 %v3196_v24, %v3148_v62  ;;  %v4070_v38 = vmul.f32 %v8659_v11, %v4021_v63  ;;  %v4071_v9 = vmul.f32 %v8659_v11, %v4022_v58  ;;  %v7354_v60 = vld [vmem:[#allocation7 + $0x20] sm:$0xff]  ;;  %v973_v62 = vpop.f32.mrf.mxu0 }
 0x1bc   : > { %v3149_v1 = vunpack.c.l.bf16 %v2907_v8  ;;  %v3709_v19 = vunpack.c.l.bf16 %v3629_v18  ;;  %v3710_v17 = vunpack.c.l.bf16 %v3630_v61  ;;  %v4072_v49 = vmul.f32 %v8659_v11, %v4023_v16  ;;  %v401_v63 = vld [vmem:[%s8149_s18 + $0x80] sm:$0xff] }
 0x1bd   : > { %v3246_v27 = vadd.f32 %v3198_v52, %v3150_v48  ;;  %v3292_v41 = vpack.c.bf16 %v3244_v31, %v3244_v31  ;;  %v4118_v29 = vpack.c.bf16 %v4070_v38, %v4070_v38  ;;  %v4119_v28 = vpack.c.bf16 %v4071_v9, %v4071_v9  ;;  %v9054_v52 = vld [vmem:[%s10747_s3] ss:$0 sm:$0xff]  ;;  %1168 = vmatpush.bf16.msra.mxu1 %v7354_v60 }
 0x1be   : > { %v3245_v50 = vadd.f32 %v3197_v45, %v3149_v1  ;;  %v3777_v33 = vrot.slane %v3709_v19, 4  ;;  %v3778_v32 = vrot.slane %v3710_v17, 4  ;;  %v4120_v12 = vpack.c.bf16 %v4072_v49, %v4072_v49 }
 0x1bf   : > { %v3294_v24 = vpack.c.bf16 %v3246_v27, %v3246_v27  ;;  %v4214_v57 = vunpack.c.l.bf16 %v4118_v29  ;;  %v4215_v15 = vunpack.c.l.bf16 %v4119_v28  ;;  %v4358_v47 = vunpack.c.l.bf16 %v2278_v35 }
 0x1c0   : > { %v3293_v39 = vpack.c.bf16 %v3245_v50, %v3245_v50  ;;  %v3779_v45 = vsel %vm1735_vm4, %v3777_v33, %v3778_v32  ;;  %v3873_v13 = vadd.f32 %v3777_v33, %v3665_v14  ;;  %v3875_v7 = vadd.f32 %v3778_v32, %v3667_v23  ;;  %v402_v14 = vld [vmem:[%s8149_s18 + $0x88] sm:$0xff]  ;;  %v522_v50 = vld [vmem:[#allocation2 + $0xd4] sm:$0xf] }
 0x1c1   : > { %v3874_v58 = vadd.f32 %v3779_v45, %v3666_v54  ;;  %v4216_v8 = vunpack.c.l.bf16 %v4120_v12  ;;  %v4359_v42 = vunpack.c.l.bf16 %v2279_v34  ;;  %v4360_v35 = vunpack.c.l.bf16 %v2280_v59  ;;  %v7353_v34 = vld [vmem:[#allocation7 + $0x18] sm:$0xff]  ;;  %v748_v33 = vld [vmem:[#allocation2 + $0x1f4] sm:$0xf] }
 0x1c2   : > { %v3921_v18 = vpack.c.bf16 %v3873_v13, %v3873_v13  ;;  %v3923_v61 = vpack.c.bf16 %v3875_v7, %v3875_v7  ;;  %v4406_v16 = vunpack.c.l.bf16 %v3292_v41  ;;  %v4407_v48 = vunpack.c.l.bf16 %v3293_v39  ;;  %v1309_v39 = vld [vmem:[#allocation2 + $0xc4] sm:$0xf]  ;;  %1169 = vmatpush.bf16.msra.mxu1 %v7353_v34 }
 0x1c3   : > { %v3922_v23 = vpack.c.bf16 %v3874_v58, %v3874_v58  ;;  %v4408_v31 = vunpack.c.l.bf16 %v3294_v24  ;;  %v9066_v38 = vadd.f32 %v9054_v52, %v973_v62  ;;  %v433_v54 = vpack.c.bf16 %v401_v63, %v401_v63  ;;  %v7352_v62 = vld [vmem:[#allocation7 + $0x10] sm:$0xff]  ;;  %v1310_v63 = vld [vmem:[#allocation2 + $0xc8] sm:$0x3] }
 0x1c4   : > { %v4166_v9 = vunpack.c.l.bf16 %v3921_v18  ;;  %v4168_v1 = vunpack.c.l.bf16 %v3923_v61  ;;  %v4454_v19 = vadd.f32 %v4406_v16, %v4358_v47  ;;  %v4455_v26 = vadd.f32 %v4407_v48, %v4359_v42  ;;  %v587_v47 = vld [vmem:[#allocation2 + $0x314] sm:$0xf] }
 0x1c5   : > { %v4167_v17 = vunpack.c.l.bf16 %v3922_v23  ;;  %v4456_v10 = vadd.f32 %v4408_v31, %v4360_v35  ;;  %v1053_v59 = vmax.f32 %v9066_v38, 0.0  ;;  %v434_v49 = vpack.c.bf16 %v402_v14, %v402_v14  ;;  %807 = vst.msk [vmem:[#allocation2 + $0x230] sm:$0xf] %vm449_vm0, %v433_v54  ;;  %v7711_v35 = vld [vmem:[#allocation2 + $0xc8] sm:$0xff]  }
 0x1c6   : > { %v4262_v27 = vadd.f32 %v4214_v57, %v4166_v9  ;;  %v4264_v41 = vadd.f32 %v4216_v8, %v4168_v1  ;;  %v4502_v29 = vpack.c.bf16 %v4454_v19, %v4454_v19  ;;  %v4503_v28 = vpack.c.bf16 %v4455_v26, %v4455_v26  ;;  %v1308_v57 = vld [vmem:[#allocation2 + $0xc0] sm:$0xc]  ;;  %1170 = vmatpush.bf16.msra.mxu1 %v7352_v62 }
 0x1c7   : > { %v4263_v32 = vadd.f32 %v4215_v15, %v4167_v17  ;;  %v4504_v12 = vpack.c.bf16 %v4456_v10, %v4456_v10  ;;  %808 = vst.msk [vmem:[#allocation2 + $0x234] sm:$0xf] %vm449_vm0, %v434_v49  ;;  %v877_v20 = vunpack.c.l.b16 %v433_v54  ;;  %v878_v24 = vunpack.c.l.b16 %v434_v49 }
 0x1c8   : > { %v4310_v45 = vpack.c.bf16 %v4262_v27, %v4262_v27  ;;  %v4312_v13 = vpack.c.bf16 %v4264_v41, %v4264_v41  ;;  %v4550_v7 = vunpack.c.l.bf16 %v4502_v29  ;;  %v4551_v60 = vunpack.c.l.bf16 %v4503_v28 }
 0x1c9   : > { %v4311_v58 = vpack.c.bf16 %v4263_v32, %v4263_v32  ;;  %v4552_v8 = vunpack.c.l.bf16 %v4504_v12  ;;  %v901_v42 = vpack.c.b16 %v878_v24, %v877_v20  ;;  %v523_v15 = vsel %vm8160_vm2, 0, %v522_v50  ;;  %v1943_v20 = vld [vmem:[#allocation2 + $0xcc] sm:$0xc]  ;;  %v1944_v24 = vld [vmem:[#allocation2 + $0xd0] sm:$0xf] }
 0x1ca   : > { %v4598_v18 = vunpack.c.l.bf16 %v4310_v45  ;;  %v4600_v61 = vunpack.c.l.bf16 %v4312_v13  ;;  %524 = vst [vmem:[#allocation2 + $0xd4] sm:$0xf] %v523_v15  ;;  %v588_v16 = vsel %vm8160_vm2, 0, %v587_v47  ;;  %v749_v48 = vsel %vm8160_vm2, 0, %v748_v33 }
 0x1cb   : > { %v4599_v14 = vunpack.c.l.bf16 %v4311_v58  ;;  %7127 = vmatmul.msk.bf16.gmra.mxu0 %vm915_vm3, %v901_v42  ;;  %589 = vst [vmem:[#allocation2 + $0x314] sm:$0xf] %v588_v16  ;;  %v1360_v23 = vunpack.c.l.bf16 %v1308_v57  ;;  %v1361_v31 = vunpack.c.l.bf16 %v1309_v39  ;;  %v1362_v54 = vunpack.c.l.bf16 %v1310_v63 }
 0x1cc   : > { %v4646_v9 = vadd.f32 %v4598_v18, %v4550_v7  ;;  %v4648_v1 = vadd.f32 %v4600_v61, %v4552_v8  ;;  %750 = vst [vmem:[#allocation2 + $0x1f4] sm:$0xf] %v749_v48  ;;  %v7408_v19 = vunpack.c.l.bf16 %v7711_v35  ;;  %v7409_v26 = vunpack.c.h.bf16 %v7711_v35  ;;  %v2329_v7 = vld [vmem:[#allocation2 + $0x1e0] sm:$0xc]  ;;  %v2330_v18 = vld [vmem:[#allocation2 + $0x1e4] sm:$0xf] }
 0x1cd   : > { %v4647_v34 = vadd.f32 %v4599_v14, %v4551_v60  ;;  %v1409_v17 = vmul.f32 %v8552_v2, %v1360_v23  ;;  %v1410_v10 = vmul.f32 %v8552_v2, %v1361_v31  ;;  %v1411_v49 = vmul.f32 %v8552_v2, %v1362_v54 }
 0x1ce   : > { %v4694_v27 = vpack.c.bf16 %v4646_v9, %v4646_v9  ;;  %v4696_v41 = vpack.c.bf16 %v4648_v1, %v4648_v1  ;;  %v1569_v29 = vmul.f32 %v7408_v19, %v8531_v53  ;;  %v1570_v28 = vmul.f32 %v7409_v26, %v8531_v53 }
 0x1cf   : > { %v4695_v50 = vpack.c.bf16 %v4647_v34, %v4647_v34  ;;  %v1457_v33 = vpack.c.bf16 %v1409_v17, %v1409_v17  ;;  %v1458_v32 = vpack.c.bf16 %v1410_v10, %v1410_v10  ;;  %v1459_v12 = vpack.c.bf16 %v1411_v49, %v1411_v49 }
 0x1d0   : > { %v7171_v47 = vrot.slane %v4694_v27, 10  ;;  %v4814_v39 = vrot.slane %v4696_v41, 6  ;;  %v1601_v45 = vpack.c.bf16 %v1569_v29, %v1569_v29  ;;  %v1602_v13 = vpack.c.bf16 %v1570_v28, %v1570_v28 }
 0x1d1   : > { %v4811_v60 = vrot.slane %v4695_v50, 6  ;;  %v1638_v62 = vunpack.c.l.bf16 %v1457_v33  ;;  %v1639_v57 = vunpack.c.l.bf16 %v1458_v32  ;;  %v1640_v63 = vunpack.c.l.bf16 %v1459_v12  ;;  %v1945_v58 = vld [vmem:[#allocation2 + $0xd4] sm:$0x3]  ;;  %v2331_v33 = vld [vmem:[#allocation2 + $0x1e8] sm:$0x3] }
 0x1d2   : > { %v1681_v8 = vunpack.c.l.bf16 %v1601_v45  ;;  %v1682_v42 = vunpack.c.l.bf16 %v1602_v13  ;;  %v1992_v15 = vunpack.c.l.bf16 %v1943_v20  ;;  %v1993_v35 = vunpack.c.l.bf16 %v1944_v24 }
 0x1d3   : > { %v4812_v61 = vsel %vm8788_vm7, %v7171_v47, %v4811_v60  ;;  %v4813_v16 = vrot.slane %v4811_v60, 4  ;;  %v1994_v48 = vunpack.c.l.bf16 %v1945_v58  ;;  %v2378_v14 = vunpack.c.l.bf16 %v2329_v7  ;;  %v7727_v7 = vld [vmem:[#allocation2 + $0x1e8] sm:$0xff]  }
 0x1d4   : > { %v4933_v23 = vunpack.c.l.bf16 %v4812_v61  ;;  %v1751_v31 = vrot.slane %v1681_v8, 4  ;;  %v1752_v54 = vrot.slane %v1682_v42, 4  ;;  %v2041_v9 = vmul.f32 %v8590_v51, %v1992_v15 }
 0x1d5   : > { %v4815_v1 = vsel %vm8788_vm7, %v4813_v16, %v4814_v39  ;;  %v2042_v19 = vmul.f32 %v8590_v51, %v1993_v35  ;;  %v2043_v26 = vmul.f32 %v8590_v51, %v1994_v48  ;;  %v2379_v34 = vunpack.c.l.bf16 %v2330_v18 }
 0x1d6   : > { %v4934_v17 = vunpack.c.l.bf16 %v4815_v1  ;;  %v4966_v10 = vadd.f32 %v8759_v37, %v4933_v23  ;;  %v1753_v49 = vsel %vm1735_vm4, %v1751_v31, %v1752_v54  ;;  %v1847_v27 = vadd.f32 %v1751_v31, %v1638_v62  ;;  %v2958_v1 = vld [vmem:[#allocation2 + $0x1f0] sm:$0xf] }
 0x1d7   : > { %v1848_v41 = vadd.f32 %v1753_v49, %v1639_v57  ;;  %v1849_v29 = vadd.f32 %v1752_v54, %v1640_v63  ;;  %v2089_v28 = vpack.c.bf16 %v2041_v9, %v2041_v9  ;;  %v2090_v50 = vpack.c.bf16 %v2042_v19, %v2042_v19  ;;  %v2957_v9 = vld [vmem:[#allocation2 + $0x1ec] sm:$0xc]  ;;  %v3345_v49 = vld [vmem:[#allocation2 + $0x304] sm:$0xf] }
 0x1d8   : > { %v4967_v32 = vadd.f32 %v8759_v37, %v4934_v17  ;;  %v4998_v12 = vmax.f32 %v4966_v10, 0.0  ;;  %v1895_v20 = vpack.c.bf16 %v1847_v27, %v1847_v27  ;;  %v2091_v24 = vpack.c.bf16 %v2043_v26, %v2043_v26  ;;  %v2959_v17 = vld [vmem:[#allocation2 + $0x1f4] sm:$0x3]  ;;  %v3344_v10 = vld [vmem:[#allocation2 + $0x300] sm:$0xc] }
 0x1d9   : > { %v1896_v47 = vpack.c.bf16 %v1848_v41, %v1848_v41  ;;  %v1897_v39 = vpack.c.bf16 %v1849_v29, %v1849_v29  ;;  %v2185_v45 = vunpack.c.l.bf16 %v2089_v28  ;;  %v2186_v13 = vunpack.c.l.bf16 %v2090_v50  ;;  %v3346_v50 = vld [vmem:[#allocation2 + $0x308] sm:$0x3] }
 0x1da   : > { %v4999_v60 = vmax.f32 %v4967_v32, 0.0  ;;  %v2137_v58 = vunpack.c.l.bf16 %v1895_v20  ;;  %v2187_v8 = vunpack.c.l.bf16 %v2091_v24  ;;  %v2380_v42 = vunpack.c.l.bf16 %v2331_v33 }
 0x1db   : > { %v2138_v62 = vunpack.c.l.bf16 %v1896_v47  ;;  %v2139_v57 = vunpack.c.l.bf16 %v1897_v39  ;;  %v2427_v63 = vmul.f32 %v8554_v4, %v2378_v14  ;;  %v2428_v15 = vmul.f32 %v8554_v4, %v2379_v34 }
 0x1dc   : > { %v5026_v35 = vpack.c.bf16 %v4999_v60, %v4998_v12  ;;  %v9095_v18 = vadd.f32 %v2185_v45, %v2137_v58  ;;  %v2429_v61 = vmul.f32 %v8554_v4, %v2380_v42  ;;  %v7472_v16 = vunpack.c.l.bf16 %v7727_v7 }
 0x1dd   : > { %v9098_v48 = vadd.f32 %v2186_v13, %v2138_v62  ;;  %v9100_v23 = vadd.f32 %v2187_v8, %v2139_v57  ;;  %v2475_v31 = vpack.c.bf16 %v2427_v63, %v2427_v63  ;;  %v2476_v54 = vpack.c.bf16 %v2428_v15, %v2428_v15 }
 0x1de   : > { %7191 = vmatmul.msk.bf16.gmra.mxu2 %vm915_vm3, %v5026_v35  ;;  %v2281_v14 = vpack.c.bf16 %v9095_v18, %v9095_v18  ;;  %v2477_v19 = vpack.c.bf16 %v2429_v61, %v2429_v61  ;;  %v7473_v26 = vunpack.c.h.bf16 %v7727_v7  ;;  %v2584_v34 = vmul.f32 %v7472_v16, %v8579_v30  ;;  %v7743_v16 = vld [vmem:[#allocation2 + $0x308] sm:$0xff]   ;;  %v7376_v18 = vld [vmem:[%s10750_s6 + $0x10] sm:$0xff] }
 0x1df   : > { %v2282_v27 = vpack.c.bf16 %v9098_v48, %v9098_v48  ;;  %v2283_v41 = vpack.c.bf16 %v9100_v23, %v9100_v23  ;;  %v2653_v29 = vunpack.c.l.bf16 %v2475_v31  ;;  %v2654_v28 = vunpack.c.l.bf16 %v2476_v54  ;;  %v404_v48 = vld [vmem:[%s8149_s18 + $0x98] sm:$0xff] }
 0x1e0   : > { %v2585_v33 = vmul.f32 %v7473_v26, %v8579_v30  ;;  %v2616_v32 = vpack.c.bf16 %v2584_v34, %v2584_v34  ;;  %v2655_v12 = vunpack.c.l.bf16 %v2477_v19  ;;  %v3006_v20 = vunpack.c.l.bf16 %v2957_v9 }
 0x1e1   : > { %v3007_v24 = vunpack.c.l.bf16 %v2958_v1  ;;  %v3008_v47 = vunpack.c.l.bf16 %v2959_v17  ;;  %v3393_v39 = vunpack.c.l.bf16 %v3344_v10  ;;  %v3394_v45 = vunpack.c.l.bf16 %v3345_v49 }
 0x1e2   : > { %v2617_v13 = vpack.c.bf16 %v2585_v33, %v2585_v33  ;;  %v2696_v7 = vunpack.c.l.bf16 %v2616_v32  ;;  %v3055_v60 = vmul.f32 %v8614_v25, %v3006_v20  ;;  %v3395_v58 = vunpack.c.l.bf16 %v3346_v50  ;;  %v3972_v32 = vld [vmem:[#allocation2 + $0x30c] sm:$0xc] }
 0x1e3   : > { %v3056_v8 = vmul.f32 %v8614_v25, %v3007_v24  ;;  %v3057_v42 = vmul.f32 %v8614_v25, %v3008_v47  ;;  %v3442_v62 = vmul.f32 %v8628_v43, %v3393_v39  ;;  %v3443_v57 = vmul.f32 %v8628_v43, %v3394_v45  ;;  %v3973_v45 = vld [vmem:[#allocation2 + $0x310] sm:$0xf] }
 0x1e4   : > { %v2697_v63 = vunpack.c.l.bf16 %v2617_v13  ;;  %v2765_v15 = vrot.slane %v2696_v7, 4  ;;  %v3103_v35 = vpack.c.bf16 %v3055_v60, %v3055_v60  ;;  %v3444_v61 = vmul.f32 %v8628_v43, %v3395_v58 }
 0x1e5   : > { %v3104_v31 = vpack.c.bf16 %v3056_v8, %v3056_v8  ;;  %v3105_v54 = vpack.c.bf16 %v3057_v42, %v3057_v42  ;;  %v3490_v9 = vpack.c.bf16 %v3442_v62, %v3442_v62  ;;  %v3491_v1 = vpack.c.bf16 %v3443_v57, %v3443_v57 }
 0x1e6   : > { %v2766_v19 = vrot.slane %v2697_v63, 4  ;;  %v2861_v26 = vadd.f32 %v2765_v15, %v2653_v29  ;;  %v3199_v34 = vunpack.c.l.bf16 %v3103_v35  ;;  %v3492_v17 = vpack.c.bf16 %v3444_v61, %v3444_v61  ;;  %v3974_v29 = vld [vmem:[#allocation2 + $0x314] sm:$0x3] }
 0x1e7   : > { %v3200_v10 = vunpack.c.l.bf16 %v3104_v31  ;;  %v3201_v49 = vunpack.c.l.bf16 %v3105_v54  ;;  %v7536_v50 = vunpack.c.l.bf16 %v7743_v16  ;;  %v7537_v33 = vunpack.c.h.bf16 %v7743_v16 }
 0x1e8   : > { %v2767_v20 = vsel %vm1735_vm4, %v2765_v15, %v2766_v19  ;;  %v2863_v24 = vadd.f32 %v2766_v19, %v2655_v12  ;;  %v2909_v47 = vpack.c.bf16 %v2861_v26, %v2861_v26  ;;  %v3668_v39 = vunpack.c.l.bf16 %v3490_v9 }
 0x1e9   : > { %v2862_v13 = vadd.f32 %v2767_v20, %v2654_v28  ;;  %v3599_v7 = vmul.f32 %v7536_v50, %v8622_v40  ;;  %v3600_v60 = vmul.f32 %v7537_v33, %v8622_v40  ;;  %v3669_v58 = vunpack.c.l.bf16 %v3491_v1 }
 0x1ea   : > { %v2911_v8 = vpack.c.bf16 %v2863_v24, %v2863_v24  ;;  %v3151_v42 = vunpack.c.l.bf16 %v2909_v47  ;;  %v3670_v62 = vunpack.c.l.bf16 %v3492_v17  ;;  %v4024_v57 = vunpack.c.l.bf16 %v3972_v32 }
 0x1eb   : > { %v2910_v63 = vpack.c.bf16 %v2862_v13, %v2862_v13  ;;  %v3631_v35 = vpack.c.bf16 %v3599_v7, %v3599_v7  ;;  %v3632_v61 = vpack.c.bf16 %v3600_v60, %v3600_v60  ;;  %v4025_v16 = vunpack.c.l.bf16 %v3973_v45  ;;  %v975_v45 = vpop.f32.mrf.mxu0  ;;  %v7351_v13 = vld [vmem:[#allocation7 + $0x8] sm:$0xff] }
 0x1ec   : > { %v3153_v15 = vunpack.c.l.bf16 %v2911_v8  ;;  %v3247_v12 = vadd.f32 %v3199_v34, %v3151_v42  ;;  %v4026_v31 = vunpack.c.l.bf16 %v3974_v29  ;;  %v4073_v54 = vmul.f32 %v8659_v11, %v4024_v57  ;;  %v7367_v34 = vld [vmem:[%s10750_s6 + $0x8] sm:$0xff]  ;;  %1171 = vmatpush.bf16.msra.mxu1 %v7351_v13 }
 0x1ed   : > { %v3152_v28 = vunpack.c.l.bf16 %v2910_v63  ;;  %v3711_v9 = vunpack.c.l.bf16 %v3631_v35  ;;  %v3712_v19 = vunpack.c.l.bf16 %v3632_v61  ;;  %v4074_v26 = vmul.f32 %v8659_v11, %v4025_v16  ;;  %v7350_v63 = vld [vmem:[#allocation7] sm:$0xff]  ;;  %5793 = vmatpush.bf16.msrb.mxu0 %v7367_v34 }
 0x1ee   : > { %v3249_v1 = vadd.f32 %v3201_v49, %v3153_v15  ;;  %v3295_v50 = vpack.c.bf16 %v3247_v12, %v3247_v12  ;;  %v4075_v33 = vmul.f32 %v8659_v11, %v4026_v31  ;;  %v4121_v17 = vpack.c.bf16 %v4073_v54, %v4073_v54 }
 0x1ef   : > { %v3248_v32 = vadd.f32 %v3200_v10, %v3152_v28  ;;  %v3780_v20 = vrot.slane %v3711_v9, 4  ;;  %v3781_v24 = vrot.slane %v3712_v19, 4  ;;  %v4122_v47 = vpack.c.bf16 %v4074_v26, %v4074_v26 }
 0x1f0   : > { %v3297_v7 = vpack.c.bf16 %v3249_v1, %v3249_v1  ;;  %v4123_v60 = vpack.c.bf16 %v4075_v33, %v4075_v33  ;;  %v4217_v29 = vunpack.c.l.bf16 %v4121_v17  ;;  %v4361_v49 = vunpack.c.l.bf16 %v2281_v14  ;;  %v403_v14 = vld [vmem:[%s8149_s18 + $0x90] sm:$0xff]  ;;  %1172 = vmatpush.bf16.msra.mxu1 %v7350_v63 }
 0x1f1   : > { %v3296_v8 = vpack.c.bf16 %v3248_v32, %v3248_v32  ;;  %v3782_v10 = vsel %vm1735_vm4, %v3780_v20, %v3781_v24  ;;  %v3876_v42 = vadd.f32 %v3780_v20, %v3668_v39  ;;  %v3878_v57 = vadd.f32 %v3781_v24, %v3670_v62 }
 0x1f2   : > { %v3877_v35 = vadd.f32 %v3782_v10, %v3669_v58  ;;  %v4218_v61 = vunpack.c.l.bf16 %v4122_v47  ;;  %v4219_v16 = vunpack.c.l.bf16 %v4123_v60  ;;  %v4362_v15 = vunpack.c.l.bf16 %v2282_v27  ;;  %v530_v60 = vld [vmem:[#allocation2 + $0xec] sm:$0xf] }
 0x1f3   : > { %v3924_v12 = vpack.c.bf16 %v3876_v42, %v3876_v42  ;;  %v3926_v31 = vpack.c.bf16 %v3878_v57, %v3878_v57  ;;  %v4363_v39 = vunpack.c.l.bf16 %v2283_v41  ;;  %v4409_v62 = vunpack.c.l.bf16 %v3295_v50  ;;  %v978_v50 = vpop.f32.mrf.mxu0  ;;  %v752_v57 = vld [vmem:[#allocation2 + $0x20c] sm:$0xf] }
 0x1f4   : > { %v3925_v58 = vpack.c.bf16 %v3877_v35, %v3877_v35  ;;  %v4410_v54 = vunpack.c.l.bf16 %v3296_v8  ;;  %v4411_v28 = vunpack.c.l.bf16 %v3297_v7  ;;  %v976_v9 = vadd.f32 %v9054_v52, %v975_v45  ;;  %6484 = vmatpush.bf16.msrb.mxu1 %v7376_v18 }
 0x1f5   : > { %v4169_v27 = vunpack.c.l.bf16 %v3924_v12  ;;  %v4171_v19 = vunpack.c.l.bf16 %v3926_v31  ;;  %v4457_v26 = vadd.f32 %v4409_v62, %v4361_v49  ;;  %v435_v1 = vpack.c.bf16 %v403_v14, %v403_v14  ;;  %v1312_v12 = vld [vmem:[#allocation2 + $0xdc] sm:$0xf]  ;;  %v1313_v31 = vld [vmem:[#allocation2 + $0xe0] sm:$0x3] }
 0x1f6   : > { %v4170_v33 = vunpack.c.l.bf16 %v3925_v58  ;;  %v4458_v17 = vadd.f32 %v4410_v54, %v4362_v15  ;;  %v4459_v32 = vadd.f32 %v4411_v28, %v4363_v39  ;;  %v1054_v20 = vmax.f32 %v976_v9, 0.0  ;;  %v1311_v15 = vld [vmem:[#allocation2 + $0xd8] sm:$0xc]  ;;  %v7712_v39 = vld [vmem:[#allocation2 + $0xe0] sm:$0xff]  }
 0x1f7   : > { %v4265_v24 = vadd.f32 %v4217_v29, %v4169_v27  ;;  %v4267_v23 = vadd.f32 %v4219_v16, %v4171_v19  ;;  %v4505_v41 = vpack.c.bf16 %v4457_v26, %v4457_v26  ;;  %v436_v47 = vpack.c.bf16 %v404_v48, %v404_v48  ;;  %809 = vst.msk [vmem:[#allocation2 + $0x248] sm:$0xf] %vm449_vm0, %v435_v1  ;;  %v595_v29 = vld [vmem:[#allocation2 + $0x32c] sm:$0xf] }
 0x1f8   : > { %v4266_v13 = vadd.f32 %v4218_v61, %v4170_v33  ;;  %v4506_v45 = vpack.c.bf16 %v4458_v17, %v4458_v17  ;;  %v4507_v34 = vpack.c.bf16 %v4459_v32, %v4459_v32  ;;  %v1085_v7 = vpack.c.bf16 %v1054_v20, %v1053_v59 }
 0x1f9   : > { %v4313_v49 = vpack.c.bf16 %v4265_v24, %v4265_v24  ;;  %v4315_v8 = vpack.c.bf16 %v4267_v23, %v4267_v23  ;;  %v4553_v10 = vunpack.c.l.bf16 %v4505_v41  ;;  %v9146_v42 = vadd.f32 %v9054_v52, %v978_v50  ;;  %810 = vst.msk [vmem:[#allocation2 + $0x24c] sm:$0xf] %vm449_vm0, %v436_v47 }
 0x1fa   : > { %v4314_v63 = vpack.c.bf16 %v4266_v13, %v4266_v13  ;;  %v4554_v35 = vunpack.c.l.bf16 %v4506_v45  ;;  %v4555_v16 = vunpack.c.l.bf16 %v4507_v34  ;;  %1173 = vmatmul.bf16.vlgmr.msra.gmra.mxu1 %v1085_v7  ;;  %v879_v61 = vunpack.c.l.b16 %v435_v1  ;;  %v1946_v45 = vld [vmem:[#allocation2 + $0xe4] sm:$0xc]  ;;  %v1947_v34 = vld [vmem:[#allocation2 + $0xe8] sm:$0xf] }
 0x1fb   : > { %v4601_v18 = vunpack.c.l.bf16 %v4313_v49  ;;  %v4603_v38 = vunpack.c.l.bf16 %v4315_v8  ;;  %v1055_v59 = vmax.f32 %v9146_v42, 0.0  ;;  %v880_v14 = vunpack.c.l.b16 %v436_v47 }
 0x1fc   : > { %v4602_v62 = vunpack.c.l.bf16 %v4314_v63  ;;  %v531_v58 = vsel %vm8160_vm2, 0, %v530_v60  ;;  %v596_v54 = vsel %vm8160_vm2, 0, %v595_v29  ;;  %v753_v28 = vsel %vm8160_vm2, 0, %v752_v57 }
 0x1fd   : > { %v4649_v9 = vadd.f32 %v4601_v18, %v4553_v10  ;;  %v4651_v48 = vadd.f32 %v4603_v38, %v4555_v16  ;;  %v902_v27 = vpack.c.b16 %v880_v14, %v879_v61  ;;  %532 = vst [vmem:[#allocation2 + $0xec] sm:$0xf] %v531_v58  ;;  %v1363_v19 = vunpack.c.l.bf16 %v1311_v15  ;;  %v2332_v18 = vld [vmem:[#allocation2 + $0x1f8] sm:$0xc] }
 0x1fe   : > { %v4650_v26 = vadd.f32 %v4602_v62, %v4554_v35  ;;  %597 = vst [vmem:[#allocation2 + $0x32c] sm:$0xf] %v596_v54  ;;  %v1364_v1 = vunpack.c.l.bf16 %v1312_v12  ;;  %v1365_v33 = vunpack.c.l.bf16 %v1313_v31  ;;  %v7412_v17 = vunpack.c.l.bf16 %v7712_v39 }
 0x1ff   : > { %v4697_v32 = vpack.c.bf16 %v4649_v9, %v4649_v9  ;;  %v4699_v20 = vpack.c.bf16 %v4651_v48, %v4651_v48  ;;  %7128 = vmatmul.msk.bf16.gmra.mxu0 %vm915_vm3, %v902_v27  ;;  %754 = vst [vmem:[#allocation2 + $0x20c] sm:$0xf] %v753_v28  ;;  %v1412_v24 = vmul.f32 %v8552_v2, %v1363_v19  ;;  %v7413_v23 = vunpack.c.h.bf16 %v7712_v39  ;;  %v2333_v9 = vld [vmem:[#allocation2 + $0x1fc] sm:$0xf] }
 0x200   : > { %v4698_v41 = vpack.c.bf16 %v4650_v26, %v4650_v26  ;;  %v1413_v50 = vmul.f32 %v8552_v2, %v1364_v1  ;;  %v1414_v47 = vmul.f32 %v8552_v2, %v1365_v33  ;;  %v1571_v13 = vmul.f32 %v7412_v17, %v8531_v53 }
 0x201   : > { %v7172_v7 = vrot.slane %v4697_v32, 10  ;;  %v4821_v60 = vrot.slane %v4699_v20, 6  ;;  %v1460_v49 = vpack.c.bf16 %v1412_v24, %v1412_v24  ;;  %v1572_v8 = vmul.f32 %v7413_v23, %v8531_v53 }
 0x202   : > { %v4818_v10 = vrot.slane %v4698_v41, 6  ;;  %v1461_v29 = vpack.c.bf16 %v1413_v50, %v1413_v50  ;;  %v1462_v57 = vpack.c.bf16 %v1414_v47, %v1414_v47  ;;  %v1603_v63 = vpack.c.bf16 %v1571_v13, %v1571_v13  ;;  %v2334_v41 = vld [vmem:[#allocation2 + $0x200] sm:$0x3] }
 0x203   : > { %v1604_v35 = vpack.c.bf16 %v1572_v8, %v1572_v8  ;;  %v1641_v16 = vunpack.c.l.bf16 %v1460_v49  ;;  %v1995_v61 = vunpack.c.l.bf16 %v1946_v45  ;;  %v1996_v15 = vunpack.c.l.bf16 %v1947_v34 }
 0x204   : > { %v4819_v38 = vsel %vm8788_vm7, %v7172_v7, %v4818_v10  ;;  %v4820_v14 = vrot.slane %v4818_v10, 4  ;;  %v1642_v12 = vunpack.c.l.bf16 %v1461_v29  ;;  %v1643_v31 = vunpack.c.l.bf16 %v1462_v57  ;;  %v1948_v39 = vld [vmem:[#allocation2 + $0xec] sm:$0x3] }
 0x205   : > { %v4935_v62 = vunpack.c.l.bf16 %v4819_v38  ;;  %v1683_v58 = vunpack.c.l.bf16 %v1603_v63  ;;  %v1684_v54 = vunpack.c.l.bf16 %v1604_v35  ;;  %v1997_v28 = vunpack.c.l.bf16 %v1948_v39  ;;  %v7728_v35 = vld [vmem:[#allocation2 + $0x200] sm:$0xff]  }
 0x206   : > { %v4822_v48 = vsel %vm8788_vm7, %v4820_v14, %v4821_v60  ;;  %v2044_v27 = vmul.f32 %v8590_v51, %v1995_v61  ;;  %v2045_v19 = vmul.f32 %v8590_v51, %v1996_v15  ;;  %v2381_v26 = vunpack.c.l.bf16 %v2332_v18 }
 0x207   : > { %v4936_v1 = vunpack.c.l.bf16 %v4822_v48  ;;  %v4968_v33 = vadd.f32 %v8759_v37, %v4935_v62  ;;  %v1754_v17 = vrot.slane %v1683_v58, 4  ;;  %v1755_v32 = vrot.slane %v1684_v54, 4 }
 0x208   : > { %v2046_v20 = vmul.f32 %v8590_v51, %v1997_v28  ;;  %v2092_v24 = vpack.c.bf16 %v2044_v27, %v2044_v27  ;;  %v2093_v23 = vpack.c.bf16 %v2045_v19, %v2045_v19  ;;  %v2382_v50 = vunpack.c.l.bf16 %v2333_v9  ;;  %v2960_v19 = vld [vmem:[#allocation2 + $0x204] sm:$0xc] }
 0x209   : > { %v4969_v47 = vadd.f32 %v8759_v37, %v4936_v1  ;;  %v5000_v13 = vmax.f32 %v4968_v33, 0.0  ;;  %v1756_v45 = vsel %vm1735_vm4, %v1754_v17, %v1755_v32  ;;  %v1850_v34 = vadd.f32 %v1754_v17, %v1641_v16 }
 0x20a   : > { %v1851_v7 = vadd.f32 %v1756_v45, %v1642_v12  ;;  %v1852_v60 = vadd.f32 %v1755_v32, %v1643_v31  ;;  %v2094_v49 = vpack.c.bf16 %v2046_v20, %v2046_v20  ;;  %v2188_v8 = vunpack.c.l.bf16 %v2092_v24  ;;  %v2961_v32 = vld [vmem:[#allocation2 + $0x208] sm:$0xf]  ;;  %v2962_v20 = vld [vmem:[#allocation2 + $0x20c] sm:$0x3]  ;;  %v3347_v24 = vld [vmem:[#allocation2 + $0x318] sm:$0xc] }
 0x20b   : > { %v5001_v10 = vmax.f32 %v4969_v47, 0.0  ;;  %v1898_v29 = vpack.c.bf16 %v1850_v34, %v1850_v34  ;;  %v2189_v57 = vunpack.c.l.bf16 %v2093_v23  ;;  %v2383_v63 = vunpack.c.l.bf16 %v2334_v41  ;;  %v3349_v45 = vld [vmem:[#allocation2 + $0x320] sm:$0x3] }
 0x20c   : > { %v1899_v61 = vpack.c.bf16 %v1851_v7, %v1851_v7  ;;  %v1900_v15 = vpack.c.bf16 %v1852_v60, %v1852_v60  ;;  %v2190_v18 = vunpack.c.l.bf16 %v2094_v49  ;;  %v2430_v38 = vmul.f32 %v8554_v4, %v2381_v26 }
 0x20d   : > { %v5027_v14 = vpack.c.bf16 %v5001_v10, %v5000_v13  ;;  %v2140_v39 = vunpack.c.l.bf16 %v1898_v29  ;;  %v2431_v62 = vmul.f32 %v8554_v4, %v2382_v50  ;;  %v2432_v16 = vmul.f32 %v8554_v4, %v2383_v63  ;;  %v3348_v13 = vld [vmem:[#allocation2 + $0x31c] sm:$0xf] }
 0x20e   : > { %v2141_v12 = vunpack.c.l.bf16 %v1899_v61  ;;  %v2142_v31 = vunpack.c.l.bf16 %v1900_v15  ;;  %v2478_v58 = vpack.c.bf16 %v2430_v38, %v2430_v38  ;;  %v7476_v54 = vunpack.c.l.bf16 %v7728_v35 }
 0x20f   : > { %7192 = vmatmul.msk.bf16.gmra.mxu2 %vm915_vm3, %v5027_v14  ;;  %v9176_v28 = vadd.f32 %v2188_v8, %v2140_v39  ;;  %v2479_v9 = vpack.c.bf16 %v2431_v62, %v2431_v62  ;;  %v2480_v48 = vpack.c.bf16 %v2432_v16, %v2432_v16  ;;  %v7477_v27 = vunpack.c.h.bf16 %v7728_v35 }
 0x210   : > { %v9178_v1 = vadd.f32 %v2189_v57, %v2141_v12  ;;  %v9180_v26 = vadd.f32 %v2190_v18, %v2142_v31  ;;  %v2586_v33 = vmul.f32 %v7476_v54, %v8579_v30  ;;  %v2656_v17 = vunpack.c.l.bf16 %v2478_v58 }
 0x211   : > { %v2284_v23 = vpack.c.bf16 %v9176_v28, %v9176_v28  ;;  %v2587_v41 = vmul.f32 %v7477_v27, %v8579_v30  ;;  %v2657_v50 = vunpack.c.l.bf16 %v2479_v9  ;;  %v2658_v47 = vunpack.c.l.bf16 %v2480_v48  ;;  %v7744_v27 = vld [vmem:[#allocation2 + $0x320] sm:$0xff]  }
 0x212   : > { %v2285_v34 = vpack.c.bf16 %v9178_v1, %v9178_v1  ;;  %v2286_v7 = vpack.c.bf16 %v9180_v26, %v9180_v26  ;;  %v2618_v60 = vpack.c.bf16 %v2586_v33, %v2586_v33  ;;  %v3009_v49 = vunpack.c.l.bf16 %v2960_v19 }
 0x213   : > { %v2619_v8 = vpack.c.bf16 %v2587_v41, %v2587_v41  ;;  %v3010_v10 = vunpack.c.l.bf16 %v2961_v32  ;;  %v3011_v29 = vunpack.c.l.bf16 %v2962_v20  ;;  %v3396_v57 = vunpack.c.l.bf16 %v3347_v24 }
 0x214   : > { %v2698_v63 = vunpack.c.l.bf16 %v2618_v60  ;;  %v3058_v35 = vmul.f32 %v8614_v25, %v3009_v49  ;;  %v3397_v61 = vunpack.c.l.bf16 %v3348_v13  ;;  %v3398_v15 = vunpack.c.l.bf16 %v3349_v45 }
 0x215   : > { %v2699_v18 = vunpack.c.l.bf16 %v2619_v8  ;;  %v3059_v38 = vmul.f32 %v8614_v25, %v3010_v10  ;;  %v3060_v14 = vmul.f32 %v8614_v25, %v3011_v29  ;;  %v3445_v39 = vmul.f32 %v8628_v43, %v3396_v57  ;;  %v3975_v29 = vld [vmem:[#allocation2 + $0x324] sm:$0xc]  ;;  %v3976_v57 = vld [vmem:[#allocation2 + $0x328] sm:$0xf] }
 0x216   : > { %v2768_v62 = vrot.slane %v2698_v63, 4  ;;  %v3106_v16 = vpack.c.bf16 %v3058_v35, %v3058_v35  ;;  %v3446_v12 = vmul.f32 %v8628_v43, %v3397_v61  ;;  %v3447_v31 = vmul.f32 %v8628_v43, %v3398_v15  ;;  %v3977_v63 = vld [vmem:[#allocation2 + $0x32c] sm:$0x3] }
 0x217   : > { %v2769_v58 = vrot.slane %v2699_v18, 4  ;;  %v3107_v54 = vpack.c.bf16 %v3059_v38, %v3059_v38  ;;  %v3108_v9 = vpack.c.bf16 %v3060_v14, %v3060_v14  ;;  %v3493_v48 = vpack.c.bf16 %v3445_v39, %v3445_v39 }
 0x218   : > { %v2864_v19 = vadd.f32 %v2768_v62, %v2656_v17  ;;  %v3202_v33 = vunpack.c.l.bf16 %v3106_v16  ;;  %v3494_v32 = vpack.c.bf16 %v3446_v12, %v3446_v12  ;;  %v3495_v20 = vpack.c.bf16 %v3447_v31, %v3447_v31 }
 0x219   : > { %v2770_v24 = vsel %vm1735_vm4, %v2768_v62, %v2769_v58  ;;  %v2866_v41 = vadd.f32 %v2769_v58, %v2658_v47  ;;  %v3203_v13 = vunpack.c.l.bf16 %v3107_v54  ;;  %v3204_v45 = vunpack.c.l.bf16 %v3108_v9 }
 0x21a   : > { %v2865_v60 = vadd.f32 %v2770_v24, %v2657_v50  ;;  %v2912_v49 = vpack.c.bf16 %v2864_v19, %v2864_v19  ;;  %v7540_v8 = vunpack.c.l.bf16 %v7744_v27  ;;  %v7541_v10 = vunpack.c.h.bf16 %v7744_v27 }
 0x21b   : > { %v2914_v35 = vpack.c.bf16 %v2866_v41, %v2866_v41  ;;  %v3671_v61 = vunpack.c.l.bf16 %v3493_v48  ;;  %v3672_v15 = vunpack.c.l.bf16 %v3494_v32  ;;  %v3673_v18 = vunpack.c.l.bf16 %v3495_v20 }
 0x21c   : > { %v2913_v17 = vpack.c.bf16 %v2865_v60, %v2865_v60  ;;  %v3154_v38 = vunpack.c.l.bf16 %v2912_v49  ;;  %v3601_v14 = vmul.f32 %v7540_v8, %v8622_v40  ;;  %v3602_v39 = vmul.f32 %v7541_v10, %v8622_v40 }
 0x21d   : > { %v3156_v47 = vunpack.c.l.bf16 %v2914_v35  ;;  %v4027_v62 = vunpack.c.l.bf16 %v3975_v29  ;;  %v4028_v16 = vunpack.c.l.bf16 %v3976_v57  ;;  %v4029_v50 = vunpack.c.l.bf16 %v3977_v63  ;;  %v980_v63 = vpop.f32.mrf.mxu0 }
 0x21e   : > { %v3155_v12 = vunpack.c.l.bf16 %v2913_v17  ;;  %v3250_v31 = vadd.f32 %v3202_v33, %v3154_v38  ;;  %v3633_v58 = vpack.c.bf16 %v3601_v14, %v3601_v14  ;;  %v3634_v54 = vpack.c.bf16 %v3602_v39, %v3602_v39  ;;  %v405_v14 = vld [vmem:[%s8149_s18 + $0xa0] sm:$0xff] }
 0x21f   : > { %v3252_v9 = vadd.f32 %v3204_v45, %v3156_v47  ;;  %v4076_v27 = vmul.f32 %v8659_v11, %v4027_v62  ;;  %v4077_v48 = vmul.f32 %v8659_v11, %v4028_v16  ;;  %v4078_v19 = vmul.f32 %v8659_v11, %v4029_v50 }
 0x220   : > { %v3251_v32 = vadd.f32 %v3203_v13, %v3155_v12  ;;  %v3298_v20 = vpack.c.bf16 %v3250_v31, %v3250_v31  ;;  %v3713_v24 = vunpack.c.l.bf16 %v3633_v58  ;;  %v3714_v41 = vunpack.c.l.bf16 %v3634_v54  ;;  %v406_v31 = vld [vmem:[%s8149_s18 + $0xa8] sm:$0xff] }
 0x221   : > { %v3300_v60 = vpack.c.bf16 %v3252_v9, %v3252_v9  ;;  %v4124_v49 = vpack.c.bf16 %v4076_v27, %v4076_v27  ;;  %v4125_v8 = vpack.c.bf16 %v4077_v48, %v4077_v48  ;;  %v4126_v10 = vpack.c.bf16 %v4078_v19, %v4078_v19 }
 0x222   : > { %v3299_v29 = vpack.c.bf16 %v3251_v32, %v3251_v32  ;;  %v3783_v33 = vrot.slane %v3713_v24, 4  ;;  %v3784_v57 = vrot.slane %v3714_v41, 4  ;;  %v4364_v45 = vunpack.c.l.bf16 %v2284_v23  ;;  %v538_v41 = vld [vmem:[#allocation2 + $0x104] sm:$0xf] }
 0x223   : > { %v4220_v35 = vunpack.c.l.bf16 %v4124_v49  ;;  %v4221_v17 = vunpack.c.l.bf16 %v4125_v8  ;;  %v4222_v13 = vunpack.c.l.bf16 %v4126_v10  ;;  %v4365_v38 = vunpack.c.l.bf16 %v2285_v34 }
 0x224   : > { %v3785_v39 = vsel %vm1735_vm4, %v3783_v33, %v3784_v57  ;;  %v3879_v47 = vadd.f32 %v3783_v33, %v3671_v61  ;;  %v3881_v62 = vadd.f32 %v3784_v57, %v3673_v18  ;;  %v4366_v16 = vunpack.c.l.bf16 %v2286_v7  ;;  %v756_v33 = vld [vmem:[#allocation2 + $0x224] sm:$0xf] }
 0x225   : > { %v3880_v28 = vadd.f32 %v3785_v39, %v3672_v15  ;;  %v4412_v50 = vunpack.c.l.bf16 %v3298_v20  ;;  %v4413_v23 = vunpack.c.l.bf16 %v3299_v29  ;;  %v4414_v12 = vunpack.c.l.bf16 %v3300_v60  ;;  %v983_v8 = vpop.f32.mrf.mxu0  ;;  %v603_v29 = vld [vmem:[#allocation2 + $0x344] sm:$0xf] }
 0x226   : > { %v3927_v58 = vpack.c.bf16 %v3879_v47, %v3879_v47  ;;  %v3929_v54 = vpack.c.bf16 %v3881_v62, %v3881_v62  ;;  %v981_v9 = vadd.f32 %v9054_v52, %v980_v63  ;;  %v437_v1 = vpack.c.bf16 %v405_v14, %v405_v14  ;;  %v1315_v47 = vld [vmem:[#allocation2 + $0xf4] sm:$0xf]  ;;  %v1316_v62 = vld [vmem:[#allocation2 + $0xf8] sm:$0x3] }
 0x227   : > { %v3928_v34 = vpack.c.bf16 %v3880_v28, %v3880_v28  ;;  %v4460_v27 = vadd.f32 %v4412_v50, %v4364_v45  ;;  %v4461_v48 = vadd.f32 %v4413_v23, %v4365_v38  ;;  %v4462_v19 = vadd.f32 %v4414_v12, %v4366_v16  ;;  %v7713_v23 = vld [vmem:[#allocation2 + $0xf8] sm:$0xff]  }
 0x228   : > { %v4172_v61 = vunpack.c.l.bf16 %v3927_v58  ;;  %v4174_v18 = vunpack.c.l.bf16 %v3929_v54  ;;  %v1056_v32 = vmax.f32 %v981_v9, 0.0  ;;  %v438_v24 = vpack.c.bf16 %v406_v31, %v406_v31  ;;  %811 = vst.msk [vmem:[#allocation2 + $0x260] sm:$0xf] %vm449_vm0, %v437_v1 }
 0x229   : > { %v4173_v26 = vunpack.c.l.bf16 %v3928_v34  ;;  %v4508_v7 = vpack.c.bf16 %v4460_v27, %v4460_v27  ;;  %v4509_v15 = vpack.c.bf16 %v4461_v48, %v4461_v48  ;;  %v4510_v20 = vpack.c.bf16 %v4462_v19, %v4462_v19 }
 0x22a   : > { %v4268_v60 = vadd.f32 %v4220_v35, %v4172_v61  ;;  %v4270_v49 = vadd.f32 %v4222_v13, %v4174_v18  ;;  %v1086_v52 = vpack.c.bf16 %v1056_v32, %v1055_v59  ;;  %812 = vst.msk [vmem:[#allocation2 + $0x264] sm:$0xf] %vm449_vm0, %v438_v24  ;;  %v881_v10 = vunpack.c.l.b16 %v437_v1  ;;  %v9222_v35 = vld [vmem:[%s10747_s3] ss:$0 sm:$0xff]  ;;  %v1314_v13 = vld [vmem:[#allocation2 + $0xf0] sm:$0xc] }
 0x22b   : > { %v4269_v57 = vadd.f32 %v4221_v17, %v4173_v26  ;;  %v4556_v45 = vunpack.c.l.bf16 %v4508_v7  ;;  %v4557_v63 = vunpack.c.l.bf16 %v4509_v15  ;;  %v4558_v38 = vunpack.c.l.bf16 %v4510_v20 }
 0x22c   : > { %v4316_v14 = vpack.c.bf16 %v4268_v60, %v4268_v60  ;;  %v4318_v39 = vpack.c.bf16 %v4270_v49, %v4270_v49  ;;  %1178 = vmatmul.bf16.gmra.mxu1 %v1086_v52  ;;  %v9225_v42 = vadd.f32 %v9222_v35, %v983_v8  ;;  %v882_v59 = vunpack.c.l.b16 %v438_v24 }
 0x22d   : > { %v4317_v16 = vpack.c.bf16 %v4269_v57, %v4269_v57  ;;  %v539_v17 = vsel %vm8160_vm2, 0, %v538_v41  ;;  %v604_v28 = vsel %vm8160_vm2, 0, %v603_v29  ;;  %v757_v50 = vsel %vm8160_vm2, 0, %v756_v33  ;;  %v1949_v29 = vld [vmem:[#allocation2 + $0xfc] sm:$0xc] }
 0x22e   : > { %v4604_v12 = vunpack.c.l.bf16 %v4316_v14  ;;  %v4606_v31 = vunpack.c.l.bf16 %v4318_v39  ;;  %v1057_v58 = vmax.f32 %v9225_v42, 0.0  ;;  %v903_v54 = vpack.c.b16 %v882_v59, %v881_v10  ;;  %540 = vst [vmem:[#allocation2 + $0x104] sm:$0xf] %v539_v17  ;;  %v1950_v33 = vld [vmem:[#allocation2 + $0x100] sm:$0xf] }
 0x22f   : > { %v4605_v9 = vunpack.c.l.bf16 %v4317_v16  ;;  %605 = vst [vmem:[#allocation2 + $0x344] sm:$0xf] %v604_v28  ;;  %v1366_v1 = vunpack.c.l.bf16 %v1314_v13  ;;  %v1367_v34 = vunpack.c.l.bf16 %v1315_v47  ;;  %v1368_v27 = vunpack.c.l.bf16 %v1316_v62  ;;  %v2335_v14 = vld [vmem:[#allocation2 + $0x210] sm:$0xc]  ;;  %v1317_v42 = vld [vmem:[#allocation2 + $0x108] sm:$0xc] }
 0x230   : > { %v4652_v48 = vadd.f32 %v4604_v12, %v4556_v45  ;;  %v4654_v19 = vadd.f32 %v4606_v31, %v4558_v38  ;;  %7129 = vmatmul.msk.bf16.gmra.mxu0 %vm915_vm3, %v903_v54  ;;  %758 = vst [vmem:[#allocation2 + $0x224] sm:$0xf] %v757_v50  ;;  %v7416_v61 = vunpack.c.l.bf16 %v7713_v23  ;;  %v7417_v18 = vunpack.c.h.bf16 %v7713_v23  ;;  %v2336_v23 = vld [vmem:[#allocation2 + $0x214] sm:$0xf] }
 0x231   : > { %v4653_v32 = vadd.f32 %v4605_v9, %v4557_v63  ;;  %v1415_v24 = vmul.f32 %v8552_v2, %v1366_v1  ;;  %v1416_v26 = vmul.f32 %v8552_v2, %v1367_v34  ;;  %v1417_v7 = vmul.f32 %v8552_v2, %v1368_v27 }
 0x232   : > { %v4700_v15 = vpack.c.bf16 %v4652_v48, %v4652_v48  ;;  %v4702_v20 = vpack.c.bf16 %v4654_v19, %v4654_v19  ;;  %v1573_v41 = vmul.f32 %v7416_v61, %v8531_v53  ;;  %v1574_v60 = vmul.f32 %v7417_v18, %v8531_v53 }
 0x233   : > { %v4701_v49 = vpack.c.bf16 %v4653_v32, %v4653_v32  ;;  %v1463_v52 = vpack.c.bf16 %v1415_v24, %v1415_v24  ;;  %v1464_v8 = vpack.c.bf16 %v1416_v26, %v1416_v26  ;;  %v1465_v10 = vpack.c.bf16 %v1417_v7, %v1417_v7 }
 0x234   : > { %v7173_v57 = vrot.slane %v4700_v15, 10  ;;  %v4828_v45 = vrot.slane %v4702_v20, 6  ;;  %v1605_v63 = vpack.c.bf16 %v1573_v41, %v1573_v41  ;;  %v1606_v38 = vpack.c.bf16 %v1574_v60, %v1574_v60 }
 0x235   : > { %v4825_v39 = vrot.slane %v4701_v49, 6  ;;  %v1644_v59 = vunpack.c.l.bf16 %v1463_v52  ;;  %v1645_v13 = vunpack.c.l.bf16 %v1464_v8  ;;  %v1646_v47 = vunpack.c.l.bf16 %v1465_v10  ;;  %v1951_v62 = vld [vmem:[#allocation2 + $0x104] sm:$0x3]  ;;  %v2337_v52 = vld [vmem:[#allocation2 + $0x218] sm:$0x3] }
 0x236   : > { %v1685_v16 = vunpack.c.l.bf16 %v1605_v63  ;;  %v1686_v17 = vunpack.c.l.bf16 %v1606_v38  ;;  %v1998_v28 = vunpack.c.l.bf16 %v1949_v29  ;;  %v1999_v50 = vunpack.c.l.bf16 %v1950_v33 }
 0x237   : > { %v4826_v12 = vsel %vm8788_vm7, %v7173_v57, %v4825_v39  ;;  %v4827_v31 = vrot.slane %v4825_v39, 4  ;;  %v2000_v54 = vunpack.c.l.bf16 %v1951_v62  ;;  %v2384_v9 = vunpack.c.l.bf16 %v2335_v14  ;;  %v7729_v14 = vld [vmem:[#allocation2 + $0x218] sm:$0xff]  }
 0x238   : > { %v4937_v1 = vunpack.c.l.bf16 %v4826_v12  ;;  %v1757_v34 = vrot.slane %v1685_v16, 4  ;;  %v1758_v27 = vrot.slane %v1686_v17, 4  ;;  %v2047_v48 = vmul.f32 %v8590_v51, %v1998_v28 }
 0x239   : > { %v4829_v19 = vsel %vm8788_vm7, %v4827_v31, %v4828_v45  ;;  %v2048_v61 = vmul.f32 %v8590_v51, %v1999_v50  ;;  %v2049_v18 = vmul.f32 %v8590_v51, %v2000_v54  ;;  %v2385_v32 = vunpack.c.l.bf16 %v2336_v23 }
 0x23a   : > { %v4938_v24 = vunpack.c.l.bf16 %v4829_v19  ;;  %v4970_v26 = vadd.f32 %v8759_v37, %v4937_v1  ;;  %v1759_v7 = vsel %vm1735_vm4, %v1757_v34, %v1758_v27  ;;  %v1853_v15 = vadd.f32 %v1757_v34, %v1644_v59  ;;  %v2964_v19 = vld [vmem:[#allocation2 + $0x220] sm:$0xf] }
 0x23b   : > { %v1854_v20 = vadd.f32 %v1759_v7, %v1645_v13  ;;  %v1855_v41 = vadd.f32 %v1758_v27, %v1646_v47  ;;  %v2095_v60 = vpack.c.bf16 %v2047_v48, %v2047_v48  ;;  %v2096_v49 = vpack.c.bf16 %v2048_v61, %v2048_v61  ;;  %v2963_v48 = vld [vmem:[#allocation2 + $0x21c] sm:$0xc]  ;;  %v3351_v7 = vld [vmem:[#allocation2 + $0x334] sm:$0xf] }
 0x23c   : > { %v4971_v8 = vadd.f32 %v8759_v37, %v4938_v24  ;;  %v5002_v10 = vmax.f32 %v4970_v26, 0.0  ;;  %v1901_v29 = vpack.c.bf16 %v1853_v15, %v1853_v15  ;;  %v2097_v33 = vpack.c.bf16 %v2049_v18, %v2049_v18  ;;  %v2965_v24 = vld [vmem:[#allocation2 + $0x224] sm:$0x3]  ;;  %v3350_v26 = vld [vmem:[#allocation2 + $0x330] sm:$0xc] }
 0x23d   : > { %v1902_v57 = vpack.c.bf16 %v1854_v20, %v1854_v20  ;;  %v1903_v45 = vpack.c.bf16 %v1855_v41, %v1855_v41  ;;  %v2191_v63 = vunpack.c.l.bf16 %v2095_v60  ;;  %v2192_v38 = vunpack.c.l.bf16 %v2096_v49  ;;  %v3352_v49 = vld [vmem:[#allocation2 + $0x338] sm:$0x3] }
 0x23e   : > { %v5003_v39 = vmax.f32 %v4971_v8, 0.0  ;;  %v2143_v62 = vunpack.c.l.bf16 %v1901_v29  ;;  %v2193_v16 = vunpack.c.l.bf16 %v2097_v33  ;;  %v2386_v17 = vunpack.c.l.bf16 %v2337_v52 }
 0x23f   : > { %v2144_v59 = vunpack.c.l.bf16 %v1902_v57  ;;  %v2145_v13 = vunpack.c.l.bf16 %v1903_v45  ;;  %v2433_v47 = vmul.f32 %v8554_v4, %v2384_v9  ;;  %v2434_v28 = vmul.f32 %v8554_v4, %v2385_v32 }
 0x240   : > { %v5028_v50 = vpack.c.bf16 %v5003_v39, %v5002_v10  ;;  %v9252_v23 = vadd.f32 %v2191_v63, %v2143_v62  ;;  %v2435_v12 = vmul.f32 %v8554_v4, %v2386_v17  ;;  %v7480_v31 = vunpack.c.l.bf16 %v7729_v14 }
 0x241   : > { %v9255_v54 = vadd.f32 %v2192_v38, %v2144_v59  ;;  %v9257_v1 = vadd.f32 %v2193_v16, %v2145_v13  ;;  %v2481_v34 = vpack.c.bf16 %v2433_v47, %v2433_v47  ;;  %v2482_v27 = vpack.c.bf16 %v2434_v28, %v2434_v28 }
 0x242   : > { %7193 = vmatmul.msk.bf16.gmra.mxu2 %vm915_vm3, %v5028_v50  ;;  %v2287_v9 = vpack.c.bf16 %v9252_v23, %v9252_v23  ;;  %v2483_v61 = vpack.c.bf16 %v2435_v12, %v2435_v12  ;;  %v7481_v18 = vunpack.c.h.bf16 %v7729_v14  ;;  %v2588_v32 = vmul.f32 %v7480_v31, %v8579_v30  ;;  %v7745_v31 = vld [vmem:[#allocation2 + $0x338] sm:$0xff]  }
 0x243   : > { %v2288_v15 = vpack.c.bf16 %v9255_v54, %v9255_v54  ;;  %v2289_v20 = vpack.c.bf16 %v9257_v1, %v9257_v1  ;;  %v2659_v41 = vunpack.c.l.bf16 %v2481_v34  ;;  %v2660_v60 = vunpack.c.l.bf16 %v2482_v27  ;;  %v7364_v54 = vld [vmem:[#allocation7 + $0x68] sm:$0xff] }
 0x244   : > { %v2589_v52 = vmul.f32 %v7481_v18, %v8579_v30  ;;  %v2620_v8 = vpack.c.bf16 %v2588_v32, %v2588_v32  ;;  %v2661_v10 = vunpack.c.l.bf16 %v2483_v61  ;;  %v3012_v29 = vunpack.c.l.bf16 %v2963_v48 }
 0x245   : > { %v3013_v33 = vunpack.c.l.bf16 %v2964_v19  ;;  %v3014_v57 = vunpack.c.l.bf16 %v2965_v24  ;;  %v3399_v45 = vunpack.c.l.bf16 %v3350_v26  ;;  %v3400_v63 = vunpack.c.l.bf16 %v3351_v7 }
 0x246   : > { %v2621_v38 = vpack.c.bf16 %v2589_v52, %v2589_v52  ;;  %v2700_v14 = vunpack.c.l.bf16 %v2620_v8  ;;  %v3061_v39 = vmul.f32 %v8614_v25, %v3012_v29  ;;  %v3401_v62 = vunpack.c.l.bf16 %v3352_v49  ;;  %v3978_v8 = vld [vmem:[#allocation2 + $0x33c] sm:$0xc] }
 0x247   : > { %v3062_v16 = vmul.f32 %v8614_v25, %v3013_v33  ;;  %v3063_v17 = vmul.f32 %v8614_v25, %v3014_v57  ;;  %v3448_v59 = vmul.f32 %v8628_v43, %v3399_v45  ;;  %v3449_v13 = vmul.f32 %v8628_v43, %v3400_v63  ;;  %v3979_v63 = vld [vmem:[#allocation2 + $0x340] sm:$0xf] }
 0x248   : > { %v2701_v47 = vunpack.c.l.bf16 %v2621_v38  ;;  %v2771_v28 = vrot.slane %v2700_v14, 4  ;;  %v3109_v50 = vpack.c.bf16 %v3061_v39, %v3061_v39  ;;  %v3450_v12 = vmul.f32 %v8628_v43, %v3401_v62 }
 0x249   : > { %v3110_v34 = vpack.c.bf16 %v3062_v16, %v3062_v16  ;;  %v3111_v27 = vpack.c.bf16 %v3063_v17, %v3063_v17  ;;  %v3496_v48 = vpack.c.bf16 %v3448_v59, %v3448_v59  ;;  %v3497_v19 = vpack.c.bf16 %v3449_v13, %v3449_v13 }
 0x24a   : > { %v2772_v61 = vrot.slane %v2701_v47, 4  ;;  %v2867_v18 = vadd.f32 %v2771_v28, %v2659_v41  ;;  %v3205_v32 = vunpack.c.l.bf16 %v3109_v50  ;;  %v3498_v24 = vpack.c.bf16 %v3450_v12, %v3450_v12  ;;  %v3980_v41 = vld [vmem:[#allocation2 + $0x344] sm:$0x3] }
 0x24b   : > { %v3206_v26 = vunpack.c.l.bf16 %v3110_v34  ;;  %v3207_v7 = vunpack.c.l.bf16 %v3111_v27  ;;  %v7544_v49 = vunpack.c.l.bf16 %v7745_v31  ;;  %v7545_v52 = vunpack.c.h.bf16 %v7745_v31 }
 0x24c   : > { %v2773_v29 = vsel %vm1735_vm4, %v2771_v28, %v2772_v61  ;;  %v2869_v33 = vadd.f32 %v2772_v61, %v2661_v10  ;;  %v2915_v57 = vpack.c.bf16 %v2867_v18, %v2867_v18  ;;  %v3674_v45 = vunpack.c.l.bf16 %v3496_v48 }
 0x24d   : > { %v2868_v38 = vadd.f32 %v2773_v29, %v2660_v60  ;;  %v3603_v14 = vmul.f32 %v7544_v49, %v8622_v40  ;;  %v3604_v39 = vmul.f32 %v7545_v52, %v8622_v40  ;;  %v3675_v62 = vunpack.c.l.bf16 %v3497_v19 }
 0x24e   : > { %v2917_v16 = vpack.c.bf16 %v2869_v33, %v2869_v33  ;;  %v3157_v17 = vunpack.c.l.bf16 %v2915_v57  ;;  %v3676_v59 = vunpack.c.l.bf16 %v3498_v24  ;;  %v4030_v13 = vunpack.c.l.bf16 %v3978_v8 }
 0x24f   : > { %v2916_v47 = vpack.c.bf16 %v2868_v38, %v2868_v38  ;;  %v3635_v50 = vpack.c.bf16 %v3603_v14, %v3603_v14  ;;  %v3636_v12 = vpack.c.bf16 %v3604_v39, %v3604_v39  ;;  %v4031_v31 = vunpack.c.l.bf16 %v3979_v63  ;;  %v985_v63 = vpop.f32.mrf.mxu0 }
 0x250   : > { %v3159_v28 = vunpack.c.l.bf16 %v2917_v16  ;;  %v3253_v10 = vadd.f32 %v3205_v32, %v3157_v17  ;;  %v4032_v34 = vunpack.c.l.bf16 %v3980_v41  ;;  %v4079_v27 = vmul.f32 %v8659_v11, %v4030_v13  ;;  %v7366_v32 = vld [vmem:[#allocation7 + $0x78] sm:$0xff] }
 0x251   : > { %v3158_v60 = vunpack.c.l.bf16 %v2916_v47  ;;  %v3715_v48 = vunpack.c.l.bf16 %v3635_v50  ;;  %v3716_v61 = vunpack.c.l.bf16 %v3636_v12  ;;  %v4080_v18 = vmul.f32 %v8659_v11, %v4031_v31  ;;  %5329 = vmatpush.bf16.msra.mxu3 %v7366_v32 }
 0x252   : > { %v3255_v19 = vadd.f32 %v3207_v7, %v3159_v28  ;;  %v3301_v49 = vpack.c.bf16 %v3253_v10, %v3253_v10  ;;  %v4081_v52 = vmul.f32 %v8659_v11, %v4032_v34  ;;  %v4127_v24 = vpack.c.bf16 %v4079_v27, %v4079_v27  ;;  %v407_v28 = vld [vmem:[%s8149_s18 + $0xb0] sm:$0xff] }
 0x253   : > { %v3254_v8 = vadd.f32 %v3206_v26, %v3158_v60  ;;  %v3786_v29 = vrot.slane %v3715_v48, 4  ;;  %v3787_v33 = vrot.slane %v3716_v61, 4  ;;  %v4128_v57 = vpack.c.bf16 %v4080_v18, %v4080_v18  ;;  %v7365_v26 = vld [vmem:[#allocation7 + $0x70] sm:$0xff] }
 0x254   : > { %v3303_v38 = vpack.c.bf16 %v3255_v19, %v3255_v19  ;;  %v4129_v14 = vpack.c.bf16 %v4081_v52, %v4081_v52  ;;  %v4223_v39 = vunpack.c.l.bf16 %v4127_v24  ;;  %v4367_v41 = vunpack.c.l.bf16 %v2287_v9 }
 0x255   : > { %v3302_v16 = vpack.c.bf16 %v3254_v8, %v3254_v8  ;;  %v3788_v7 = vsel %vm1735_vm4, %v3786_v29, %v3787_v33  ;;  %v3882_v17 = vadd.f32 %v3786_v29, %v3674_v45  ;;  %v3884_v13 = vadd.f32 %v3787_v33, %v3676_v59  ;;  %5330 = vmatpush.bf16.msra.mxu3 %v7365_v26  ;;  %v611_v26 = vld [vmem:[#allocation2 + $0x35c] sm:$0xf] }
 0x256   : > { %v3883_v47 = vadd.f32 %v3788_v7, %v3675_v62  ;;  %v4224_v50 = vunpack.c.l.bf16 %v4128_v57  ;;  %v4225_v12 = vunpack.c.l.bf16 %v4129_v14  ;;  %v4368_v31 = vunpack.c.l.bf16 %v2288_v15  ;;  %v408_v62 = vld [vmem:[%s8149_s18 + $0xb8] sm:$0xff]  ;;  %v546_v14 = vld [vmem:[#allocation2 + $0x11c] sm:$0xf]  ;;  %s7009_s18 = sshll.u32 %s10585_s20, 4  ;;  %s7010_s18 = int_to_ptr.vmem [resolvable:$true] %s7009_s18 }
 0x257   : > { %v3930_v10 = vpack.c.bf16 %v3882_v17, %v3882_v17  ;;  %v3932_v34 = vpack.c.bf16 %v3884_v13, %v3884_v13  ;;  %v4369_v23 = vunpack.c.l.bf16 %v2289_v20  ;;  %v4415_v9 = vunpack.c.l.bf16 %v3301_v49  ;;  %v988_v49 = vpop.f32.mrf.mxu0 }
 0x258   : > { %v3931_v45 = vpack.c.bf16 %v3883_v47, %v3883_v47  ;;  %v4416_v59 = vunpack.c.l.bf16 %v3302_v16  ;;  %v4417_v27 = vunpack.c.l.bf16 %v3303_v38  ;;  %v986_v60 = vadd.f32 %v9222_v35, %v985_v63 }
 0x259   : > { %v4175_v48 = vunpack.c.l.bf16 %v3930_v10  ;;  %v4177_v61 = vunpack.c.l.bf16 %v3932_v34  ;;  %v4463_v18 = vadd.f32 %v4415_v9, %v4367_v41  ;;  %v439_v15 = vpack.c.bf16 %v407_v28, %v407_v28  ;;  %v760_v41 = vld [vmem:[#allocation2 + $0x23c] sm:$0xf]  ;;  %5331 = vmatpush.bf16.msra.mxu3 %v7364_v54  ;;  %v1319_v9 = vld [vmem:[#allocation2 + $0x110] sm:$0x3] }
 0x25a   : > { %v4176_v19 = vunpack.c.l.bf16 %v3931_v45  ;;  %v4464_v52 = vadd.f32 %v4416_v59, %v4368_v31  ;;  %v4465_v24 = vadd.f32 %v4417_v27, %v4369_v23  ;;  %v1058_v8 = vmax.f32 %v986_v60, 0.0  ;;  %v1318_v23 = vld [vmem:[#allocation2 + $0x10c] sm:$0xf]  ;;  %v7714_v45 = vld [vmem:[#allocation2 + $0x110] sm:$0xff]  }
 0x25b   : > { %v4271_v29 = vadd.f32 %v4223_v39, %v4175_v48  ;;  %v4273_v1 = vadd.f32 %v4225_v12, %v4177_v61  ;;  %v4511_v20 = vpack.c.bf16 %v4463_v18, %v4463_v18  ;;  %v440_v33 = vpack.c.bf16 %v408_v62, %v408_v62  ;;  %813 = vst.msk [vmem:[#allocation2 + $0x278] sm:$0xf] %vm449_vm0, %v439_v15  ;;  %v7363_v39 = vld [vmem:[#allocation7 + $0x60] sm:$0xff] }
 0x25c   : > { %v4272_v57 = vadd.f32 %v4224_v50, %v4176_v19  ;;  %v4512_v63 = vpack.c.bf16 %v4464_v52, %v4464_v52  ;;  %v4513_v32 = vpack.c.bf16 %v4465_v24, %v4465_v24  ;;  %v1087_v38 = vpack.c.bf16 %v1058_v8, %v1057_v58 }
 0x25d   : > { %v4319_v16 = vpack.c.bf16 %v4271_v29, %v4271_v29  ;;  %v4321_v7 = vpack.c.bf16 %v4273_v1, %v4273_v1  ;;  %v4559_v17 = vunpack.c.l.bf16 %v4511_v20  ;;  %v9297_v13 = vadd.f32 %v9222_v35, %v988_v49  ;;  %814 = vst.msk [vmem:[#allocation2 + $0x27c] sm:$0xf] %vm449_vm0, %v440_v33  ;;  %5332 = vmatpush.bf16.msra.mxu3 %v7363_v39 }
 0x25e   : > { %v4320_v47 = vpack.c.bf16 %v4272_v57, %v4272_v57  ;;  %v4560_v50 = vunpack.c.l.bf16 %v4512_v63  ;;  %v4561_v12 = vunpack.c.l.bf16 %v4513_v32  ;;  %1183 = vmatmul.bf16.gmra.mxu1 %v1087_v38  ;;  %v883_v31 = vunpack.c.l.b16 %v439_v15  ;;  %v1952_v32 = vld [vmem:[#allocation2 + $0x114] sm:$0xc]  ;;  %v1953_v38 = vld [vmem:[#allocation2 + $0x118] sm:$0xf] }
 0x25f   : > { %v4607_v58 = vunpack.c.l.bf16 %v4319_v16  ;;  %v4609_v28 = vunpack.c.l.bf16 %v4321_v7  ;;  %v1059_v10 = vmax.f32 %v9297_v13, 0.0  ;;  %v884_v34 = vunpack.c.l.b16 %v440_v33  ;;  %v7715_v13 = vld [vmem:[#allocation2 + $0x128] sm:$0xff]  }
 0x260   : > { %v4608_v59 = vunpack.c.l.bf16 %v4320_v47  ;;  %v547_v27 = vsel %vm8160_vm2, 0, %v546_v14  ;;  %v612_v60 = vsel %vm8160_vm2, 0, %v611_v26  ;;  %v761_v62 = vsel %vm8160_vm2, 0, %v760_v41 }
 0x261   : > { %v4655_v48 = vadd.f32 %v4607_v58, %v4559_v17  ;;  %v4657_v61 = vadd.f32 %v4609_v28, %v4561_v12  ;;  %v904_v18 = vpack.c.b16 %v884_v34, %v883_v31  ;;  %548 = vst [vmem:[#allocation2 + $0x11c] sm:$0xf] %v547_v27  ;;  %v1369_v54 = vunpack.c.l.bf16 %v1317_v42  ;;  %v2338_v58 = vld [vmem:[#allocation2 + $0x228] sm:$0xc] }
 0x262   : > { %v4656_v15 = vadd.f32 %v4608_v59, %v4560_v50  ;;  %613 = vst [vmem:[#allocation2 + $0x35c] sm:$0xf] %v612_v60  ;;  %v1370_v19 = vunpack.c.l.bf16 %v1318_v23  ;;  %v1371_v52 = vunpack.c.l.bf16 %v1319_v9  ;;  %v7420_v24 = vunpack.c.l.bf16 %v7714_v45 }
 0x263   : > { %v4703_v8 = vpack.c.bf16 %v4655_v48, %v4655_v48  ;;  %v4705_v29 = vpack.c.bf16 %v4657_v61, %v4657_v61  ;;  %7130 = vmatmul.msk.bf16.gmra.mxu0 %vm915_vm3, %v904_v18  ;;  %762 = vst [vmem:[#allocation2 + $0x23c] sm:$0xf] %v761_v62  ;;  %v1418_v1 = vmul.f32 %v8552_v2, %v1369_v54  ;;  %v7421_v20 = vunpack.c.h.bf16 %v7714_v45  ;;  %v2339_v48 = vld [vmem:[#allocation2 + $0x22c] sm:$0xf] }
 0x264   : > { %v4704_v49 = vpack.c.bf16 %v4656_v15, %v4656_v15  ;;  %v1419_v33 = vmul.f32 %v8552_v2, %v1370_v19  ;;  %v1420_v57 = vmul.f32 %v8552_v2, %v1371_v52  ;;  %v1575_v63 = vmul.f32 %v7420_v24, %v8531_v53 }
 0x265   : > { %v7174_v14 = vrot.slane %v4703_v8, 10  ;;  %v4835_v41 = vrot.slane %v4705_v29, 6  ;;  %v1466_v16 = vpack.c.bf16 %v1418_v1, %v1418_v1  ;;  %v1576_v7 = vmul.f32 %v7421_v20, %v8531_v53 }
 0x266   : > { %v4832_v17 = vrot.slane %v4704_v49, 6  ;;  %v1467_v39 = vpack.c.bf16 %v1419_v33, %v1419_v33  ;;  %v1468_v26 = vpack.c.bf16 %v1420_v57, %v1420_v57  ;;  %v1607_v47 = vpack.c.bf16 %v1575_v63, %v1575_v63  ;;  %v2340_v49 = vld [vmem:[#allocation2 + $0x230] sm:$0x3] }
 0x267   : > { %v1608_v50 = vpack.c.bf16 %v1576_v7, %v1576_v7  ;;  %v1647_v12 = vunpack.c.l.bf16 %v1466_v16  ;;  %v2001_v31 = vunpack.c.l.bf16 %v1952_v32  ;;  %v2002_v42 = vunpack.c.l.bf16 %v1953_v38 }
 0x268   : > { %v4833_v28 = vsel %vm8788_vm7, %v7174_v14, %v4832_v17  ;;  %v4834_v34 = vrot.slane %v4832_v17, 4  ;;  %v1648_v23 = vunpack.c.l.bf16 %v1467_v39  ;;  %v1649_v9 = vunpack.c.l.bf16 %v1468_v26  ;;  %v1954_v45 = vld [vmem:[#allocation2 + $0x11c] sm:$0x3] }
 0x269   : > { %v4939_v59 = vunpack.c.l.bf16 %v4833_v28  ;;  %v1687_v27 = vunpack.c.l.bf16 %v1607_v47  ;;  %v1688_v60 = vunpack.c.l.bf16 %v1608_v50  ;;  %v2003_v62 = vunpack.c.l.bf16 %v1954_v45  ;;  %v7730_v50 = vld [vmem:[#allocation2 + $0x230] sm:$0xff]  }
 0x26a   : > { %v4836_v61 = vsel %vm8788_vm7, %v4834_v34, %v4835_v41  ;;  %v2050_v18 = vmul.f32 %v8590_v51, %v2001_v31  ;;  %v2051_v54 = vmul.f32 %v8590_v51, %v2002_v42  ;;  %v2387_v15 = vunpack.c.l.bf16 %v2338_v58 }
 0x26b   : > { %v4940_v19 = vunpack.c.l.bf16 %v4836_v61  ;;  %v4972_v52 = vadd.f32 %v8759_v37, %v4939_v59  ;;  %v1760_v24 = vrot.slane %v1687_v27, 4  ;;  %v1761_v8 = vrot.slane %v1688_v60, 4 }
 0x26c   : > { %v2052_v29 = vmul.f32 %v8590_v51, %v2003_v62  ;;  %v2098_v1 = vpack.c.bf16 %v2050_v18, %v2050_v18  ;;  %v2099_v20 = vpack.c.bf16 %v2051_v54, %v2051_v54  ;;  %v2388_v33 = vunpack.c.l.bf16 %v2339_v48  ;;  %v2966_v54 = vld [vmem:[#allocation2 + $0x234] sm:$0xc] }
 0x26d   : > { %v4973_v57 = vadd.f32 %v8759_v37, %v4940_v19  ;;  %v5004_v63 = vmax.f32 %v4972_v52, 0.0  ;;  %v1762_v32 = vsel %vm1735_vm4, %v1760_v24, %v1761_v8  ;;  %v1856_v38 = vadd.f32 %v1760_v24, %v1647_v12 }
 0x26e   : > { %v1857_v14 = vadd.f32 %v1762_v32, %v1648_v23  ;;  %v1858_v41 = vadd.f32 %v1761_v8, %v1649_v9  ;;  %v2100_v16 = vpack.c.bf16 %v2052_v29, %v2052_v29  ;;  %v2194_v7 = vunpack.c.l.bf16 %v2098_v1  ;;  %v2967_v8 = vld [vmem:[#allocation2 + $0x238] sm:$0xf]  ;;  %v2968_v29 = vld [vmem:[#allocation2 + $0x23c] sm:$0x3]  ;;  %v3353_v1 = vld [vmem:[#allocation2 + $0x348] sm:$0xc] }
 0x26f   : > { %v5005_v17 = vmax.f32 %v4973_v57, 0.0  ;;  %v1904_v39 = vpack.c.bf16 %v1856_v38, %v1856_v38  ;;  %v2195_v26 = vunpack.c.l.bf16 %v2099_v20  ;;  %v2389_v47 = vunpack.c.l.bf16 %v2340_v49  ;;  %v3355_v32 = vld [vmem:[#allocation2 + $0x350] sm:$0x3] }
 0x270   : > { %v1905_v31 = vpack.c.bf16 %v1857_v14, %v1857_v14  ;;  %v1906_v42 = vpack.c.bf16 %v1858_v41, %v1858_v41  ;;  %v2196_v58 = vunpack.c.l.bf16 %v2100_v16  ;;  %v2436_v28 = vmul.f32 %v8554_v4, %v2387_v15 }
 0x271   : > { %v5029_v34 = vpack.c.bf16 %v5005_v17, %v5004_v63  ;;  %v2146_v45 = vunpack.c.l.bf16 %v1904_v39  ;;  %v2437_v59 = vmul.f32 %v8554_v4, %v2388_v33  ;;  %v2438_v12 = vmul.f32 %v8554_v4, %v2389_v47  ;;  %v3354_v63 = vld [vmem:[#allocation2 + $0x34c] sm:$0xf] }
 0x272   : > { %v2147_v23 = vunpack.c.l.bf16 %v1905_v31  ;;  %v2148_v9 = vunpack.c.l.bf16 %v1906_v42  ;;  %v2484_v27 = vpack.c.bf16 %v2436_v28, %v2436_v28  ;;  %v7484_v60 = vunpack.c.l.bf16 %v7730_v50 }
 0x273   : > { %7194 = vmatmul.msk.bf16.gmra.mxu2 %vm915_vm3, %v5029_v34  ;;  %v9327_v62 = vadd.f32 %v2194_v7, %v2146_v45  ;;  %v2485_v48 = vpack.c.bf16 %v2437_v59, %v2437_v59  ;;  %v2486_v61 = vpack.c.bf16 %v2438_v12, %v2438_v12  ;;  %v7485_v18 = vunpack.c.h.bf16 %v7730_v50 }
 0x274   : > { %v9329_v19 = vadd.f32 %v2195_v26, %v2147_v23  ;;  %v9331_v15 = vadd.f32 %v2196_v58, %v2148_v9  ;;  %v2590_v52 = vmul.f32 %v7484_v60, %v8579_v30  ;;  %v2662_v24 = vunpack.c.l.bf16 %v2484_v27 }
 0x275   : > { %v2290_v20 = vpack.c.bf16 %v9327_v62, %v9327_v62  ;;  %v2591_v49 = vmul.f32 %v7485_v18, %v8579_v30  ;;  %v2663_v33 = vunpack.c.l.bf16 %v2485_v48  ;;  %v2664_v57 = vunpack.c.l.bf16 %v2486_v61  ;;  %v7746_v18 = vld [vmem:[#allocation2 + $0x350] sm:$0xff]  }
 0x276   : > { %v2291_v38 = vpack.c.bf16 %v9329_v19, %v9329_v19  ;;  %v2292_v14 = vpack.c.bf16 %v9331_v15, %v9331_v15  ;;  %v2622_v41 = vpack.c.bf16 %v2590_v52, %v2590_v52  ;;  %v3015_v16 = vunpack.c.l.bf16 %v2966_v54 }
 0x277   : > { %v2623_v7 = vpack.c.bf16 %v2591_v49, %v2591_v49  ;;  %v3016_v17 = vunpack.c.l.bf16 %v2967_v8  ;;  %v3017_v39 = vunpack.c.l.bf16 %v2968_v29  ;;  %v3402_v26 = vunpack.c.l.bf16 %v3353_v1 }
 0x278   : > { %v2702_v47 = vunpack.c.l.bf16 %v2622_v41  ;;  %v3064_v50 = vmul.f32 %v8614_v25, %v3015_v16  ;;  %v3403_v31 = vunpack.c.l.bf16 %v3354_v63  ;;  %v3404_v42 = vunpack.c.l.bf16 %v3355_v32 }
 0x279   : > { %v2703_v58 = vunpack.c.l.bf16 %v2623_v7  ;;  %v3065_v28 = vmul.f32 %v8614_v25, %v3016_v17  ;;  %v3066_v34 = vmul.f32 %v8614_v25, %v3017_v39  ;;  %v3451_v45 = vmul.f32 %v8628_v43, %v3402_v26  ;;  %v3981_v39 = vld [vmem:[#allocation2 + $0x354] sm:$0xc]  ;;  %v3982_v26 = vld [vmem:[#allocation2 + $0x358] sm:$0xf] }
 0x27a   : > { %v2774_v59 = vrot.slane %v2702_v47, 4  ;;  %v3112_v12 = vpack.c.bf16 %v3064_v50, %v3064_v50  ;;  %v3452_v23 = vmul.f32 %v8628_v43, %v3403_v31  ;;  %v3453_v9 = vmul.f32 %v8628_v43, %v3404_v42  ;;  %v3983_v47 = vld [vmem:[#allocation2 + $0x35c] sm:$0x3] }
 0x27b   : > { %v2775_v27 = vrot.slane %v2703_v58, 4  ;;  %v3113_v60 = vpack.c.bf16 %v3065_v28, %v3065_v28  ;;  %v3114_v48 = vpack.c.bf16 %v3066_v34, %v3066_v34  ;;  %v3499_v61 = vpack.c.bf16 %v3451_v45, %v3451_v45 }
 0x27c   : > { %v2870_v54 = vadd.f32 %v2774_v59, %v2662_v24  ;;  %v3208_v52 = vunpack.c.l.bf16 %v3112_v12  ;;  %v3500_v8 = vpack.c.bf16 %v3452_v23, %v3452_v23  ;;  %v3501_v29 = vpack.c.bf16 %v3453_v9, %v3453_v9 }
 0x27d   : > { %v2776_v1 = vsel %vm1735_vm4, %v2774_v59, %v2775_v27  ;;  %v2872_v49 = vadd.f32 %v2775_v27, %v2664_v57  ;;  %v3209_v63 = vunpack.c.l.bf16 %v3113_v60  ;;  %v3210_v32 = vunpack.c.l.bf16 %v3114_v48 }
 0x27e   : > { %v2871_v41 = vadd.f32 %v2776_v1, %v2663_v33  ;;  %v2918_v16 = vpack.c.bf16 %v2870_v54, %v2870_v54  ;;  %v7548_v7 = vunpack.c.l.bf16 %v7746_v18  ;;  %v7549_v17 = vunpack.c.h.bf16 %v7746_v18 }
 0x27f   : > { %v2920_v50 = vpack.c.bf16 %v2872_v49, %v2872_v49  ;;  %v3677_v31 = vunpack.c.l.bf16 %v3499_v61  ;;  %v3678_v42 = vunpack.c.l.bf16 %v3500_v8  ;;  %v3679_v58 = vunpack.c.l.bf16 %v3501_v29 }
 0x280   : > { %v2919_v24 = vpack.c.bf16 %v2871_v41, %v2871_v41  ;;  %v3160_v28 = vunpack.c.l.bf16 %v2918_v16  ;;  %v3605_v34 = vmul.f32 %v7548_v7, %v8622_v40  ;;  %v3606_v45 = vmul.f32 %v7549_v17, %v8622_v40 }
 0x281   : > { %v3162_v57 = vunpack.c.l.bf16 %v2920_v50  ;;  %v4033_v59 = vunpack.c.l.bf16 %v3981_v39  ;;  %v4034_v12 = vunpack.c.l.bf16 %v3982_v26  ;;  %v4035_v33 = vunpack.c.l.bf16 %v3983_v47  ;;  %v990_v47 = vpop.f32.mrf.mxu0  ;;  %v5104_v50 = vpop.f32.mrf.mxu2 }
 0x282   : > { %v3161_v23 = vunpack.c.l.bf16 %v2919_v24  ;;  %v3256_v9 = vadd.f32 %v3208_v52, %v3160_v28  ;;  %v3637_v27 = vpack.c.bf16 %v3605_v34, %v3605_v34  ;;  %v3638_v60 = vpack.c.bf16 %v3606_v45, %v3606_v45  ;;  %v7362_v24 = vld [vmem:[#allocation7 + $0x58] sm:$0xff] }
 0x283   : > { %v3258_v48 = vadd.f32 %v3210_v32, %v3162_v57  ;;  %v4082_v18 = vmul.f32 %v8659_v11, %v4033_v59  ;;  %v4083_v61 = vmul.f32 %v8659_v11, %v4034_v12  ;;  %v4084_v54 = vmul.f32 %v8659_v11, %v4035_v33  ;;  %v1291_v57 = vld [vmem:[%s10751_s7] sm:$0x7]  ;;  %5333 = vmatpush.bf16.msra.mxu3 %v7362_v24 }
 0x284   : > { %v3257_v8 = vadd.f32 %v3209_v63, %v3161_v23  ;;  %v3304_v29 = vpack.c.bf16 %v3256_v9, %v3256_v9  ;;  %v3717_v1 = vunpack.c.l.bf16 %v3637_v27  ;;  %v3718_v49 = vunpack.c.l.bf16 %v3638_v60 }
 0x285   : > { %v3306_v41 = vpack.c.bf16 %v3258_v48, %v3258_v48  ;;  %v4130_v16 = vpack.c.bf16 %v4082_v18, %v4082_v18  ;;  %v4131_v7 = vpack.c.bf16 %v4083_v61, %v4083_v61  ;;  %v4132_v17 = vpack.c.bf16 %v4084_v54, %v4084_v54 }
 0x286   : > { %v3305_v39 = vpack.c.bf16 %v3257_v8, %v3257_v8  ;;  %v3789_v26 = vrot.slane %v3717_v1, 4  ;;  %v3790_v52 = vrot.slane %v3718_v49, 4  ;;  %v4370_v32 = vunpack.c.l.bf16 %v2290_v20  ;;  %v7361_v20 = vld [vmem:[#allocation7 + $0x50] sm:$0xff] }
 0x287   : > { %v4226_v28 = vunpack.c.l.bf16 %v4130_v16  ;;  %v4227_v34 = vunpack.c.l.bf16 %v4131_v7  ;;  %v4228_v63 = vunpack.c.l.bf16 %v4132_v17  ;;  %v4371_v45 = vunpack.c.l.bf16 %v2291_v38  ;;  %5334 = vmatpush.bf16.msra.mxu3 %v7361_v20  ;;  %v7360_v16 = vld [vmem:[#allocation7 + $0x48] sm:$0xff] }
 0x288   : > { %v3791_v59 = vsel %vm1735_vm4, %v3789_v26, %v3790_v52  ;;  %v3885_v12 = vadd.f32 %v3789_v26, %v3677_v31  ;;  %v3887_v33 = vadd.f32 %v3790_v52, %v3679_v58  ;;  %v4372_v62 = vunpack.c.l.bf16 %v2292_v14 }
 0x289   : > { %v3886_v23 = vadd.f32 %v3791_v59, %v3678_v42  ;;  %v4418_v9 = vunpack.c.l.bf16 %v3304_v29  ;;  %v4419_v27 = vunpack.c.l.bf16 %v3305_v39  ;;  %v4420_v60 = vunpack.c.l.bf16 %v3306_v41  ;;  %v993_v52 = vpop.f32.mrf.mxu0 }
 0x28a   : > { %v3933_v19 = vpack.c.bf16 %v3885_v12, %v3885_v12  ;;  %v3935_v38 = vpack.c.bf16 %v3887_v33, %v3887_v33  ;;  %v991_v48 = vadd.f32 %v9222_v35, %v990_v47  ;;  %v9367_v18 = vperm.slane %v1291_v57, 0  ;;  %v554_v47 = vld [vmem:[#allocation2 + $0x134] sm:$0xf] }
 0x28b   : > { %v3934_v61 = vpack.c.bf16 %v3886_v23, %v3886_v23  ;;  %v4466_v54 = vadd.f32 %v4418_v9, %v4370_v32  ;;  %v4467_v31 = vadd.f32 %v4419_v27, %v4371_v45  ;;  %v4468_v58 = vadd.f32 %v4420_v60, %v4372_v62  ;;  %v5106_v32 = vpop.f32.mrf.mxu2  ;;  %v764_v62 = vld [vmem:[#allocation2 + $0x254] sm:$0xf]  ;;  %5335 = vmatpush.bf16.msra.mxu3 %v7360_v16  ;;  %v1320_v27 = vld [vmem:[#allocation2 + $0x120] sm:$0xc]  ;;  %v1321_v60 = vld [vmem:[#allocation2 + $0x124] sm:$0xf] }
 0x28c   : > { %v4178_v8 = vunpack.c.l.bf16 %v3933_v19  ;;  %v4180_v1 = vunpack.c.l.bf16 %v3935_v38  ;;  %v1060_v15 = vmax.f32 %v991_v48, 0.0  ;;  %v9370_v14 = vadd.f32 %v5104_v50, %v9367_v18  ;;  %v7359_v23 = vld [vmem:[#allocation7 + $0x40] sm:$0xff] }
 0x28d   : > { %v4179_v42 = vunpack.c.l.bf16 %v3934_v61  ;;  %v4514_v29 = vpack.c.bf16 %v4466_v54, %v4466_v54  ;;  %v4515_v49 = vpack.c.bf16 %v4467_v31, %v4467_v31  ;;  %v4516_v41 = vpack.c.bf16 %v4468_v58, %v4468_v58  ;;  %v1322_v61 = vld [vmem:[#allocation2 + $0x128] sm:$0x3] }
 0x28e   : > { %v4274_v7 = vadd.f32 %v4226_v28, %v4178_v8  ;;  %v4276_v17 = vadd.f32 %v4228_v63, %v4180_v1  ;;  %v5184_v39 = vmax.f32 %v9370_v14, 0.0  ;;  %v1088_v26 = vpack.c.bf16 %v1060_v15, %v1059_v10  ;;  %v619_v63 = vld [vmem:[#allocation2 + $0x374] sm:$0xf] }
 0x28f   : > { %v4275_v24 = vadd.f32 %v4227_v34, %v4179_v42  ;;  %v4562_v45 = vunpack.c.l.bf16 %v4514_v29  ;;  %v4563_v50 = vunpack.c.l.bf16 %v4515_v49  ;;  %v4564_v57 = vunpack.c.l.bf16 %v4516_v41  ;;  %5336 = vmatpush.bf16.msra.mxu3 %v7359_v23 }
 0x290   : > { %v4322_v59 = vpack.c.bf16 %v4274_v7, %v4274_v7  ;;  %v4324_v12 = vpack.c.bf16 %v4276_v17, %v4276_v17  ;;  %1188 = vmatmul.bf16.gmra.mxu1 %v1088_v26  ;;  %v9376_v33 = vadd.f32 %v9222_v35, %v993_v52  ;;  %v9379_v28 = vadd.f32 %v5106_v32, %v9367_v18 }
 0x291   : > { %v4323_v10 = vpack.c.bf16 %v4275_v24, %v4275_v24  ;;  %v885_v20 = vunpack.c.l.b16 %v8522_v46  ;;  %v886_v34 = vunpack.c.l.b16 %v8535_v55  ;;  %v555_v9 = vsel %vm8160_vm2, 0, %v554_v47 }
 0x292   : > { %v4610_v35 = vunpack.c.l.bf16 %v4322_v59  ;;  %v4612_v19 = vunpack.c.l.bf16 %v4324_v12  ;;  %v1061_v38 = vmax.f32 %v9376_v33, 0.0  ;;  %v5185_v48 = vmax.f32 %v9379_v28, 0.0  ;;  %556 = vst [vmem:[#allocation2 + $0x134] sm:$0xf] %v555_v9  ;;  %v768_v33 = vld [vmem:[#allocation2 + $0x26c] sm:$0xf] }
 0x293   : > { %v4611_v54 = vunpack.c.l.bf16 %v4323_v10  ;;  %v905_v31 = vpack.c.b16 %v886_v34, %v885_v20  ;;  %v620_v46 = vsel %vm8160_vm2, 0, %v619_v63  ;;  %v765_v55 = vsel %vm8160_vm2, 0, %v764_v62 }
 0x294   : > { %v4658_v58 = vadd.f32 %v4610_v35, %v4562_v45  ;;  %v4660_v8 = vadd.f32 %v4612_v19, %v4564_v57  ;;  %621 = vst [vmem:[#allocation2 + $0x374] sm:$0xf] %v620_v46  ;;  %v1372_v1 = vunpack.c.l.bf16 %v1320_v27  ;;  %v1373_v15 = vunpack.c.l.bf16 %v1321_v60  ;;  %v1955_v45 = vld [vmem:[#allocation2 + $0x12c] sm:$0xc]  ;;  %v2341_v35 = vld [vmem:[#allocation2 + $0x240] sm:$0xc] }
 0x295   : > { %v4659_v42 = vadd.f32 %v4611_v54, %v4563_v50  ;;  %7131 = vmatmul.msk.bf16.gmra.mxu0 %vm915_vm3, %v905_v31  ;;  %766 = vst [vmem:[#allocation2 + $0x254] sm:$0xf] %v765_v55  ;;  %v1374_v29 = vunpack.c.l.bf16 %v1322_v61  ;;  %v7424_v49 = vunpack.c.l.bf16 %v7715_v13  ;;  %v7425_v41 = vunpack.c.h.bf16 %v7715_v13  ;;  %v1956_v50 = vld [vmem:[#allocation2 + $0x130] sm:$0xf] }
 0x296   : > { %v4706_v16 = vpack.c.bf16 %v4658_v58, %v4658_v58  ;;  %v4708_v7 = vpack.c.bf16 %v4660_v8, %v4660_v8  ;;  %v1421_v17 = vmul.f32 %v8552_v2, %v1372_v1  ;;  %v1422_v26 = vmul.f32 %v8552_v2, %v1373_v15  ;;  %v2342_v1 = vld [vmem:[#allocation2 + $0x244] sm:$0xf] }
 0x297   : > { %v4707_v52 = vpack.c.bf16 %v4659_v42, %v4659_v42  ;;  %v1423_v32 = vmul.f32 %v8552_v2, %v1374_v29  ;;  %v1577_v47 = vmul.f32 %v7424_v49, %v8531_v53  ;;  %v1578_v24 = vmul.f32 %v7425_v41, %v8531_v53 }
 0x298   : > { %v7175_v57 = vrot.slane %v4706_v16, 10  ;;  %v4842_v59 = vrot.slane %v4708_v7, 6  ;;  %v1469_v12 = vpack.c.bf16 %v1421_v17, %v1421_v17  ;;  %v1470_v63 = vpack.c.bf16 %v1422_v26, %v1422_v26 }
 0x299   : > { %v4839_v62 = vrot.slane %v4707_v52, 6  ;;  %v1471_v13 = vpack.c.bf16 %v1423_v32, %v1423_v32  ;;  %v1609_v10 = vpack.c.bf16 %v1577_v47, %v1577_v47  ;;  %v1610_v20 = vpack.c.bf16 %v1578_v24, %v1578_v24  ;;  %v1957_v34 = vld [vmem:[#allocation2 + $0x134] sm:$0x3]  ;;  %v2343_v47 = vld [vmem:[#allocation2 + $0x248] sm:$0x3] }
 0x29a   : > { %v1650_v23 = vunpack.c.l.bf16 %v1469_v12  ;;  %v1651_v9 = vunpack.c.l.bf16 %v1470_v63  ;;  %v2004_v27 = vunpack.c.l.bf16 %v1955_v45  ;;  %v2005_v60 = vunpack.c.l.bf16 %v1956_v50 }
 0x29b   : > { %v4840_v19 = vsel %vm8788_vm7, %v7175_v57, %v4839_v62  ;;  %v4841_v61 = vrot.slane %v4839_v62, 4  ;;  %v1652_v54 = vunpack.c.l.bf16 %v1471_v13  ;;  %v1689_v31 = vunpack.c.l.bf16 %v1609_v10 }
 0x29c   : > { %v4941_v46 = vunpack.c.l.bf16 %v4840_v19  ;;  %v1690_v55 = vunpack.c.l.bf16 %v1610_v20  ;;  %v2006_v58 = vunpack.c.l.bf16 %v1957_v34  ;;  %v2053_v8 = vmul.f32 %v8590_v51, %v2004_v27 }
 0x29d   : > { %v4843_v15 = vsel %vm8788_vm7, %v4841_v61, %v4842_v59  ;;  %v1763_v42 = vrot.slane %v1689_v31, 4  ;;  %v2054_v29 = vmul.f32 %v8590_v51, %v2005_v60  ;;  %v2390_v49 = vunpack.c.l.bf16 %v2341_v35  ;;  %v7731_v60 = vld [vmem:[#allocation2 + $0x248] sm:$0xff]  }
 0x29e   : > { %v4942_v41 = vunpack.c.l.bf16 %v4843_v15  ;;  %v4974_v16 = vadd.f32 %v8759_v37, %v4941_v46  ;;  %v1764_v7 = vrot.slane %v1690_v55, 4  ;;  %v2055_v17 = vmul.f32 %v8590_v51, %v2006_v58 }
 0x29f   : > { %v1859_v26 = vadd.f32 %v1763_v42, %v1650_v23  ;;  %v2101_v52 = vpack.c.bf16 %v2053_v8, %v2053_v8  ;;  %v2102_v32 = vpack.c.bf16 %v2054_v29, %v2054_v29  ;;  %v2391_v24 = vunpack.c.l.bf16 %v2342_v1 }
 0x2a0   : > { %v4975_v45 = vadd.f32 %v8759_v37, %v4942_v41  ;;  %v5006_v50 = vmax.f32 %v4974_v16, 0.0  ;;  %v1765_v57 = vsel %vm1735_vm4, %v1763_v42, %v1764_v7  ;;  %v1861_v59 = vadd.f32 %v1764_v7, %v1652_v54  ;;  %v2969_v16 = vld [vmem:[#allocation2 + $0x24c] sm:$0xc] }
 0x2a1   : > { %v1860_v12 = vadd.f32 %v1765_v57, %v1651_v9  ;;  %v1907_v63 = vpack.c.bf16 %v1859_v26, %v1859_v26  ;;  %v2103_v62 = vpack.c.bf16 %v2055_v17, %v2055_v17  ;;  %v2197_v13 = vunpack.c.l.bf16 %v2101_v52 }
 0x2a2   : > { %v5007_v10 = vmax.f32 %v4975_v45, 0.0  ;;  %v1909_v20 = vpack.c.bf16 %v1861_v59, %v1861_v59  ;;  %v2198_v34 = vunpack.c.l.bf16 %v2102_v32  ;;  %v2392_v27 = vunpack.c.l.bf16 %v2343_v47  ;;  %v2971_v32 = vld [vmem:[#allocation2 + $0x254] sm:$0x3]  ;;  %v3356_v47 = vld [vmem:[#allocation2 + $0x360] sm:$0xc] }
 0x2a3   : > { %v1908_v23 = vpack.c.bf16 %v1860_v12, %v1860_v12  ;;  %v2149_v35 = vunpack.c.l.bf16 %v1907_v63  ;;  %v2199_v19 = vunpack.c.l.bf16 %v2103_v62  ;;  %v2439_v61 = vmul.f32 %v8554_v4, %v2390_v49  ;;  %v2970_v49 = vld [vmem:[#allocation2 + $0x250] sm:$0xf]  ;;  %v3358_v12 = vld [vmem:[#allocation2 + $0x368] sm:$0x3] }
 0x2a4   : > { %v5030_v31 = vpack.c.bf16 %v5007_v10, %v5006_v50  ;;  %v2151_v46 = vunpack.c.l.bf16 %v1909_v20  ;;  %v2440_v55 = vmul.f32 %v8554_v4, %v2391_v24  ;;  %v2441_v54 = vmul.f32 %v8554_v4, %v2392_v27  ;;  %v3357_v24 = vld [vmem:[#allocation2 + $0x364] sm:$0xf] }
 0x2a5   : > { %v2150_v9 = vunpack.c.l.bf16 %v1908_v23  ;;  %v9410_v58 = vadd.f32 %v2197_v13, %v2149_v35  ;;  %v2487_v8 = vpack.c.bf16 %v2439_v61, %v2439_v61  ;;  %v7488_v1 = vunpack.c.l.bf16 %v7731_v60 }
 0x2a6   : > { %7195 = vmatmul.msk.bf16.gmra.mxu2 %vm915_vm3, %v5030_v31  ;;  %v9413_v15 = vadd.f32 %v2199_v19, %v2151_v46  ;;  %v2488_v42 = vpack.c.bf16 %v2440_v55, %v2440_v55  ;;  %v2489_v29 = vpack.c.bf16 %v2441_v54, %v2441_v54  ;;  %v7489_v41 = vunpack.c.h.bf16 %v7731_v60 }
 0x2a7   : > { %v9415_v7 = vadd.f32 %v2198_v34, %v2150_v9  ;;  %v2293_v17 = vpack.c.bf16 %v9410_v58, %v9410_v58  ;;  %v2592_v26 = vmul.f32 %v7488_v1, %v8579_v30  ;;  %v2665_v52 = vunpack.c.l.bf16 %v2487_v8 }
 0x2a8   : > { %v2295_v45 = vpack.c.bf16 %v9413_v15, %v9413_v15  ;;  %v2593_v50 = vmul.f32 %v7489_v41, %v8579_v30  ;;  %v2666_v57 = vunpack.c.l.bf16 %v2488_v42  ;;  %v2667_v59 = vunpack.c.l.bf16 %v2489_v29  ;;  %v7747_v29 = vld [vmem:[#allocation2 + $0x368] sm:$0xff]  }
 0x2a9   : > { %v2294_v63 = vpack.c.bf16 %v9415_v7, %v9415_v7  ;;  %v2624_v62 = vpack.c.bf16 %v2592_v26, %v2592_v26  ;;  %v3018_v13 = vunpack.c.l.bf16 %v2969_v16  ;;  %v3019_v10 = vunpack.c.l.bf16 %v2970_v49 }
 0x2aa   : > { %v2625_v20 = vpack.c.bf16 %v2593_v50, %v2593_v50  ;;  %v3020_v34 = vunpack.c.l.bf16 %v2971_v32  ;;  %v3405_v27 = vunpack.c.l.bf16 %v3356_v47  ;;  %v3406_v60 = vunpack.c.l.bf16 %v3357_v24 }
 0x2ab   : > { %v2704_v23 = vunpack.c.l.bf16 %v2624_v62  ;;  %v3067_v35 = vmul.f32 %v8614_v25, %v3018_v13  ;;  %v3068_v19 = vmul.f32 %v8614_v25, %v3019_v10  ;;  %v3407_v61 = vunpack.c.l.bf16 %v3358_v12 }
 0x2ac   : > { %v2705_v31 = vunpack.c.l.bf16 %v2625_v20  ;;  %v3069_v46 = vmul.f32 %v8614_v25, %v3020_v34  ;;  %v3454_v55 = vmul.f32 %v8628_v43, %v3405_v27  ;;  %v3455_v54 = vmul.f32 %v8628_v43, %v3406_v60  ;;  %v3984_v20 = vld [vmem:[#allocation2 + $0x36c] sm:$0xc] }
 0x2ad   : > { %v2777_v9 = vrot.slane %v2704_v23, 4  ;;  %v3115_v8 = vpack.c.bf16 %v3067_v35, %v3067_v35  ;;  %v3116_v1 = vpack.c.bf16 %v3068_v19, %v3068_v19  ;;  %v3456_v42 = vmul.f32 %v8628_v43, %v3407_v61  ;;  %v3985_v35 = vld [vmem:[#allocation2 + $0x370] sm:$0xf]  ;;  %v3986_v19 = vld [vmem:[#allocation2 + $0x374] sm:$0x3] }
 0x2ae   : > { %v2778_v41 = vrot.slane %v2705_v31, 4  ;;  %v3117_v16 = vpack.c.bf16 %v3069_v46, %v3069_v46  ;;  %v3502_v49 = vpack.c.bf16 %v3454_v55, %v3454_v55  ;;  %v3503_v26 = vpack.c.bf16 %v3455_v54, %v3455_v54 }
 0x2af   : > { %v2873_v32 = vadd.f32 %v2777_v9, %v2665_v52  ;;  %v3211_v47 = vunpack.c.l.bf16 %v3115_v8  ;;  %v3212_v24 = vunpack.c.l.bf16 %v3116_v1  ;;  %v3504_v50 = vpack.c.bf16 %v3456_v42, %v3456_v42 }
 0x2b0   : > { %v2779_v12 = vsel %vm1735_vm4, %v2777_v9, %v2778_v41  ;;  %v2875_v62 = vadd.f32 %v2778_v41, %v2667_v59  ;;  %v3213_v13 = vunpack.c.l.bf16 %v3117_v16  ;;  %v7552_v10 = vunpack.c.l.bf16 %v7747_v29 }
 0x2b1   : > { %v2874_v34 = vadd.f32 %v2779_v12, %v2666_v57  ;;  %v2921_v27 = vpack.c.bf16 %v2873_v32, %v2873_v32  ;;  %v7553_v60 = vunpack.c.h.bf16 %v7747_v29  ;;  %v3680_v23 = vunpack.c.l.bf16 %v3502_v49 }
 0x2b2   : > { %v2923_v61 = vpack.c.bf16 %v2875_v62, %v2875_v62  ;;  %v3607_v31 = vmul.f32 %v7552_v10, %v8622_v40  ;;  %v3681_v46 = vunpack.c.l.bf16 %v3503_v26  ;;  %v3682_v52 = vunpack.c.l.bf16 %v3504_v50 }
 0x2b3   : > { %v2922_v55 = vpack.c.bf16 %v2874_v34, %v2874_v34  ;;  %v3163_v54 = vunpack.c.l.bf16 %v2921_v27  ;;  %v3608_v8 = vmul.f32 %v7553_v60, %v8622_v40  ;;  %v4036_v9 = vunpack.c.l.bf16 %v3984_v20 }
 0x2b4   : > { %v3165_v59 = vunpack.c.l.bf16 %v2923_v61  ;;  %v3639_v1 = vpack.c.bf16 %v3607_v31, %v3607_v31  ;;  %v4037_v42 = vunpack.c.l.bf16 %v3985_v35  ;;  %v4038_v41 = vunpack.c.l.bf16 %v3986_v19 }
 0x2b5   : > { %v3164_v57 = vunpack.c.l.bf16 %v2922_v55  ;;  %v3259_v16 = vadd.f32 %v3211_v47, %v3163_v54  ;;  %v3640_v29 = vpack.c.bf16 %v3608_v8, %v3608_v8  ;;  %v4085_v49 = vmul.f32 %v8659_v11, %v4036_v9  ;;  %v995_v55 = vpop.f32.mrf.mxu0  ;;  %v5109_v54 = vpop.f32.mrf.mxu2 }
 0x2b6   : > { %v3261_v32 = vadd.f32 %v3213_v13, %v3165_v59  ;;  %v3719_v12 = vunpack.c.l.bf16 %v3639_v1  ;;  %v4086_v62 = vmul.f32 %v8659_v11, %v4037_v42  ;;  %v4087_v26 = vmul.f32 %v8659_v11, %v4038_v41 }
 0x2b7   : > { %v3260_v50 = vadd.f32 %v3212_v24, %v3164_v57  ;;  %v3307_v10 = vpack.c.bf16 %v3259_v16, %v3259_v16  ;;  %v3720_v34 = vunpack.c.l.bf16 %v3640_v29  ;;  %v4133_v27 = vpack.c.bf16 %v4085_v49, %v4085_v49 }
 0x2b8   : > { %v3309_v20 = vpack.c.bf16 %v3261_v32, %v3261_v32  ;;  %v3792_v60 = vrot.slane %v3719_v12, 4  ;;  %v4134_v61 = vpack.c.bf16 %v4086_v62, %v4086_v62  ;;  %v4135_v35 = vpack.c.bf16 %v4087_v26, %v4087_v26 }
 0x2b9   : > { %v3308_v19 = vpack.c.bf16 %v3260_v50, %v3260_v50  ;;  %v3793_v31 = vrot.slane %v3720_v34, 4  ;;  %v4229_v47 = vunpack.c.l.bf16 %v4133_v27  ;;  %v4373_v13 = vunpack.c.l.bf16 %v2293_v17 }
 0x2ba   : > { %v3888_v8 = vadd.f32 %v3792_v60, %v3680_v23  ;;  %v4230_v9 = vunpack.c.l.bf16 %v4134_v61  ;;  %v4231_v59 = vunpack.c.l.bf16 %v4135_v35  ;;  %v4374_v24 = vunpack.c.l.bf16 %v2294_v63  ;;  %v9454_v63 = vld [vmem:[%s10747_s3] ss:$0 sm:$0xff]  ;;  %v562_v35 = vld [vmem:[#allocation2 + $0x14c] sm:$0xf] }
 0x2bb   : > { %v3794_v1 = vsel %vm1735_vm4, %v3792_v60, %v3793_v31  ;;  %v3890_v42 = vadd.f32 %v3793_v31, %v3682_v52  ;;  %v4375_v41 = vunpack.c.l.bf16 %v2295_v45  ;;  %v4421_v57 = vunpack.c.l.bf16 %v3307_v10 }
 0x2bc   : > { %v3889_v16 = vadd.f32 %v3794_v1, %v3681_v46  ;;  %v3936_v58 = vpack.c.bf16 %v3888_v8, %v3888_v8  ;;  %v4422_v17 = vunpack.c.l.bf16 %v3308_v19  ;;  %v4423_v29 = vunpack.c.l.bf16 %v3309_v20 }
 0x2bd   : > { %v3938_v49 = vpack.c.bf16 %v3890_v42, %v3890_v42  ;;  %v4469_v23 = vadd.f32 %v4421_v57, %v4373_v13  ;;  %v5248_v7 = vpack.c.bf16 %v5185_v48, %v5184_v39  ;;  %v996_v15 = vadd.f32 %v9454_v63, %v995_v55  ;;  %v998_v60 = vpop.f32.mrf.mxu0  ;;  %v5111_v61 = vpop.f32.mrf.mxu2  ;;  %v1323_v57 = vld [vmem:[#allocation2 + $0x138] sm:$0xc] }
 0x2be   : > { %v3937_v45 = vpack.c.bf16 %v3889_v16, %v3889_v16  ;;  %v4181_v52 = vunpack.c.l.bf16 %v3936_v58  ;;  %v4470_v46 = vadd.f32 %v4422_v17, %v4374_v24  ;;  %v4471_v32 = vadd.f32 %v4423_v29, %v4375_v41  ;;  %v1325_v16 = vld [vmem:[#allocation2 + $0x140] sm:$0x3] }
 0x2bf   : > { %v4183_v12 = vunpack.c.l.bf16 %v3938_v49  ;;  %v4517_v62 = vpack.c.bf16 %v4469_v23, %v4469_v23  ;;  %5337 = vmatmul.bf16.vlgmr.msra.gmra.mxu3 %v5248_v7  ;;  %v1062_v26 = vmax.f32 %v996_v15, 0.0  ;;  %v9458_v14 = vadd.f32 %v5109_v54, %v9367_v18  ;;  %v627_v54 = vld [vmem:[#allocation2 + $0x38c] sm:$0xf]  ;;  %v7716_v49 = vld [vmem:[#allocation2 + $0x140] sm:$0xff]  }
 0x2c0   : > { %v4182_v28 = vunpack.c.l.bf16 %v3937_v45  ;;  %v4277_v39 = vadd.f32 %v4229_v47, %v4181_v52  ;;  %v4518_v48 = vpack.c.bf16 %v4470_v46, %v4470_v46  ;;  %v4519_v50 = vpack.c.bf16 %v4471_v32, %v4471_v32 }
 0x2c1   : > { %v4279_v10 = vadd.f32 %v4231_v59, %v4183_v12  ;;  %v4565_v34 = vunpack.c.l.bf16 %v4517_v62  ;;  %v5186_v27 = vmax.f32 %v9458_v14, 0.0  ;;  %v1089_v20 = vpack.c.bf16 %v1062_v26, %v1061_v38  ;;  %v1324_v38 = vld [vmem:[#allocation2 + $0x13c] sm:$0xf] }
 0x2c2   : > { %v4278_v19 = vadd.f32 %v4230_v9, %v4182_v28  ;;  %v4325_v31 = vpack.c.bf16 %v4277_v39, %v4277_v39  ;;  %v4566_v13 = vunpack.c.l.bf16 %v4518_v48  ;;  %v4567_v55 = vunpack.c.l.bf16 %v4519_v50 }
 0x2c3   : > { %v4327_v8 = vpack.c.bf16 %v4279_v10, %v4279_v10  ;;  %1193 = vmatmul.bf16.gmra.mxu1 %v1089_v20  ;;  %v9464_v47 = vadd.f32 %v9454_v63, %v998_v60  ;;  %v9467_v59 = vadd.f32 %v5111_v61, %v9367_v18  ;;  %v887_v24 = vunpack.c.l.b16 %v8650_v3 }
 0x2c4   : > { %v4326_v1 = vpack.c.bf16 %v4278_v19, %v4278_v19  ;;  %v4613_v42 = vunpack.c.l.bf16 %v4325_v31  ;;  %v888_v9 = vunpack.c.l.b16 %v8652_v5  ;;  %v563_v41 = vsel %vm8160_vm2, 0, %v562_v35  ;;  %v1959_v19 = vld [vmem:[#allocation2 + $0x148] sm:$0xf] }
 0x2c5   : > { %v4615_v58 = vunpack.c.l.bf16 %v4327_v8  ;;  %v1063_v17 = vmax.f32 %v9464_v47, 0.0  ;;  %v5187_v29 = vmax.f32 %v9467_v59, 0.0  ;;  %564 = vst [vmem:[#allocation2 + $0x14c] sm:$0xf] %v563_v41  ;;  %v628_v3 = vsel %vm8160_vm2, 0, %v627_v54 }
 0x2c6   : > { %v4614_v23 = vunpack.c.l.bf16 %v4326_v1  ;;  %v4661_v7 = vadd.f32 %v4613_v42, %v4565_v34  ;;  %v906_v15 = vpack.c.b16 %v888_v9, %v887_v24  ;;  %629 = vst [vmem:[#allocation2 + $0x38c] sm:$0xf] %v628_v3  ;;  %v769_v5 = vsel %vm8160_vm2, 0, %v768_v33  ;;  %v1958_v34 = vld [vmem:[#allocation2 + $0x144] sm:$0xc] }
 0x2c7   : > { %v4663_v45 = vadd.f32 %v4615_v58, %v4567_v55  ;;  %770 = vst [vmem:[#allocation2 + $0x26c] sm:$0xf] %v769_v5  ;;  %v1375_v52 = vunpack.c.l.bf16 %v1323_v57  ;;  %v1376_v46 = vunpack.c.l.bf16 %v1324_v38  ;;  %v1377_v32 = vunpack.c.l.bf16 %v1325_v16  ;;  %v2344_v16 = vld [vmem:[#allocation2 + $0x258] sm:$0xc] }
 0x2c8   : > { %v4662_v12 = vadd.f32 %v4614_v23, %v4566_v13  ;;  %v4709_v62 = vpack.c.bf16 %v4661_v7, %v4661_v7  ;;  %7132 = vmatmul.msk.bf16.gmra.mxu0 %vm915_vm3, %v906_v15  ;;  %v7428_v26 = vunpack.c.l.bf16 %v7716_v49  ;;  %v7429_v28 = vunpack.c.h.bf16 %v7716_v49 }
 0x2c9   : > { %v4711_v39 = vpack.c.bf16 %v4663_v45, %v4663_v45  ;;  %v1424_v48 = vmul.f32 %v8552_v2, %v1375_v52  ;;  %v1425_v50 = vmul.f32 %v8552_v2, %v1376_v46  ;;  %v1426_v10 = vmul.f32 %v8552_v2, %v1377_v32 }
 0x2ca   : > { %v4710_v20 = vpack.c.bf16 %v4662_v12, %v4662_v12  ;;  %v7176_v60 = vrot.slane %v4709_v62, 10  ;;  %v1579_v61 = vmul.f32 %v7428_v26, %v8531_v53  ;;  %v1580_v35 = vmul.f32 %v7429_v28, %v8531_v53 }
 0x2cb   : > { %v4849_v31 = vrot.slane %v4711_v39, 6  ;;  %v1472_v13 = vpack.c.bf16 %v1424_v48, %v1424_v48  ;;  %v1473_v55 = vpack.c.bf16 %v1425_v50, %v1425_v50  ;;  %v1474_v54 = vpack.c.bf16 %v1426_v10, %v1426_v10 }
 0x2cc   : > { %v4846_v8 = vrot.slane %v4710_v20, 6  ;;  %v1611_v24 = vpack.c.bf16 %v1579_v61, %v1579_v61  ;;  %v1612_v33 = vpack.c.bf16 %v1580_v35, %v1580_v35  ;;  %v1960_v38 = vld [vmem:[#allocation2 + $0x14c] sm:$0x3]  ;;  %v2007_v1 = vunpack.c.l.bf16 %v1958_v34  ;;  %v2345_v20 = vld [vmem:[#allocation2 + $0x25c] sm:$0xf] }
 0x2cd   : > { %v1653_v42 = vunpack.c.l.bf16 %v1472_v13  ;;  %v1654_v9 = vunpack.c.l.bf16 %v1473_v55  ;;  %v1655_v41 = vunpack.c.l.bf16 %v1474_v54  ;;  %v2008_v57 = vunpack.c.l.bf16 %v1959_v19 }
 0x2ce   : > { %v4847_v58 = vsel %vm8788_vm7, %v7176_v60, %v4846_v8  ;;  %v4848_v3 = vrot.slane %v4846_v8, 4  ;;  %v1691_v49 = vunpack.c.l.bf16 %v1611_v24  ;;  %v1692_v23 = vunpack.c.l.bf16 %v1612_v33  ;;  %v7732_v24 = vld [vmem:[#allocation2 + $0x260] sm:$0xff]  }
 0x2cf   : > { %v4943_v7 = vunpack.c.l.bf16 %v4847_v58  ;;  %v2009_v15 = vunpack.c.l.bf16 %v1960_v38  ;;  %v2056_v5 = vmul.f32 %v8590_v51, %v2007_v1  ;;  %v2057_v45 = vmul.f32 %v8590_v51, %v2008_v57 }
 0x2d0   : > { %v4850_v52 = vsel %vm8788_vm7, %v4848_v3, %v4849_v31  ;;  %v1766_v46 = vrot.slane %v1691_v49, 4  ;;  %v1767_v32 = vrot.slane %v1692_v23, 4  ;;  %v2393_v12 = vunpack.c.l.bf16 %v2344_v16  ;;  %v2346_v31 = vld [vmem:[#allocation2 + $0x260] sm:$0x3] }
 0x2d1   : > { %v4944_v62 = vunpack.c.l.bf16 %v4850_v52  ;;  %v4976_v26 = vadd.f32 %v8759_v37, %v4943_v7  ;;  %v2058_v28 = vmul.f32 %v8590_v51, %v2009_v15  ;;  %v2104_v39 = vpack.c.bf16 %v2056_v5, %v2056_v5 }
 0x2d2   : > { %v1768_v48 = vsel %vm1735_vm4, %v1766_v46, %v1767_v32  ;;  %v1862_v50 = vadd.f32 %v1766_v46, %v1653_v42  ;;  %v1864_v10 = vadd.f32 %v1767_v32, %v1655_v41  ;;  %v2105_v34 = vpack.c.bf16 %v2057_v45, %v2057_v45 }
 0x2d3   : > { %v4977_v60 = vadd.f32 %v8759_v37, %v4944_v62  ;;  %v5008_v61 = vmax.f32 %v4976_v26, 0.0  ;;  %v1863_v35 = vadd.f32 %v1768_v48, %v1654_v9  ;;  %v2106_v19 = vpack.c.bf16 %v2058_v28, %v2058_v28  ;;  %v2972_v62 = vld [vmem:[#allocation2 + $0x264] sm:$0xc]  ;;  %v2973_v26 = vld [vmem:[#allocation2 + $0x268] sm:$0xf] }
 0x2d4   : > { %v1910_v13 = vpack.c.bf16 %v1862_v50, %v1862_v50  ;;  %v1912_v55 = vpack.c.bf16 %v1864_v10, %v1864_v10  ;;  %v2200_v54 = vunpack.c.l.bf16 %v2104_v39  ;;  %v2201_v8 = vunpack.c.l.bf16 %v2105_v34  ;;  %v2974_v28 = vld [vmem:[#allocation2 + $0x26c] sm:$0x3]  ;;  %v3359_v34 = vld [vmem:[#allocation2 + $0x378] sm:$0xc] }
 0x2d5   : > { %v5009_v33 = vmax.f32 %v4977_v60, 0.0  ;;  %v1911_v38 = vpack.c.bf16 %v1863_v35, %v1863_v35  ;;  %v2202_v1 = vunpack.c.l.bf16 %v2106_v19  ;;  %v2394_v57 = vunpack.c.l.bf16 %v2345_v20  ;;  %v3360_v20 = vld [vmem:[#allocation2 + $0x37c] sm:$0xf] }
 0x2d6   : > { %v2152_v16 = vunpack.c.l.bf16 %v1910_v13  ;;  %v2154_v42 = vunpack.c.l.bf16 %v1912_v55  ;;  %v2395_v41 = vunpack.c.l.bf16 %v2346_v31  ;;  %v2442_v58 = vmul.f32 %v8554_v4, %v2393_v12  ;;  %v3361_v31 = vld [vmem:[#allocation2 + $0x380] sm:$0x3] }
 0x2d7   : > { %v5031_v3 = vpack.c.bf16 %v5009_v33, %v5008_v61  ;;  %v2153_v49 = vunpack.c.l.bf16 %v1911_v38  ;;  %v2443_v9 = vmul.f32 %v8554_v4, %v2394_v57  ;;  %v7492_v23 = vunpack.c.l.bf16 %v7732_v24 }
 0x2d8   : > { %v9497_v7 = vadd.f32 %v2200_v54, %v2152_v16  ;;  %v9499_v15 = vadd.f32 %v2202_v1, %v2154_v42  ;;  %v2444_v5 = vmul.f32 %v8554_v4, %v2395_v41  ;;  %v2490_v45 = vpack.c.bf16 %v2442_v58, %v2442_v58 }
 0x2d9   : > { %7196 = vmatmul.msk.bf16.gmra.mxu2 %vm915_vm3, %v5031_v3  ;;  %v9503_v52 = vadd.f32 %v2201_v8, %v2153_v49  ;;  %v2491_v46 = vpack.c.bf16 %v2443_v9, %v2443_v9  ;;  %v7493_v32 = vunpack.c.h.bf16 %v7732_v24  ;;  %v2594_v12 = vmul.f32 %v7492_v23, %v8579_v30 }
 0x2da   : > { %v2296_v39 = vpack.c.bf16 %v9497_v7, %v9497_v7  ;;  %v2298_v48 = vpack.c.bf16 %v9499_v15, %v9499_v15  ;;  %v2492_v50 = vpack.c.bf16 %v2444_v5, %v2444_v5  ;;  %v2668_v10 = vunpack.c.l.bf16 %v2490_v45 }
 0x2db   : > { %v2297_v60 = vpack.c.bf16 %v9503_v52, %v9503_v52  ;;  %v2595_v61 = vmul.f32 %v7493_v32, %v8579_v30  ;;  %v2626_v35 = vpack.c.bf16 %v2594_v12, %v2594_v12  ;;  %v2669_v19 = vunpack.c.l.bf16 %v2491_v46  ;;  %v7748_v32 = vld [vmem:[#allocation2 + $0x380] sm:$0xff]  }
 0x2dc   : > { %v2670_v13 = vunpack.c.l.bf16 %v2492_v50  ;;  %v3021_v55 = vunpack.c.l.bf16 %v2972_v62  ;;  %v3022_v54 = vunpack.c.l.bf16 %v2973_v26  ;;  %v3023_v8 = vunpack.c.l.bf16 %v2974_v28 }
 0x2dd   : > { %v2627_v24 = vpack.c.bf16 %v2595_v61, %v2595_v61  ;;  %v2706_v33 = vunpack.c.l.bf16 %v2626_v35  ;;  %v3408_v38 = vunpack.c.l.bf16 %v3359_v34  ;;  %v3409_v1 = vunpack.c.l.bf16 %v3360_v20 }
 0x2de   : > { %v3070_v57 = vmul.f32 %v8614_v25, %v3021_v55  ;;  %v3071_v16 = vmul.f32 %v8614_v25, %v3022_v54  ;;  %v3072_v42 = vmul.f32 %v8614_v25, %v3023_v8  ;;  %v3410_v41 = vunpack.c.l.bf16 %v3361_v31  ;;  %v3987_v8 = vld [vmem:[#allocation2 + $0x384] sm:$0xc] }
 0x2df   : > { %v2707_v58 = vunpack.c.l.bf16 %v2627_v24  ;;  %v2780_v3 = vrot.slane %v2706_v33, 4  ;;  %v3457_v49 = vmul.f32 %v8628_v43, %v3408_v38  ;;  %v3458_v9 = vmul.f32 %v8628_v43, %v3409_v1  ;;  %v3988_v24 = vld [vmem:[#allocation2 + $0x388] sm:$0xf] }
 0x2e0   : > { %v3118_v23 = vpack.c.bf16 %v3070_v57, %v3070_v57  ;;  %v3119_v5 = vpack.c.bf16 %v3071_v16, %v3071_v16  ;;  %v3120_v45 = vpack.c.bf16 %v3072_v42, %v3072_v42  ;;  %v3459_v46 = vmul.f32 %v8628_v43, %v3410_v41  ;;  %v3989_v16 = vld [vmem:[#allocation2 + $0x38c] sm:$0x3] }
 0x2e1   : > { %v2781_v12 = vrot.slane %v2707_v58, 4  ;;  %v2876_v62 = vadd.f32 %v2780_v3, %v2668_v10  ;;  %v3505_v26 = vpack.c.bf16 %v3457_v49, %v3457_v49  ;;  %v3506_v28 = vpack.c.bf16 %v3458_v9, %v3458_v9 }
 0x2e2   : > { %v3214_v50 = vunpack.c.l.bf16 %v3118_v23  ;;  %v3215_v34 = vunpack.c.l.bf16 %v3119_v5  ;;  %v3216_v20 = vunpack.c.l.bf16 %v3120_v45  ;;  %v3507_v61 = vpack.c.bf16 %v3459_v46, %v3459_v46 }
 0x2e3   : > { %v2782_v35 = vsel %vm1735_vm4, %v2780_v3, %v2781_v12  ;;  %v2878_v31 = vadd.f32 %v2781_v12, %v2670_v13  ;;  %v2924_v55 = vpack.c.bf16 %v2876_v62, %v2876_v62  ;;  %v7556_v54 = vunpack.c.l.bf16 %v7748_v32 }
 0x2e4   : > { %v2877_v33 = vadd.f32 %v2782_v35, %v2669_v19  ;;  %v7557_v38 = vunpack.c.h.bf16 %v7748_v32  ;;  %v3683_v1 = vunpack.c.l.bf16 %v3505_v26  ;;  %v3684_v57 = vunpack.c.l.bf16 %v3506_v28 }
 0x2e5   : > { %v2926_v42 = vpack.c.bf16 %v2878_v31, %v2878_v31  ;;  %v3166_v10 = vunpack.c.l.bf16 %v2924_v55  ;;  %v3609_v41 = vmul.f32 %v7556_v54, %v8622_v40  ;;  %v3685_v58 = vunpack.c.l.bf16 %v3507_v61 }
 0x2e6   : > { %v2925_v49 = vpack.c.bf16 %v2877_v33, %v2877_v33  ;;  %v3610_v9 = vmul.f32 %v7557_v38, %v8622_v40  ;;  %v4039_v23 = vunpack.c.l.bf16 %v3987_v8  ;;  %v4040_v3 = vunpack.c.l.bf16 %v3988_v24 }
 0x2e7   : > { %v3168_v13 = vunpack.c.l.bf16 %v2926_v42  ;;  %v3262_v5 = vadd.f32 %v3214_v50, %v3166_v10  ;;  %v3641_v45 = vpack.c.bf16 %v3609_v41, %v3609_v41  ;;  %v4041_v46 = vunpack.c.l.bf16 %v3989_v16 }
 0x2e8   : > { %v3167_v12 = vunpack.c.l.bf16 %v2925_v49  ;;  %v3642_v19 = vpack.c.bf16 %v3610_v9, %v3610_v9  ;;  %v4088_v32 = vmul.f32 %v8659_v11, %v4039_v23  ;;  %v4089_v62 = vmul.f32 %v8659_v11, %v4040_v3  ;;  %v5114_v49 = vpop.f32.mrf.mxu2 }
 0x2e9   : > { %v3264_v26 = vadd.f32 %v3216_v20, %v3168_v13  ;;  %v3310_v28 = vpack.c.bf16 %v3262_v5, %v3262_v5  ;;  %v3721_v35 = vunpack.c.l.bf16 %v3641_v45  ;;  %v4090_v61 = vmul.f32 %v8659_v11, %v4041_v46  ;;  %v1000_v20 = vpop.f32.mrf.mxu0 }
 0x2ea   : > { %v3263_v31 = vadd.f32 %v3215_v34, %v3167_v12  ;;  %v3722_v55 = vunpack.c.l.bf16 %v3642_v19  ;;  %v4136_v54 = vpack.c.bf16 %v4088_v32, %v4088_v32  ;;  %v4137_v8 = vpack.c.bf16 %v4089_v62, %v4089_v62 }
 0x2eb   : > { %v3312_v24 = vpack.c.bf16 %v3264_v26, %v3264_v26  ;;  %v3795_v33 = vrot.slane %v3721_v35, 4  ;;  %v4138_v50 = vpack.c.bf16 %v4090_v61, %v4090_v61  ;;  %v4376_v38 = vunpack.c.l.bf16 %v2296_v39 }
 0x2ec   : > { %v3311_v16 = vpack.c.bf16 %v3263_v31, %v3263_v31  ;;  %v3796_v42 = vrot.slane %v3722_v55, 4  ;;  %v4232_v10 = vunpack.c.l.bf16 %v4136_v54  ;;  %v4233_v41 = vunpack.c.l.bf16 %v4137_v8 }
 0x2ed   : > { %v3891_v9 = vadd.f32 %v3795_v33, %v3683_v1  ;;  %v4234_v23 = vunpack.c.l.bf16 %v4138_v50  ;;  %v4377_v34 = vunpack.c.l.bf16 %v2297_v60  ;;  %v4378_v3 = vunpack.c.l.bf16 %v2298_v48 }
 0x2ee   : > { %v3797_v13 = vsel %vm1735_vm4, %v3795_v33, %v3796_v42  ;;  %v3893_v7 = vadd.f32 %v3796_v42, %v3685_v58  ;;  %v4424_v39 = vunpack.c.l.bf16 %v3310_v28  ;;  %v4425_v5 = vunpack.c.l.bf16 %v3311_v16  ;;  %v570_v33 = vld [vmem:[#allocation2 + $0x164] sm:$0xf] }
 0x2ef   : > { %v3892_v45 = vadd.f32 %v3797_v13, %v3684_v57  ;;  %v3939_v46 = vpack.c.bf16 %v3891_v9, %v3891_v9  ;;  %v4426_v12 = vunpack.c.l.bf16 %v3312_v24  ;;  %v5249_v1 = vpack.c.bf16 %v5187_v29, %v5186_v27 }
 0x2f0   : > { %v3941_v19 = vpack.c.bf16 %v3893_v7, %v3893_v7  ;;  %v4472_v52 = vadd.f32 %v4424_v39, %v4376_v38  ;;  %v4473_v60 = vadd.f32 %v4425_v5, %v4377_v34  ;;  %v1001_v32 = vadd.f32 %v9454_v63, %v1000_v20  ;;  %v5116_v24 = vpop.f32.mrf.mxu2  ;;  %v635_v20 = vld [vmem:[#allocation2 + $0x3a4] sm:$0xf]  ;;  %v7717_v34 = vld [vmem:[#allocation2 + $0x158] sm:$0xff]   ;;  %v1327_v39 = vld [vmem:[#allocation2 + $0x154] sm:$0xf] }
 0x2f1   : > { %v3940_v15 = vpack.c.bf16 %v3892_v45, %v3892_v45  ;;  %v4184_v48 = vunpack.c.l.bf16 %v3939_v46  ;;  %v4474_v62 = vadd.f32 %v4426_v12, %v4378_v3  ;;  %5342 = vmatmul.bf16.gmra.mxu3 %v5249_v1  ;;  %v9541_v58 = vadd.f32 %v5114_v49, %v9367_v18  ;;  %v1003_v8 = vpop.f32.mrf.mxu0  ;;  %v1328_v5 = vld [vmem:[#allocation2 + $0x158] sm:$0x3] }
 0x2f2   : > { %v4186_v57 = vunpack.c.l.bf16 %v3941_v19  ;;  %v4520_v26 = vpack.c.bf16 %v4472_v52, %v4472_v52  ;;  %v4521_v28 = vpack.c.bf16 %v4473_v60, %v4473_v60  ;;  %v1064_v35 = vmax.f32 %v1001_v32, 0.0 }
 0x2f3   : > { %v4185_v14 = vunpack.c.l.bf16 %v3940_v15  ;;  %v4280_v61 = vadd.f32 %v4232_v10, %v4184_v48  ;;  %v4522_v59 = vpack.c.bf16 %v4474_v62, %v4474_v62  ;;  %v5188_v27 = vmax.f32 %v9541_v58, 0.0 }
 0x2f4   : > { %v4282_v29 = vadd.f32 %v4234_v23, %v4186_v57  ;;  %v4568_v31 = vunpack.c.l.bf16 %v4520_v26  ;;  %v4569_v55 = vunpack.c.l.bf16 %v4521_v28  ;;  %v1090_v54 = vpack.c.bf16 %v1064_v35, %v1063_v17  ;;  %v772_v17 = vld [vmem:[#allocation2 + $0x284] sm:$0xf]  ;;  %v1326_v23 = vld [vmem:[#allocation2 + $0x150] sm:$0xc] }
 0x2f5   : > { %v4281_v50 = vadd.f32 %v4233_v41, %v4185_v14  ;;  %v4328_v38 = vpack.c.bf16 %v4280_v61, %v4280_v61  ;;  %v4570_v16 = vunpack.c.l.bf16 %v4522_v59  ;;  %v9547_v42 = vadd.f32 %v9454_v63, %v1003_v8 }
 0x2f6   : > { %v4330_v10 = vpack.c.bf16 %v4282_v29, %v4282_v29  ;;  %1198 = vmatmul.bf16.gmra.mxu1 %v1090_v54  ;;  %v9550_v49 = vadd.f32 %v5116_v24, %v9367_v18  ;;  %v889_v9 = vunpack.c.l.b16 %v8846_v36  ;;  %v890_v47 = vunpack.c.l.b16 %v8848_v6  ;;  %v1961_v29 = vld [vmem:[#allocation2 + $0x15c] sm:$0xc] }
 0x2f7   : > { %v4329_v3 = vpack.c.bf16 %v4281_v50, %v4281_v50  ;;  %v4616_v41 = vunpack.c.l.bf16 %v4328_v38  ;;  %v1065_v13 = vmax.f32 %v9547_v42, 0.0  ;;  %v571_v7 = vsel %vm8160_vm2, 0, %v570_v33  ;;  %v1962_v33 = vld [vmem:[#allocation2 + $0x160] sm:$0xf] }
 0x2f8   : > { %v4618_v45 = vunpack.c.l.bf16 %v4330_v10  ;;  %v5189_v46 = vmax.f32 %v9550_v49, 0.0  ;;  %v907_v12 = vpack.c.b16 %v890_v47, %v889_v9  ;;  %572 = vst [vmem:[#allocation2 + $0x164] sm:$0xf] %v571_v7  ;;  %v636_v36 = vsel %vm8160_vm2, 0, %v635_v20  ;;  %v2347_v7 = vld [vmem:[#allocation2 + $0x270] sm:$0xc] }
 0x2f9   : > { %v4617_v6 = vunpack.c.l.bf16 %v4329_v3  ;;  %v4664_v1 = vadd.f32 %v4616_v41, %v4568_v31  ;;  %637 = vst [vmem:[#allocation2 + $0x3a4] sm:$0xf] %v636_v36  ;;  %v773_v19 = vsel %vm8160_vm2, 0, %v772_v17  ;;  %v1378_v52 = vunpack.c.l.bf16 %v1326_v23 }
 0x2fa   : > { %v4666_v60 = vadd.f32 %v4618_v45, %v4570_v16  ;;  %7133 = vmatmul.msk.bf16.gmra.mxu0 %vm915_vm3, %v907_v12  ;;  %774 = vst [vmem:[#allocation2 + $0x284] sm:$0xf] %v773_v19  ;;  %v1379_v32 = vunpack.c.l.bf16 %v1327_v39  ;;  %v1380_v15 = vunpack.c.l.bf16 %v1328_v5  ;;  %v7432_v48 = vunpack.c.l.bf16 %v7717_v34 }
 0x2fb   : > { %v4665_v62 = vadd.f32 %v4617_v6, %v4569_v55  ;;  %v4712_v57 = vpack.c.bf16 %v4664_v1, %v4664_v1  ;;  %v1427_v26 = vmul.f32 %v8552_v2, %v1378_v52  ;;  %v7433_v28 = vunpack.c.h.bf16 %v7717_v34 }
 0x2fc   : > { %v4714_v35 = vpack.c.bf16 %v4666_v60, %v4666_v60  ;;  %v1428_v14 = vmul.f32 %v8552_v2, %v1379_v32  ;;  %v1429_v61 = vmul.f32 %v8552_v2, %v1380_v15  ;;  %v1581_v59 = vmul.f32 %v7432_v48, %v8531_v53 }
 0x2fd   : > { %v4713_v31 = vpack.c.bf16 %v4665_v62, %v4665_v62  ;;  %v7177_v54 = vrot.slane %v4712_v57, 10  ;;  %v1475_v8 = vpack.c.bf16 %v1427_v26, %v1427_v26  ;;  %v1582_v24 = vmul.f32 %v7433_v28, %v8531_v53 }
 0x2fe   : > { %v4856_v50 = vrot.slane %v4714_v35, 6  ;;  %v1476_v55 = vpack.c.bf16 %v1428_v14, %v1428_v14  ;;  %v1477_v38 = vpack.c.bf16 %v1429_v61, %v1429_v61  ;;  %v1613_v16 = vpack.c.bf16 %v1581_v59, %v1581_v59  ;;  %v2348_v59 = vld [vmem:[#allocation2 + $0x274] sm:$0xf] }
 0x2ff   : > { %v4853_v20 = vrot.slane %v4713_v31, 6  ;;  %v1614_v10 = vpack.c.bf16 %v1582_v24, %v1582_v24  ;;  %v1656_v9 = vunpack.c.l.bf16 %v1475_v8  ;;  %v1963_v47 = vld [vmem:[#allocation2 + $0x164] sm:$0x3]  ;;  %v2010_v17 = vunpack.c.l.bf16 %v1961_v29  ;;  %v2349_v24 = vld [vmem:[#allocation2 + $0x278] sm:$0x3] }
 0x300   : > { %v1657_v23 = vunpack.c.l.bf16 %v1476_v55  ;;  %v1658_v34 = vunpack.c.l.bf16 %v1477_v38  ;;  %v1693_v3 = vunpack.c.l.bf16 %v1613_v16  ;;  %v2011_v41 = vunpack.c.l.bf16 %v1962_v33  ;;  %v7733_v33 = vld [vmem:[#allocation2 + $0x278] sm:$0xff]  }
 0x301   : > { %v4854_v39 = vsel %vm8788_vm7, %v7177_v54, %v4853_v20  ;;  %v4855_v5 = vrot.slane %v4853_v20, 4  ;;  %v1694_v45 = vunpack.c.l.bf16 %v1614_v10  ;;  %v2012_v12 = vunpack.c.l.bf16 %v1963_v47 }
 0x302   : > { %v4945_v36 = vunpack.c.l.bf16 %v4854_v39  ;;  %v1769_v6 = vrot.slane %v1693_v3, 4  ;;  %v2059_v1 = vmul.f32 %v8590_v51, %v2010_v17  ;;  %v2060_v19 = vmul.f32 %v8590_v51, %v2011_v41 }
 0x303   : > { %v4857_v52 = vsel %vm8788_vm7, %v4855_v5, %v4856_v50  ;;  %v1770_v60 = vrot.slane %v1694_v45, 4  ;;  %v2061_v32 = vmul.f32 %v8590_v51, %v2012_v12  ;;  %v2396_v15 = vunpack.c.l.bf16 %v2347_v7 }
 0x304   : > { %v4946_v48 = vunpack.c.l.bf16 %v4857_v52  ;;  %v4978_v62 = vadd.f32 %v8759_v37, %v4945_v36  ;;  %v1865_v57 = vadd.f32 %v1769_v6, %v1656_v9  ;;  %v2107_v26 = vpack.c.bf16 %v2059_v1, %v2059_v1  ;;  %v2975_v1 = vld [vmem:[#allocation2 + $0x27c] sm:$0xc] }
 0x305   : > { %v1771_v28 = vsel %vm1735_vm4, %v1769_v6, %v1770_v60  ;;  %v1867_v35 = vadd.f32 %v1770_v60, %v1658_v34  ;;  %v2108_v14 = vpack.c.bf16 %v2060_v19, %v2060_v19  ;;  %v2109_v61 = vpack.c.bf16 %v2061_v32, %v2061_v32 }
 0x306   : > { %v4979_v29 = vadd.f32 %v8759_v37, %v4946_v48  ;;  %v5010_v31 = vmax.f32 %v4978_v62, 0.0  ;;  %v1866_v54 = vadd.f32 %v1771_v28, %v1657_v23  ;;  %v1913_v8 = vpack.c.bf16 %v1865_v57, %v1865_v57  ;;  %v2977_v48 = vld [vmem:[#allocation2 + $0x284] sm:$0x3] }
 0x307   : > { %v1915_v50 = vpack.c.bf16 %v1867_v35, %v1867_v35  ;;  %v2203_v55 = vunpack.c.l.bf16 %v2107_v26  ;;  %v2204_v38 = vunpack.c.l.bf16 %v2108_v14  ;;  %v2205_v16 = vunpack.c.l.bf16 %v2109_v61  ;;  %v3362_v35 = vld [vmem:[#allocation2 + $0x390] sm:$0xc]  ;;  %v3363_v14 = vld [vmem:[#allocation2 + $0x394] sm:$0xf] }
 0x308   : > { %v5011_v20 = vmax.f32 %v4979_v29, 0.0  ;;  %v1914_v10 = vpack.c.bf16 %v1866_v54, %v1866_v54  ;;  %v2155_v9 = vunpack.c.l.bf16 %v1913_v8  ;;  %v2397_v47 = vunpack.c.l.bf16 %v2348_v59  ;;  %v3364_v54 = vld [vmem:[#allocation2 + $0x398] sm:$0x3] }
 0x309   : > { %v2157_v17 = vunpack.c.l.bf16 %v1915_v50  ;;  %v2398_v34 = vunpack.c.l.bf16 %v2349_v24  ;;  %v2445_v3 = vmul.f32 %v8554_v4, %v2396_v15  ;;  %v7496_v41 = vunpack.c.l.bf16 %v7733_v33  ;;  %v2976_v15 = vld [vmem:[#allocation2 + $0x280] sm:$0xf] }
 0x30a   : > { %v5032_v7 = vpack.c.bf16 %v5011_v20, %v5010_v31  ;;  %v2156_v39 = vunpack.c.l.bf16 %v1914_v10  ;;  %v9579_v5 = vadd.f32 %v2203_v55, %v2155_v9  ;;  %v2446_v23 = vmul.f32 %v8554_v4, %v2397_v47 }
 0x30b   : > { %v9582_v45 = vadd.f32 %v2205_v16, %v2157_v17  ;;  %v2447_v12 = vmul.f32 %v8554_v4, %v2398_v34  ;;  %v2493_v36 = vpack.c.bf16 %v2445_v3, %v2445_v3  ;;  %v7497_v6 = vunpack.c.h.bf16 %v7733_v33 }
 0x30c   : > { %7197 = vmatmul.msk.bf16.gmra.mxu2 %vm915_vm3, %v5032_v7  ;;  %v9586_v19 = vadd.f32 %v2204_v38, %v2156_v39  ;;  %v2299_v52 = vpack.c.bf16 %v9579_v5, %v9579_v5  ;;  %v2494_v60 = vpack.c.bf16 %v2446_v23, %v2446_v23  ;;  %v2596_v32 = vmul.f32 %v7496_v41, %v8579_v30 }
 0x30d   : > { %v2301_v62 = vpack.c.bf16 %v9582_v45, %v9582_v45  ;;  %v2495_v57 = vpack.c.bf16 %v2447_v12, %v2447_v12  ;;  %v2597_v26 = vmul.f32 %v7497_v6, %v8579_v30  ;;  %v2671_v28 = vunpack.c.l.bf16 %v2493_v36  ;;  %v7749_v6 = vld [vmem:[#allocation2 + $0x398] sm:$0xff]  }
 0x30e   : > { %v2300_v61 = vpack.c.bf16 %v9586_v19, %v9586_v19  ;;  %v2628_v59 = vpack.c.bf16 %v2596_v32, %v2596_v32  ;;  %v2672_v29 = vunpack.c.l.bf16 %v2494_v60  ;;  %v3024_v31 = vunpack.c.l.bf16 %v2975_v1 }
 0x30f   : > { %v2629_v8 = vpack.c.bf16 %v2597_v26, %v2597_v26  ;;  %v2673_v24 = vunpack.c.l.bf16 %v2495_v57  ;;  %v3025_v33 = vunpack.c.l.bf16 %v2976_v15  ;;  %v3026_v50 = vunpack.c.l.bf16 %v2977_v48 }
 0x310   : > { %v2708_v55 = vunpack.c.l.bf16 %v2628_v59  ;;  %v3073_v38 = vmul.f32 %v8614_v25, %v3024_v31  ;;  %v3411_v16 = vunpack.c.l.bf16 %v3362_v35  ;;  %v3412_v20 = vunpack.c.l.bf16 %v3363_v14 }
 0x311   : > { %v2709_v10 = vunpack.c.l.bf16 %v2629_v8  ;;  %v3074_v9 = vmul.f32 %v8614_v25, %v3025_v33  ;;  %v3075_v47 = vmul.f32 %v8614_v25, %v3026_v50  ;;  %v3413_v17 = vunpack.c.l.bf16 %v3364_v54  ;;  %v3990_v8 = vld [vmem:[#allocation2 + $0x39c] sm:$0xc]  ;;  %v3991_v33 = vld [vmem:[#allocation2 + $0x3a0] sm:$0xf] }
 0x312   : > { %v2783_v34 = vrot.slane %v2708_v55, 4  ;;  %v3121_v3 = vpack.c.bf16 %v3073_v38, %v3073_v38  ;;  %v3460_v41 = vmul.f32 %v8628_v43, %v3411_v16  ;;  %v3461_v7 = vmul.f32 %v8628_v43, %v3412_v20  ;;  %v3992_v20 = vld [vmem:[#allocation2 + $0x3a4] sm:$0x3] }
 0x313   : > { %v2784_v39 = vrot.slane %v2709_v10, 4  ;;  %v3122_v23 = vpack.c.bf16 %v3074_v9, %v3074_v9  ;;  %v3123_v12 = vpack.c.bf16 %v3075_v47, %v3075_v47  ;;  %v3462_v36 = vmul.f32 %v8628_v43, %v3413_v17 }
 0x314   : > { %v2879_v1 = vadd.f32 %v2783_v34, %v2671_v28  ;;  %v3217_v60 = vunpack.c.l.bf16 %v3121_v3  ;;  %v3508_v32 = vpack.c.bf16 %v3460_v41, %v3460_v41  ;;  %v3509_v15 = vpack.c.bf16 %v3461_v7, %v3461_v7 }
 0x315   : > { %v2785_v48 = vsel %vm1735_vm4, %v2783_v34, %v2784_v39  ;;  %v2881_v57 = vadd.f32 %v2784_v39, %v2673_v24  ;;  %v3218_v26 = vunpack.c.l.bf16 %v3122_v23  ;;  %v3219_v35 = vunpack.c.l.bf16 %v3123_v12 }
 0x316   : > { %v2880_v14 = vadd.f32 %v2785_v48, %v2672_v29  ;;  %v2927_v59 = vpack.c.bf16 %v2879_v1, %v2879_v1  ;;  %v3510_v31 = vpack.c.bf16 %v3462_v36, %v3462_v36  ;;  %v7560_v54 = vunpack.c.l.bf16 %v7749_v6 }
 0x317   : > { %v2929_v50 = vpack.c.bf16 %v2881_v57, %v2881_v57  ;;  %v7561_v55 = vunpack.c.h.bf16 %v7749_v6  ;;  %v3686_v38 = vunpack.c.l.bf16 %v3508_v32  ;;  %v3687_v16 = vunpack.c.l.bf16 %v3509_v15 }
 0x318   : > { %v2928_v28 = vpack.c.bf16 %v2880_v14, %v2880_v14  ;;  %v3169_v10 = vunpack.c.l.bf16 %v2927_v59  ;;  %v3611_v9 = vmul.f32 %v7560_v54, %v8622_v40  ;;  %v3688_v47 = vunpack.c.l.bf16 %v3510_v31 }
 0x319   : > { %v3171_v17 = vunpack.c.l.bf16 %v2929_v50  ;;  %v3612_v24 = vmul.f32 %v7561_v55, %v8622_v40  ;;  %v4042_v34 = vunpack.c.l.bf16 %v3990_v8  ;;  %v4043_v29 = vunpack.c.l.bf16 %v3991_v33 }
 0x31a   : > { %v3170_v3 = vunpack.c.l.bf16 %v2928_v28  ;;  %v3265_v41 = vadd.f32 %v3217_v60, %v3169_v10  ;;  %v3643_v7 = vpack.c.bf16 %v3611_v9, %v3611_v9  ;;  %v4044_v39 = vunpack.c.l.bf16 %v3992_v20  ;;  %v1005_v20 = vpop.f32.mrf.mxu0  ;;  %v5119_v28 = vpop.f32.mrf.mxu2 }
 0x31b   : > { %v3267_v23 = vadd.f32 %v3219_v35, %v3171_v17  ;;  %v3644_v12 = vpack.c.bf16 %v3612_v24, %v3612_v24  ;;  %v4091_v36 = vmul.f32 %v8659_v11, %v4042_v34  ;;  %v4092_v6 = vmul.f32 %v8659_v11, %v4043_v29 }
 0x31c   : > { %v3266_v1 = vadd.f32 %v3218_v26, %v3170_v3  ;;  %v3313_v32 = vpack.c.bf16 %v3265_v41, %v3265_v41  ;;  %v3723_v15 = vunpack.c.l.bf16 %v3643_v7  ;;  %v4093_v48 = vmul.f32 %v8659_v11, %v4044_v39 }
 0x31d   : > { %v3315_v57 = vpack.c.bf16 %v3267_v23, %v3267_v23  ;;  %v3724_v14 = vunpack.c.l.bf16 %v3644_v12  ;;  %v4139_v59 = vpack.c.bf16 %v4091_v36, %v4091_v36  ;;  %v4140_v31 = vpack.c.bf16 %v4092_v6, %v4092_v6 }
 0x31e   : > { %v3314_v54 = vpack.c.bf16 %v3266_v1, %v3266_v1  ;;  %v3798_v8 = vrot.slane %v3723_v15, 4  ;;  %v4141_v60 = vpack.c.bf16 %v4093_v48, %v4093_v48  ;;  %v4379_v35 = vunpack.c.l.bf16 %v2299_v52 }
 0x31f   : > { %v3799_v33 = vrot.slane %v3724_v14, 4  ;;  %v4235_v50 = vunpack.c.l.bf16 %v4139_v59  ;;  %v4236_v55 = vunpack.c.l.bf16 %v4140_v31  ;;  %v4380_v26 = vunpack.c.l.bf16 %v2300_v61 }
 0x320   : > { %v3894_v10 = vadd.f32 %v3798_v8, %v3686_v38  ;;  %v4237_v9 = vunpack.c.l.bf16 %v4141_v60  ;;  %v4381_v17 = vunpack.c.l.bf16 %v2301_v62  ;;  %v4427_v24 = vunpack.c.l.bf16 %v3313_v32 }
 0x321   : > { %v3800_v34 = vsel %vm1735_vm4, %v3798_v8, %v3799_v33  ;;  %v3896_v5 = vadd.f32 %v3799_v33, %v3688_v47  ;;  %v4428_v52 = vunpack.c.l.bf16 %v3314_v54  ;;  %v4429_v29 = vunpack.c.l.bf16 %v3315_v57  ;;  %v1329_v33 = vld [vmem:[#allocation2 + $0x168] sm:$0xc] }
 0x322   : > { %v3895_v3 = vadd.f32 %v3800_v34, %v3687_v16  ;;  %v3942_v41 = vpack.c.bf16 %v3894_v10, %v3894_v10  ;;  %v4475_v7 = vadd.f32 %v4427_v24, %v4379_v35  ;;  %v5250_v19 = vpack.c.bf16 %v5189_v46, %v5188_v27  ;;  %v643_v46 = vld [vmem:[#allocation2 + $0x3bc] sm:$0xf]  ;;  %v1008_v59 = vpop.f32.mrf.mxu0  ;;  %v5121_v31 = vpop.f32.mrf.mxu2 }
 0x323   : > { %v3944_v61 = vpack.c.bf16 %v3896_v5, %v3896_v5  ;;  %v4476_v38 = vadd.f32 %v4428_v52, %v4380_v26  ;;  %v4477_v39 = vadd.f32 %v4429_v29, %v4381_v17  ;;  %v1006_v45 = vadd.f32 %v9454_v63, %v1005_v20 }
 0x324   : > { %v3943_v62 = vpack.c.bf16 %v3895_v3, %v3895_v3  ;;  %v4187_v23 = vunpack.c.l.bf16 %v3942_v41  ;;  %v4523_v12 = vpack.c.bf16 %v4475_v7, %v4475_v7  ;;  %5347 = vmatmul.bf16.gmra.mxu3 %v5250_v19  ;;  %v9624_v47 = vadd.f32 %v5119_v28, %v9367_v18 }
 0x325   : > { %v4189_v16 = vunpack.c.l.bf16 %v3944_v61  ;;  %v4524_v36 = vpack.c.bf16 %v4476_v38, %v4476_v38  ;;  %v4525_v6 = vpack.c.bf16 %v4477_v39, %v4477_v39  ;;  %v1066_v1 = vmax.f32 %v1006_v45, 0.0 }
 0x326   : > { %v4188_v58 = vunpack.c.l.bf16 %v3943_v62  ;;  %v4283_v32 = vadd.f32 %v4235_v50, %v4187_v23  ;;  %v4571_v49 = vunpack.c.l.bf16 %v4523_v12  ;;  %v5190_v27 = vmax.f32 %v9624_v47, 0.0  ;;  %v1330_v50 = vld [vmem:[#allocation2 + $0x16c] sm:$0xf] }
 0x327   : > { %v4285_v15 = vadd.f32 %v4237_v9, %v4189_v16  ;;  %v4572_v48 = vunpack.c.l.bf16 %v4524_v36  ;;  %v4573_v57 = vunpack.c.l.bf16 %v4525_v6  ;;  %v1091_v14 = vpack.c.bf16 %v1066_v1, %v1065_v13  ;;  %v1331_v13 = vld [vmem:[#allocation2 + $0x170] sm:$0x3]  ;;  %v1964_v6 = vld [vmem:[#allocation2 + $0x174] sm:$0xc]  ;;  %v2350_v1 = vld [vmem:[#allocation2 + $0x288] sm:$0xc] }
 0x328   : > { %v4284_v54 = vadd.f32 %v4236_v55, %v4188_v58  ;;  %v4331_v8 = vpack.c.bf16 %v4283_v32, %v4283_v32  ;;  %v9630_v60 = vadd.f32 %v9454_v63, %v1008_v59  ;;  %v9633_v35 = vadd.f32 %v5121_v31, %v9367_v18  ;;  %v9639_v55 = vld [vmem:[#allocation2 + $0x170] sm:$0xff]  }
 0x329   : > { %v4333_v26 = vpack.c.bf16 %v4285_v15, %v4285_v15  ;;  %1203 = vmatmul.bf16.gmra.mxu1 %v1091_v14  ;;  %v891_v20 = vunpack.c.l.b16 %v8922_v21  ;;  %v892_v28 = vunpack.c.l.b16 %v8925_v44  ;;  %v644_v42 = vsel %vm8160_vm2, 0, %v643_v46  ;;  %v1965_v15 = vld [vmem:[#allocation2 + $0x178] sm:$0xf] }
 0x32a   : > { %v4332_v10 = vpack.c.bf16 %v4284_v54, %v4284_v54  ;;  %v4619_v63 = vunpack.c.l.bf16 %v4331_v8  ;;  %v1067_v9 = vmax.f32 %v9630_v60, 0.0  ;;  %v5191_v17 = vmax.f32 %v9633_v35, 0.0  ;;  %645 = vst [vmem:[#allocation2 + $0x3bc] sm:$0xf] %v644_v42  ;;  %v2351_v42 = vld [vmem:[#allocation2 + $0x28c] sm:$0xf] }
 0x32b   : > { %v4621_v24 = vunpack.c.l.bf16 %v4333_v26  ;;  %v908_v34 = vpack.c.b16 %v892_v28, %v891_v20  ;;  %v1381_v5 = vunpack.c.l.bf16 %v1329_v33  ;;  %v1382_v52 = vunpack.c.l.bf16 %v1330_v50 }
 0x32c   : > { %v4620_v21 = vunpack.c.l.bf16 %v4332_v10  ;;  %v4667_v29 = vadd.f32 %v4619_v63, %v4571_v49  ;;  %v1383_v44 = vunpack.c.l.bf16 %v1331_v13  ;;  %v7436_v3 = vunpack.c.l.bf16 %v9639_v55 }
 0x32d   : > { %v4669_v41 = vadd.f32 %v4621_v24, %v4573_v57  ;;  %7134 = vmatmul.msk.bf16.gmra.mxu0 %vm915_vm3, %v908_v34  ;;  %v1430_v7 = vmul.f32 %v8552_v2, %v1381_v5  ;;  %v1431_v19 = vmul.f32 %v8552_v2, %v1382_v52  ;;  %v7437_v61 = vunpack.c.h.bf16 %v9639_v55  ;;  %v1968_v55 = vld [vmem:[#allocation2 + $0x190] sm:$0xf] }
 0x32e   : > { %v4668_v38 = vadd.f32 %v4620_v21, %v4572_v48  ;;  %v4715_v39 = vpack.c.bf16 %v4667_v29, %v4667_v29  ;;  %v1432_v45 = vmul.f32 %v8552_v2, %v1383_v44  ;;  %v1583_v62 = vmul.f32 %v7436_v3, %v8531_v53  ;;  %v1966_v48 = vld [vmem:[#allocation2 + $0x17c] sm:$0x3] }
 0x32f   : > { %v4717_v23 = vpack.c.bf16 %v4669_v41, %v4669_v41  ;;  %v1478_v12 = vpack.c.bf16 %v1430_v7, %v1430_v7  ;;  %v1479_v16 = vpack.c.bf16 %v1431_v19, %v1431_v19  ;;  %v1584_v36 = vmul.f32 %v7437_v61, %v8531_v53 }
 0x330   : > { %v4716_v58 = vpack.c.bf16 %v4668_v38, %v4668_v38  ;;  %v7178_v32 = vrot.slane %v4715_v39, 10  ;;  %v1480_v49 = vpack.c.bf16 %v1432_v45, %v1432_v45  ;;  %v1615_v46 = vpack.c.bf16 %v1583_v62, %v1583_v62 }
 0x331   : > { %v4863_v57 = vrot.slane %v4717_v23, 6  ;;  %v1616_v14 = vpack.c.bf16 %v1584_v36, %v1584_v36  ;;  %v1659_v59 = vunpack.c.l.bf16 %v1478_v12  ;;  %v1660_v31 = vunpack.c.l.bf16 %v1479_v16 }
 0x332   : > { %v4860_v54 = vrot.slane %v4716_v58, 6  ;;  %v1661_v8 = vunpack.c.l.bf16 %v1480_v49  ;;  %v1695_v33 = vunpack.c.l.bf16 %v1615_v46  ;;  %v2013_v50 = vunpack.c.l.bf16 %v1964_v6  ;;  %v2352_v6 = vld [vmem:[#allocation2 + $0x290] sm:$0x3] }
 0x333   : > { %v1696_v26 = vunpack.c.l.bf16 %v1616_v14  ;;  %v2014_v20 = vunpack.c.l.bf16 %v1965_v15  ;;  %v2015_v28 = vunpack.c.l.bf16 %v1966_v48  ;;  %v2399_v13 = vunpack.c.l.bf16 %v2350_v1  ;;  %v7734_v46 = vld [vmem:[#allocation2 + $0x290] sm:$0xff]  }
 0x334   : > { %v4861_v10 = vsel %vm8788_vm7, %v7178_v32, %v4860_v54  ;;  %v4862_v63 = vrot.slane %v4860_v54, 4  ;;  %v1772_v24 = vrot.slane %v1695_v33, 4  ;;  %v2062_v34 = vmul.f32 %v8590_v51, %v2013_v50 }
 0x335   : > { %v4947_v5 = vunpack.c.l.bf16 %v4861_v10  ;;  %v1773_v52 = vrot.slane %v1696_v26, 4  ;;  %v2063_v21 = vmul.f32 %v8590_v51, %v2014_v20  ;;  %v2064_v29 = vmul.f32 %v8590_v51, %v2015_v28 }
 0x336   : > { %v4864_v44 = vsel %vm8788_vm7, %v4862_v63, %v4863_v57  ;;  %v1868_v41 = vadd.f32 %v1772_v24, %v1659_v59  ;;  %v2110_v7 = vpack.c.bf16 %v2062_v34, %v2062_v34  ;;  %v2400_v19 = vunpack.c.l.bf16 %v2351_v42 }
 0x337   : > { %v4948_v38 = vunpack.c.l.bf16 %v4864_v44  ;;  %v4980_v39 = vadd.f32 %v8759_v37, %v4947_v5  ;;  %v1774_v45 = vsel %vm1735_vm4, %v1772_v24, %v1773_v52  ;;  %v1870_v62 = vadd.f32 %v1773_v52, %v1661_v8  ;;  %v2978_v24 = vld [vmem:[#allocation2 + $0x294] sm:$0xc] }
 0x338   : > { %v1869_v23 = vadd.f32 %v1774_v45, %v1660_v31  ;;  %v1916_v12 = vpack.c.bf16 %v1868_v41, %v1868_v41  ;;  %v2111_v16 = vpack.c.bf16 %v2063_v21, %v2063_v21  ;;  %v2112_v36 = vpack.c.bf16 %v2064_v29, %v2064_v29  ;;  %v2979_v21 = vld [vmem:[#allocation2 + $0x298] sm:$0xf]  ;;  %v2980_v29 = vld [vmem:[#allocation2 + $0x29c] sm:$0x3] }
 0x339   : > { %v4981_v1 = vadd.f32 %v8759_v37, %v4948_v38  ;;  %v5012_v58 = vmax.f32 %v4980_v39, 0.0  ;;  %v1918_v32 = vpack.c.bf16 %v1870_v62, %v1870_v62  ;;  %v2206_v49 = vunpack.c.l.bf16 %v2110_v7  ;;  %v3365_v38 = vld [vmem:[#allocation2 + $0x3a8] sm:$0xc]  ;;  %v3366_v39 = vld [vmem:[#allocation2 + $0x3ac] sm:$0xf] }
 0x33a   : > { %v1917_v15 = vpack.c.bf16 %v1869_v23, %v1869_v23  ;;  %v2158_v48 = vunpack.c.l.bf16 %v1916_v12  ;;  %v2207_v57 = vunpack.c.l.bf16 %v2111_v16  ;;  %v2208_v14 = vunpack.c.l.bf16 %v2112_v36  ;;  %v3367_v16 = vld [vmem:[#allocation2 + $0x3b0] sm:$0x3] }
 0x33b   : > { %v5013_v59 = vmax.f32 %v4981_v1, 0.0  ;;  %v2160_v54 = vunpack.c.l.bf16 %v1918_v32  ;;  %v2401_v33 = vunpack.c.l.bf16 %v2352_v6  ;;  %v2448_v8 = vmul.f32 %v8554_v4, %v2399_v13 }
 0x33c   : > { %v2159_v31 = vunpack.c.l.bf16 %v1917_v15  ;;  %v9666_v50 = vadd.f32 %v2206_v49, %v2158_v48  ;;  %v2449_v26 = vmul.f32 %v8554_v4, %v2400_v19  ;;  %v7500_v20 = vunpack.c.l.bf16 %v7734_v46 }
 0x33d   : > { %v5033_v28 = vpack.c.bf16 %v5013_v59, %v5012_v58  ;;  %v9669_v42 = vadd.f32 %v2208_v14, %v2160_v54  ;;  %v2450_v10 = vmul.f32 %v8554_v4, %v2401_v33  ;;  %v2496_v63 = vpack.c.bf16 %v2448_v8, %v2448_v8 }
 0x33e   : > { %v9672_v34 = vadd.f32 %v2207_v57, %v2159_v31  ;;  %v2302_v5 = vpack.c.bf16 %v9666_v50, %v9666_v50  ;;  %v2497_v52 = vpack.c.bf16 %v2449_v26, %v2449_v26  ;;  %v7501_v13 = vunpack.c.h.bf16 %v7734_v46 }
 0x33f   : > { %7198 = vmatmul.msk.bf16.gmra.mxu2 %vm915_vm3, %v5033_v28  ;;  %v2304_v44 = vpack.c.bf16 %v9669_v42, %v9669_v42  ;;  %v2498_v41 = vpack.c.bf16 %v2450_v10, %v2450_v10  ;;  %v2598_v7 = vmul.f32 %v7500_v20, %v8579_v30  ;;  %v2674_v19 = vunpack.c.l.bf16 %v2496_v63  ;;  %v7750_v63 = vld [vmem:[#allocation2 + $0x3b0] sm:$0xff]  }
 0x340   : > { %v2303_v45 = vpack.c.bf16 %v9672_v34, %v9672_v34  ;;  %v2599_v62 = vmul.f32 %v7501_v13, %v8579_v30  ;;  %v2675_v23 = vunpack.c.l.bf16 %v2497_v52  ;;  %v3027_v12 = vunpack.c.l.bf16 %v2978_v24  ;;  %v9712_v34 = vld [vmem:[%s10747_s3] ss:$0 sm:$0xff] }
 0x341   : > { %v2630_v36 = vpack.c.bf16 %v2598_v7, %v2598_v7  ;;  %v2676_v6 = vunpack.c.l.bf16 %v2498_v41  ;;  %v3028_v1 = vunpack.c.l.bf16 %v2979_v21  ;;  %v3029_v58 = vunpack.c.l.bf16 %v2980_v29 }
 0x342   : > { %v2631_v32 = vpack.c.bf16 %v2599_v62, %v2599_v62  ;;  %v3076_v49 = vmul.f32 %v8614_v25, %v3027_v12  ;;  %v3414_v46 = vunpack.c.l.bf16 %v3365_v38  ;;  %v3415_v15 = vunpack.c.l.bf16 %v3366_v39 }
 0x343   : > { %v2710_v48 = vunpack.c.l.bf16 %v2630_v36  ;;  %v3077_v57 = vmul.f32 %v8614_v25, %v3028_v1  ;;  %v3078_v14 = vmul.f32 %v8614_v25, %v3029_v58  ;;  %v3416_v59 = vunpack.c.l.bf16 %v3367_v16  ;;  %v3993_v36 = vld [vmem:[#allocation2 + $0x3b4] sm:$0xc]  ;;  %v3994_v1 = vld [vmem:[#allocation2 + $0x3b8] sm:$0xf] }
 0x344   : > { %v2711_v54 = vunpack.c.l.bf16 %v2631_v32  ;;  %v3124_v33 = vpack.c.bf16 %v3076_v49, %v3076_v49  ;;  %v3463_v8 = vmul.f32 %v8628_v43, %v3414_v46  ;;  %v3464_v31 = vmul.f32 %v8628_v43, %v3415_v15  ;;  %v3995_v15 = vld [vmem:[#allocation2 + $0x3bc] sm:$0x3] }
 0x345   : > { %v2786_v26 = vrot.slane %v2710_v48, 4  ;;  %v3125_v20 = vpack.c.bf16 %v3077_v57, %v3077_v57  ;;  %v3126_v28 = vpack.c.bf16 %v3078_v14, %v3078_v14  ;;  %v3465_v10 = vmul.f32 %v8628_v43, %v3416_v59 }
 0x346   : > { %v2787_v24 = vrot.slane %v2711_v54, 4  ;;  %v3220_v52 = vunpack.c.l.bf16 %v3124_v33  ;;  %v3511_v13 = vpack.c.bf16 %v3463_v8, %v3463_v8  ;;  %v3512_v21 = vpack.c.bf16 %v3464_v31, %v3464_v31 }
 0x347   : > { %v2882_v29 = vadd.f32 %v2786_v26, %v2674_v19  ;;  %v3221_v41 = vunpack.c.l.bf16 %v3125_v20  ;;  %v3222_v7 = vunpack.c.l.bf16 %v3126_v28  ;;  %v3513_v38 = vpack.c.bf16 %v3465_v10, %v3465_v10 }
 0x348   : > { %v2788_v39 = vsel %vm1735_vm4, %v2786_v26, %v2787_v24  ;;  %v2884_v62 = vadd.f32 %v2787_v24, %v2676_v6  ;;  %v7564_v12 = vunpack.c.l.bf16 %v7750_v63  ;;  %v7565_v16 = vunpack.c.h.bf16 %v7750_v63 }
 0x349   : > { %v2883_v58 = vadd.f32 %v2788_v39, %v2675_v23  ;;  %v2930_v32 = vpack.c.bf16 %v2882_v29, %v2882_v29  ;;  %v3689_v49 = vunpack.c.l.bf16 %v3511_v13  ;;  %v3690_v46 = vunpack.c.l.bf16 %v3512_v21 }
 0x34a   : > { %v2932_v48 = vpack.c.bf16 %v2884_v62, %v2884_v62  ;;  %v3613_v57 = vmul.f32 %v7564_v12, %v8622_v40  ;;  %v3614_v19 = vmul.f32 %v7565_v16, %v8622_v40  ;;  %v3691_v14 = vunpack.c.l.bf16 %v3513_v38 }
 0x34b   : > { %v2931_v59 = vpack.c.bf16 %v2883_v58, %v2883_v58  ;;  %v3172_v54 = vunpack.c.l.bf16 %v2930_v32  ;;  %v4045_v33 = vunpack.c.l.bf16 %v3993_v36  ;;  %v4046_v8 = vunpack.c.l.bf16 %v3994_v1  ;;  %v1010_v32 = vpop.f32.mrf.mxu0 }
 0x34c   : > { %v3174_v6 = vunpack.c.l.bf16 %v2932_v48  ;;  %v3645_v31 = vpack.c.bf16 %v3613_v57, %v3613_v57  ;;  %v3646_v26 = vpack.c.bf16 %v3614_v19, %v3614_v19  ;;  %v4047_v20 = vunpack.c.l.bf16 %v3995_v15  ;;  %v5124_v15 = vpop.f32.mrf.mxu2 }
 0x34d   : > { %v3173_v28 = vunpack.c.l.bf16 %v2931_v59  ;;  %v3268_v23 = vadd.f32 %v3220_v52, %v3172_v54  ;;  %v4094_v10 = vmul.f32 %v8659_v11, %v4045_v33  ;;  %v4095_v63 = vmul.f32 %v8659_v11, %v4046_v8 }
 0x34e   : > { %v3270_v24 = vadd.f32 %v3222_v7, %v3174_v6  ;;  %v3725_v13 = vunpack.c.l.bf16 %v3645_v31  ;;  %v3726_v21 = vunpack.c.l.bf16 %v3646_v26  ;;  %v4096_v29 = vmul.f32 %v8659_v11, %v4047_v20 }
 0x34f   : > { %v3269_v38 = vadd.f32 %v3221_v41, %v3173_v28  ;;  %v3316_v39 = vpack.c.bf16 %v3268_v23, %v3268_v23  ;;  %v4142_v62 = vpack.c.bf16 %v4094_v10, %v4094_v10  ;;  %v4143_v12 = vpack.c.bf16 %v4095_v63, %v4095_v63 }
 0x350   : > { %v3318_v16 = vpack.c.bf16 %v3270_v24, %v3270_v24  ;;  %v3801_v36 = vrot.slane %v3725_v13, 4  ;;  %v3802_v1 = vrot.slane %v3726_v21, 4  ;;  %v4144_v58 = vpack.c.bf16 %v4096_v29, %v4096_v29 }
 0x351   : > { %v3317_v52 = vpack.c.bf16 %v3269_v38, %v3269_v38  ;;  %v4238_v48 = vunpack.c.l.bf16 %v4142_v62  ;;  %v4239_v57 = vunpack.c.l.bf16 %v4143_v12  ;;  %v4382_v7 = vunpack.c.l.bf16 %v2302_v5  ;;  %v1288_v38 = vld [vmem:[%s10748_s4 + $0x8] sm:$0xf] }
 0x352   : > { %v3803_v19 = vsel %vm1735_vm4, %v3801_v36, %v3802_v1  ;;  %v3897_v59 = vadd.f32 %v3801_v36, %v3689_v49  ;;  %v3899_v41 = vadd.f32 %v3802_v1, %v3691_v14  ;;  %v4240_v54 = vunpack.c.l.bf16 %v4144_v58  ;;  %v651_v36 = vld [vmem:[#allocation2 + $0x3d4] sm:$0xf]  ;;  %v1332_v1 = vld [vmem:[#allocation2 + $0x180] sm:$0xc] }
 0x353   : > { %v3898_v33 = vadd.f32 %v3803_v19, %v3690_v46  ;;  %v4383_v8 = vunpack.c.l.bf16 %v2303_v45  ;;  %v4384_v6 = vunpack.c.l.bf16 %v2304_v44  ;;  %v4430_v31 = vunpack.c.l.bf16 %v3316_v39  ;;  %v1013_v21 = vpop.f32.mrf.mxu0 }
 0x354   : > { %v3945_v26 = vpack.c.bf16 %v3897_v59, %v3897_v59  ;;  %v3947_v20 = vpack.c.bf16 %v3899_v41, %v3899_v41  ;;  %v4431_v28 = vunpack.c.l.bf16 %v3317_v52  ;;  %v4432_v50 = vunpack.c.l.bf16 %v3318_v16  ;;  %v5126_v29 = vpop.f32.mrf.mxu2  ;;  %v1333_v59 = vld [vmem:[#allocation2 + $0x184] sm:$0xf]  ;;  %v1334_v41 = vld [vmem:[#allocation2 + $0x188] sm:$0x3] }
 0x355   : > { %v3946_v5 = vpack.c.bf16 %v3898_v33, %v3898_v33  ;;  %v4478_v23 = vadd.f32 %v4430_v31, %v4382_v7  ;;  %v5251_v49 = vpack.c.bf16 %v5191_v17, %v5190_v27  ;;  %v1011_v42 = vadd.f32 %v9712_v34, %v1010_v32 }
 0x356   : > { %v4190_v44 = vunpack.c.l.bf16 %v3945_v26  ;;  %v4192_v45 = vunpack.c.l.bf16 %v3947_v20  ;;  %v4479_v46 = vadd.f32 %v4431_v28, %v4383_v8  ;;  %v4480_v14 = vadd.f32 %v4432_v50, %v4384_v6  ;;  %v9732_v8 = vld [vmem:[#allocation2 + $0x188] sm:$0xff]  }
 0x357   : > { %v4191_v10 = vunpack.c.l.bf16 %v3946_v5  ;;  %v4526_v63 = vpack.c.bf16 %v4478_v23, %v4478_v23  ;;  %5352 = vmatmul.bf16.gmra.mxu3 %v5251_v49  ;;  %v1068_v24 = vmax.f32 %v1011_v42, 0.0  ;;  %v9716_v47 = vadd.f32 %v5124_v15, %v9367_v18 }
 0x358   : > { %v4286_v35 = vadd.f32 %v4238_v48, %v4190_v44  ;;  %v4288_v27 = vadd.f32 %v4240_v54, %v4192_v45  ;;  %v4527_v17 = vpack.c.bf16 %v4479_v46, %v4479_v46  ;;  %v4528_v13 = vpack.c.bf16 %v4480_v14, %v4480_v14 }
 0x359   : > { %v4287_v39 = vadd.f32 %v4239_v57, %v4191_v10  ;;  %v4574_v62 = vunpack.c.l.bf16 %v4526_v63  ;;  %v5192_v12 = vmax.f32 %v9716_v47, 0.0  ;;  %v1092_v16 = vpack.c.bf16 %v1068_v24, %v1067_v9 }
 0x35a   : > { %v4334_v58 = vpack.c.bf16 %v4286_v35, %v4286_v35  ;;  %v4336_v32 = vpack.c.bf16 %v4288_v27, %v4288_v27  ;;  %v4575_v15 = vunpack.c.l.bf16 %v4527_v17  ;;  %v4576_v52 = vunpack.c.l.bf16 %v4528_v13 }
 0x35b   : > { %v4335_v48 = vpack.c.bf16 %v4287_v39, %v4287_v39  ;;  %1208 = vmatmul.bf16.gmra.mxu1 %v1092_v16  ;;  %v9725_v7 = vadd.f32 %v9712_v34, %v1013_v21  ;;  %v9728_v19 = vadd.f32 %v5126_v29, %v9367_v18  ;;  %v5515_v57 = vpack.i.b16 %v1288_v38, %v1288_v38 }
 0x35c   : > { %v4622_v54 = vunpack.c.l.bf16 %v4334_v58  ;;  %v4624_v60 = vunpack.c.l.bf16 %v4336_v32  ;;  %v652_v9 = vsel %vm8160_vm2, 0, %v651_v36  ;;  %v1384_v33 = vunpack.c.l.bf16 %v1332_v1  ;;  %v1967_v1 = vld [vmem:[#allocation2 + $0x18c] sm:$0xc] }
 0x35d   : > { %v4623_v6 = vunpack.c.l.bf16 %v4335_v48  ;;  %v1069_v31 = vmax.f32 %v9725_v7, 0.0  ;;  %v5193_v26 = vmax.f32 %v9728_v19, 0.0  ;;  %v5517_v20 = vperm.slane %v5515_v57, 2  ;;  %653 = vst [vmem:[#allocation2 + $0x3d4] sm:$0xf] %v652_v9 }
 0x35e   : > { %v4670_v28 = vadd.f32 %v4622_v54, %v4574_v62  ;;  %v4672_v50 = vadd.f32 %v4624_v60, %v4576_v52  ;;  %v1385_v5 = vunpack.c.l.bf16 %v1333_v59  ;;  %v1386_v23 = vunpack.c.l.bf16 %v1334_v41  ;;  %v1969_v60 = vld [vmem:[#allocation2 + $0x194] sm:$0x3] }
 0x35f   : > { %v4671_v49 = vadd.f32 %v4623_v6, %v4575_v15  ;;  %v9736_v42 = vunpack.c.l.bf16 %v5517_v20  ;;  %v1433_v44 = vmul.f32 %v8552_v2, %v1384_v33  ;;  %v7440_v45 = vunpack.c.l.bf16 %v9732_v8 }
 0x360   : > { %v4718_v46 = vpack.c.bf16 %v4670_v28, %v4670_v28  ;;  %v4720_v14 = vpack.c.bf16 %v4672_v50, %v4672_v50  ;;  %v1434_v10 = vmul.f32 %v8552_v2, %v1385_v5  ;;  %v1435_v63 = vmul.f32 %v8552_v2, %v1386_v23 }
 0x361   : > { %v4719_v24 = vpack.c.bf16 %v4671_v49, %v4671_v49  ;;  %v5551_v35 = vmul.f32 %v7436_v3, %v9736_v42  ;;  %v5552_v27 = vmul.f32 %v7437_v61, %v9736_v42  ;;  %v1481_v17 = vpack.c.bf16 %v1433_v44, %v1433_v44 }
 0x362   : > { %v7179_v13 = vrot.slane %v4718_v46, 10  ;;  %v4870_v21 = vrot.slane %v4720_v14, 6  ;;  %v1482_v29 = vpack.c.bf16 %v1434_v10, %v1434_v10  ;;  %v1483_v38 = vpack.c.bf16 %v1435_v63, %v1435_v63  ;;  %v2353_v63 = vld [vmem:[#allocation2 + $0x2a0] sm:$0xc] }
 0x363   : > { %v4867_v39 = vrot.slane %v4719_v24, 6  ;;  %v5583_v62 = vpack.c.bf16 %v5551_v35, %v5551_v35  ;;  %v5584_v16 = vpack.c.bf16 %v5552_v27, %v5552_v27  ;;  %v7441_v36 = vunpack.c.h.bf16 %v9732_v8 }
 0x364   : > { %v1585_v58 = vmul.f32 %v7440_v45, %v8531_v53  ;;  %v1662_v3 = vunpack.c.l.bf16 %v1481_v17  ;;  %v1663_v32 = vunpack.c.l.bf16 %v1482_v29  ;;  %v1664_v15 = vunpack.c.l.bf16 %v1483_v38 }
 0x365   : > { %v4868_v61 = vsel %vm8788_vm7, %v7179_v13, %v4867_v39  ;;  %v4869_v52 = vrot.slane %v4867_v39, 4  ;;  %v5615_v48 = vunpack.c.l.bf16 %v5583_v62  ;;  %v5616_v57 = vunpack.c.l.bf16 %v5584_v16  ;;  %v2354_v13 = vld [vmem:[#allocation2 + $0x2a4] sm:$0xf] }
 0x366   : > { %v4949_v59 = vunpack.c.l.bf16 %v4868_v61  ;;  %v1586_v41 = vmul.f32 %v7441_v36, %v8531_v53  ;;  %v1617_v54 = vpack.c.bf16 %v1585_v58, %v1585_v58  ;;  %v2016_v9 = vunpack.c.l.bf16 %v1967_v1  ;;  %v2355_v58 = vld [vmem:[#allocation2 + $0x2a8] sm:$0x3] }
 0x367   : > { %v4871_v33 = vsel %vm8788_vm7, %v4869_v52, %v4870_v21  ;;  %v5648_v6 = vadd.f32 %v8765_v56, %v5615_v48  ;;  %v5649_v20 = vadd.f32 %v8765_v56, %v5616_v57  ;;  %v2017_v28 = vunpack.c.l.bf16 %v1968_v55 }
 0x368   : > { %v4950_v50 = vunpack.c.l.bf16 %v4871_v33  ;;  %v4982_v5 = vadd.f32 %v8759_v37, %v4949_v59  ;;  %v1618_v23 = vpack.c.bf16 %v1586_v41, %v1586_v41  ;;  %v1697_v49 = vunpack.c.l.bf16 %v1617_v54 }
 0x369   : > { %v5680_v44 = vmax.f32 %v5648_v6, 0.0  ;;  %v5681_v46 = vmax.f32 %v5649_v20, 0.0  ;;  %v2018_v14 = vunpack.c.l.bf16 %v1969_v60  ;;  %v2065_v10 = vmul.f32 %v8590_v51, %v2016_v9  ;;  %v7735_v9 = vld [vmem:[#allocation2 + $0x2a8] sm:$0xff]  }
 0x36a   : > { %v4983_v24 = vadd.f32 %v8759_v37, %v4950_v50  ;;  %v5014_v35 = vmax.f32 %v4982_v5, 0.0  ;;  %v1698_v27 = vunpack.c.l.bf16 %v1618_v23  ;;  %v1775_v17 = vrot.slane %v1697_v49, 4 }
 0x36b   : > { %v5712_v21 = vpack.c.bf16 %v5681_v46, %v5680_v44  ;;  %v2066_v29 = vmul.f32 %v8590_v51, %v2017_v28  ;;  %v2067_v38 = vmul.f32 %v8590_v51, %v2018_v14  ;;  %v2113_v39 = vpack.c.bf16 %v2065_v10, %v2065_v10 }
 0x36c   : > { %v5015_v62 = vmax.f32 %v4983_v24, 0.0  ;;  %v1776_v16 = vrot.slane %v1698_v27, 4  ;;  %v1871_v1 = vadd.f32 %v1775_v17, %v1662_v3  ;;  %v2402_v55 = vunpack.c.l.bf16 %v2353_v63 }
 0x36d   : > { %7241 = vmatmul.msk.bf16.vlgmr.msrb.gmra.mxu0 %vm915_vm3, %v5712_v21  ;;  %v2114_v61 = vpack.c.bf16 %v2066_v29, %v2066_v29  ;;  %v2115_v52 = vpack.c.bf16 %v2067_v38, %v2067_v38  ;;  %v2209_v48 = vunpack.c.l.bf16 %v2113_v39  ;;  %v2403_v57 = vunpack.c.l.bf16 %v2354_v13  ;;  %v2981_v13 = vld [vmem:[#allocation2 + $0x2ac] sm:$0xc]  ;;  %v2982_v21 = vld [vmem:[#allocation2 + $0x2b0] sm:$0xf]  ;;  %v2983_v29 = vld [vmem:[#allocation2 + $0x2b4] sm:$0x3] }
 0x36e   : > { %v5034_v59 = vpack.c.bf16 %v5015_v62, %v5014_v35  ;;  %v1777_v41 = vsel %vm1735_vm4, %v1775_v17, %v1776_v16  ;;  %v1873_v54 = vadd.f32 %v1776_v16, %v1664_v15  ;;  %v1919_v60 = vpack.c.bf16 %v1871_v1, %v1871_v1  ;;  %v3368_v1 = vld [vmem:[#allocation2 + $0x3c0] sm:$0xc] }
 0x36f   : > { %v1872_v33 = vadd.f32 %v1777_v41, %v1663_v32  ;;  %v2210_v6 = vunpack.c.l.bf16 %v2114_v61  ;;  %v2211_v20 = vunpack.c.l.bf16 %v2115_v52  ;;  %v2404_v28 = vunpack.c.l.bf16 %v2355_v58 }
 0x370   : > { %7199 = vmatmul.msk.bf16.gmra.mxu2 %vm915_vm3, %v5034_v59  ;;  %v1921_v3 = vpack.c.bf16 %v1873_v54, %v1873_v54  ;;  %v2161_v50 = vunpack.c.l.bf16 %v1919_v60  ;;  %v2451_v5 = vmul.f32 %v8554_v4, %v2402_v55  ;;  %v2452_v23 = vmul.f32 %v8554_v4, %v2403_v57  ;;  %v3370_v60 = vld [vmem:[#allocation2 + $0x3c8] sm:$0x3] }
 0x371   : > { %v1920_v49 = vpack.c.bf16 %v1872_v33, %v1872_v33  ;;  %v2453_v44 = vmul.f32 %v8554_v4, %v2404_v28  ;;  %v7504_v46 = vunpack.c.l.bf16 %v7735_v9  ;;  %v7505_v14 = vunpack.c.h.bf16 %v7735_v9 }
 0x372   : > { %v2163_v15 = vunpack.c.l.bf16 %v1921_v3  ;;  %v9772_v10 = vadd.f32 %v2209_v48, %v2161_v50  ;;  %v2499_v32 = vpack.c.bf16 %v2451_v5, %v2451_v5  ;;  %v2500_v63 = vpack.c.bf16 %v2452_v23, %v2452_v23  ;;  %v3369_v48 = vld [vmem:[#allocation2 + $0x3c4] sm:$0xf] }
 0x373   : > { %v2162_v24 = vunpack.c.l.bf16 %v1920_v49  ;;  %v2501_v35 = vpack.c.bf16 %v2453_v44, %v2453_v44  ;;  %v2600_v27 = vmul.f32 %v7504_v46, %v8579_v30  ;;  %v2601_v17 = vmul.f32 %v7505_v14, %v8579_v30 }
 0x374   : > { %v9776_v38 = vadd.f32 %v2211_v20, %v2163_v15  ;;  %v2305_v39 = vpack.c.bf16 %v9772_v10, %v9772_v10  ;;  %v2677_v62 = vunpack.c.l.bf16 %v2499_v32  ;;  %v2678_v16 = vunpack.c.l.bf16 %v2500_v63 }
 0x375   : > { %v9780_v58 = vadd.f32 %v2210_v6, %v2162_v24  ;;  %v2632_v55 = vpack.c.bf16 %v2600_v27, %v2600_v27  ;;  %v2633_v61 = vpack.c.bf16 %v2601_v17, %v2601_v17  ;;  %v2679_v52 = vunpack.c.l.bf16 %v2501_v35 }
 0x376   : > { %v2307_v57 = vpack.c.bf16 %v9776_v38, %v9776_v38  ;;  %v3030_v59 = vunpack.c.l.bf16 %v2981_v13  ;;  %v3031_v41 = vunpack.c.l.bf16 %v2982_v21  ;;  %v3032_v54 = vunpack.c.l.bf16 %v2983_v29  ;;  %v7751_v13 = vld [vmem:[#allocation2 + $0x3c8] sm:$0xff]  }
 0x377   : > { %v2306_v9 = vpack.c.bf16 %v9780_v58, %v9780_v58  ;;  %v2712_v33 = vunpack.c.l.bf16 %v2632_v55  ;;  %v2713_v20 = vunpack.c.l.bf16 %v2633_v61  ;;  %v3417_v28 = vunpack.c.l.bf16 %v3368_v1 }
 0x378   : > { %v3079_v6 = vmul.f32 %v8614_v25, %v3030_v59  ;;  %v3080_v3 = vmul.f32 %v8614_v25, %v3031_v41  ;;  %v3081_v50 = vmul.f32 %v8614_v25, %v3032_v54  ;;  %v3418_v5 = vunpack.c.l.bf16 %v3369_v48 }
 0x379   : > { %v2789_v23 = vrot.slane %v2712_v33, 4  ;;  %v2790_v49 = vrot.slane %v2713_v20, 4  ;;  %v3419_v44 = vunpack.c.l.bf16 %v3370_v60  ;;  %v3466_v46 = vmul.f32 %v8628_v43, %v3417_v28  ;;  %v3996_v20 = vld [vmem:[#allocation2 + $0x3cc] sm:$0xc]  ;;  %v3997_v28 = vld [vmem:[#allocation2 + $0x3d0] sm:$0xf] }
 0x37a   : > { %v3127_v14 = vpack.c.bf16 %v3079_v6, %v3079_v6  ;;  %v3128_v15 = vpack.c.bf16 %v3080_v3, %v3080_v3  ;;  %v3129_v32 = vpack.c.bf16 %v3081_v50, %v3081_v50  ;;  %v3467_v63 = vmul.f32 %v8628_v43, %v3418_v5  ;;  %v3998_v50 = vld [vmem:[#allocation2 + $0x3d4] sm:$0x3] }
 0x37b   : > { %v2791_v24 = vsel %vm1735_vm4, %v2789_v23, %v2790_v49  ;;  %v2885_v35 = vadd.f32 %v2789_v23, %v2677_v62  ;;  %v2887_v27 = vadd.f32 %v2790_v49, %v2679_v52  ;;  %v3468_v17 = vmul.f32 %v8628_v43, %v3419_v44 }
 0x37c   : > { %v2886_v21 = vadd.f32 %v2791_v24, %v2678_v16  ;;  %v3223_v29 = vunpack.c.l.bf16 %v3127_v14  ;;  %v3224_v1 = vunpack.c.l.bf16 %v3128_v15  ;;  %v3225_v58 = vunpack.c.l.bf16 %v3129_v32 }
 0x37d   : > { %v2933_v55 = vpack.c.bf16 %v2885_v35, %v2885_v35  ;;  %v2935_v61 = vpack.c.bf16 %v2887_v27, %v2887_v27  ;;  %v3514_v48 = vpack.c.bf16 %v3466_v46, %v3466_v46  ;;  %v3515_v59 = vpack.c.bf16 %v3467_v63, %v3467_v63 }
 0x37e   : > { %v2934_v41 = vpack.c.bf16 %v2886_v21, %v2886_v21  ;;  %v3516_v54 = vpack.c.bf16 %v3468_v17, %v3468_v17  ;;  %v7568_v60 = vunpack.c.l.bf16 %v7751_v13  ;;  %v7569_v33 = vunpack.c.h.bf16 %v7751_v13 }
 0x37f   : > { %v3175_v6 = vunpack.c.l.bf16 %v2933_v55  ;;  %v3177_v62 = vunpack.c.l.bf16 %v2935_v61  ;;  %v3692_v52 = vunpack.c.l.bf16 %v3514_v48  ;;  %v3693_v3 = vunpack.c.l.bf16 %v3515_v59 }
 0x380   : > { %v3176_v5 = vunpack.c.l.bf16 %v2934_v41  ;;  %v3615_v16 = vmul.f32 %v7568_v60, %v8622_v40  ;;  %v3616_v23 = vmul.f32 %v7569_v33, %v8622_v40  ;;  %v3694_v49 = vunpack.c.l.bf16 %v3516_v54 }
 0x381   : > { %v3271_v44 = vadd.f32 %v3223_v29, %v3175_v6  ;;  %v3273_v46 = vadd.f32 %v3225_v58, %v3177_v62  ;;  %v4048_v14 = vunpack.c.l.bf16 %v3996_v20  ;;  %v4049_v15 = vunpack.c.l.bf16 %v3997_v28  ;;  %v1015_v28 = vpop.f32.mrf.mxu0  ;;  %v5129_v6 = vpop.f32.mrf.mxu2 }
 0x382   : > { %v3272_v32 = vadd.f32 %v3224_v1, %v3176_v5  ;;  %v3647_v63 = vpack.c.bf16 %v3615_v16, %v3615_v16  ;;  %v3648_v24 = vpack.c.bf16 %v3616_v23, %v3616_v23  ;;  %v4050_v35 = vunpack.c.l.bf16 %v3998_v50 }
 0x383   : > { %v3319_v27 = vpack.c.bf16 %v3271_v44, %v3271_v44  ;;  %v3321_v17 = vpack.c.bf16 %v3273_v46, %v3273_v46  ;;  %v4097_v13 = vmul.f32 %v8659_v11, %v4048_v14  ;;  %v4098_v21 = vmul.f32 %v8659_v11, %v4049_v15 }
 0x384   : > { %v3320_v55 = vpack.c.bf16 %v3272_v32, %v3272_v32  ;;  %v3727_v61 = vunpack.c.l.bf16 %v3647_v63  ;;  %v3728_v48 = vunpack.c.l.bf16 %v3648_v24  ;;  %v4099_v59 = vmul.f32 %v8659_v11, %v4050_v35 }
 0x385   : > { %v4145_v41 = vpack.c.bf16 %v4097_v13, %v4097_v13  ;;  %v4146_v29 = vpack.c.bf16 %v4098_v21, %v4098_v21  ;;  %v4385_v1 = vunpack.c.l.bf16 %v2305_v39  ;;  %v4386_v58 = vunpack.c.l.bf16 %v2306_v9 }
 0x386   : > { %v3804_v54 = vrot.slane %v3727_v61, 4  ;;  %v3805_v60 = vrot.slane %v3728_v48, 4  ;;  %v4147_v33 = vpack.c.bf16 %v4099_v59, %v4099_v59  ;;  %v4387_v20 = vunpack.c.l.bf16 %v2307_v57 }
 0x387   : > { %v4241_v62 = vunpack.c.l.bf16 %v4145_v41  ;;  %v4242_v50 = vunpack.c.l.bf16 %v4146_v29  ;;  %v4433_v5 = vunpack.c.l.bf16 %v3319_v27  ;;  %v4434_v16 = vunpack.c.l.bf16 %v3320_v55  ;;  %v659_v29 = vld [vmem:[#allocation2 + $0x3ec] sm:$0xf] }
 0x388   : > { %v3806_v23 = vsel %vm1735_vm4, %v3804_v54, %v3805_v60  ;;  %v3900_v44 = vadd.f32 %v3804_v54, %v3692_v52  ;;  %v3902_v46 = vadd.f32 %v3805_v60, %v3694_v49  ;;  %v4243_v10 = vunpack.c.l.bf16 %v4147_v33 }
 0x389   : > { %v3901_v39 = vadd.f32 %v3806_v23, %v3693_v3  ;;  %v4435_v9 = vunpack.c.l.bf16 %v3321_v17  ;;  %v4481_v14 = vadd.f32 %v4433_v5, %v4385_v1  ;;  %v4482_v15 = vadd.f32 %v4434_v16, %v4386_v58  ;;  %v1018_v59 = vpop.f32.mrf.mxu0  ;;  %v5131_v41 = vpop.f32.mrf.mxu2 }
 0x38a   : > { %v3948_v32 = vpack.c.bf16 %v3900_v44, %v3900_v44  ;;  %v3950_v63 = vpack.c.bf16 %v3902_v46, %v3902_v46  ;;  %v5252_v38 = vpack.c.bf16 %v5193_v26, %v5192_v12  ;;  %v1016_v57 = vadd.f32 %v9712_v34, %v1015_v28 }
 0x38b   : > { %v3949_v24 = vpack.c.bf16 %v3901_v39, %v3901_v39  ;;  %v4483_v35 = vadd.f32 %v4435_v9, %v4387_v20  ;;  %v4529_v27 = vpack.c.bf16 %v4481_v14, %v4481_v14  ;;  %v4530_v13 = vpack.c.bf16 %v4482_v15, %v4482_v15 }
 0x38c   : > { %v4193_v52 = vunpack.c.l.bf16 %v3948_v32  ;;  %v4195_v49 = vunpack.c.l.bf16 %v3950_v63  ;;  %5357 = vmatmul.bf16.gmra.mxu3 %v5252_v38  ;;  %v1070_v3 = vmax.f32 %v1016_v57, 0.0  ;;  %v9811_v17 = vadd.f32 %v5129_v6, %v9367_v18  ;;  %v1336_v6 = vld [vmem:[#allocation2 + $0x19c] sm:$0xf] }
 0x38d   : > { %v4194_v21 = vunpack.c.l.bf16 %v3949_v24  ;;  %v4531_v55 = vpack.c.bf16 %v4483_v35, %v4483_v35  ;;  %v4577_v61 = vunpack.c.l.bf16 %v4529_v27  ;;  %v4578_v47 = vunpack.c.l.bf16 %v4530_v13 }
 0x38e   : > { %v4289_v48 = vadd.f32 %v4241_v62, %v4193_v52  ;;  %v4291_v19 = vadd.f32 %v4243_v10, %v4195_v49  ;;  %v5194_v12 = vmax.f32 %v9811_v17, 0.0  ;;  %v1093_v26 = vpack.c.bf16 %v1070_v3, %v1069_v31  ;;  %v1335_v31 = vld [vmem:[#allocation2 + $0x198] sm:$0xc]  ;;  %v1337_v62 = vld [vmem:[#allocation2 + $0x1a0] sm:$0x3] }
 0x38f   : > { %v4290_v1 = vadd.f32 %v4242_v50, %v4194_v21  ;;  %v4579_v58 = vunpack.c.l.bf16 %v4531_v55  ;;  %v9817_v54 = vadd.f32 %v9712_v34, %v1018_v59  ;;  %v9820_v60 = vadd.f32 %v5131_v41, %v9367_v18  ;;  %v9837_v3 = vld [vmem:[#allocation2 + $0x1a0] sm:$0xff]  }
 0x390   : > { %v4337_v33 = vpack.c.bf16 %v4289_v48, %v4289_v48  ;;  %v4339_v20 = vpack.c.bf16 %v4291_v19, %v4291_v19  ;;  %1213 = vmatmul.bf16.gmra.mxu1 %v1093_v26  ;;  %v5553_v28 = vmul.f32 %v7440_v45, %v9736_v42  ;;  %v5554_v7 = vmul.f32 %v7441_v36, %v9736_v42  ;;  %v1970_v19 = vld [vmem:[#allocation2 + $0x1a4] sm:$0xc] }
 0x391   : > { %v4338_v50 = vpack.c.bf16 %v4290_v1, %v4290_v1  ;;  %v1071_v5 = vmax.f32 %v9817_v54, 0.0  ;;  %v5195_v16 = vmax.f32 %v9820_v60, 0.0  ;;  %v660_v23 = vsel %vm8160_vm2, 0, %v659_v29  ;;  %v1338_v54 = vld [vmem:[#allocation2 + $0x1b0] sm:$0xc] }
 0x392   : > { %v4625_v44 = vunpack.c.l.bf16 %v4337_v33  ;;  %v4627_v46 = vunpack.c.l.bf16 %v4339_v20  ;;  %v5585_v10 = vpack.c.bf16 %v5553_v28, %v5553_v28  ;;  %v5586_v39 = vpack.c.bf16 %v5554_v7, %v5554_v7  ;;  %661 = vst [vmem:[#allocation2 + $0x3ec] sm:$0xf] %v660_v23  ;;  %v1971_v20 = vld [vmem:[#allocation2 + $0x1a8] sm:$0xf]  ;;  %v1972_v28 = vld [vmem:[#allocation2 + $0x1ac] sm:$0x3] }
 0x393   : > { %v4626_v45 = vunpack.c.l.bf16 %v4338_v50  ;;  %v1387_v9 = vunpack.c.l.bf16 %v1335_v31  ;;  %v1388_v8 = vunpack.c.l.bf16 %v1336_v6  ;;  %v1389_v36 = vunpack.c.l.bf16 %v1337_v62  ;;  %v2356_v50 = vld [vmem:[#allocation2 + $0x2b8] sm:$0xc] }
 0x394   : > { %v4673_v14 = vadd.f32 %v4625_v44, %v4577_v61  ;;  %v4675_v15 = vadd.f32 %v4627_v46, %v4579_v58  ;;  %v5617_v32 = vunpack.c.l.bf16 %v5585_v10  ;;  %v5618_v63 = vunpack.c.l.bf16 %v5586_v39 }
 0x395   : > { %v4674_v38 = vadd.f32 %v4626_v45, %v4578_v47  ;;  %v1436_v57 = vmul.f32 %v8552_v2, %v1387_v9  ;;  %v1437_v24 = vmul.f32 %v8552_v2, %v1388_v8  ;;  %v1438_v35 = vmul.f32 %v8552_v2, %v1389_v36  ;;  %v2357_v36 = vld [vmem:[#allocation2 + $0x2bc] sm:$0xf] }
 0x396   : > { %v4721_v27 = vpack.c.bf16 %v4673_v14, %v4673_v14  ;;  %v4723_v13 = vpack.c.bf16 %v4675_v15, %v4675_v15  ;;  %v5650_v52 = vadd.f32 %v8765_v56, %v5617_v32  ;;  %v5651_v49 = vadd.f32 %v8765_v56, %v5618_v63 }
 0x397   : > { %v4722_v21 = vpack.c.bf16 %v4674_v38, %v4674_v38  ;;  %v1484_v55 = vpack.c.bf16 %v1436_v57, %v1436_v57  ;;  %v1485_v61 = vpack.c.bf16 %v1437_v24, %v1437_v24  ;;  %v1486_v48 = vpack.c.bf16 %v1438_v35, %v1438_v35 }
 0x398   : > { %v7180_v47 = vrot.slane %v4721_v27, 10  ;;  %v4877_v26 = vrot.slane %v4723_v13, 6  ;;  %v5682_v59 = vmax.f32 %v5650_v52, 0.0  ;;  %v5683_v41 = vmax.f32 %v5651_v49, 0.0  ;;  %v2358_v27 = vld [vmem:[#allocation2 + $0x2c0] sm:$0x3] }
 0x399   : > { %v4874_v29 = vrot.slane %v4722_v21, 6  ;;  %v7444_v1 = vunpack.c.l.bf16 %v9837_v3  ;;  %v7445_v58 = vunpack.c.h.bf16 %v9837_v3  ;;  %v1665_v33 = vunpack.c.l.bf16 %v1484_v55 }
 0x39a   : > { %v5713_v7 = vpack.c.bf16 %v5683_v41, %v5682_v59  ;;  %v1666_v31 = vunpack.c.l.bf16 %v1485_v61  ;;  %v1667_v6 = vunpack.c.l.bf16 %v1486_v48  ;;  %v2019_v62 = vunpack.c.l.bf16 %v1970_v19 }
 0x39b   : > { %v4875_v23 = vsel %vm8788_vm7, %v7180_v47, %v4874_v29  ;;  %v4876_v44 = vrot.slane %v4874_v29, 4  ;;  %v1587_v46 = vmul.f32 %v7444_v1, %v8531_v53  ;;  %v1588_v10 = vmul.f32 %v7445_v58, %v8531_v53 }
 0x39c   : > { %v4951_v39 = vunpack.c.l.bf16 %v4875_v23  ;;  %7242 = vmatmul.msk.bf16.gmra.mxu0 %vm915_vm3, %v5713_v7  ;;  %v2020_v45 = vunpack.c.l.bf16 %v1971_v20  ;;  %v2021_v9 = vunpack.c.l.bf16 %v1972_v28  ;;  %v2068_v8 = vmul.f32 %v8590_v51, %v2019_v62  ;;  %v7736_v62 = vld [vmem:[#allocation2 + $0x2c0] sm:$0xff]  }
 0x39d   : > { %v4878_v14 = vsel %vm8788_vm7, %v4876_v44, %v4877_v26  ;;  %v1619_v15 = vpack.c.bf16 %v1587_v46, %v1587_v46  ;;  %v1620_v32 = vpack.c.bf16 %v1588_v10, %v1588_v10  ;;  %v2405_v63 = vunpack.c.l.bf16 %v2356_v50 }
 0x39e   : > { %v4952_v38 = vunpack.c.l.bf16 %v4878_v14  ;;  %v4984_v57 = vadd.f32 %v8759_v37, %v4951_v39  ;;  %v2069_v24 = vmul.f32 %v8590_v51, %v2020_v45  ;;  %v2070_v35 = vmul.f32 %v8590_v51, %v2021_v9 }
 0x39f   : > { %v1699_v13 = vunpack.c.l.bf16 %v1619_v15  ;;  %v1700_v52 = vunpack.c.l.bf16 %v1620_v32  ;;  %v2116_v49 = vpack.c.bf16 %v2068_v8, %v2068_v8  ;;  %v2406_v21 = vunpack.c.l.bf16 %v2357_v36  ;;  %v2984_v32 = vld [vmem:[#allocation2 + $0x2c4] sm:$0xc] }
 0x3a0   : > { %v4985_v55 = vadd.f32 %v8759_v37, %v4952_v38  ;;  %v5016_v61 = vmax.f32 %v4984_v57, 0.0  ;;  %v2117_v48 = vpack.c.bf16 %v2069_v24, %v2069_v24  ;;  %v2118_v19 = vpack.c.bf16 %v2070_v35, %v2070_v35 }
 0x3a1   : > { %v1778_v47 = vrot.slane %v1699_v13, 4  ;;  %v1779_v26 = vrot.slane %v1700_v52, 4  ;;  %v2212_v59 = vunpack.c.l.bf16 %v2116_v49  ;;  %v2407_v41 = vunpack.c.l.bf16 %v2358_v27  ;;  %v2986_v13 = vld [vmem:[#allocation2 + $0x2cc] sm:$0x3] }
 0x3a2   : > { %v5017_v29 = vmax.f32 %v4985_v55, 0.0  ;;  %v2213_v20 = vunpack.c.l.bf16 %v2117_v48  ;;  %v2214_v28 = vunpack.c.l.bf16 %v2118_v19  ;;  %v2454_v7 = vmul.f32 %v8554_v4, %v2405_v63 }
 0x3a3   : > { %v1780_v50 = vsel %vm1735_vm4, %v1778_v47, %v1779_v26  ;;  %v1874_v23 = vadd.f32 %v1778_v47, %v1665_v33  ;;  %v1876_v44 = vadd.f32 %v1779_v26, %v1667_v6  ;;  %v2455_v46 = vmul.f32 %v8554_v4, %v2406_v21  ;;  %v2985_v33 = vld [vmem:[#allocation2 + $0x2c8] sm:$0xf] }
 0x3a4   : > { %v5035_v10 = vpack.c.bf16 %v5017_v29, %v5016_v61  ;;  %v1875_v39 = vadd.f32 %v1780_v50, %v1666_v31  ;;  %v2456_v45 = vmul.f32 %v8554_v4, %v2407_v41  ;;  %v2502_v9 = vpack.c.bf16 %v2454_v7, %v2454_v7  ;;  %v3372_v50 = vld [vmem:[#allocation2 + $0x3dc] sm:$0xf] }
 0x3a5   : > { %v1922_v8 = vpack.c.bf16 %v1874_v23, %v1874_v23  ;;  %v1924_v36 = vpack.c.bf16 %v1876_v44, %v1876_v44  ;;  %v2503_v14 = vpack.c.bf16 %v2455_v46, %v2455_v46  ;;  %v7508_v15 = vunpack.c.l.bf16 %v7736_v62  ;;  %v3373_v46 = vld [vmem:[#allocation2 + $0x3e0] sm:$0x3] }
 0x3a6   : > { %7200 = vmatmul.msk.bf16.gmra.mxu2 %vm915_vm3, %v5035_v10  ;;  %v1923_v63 = vpack.c.bf16 %v1875_v39, %v1875_v39  ;;  %v2504_v38 = vpack.c.bf16 %v2456_v45, %v2456_v45  ;;  %v7509_v57 = vunpack.c.h.bf16 %v7736_v62  ;;  %v2680_v24 = vunpack.c.l.bf16 %v2502_v9  ;;  %v3371_v62 = vld [vmem:[#allocation2 + $0x3d8] sm:$0xc] }
 0x3a7   : > { %v2164_v6 = vunpack.c.l.bf16 %v1922_v8  ;;  %v2166_v35 = vunpack.c.l.bf16 %v1924_v36  ;;  %v2602_v27 = vmul.f32 %v7508_v15, %v8579_v30  ;;  %v2681_v31 = vunpack.c.l.bf16 %v2503_v14 }
 0x3a8   : > { %v2165_v52 = vunpack.c.l.bf16 %v1923_v63  ;;  %v2603_v49 = vmul.f32 %v7509_v57, %v8579_v30  ;;  %v2682_v21 = vunpack.c.l.bf16 %v2504_v38  ;;  %v3033_v55 = vunpack.c.l.bf16 %v2984_v32 }
 0x3a9   : > { %v9864_v61 = vadd.f32 %v2212_v59, %v2164_v6  ;;  %v9866_v48 = vadd.f32 %v2214_v28, %v2166_v35  ;;  %v2634_v19 = vpack.c.bf16 %v2602_v27, %v2602_v27  ;;  %v3034_v47 = vunpack.c.l.bf16 %v2985_v33  ;;  %v7752_v27 = vld [vmem:[#allocation2 + $0x3e0] sm:$0xff]  }
 0x3aa   : > { %v9868_v26 = vadd.f32 %v2213_v20, %v2165_v52  ;;  %v2635_v41 = vpack.c.bf16 %v2603_v49, %v2603_v49  ;;  %v3035_v29 = vunpack.c.l.bf16 %v2986_v13  ;;  %v3082_v7 = vmul.f32 %v8614_v25, %v3033_v55 }
 0x3ab   : > { %v2308_v23 = vpack.c.bf16 %v9864_v61, %v9864_v61  ;;  %v2310_v44 = vpack.c.bf16 %v9866_v48, %v9866_v48  ;;  %v2714_v59 = vunpack.c.l.bf16 %v2634_v19  ;;  %v3083_v28 = vmul.f32 %v8614_v25, %v3034_v47 }
 0x3ac   : > { %v2309_v20 = vpack.c.bf16 %v9868_v26, %v9868_v26  ;;  %v2715_v10 = vunpack.c.l.bf16 %v2635_v41  ;;  %v3084_v39 = vmul.f32 %v8614_v25, %v3035_v29  ;;  %v3130_v45 = vpack.c.bf16 %v3082_v7, %v3082_v7 }
 0x3ad   : > { %v2792_v9 = vrot.slane %v2714_v59, 4  ;;  %v3131_v8 = vpack.c.bf16 %v3083_v28, %v3083_v28  ;;  %v3420_v36 = vunpack.c.l.bf16 %v3371_v62  ;;  %v3421_v14 = vunpack.c.l.bf16 %v3372_v50  ;;  %v3999_v59 = vld [vmem:[#allocation2 + $0x3e4] sm:$0xc]  ;;  %v4000_v28 = vld [vmem:[#allocation2 + $0x3e8] sm:$0xf] }
 0x3ae   : > { %v2793_v15 = vrot.slane %v2715_v10, 4  ;;  %v3132_v32 = vpack.c.bf16 %v3084_v39, %v3084_v39  ;;  %v3226_v63 = vunpack.c.l.bf16 %v3130_v45  ;;  %v3422_v38 = vunpack.c.l.bf16 %v3373_v46 }
 0x3af   : > { %v2888_v57 = vadd.f32 %v2792_v9, %v2680_v24  ;;  %v3227_v33 = vunpack.c.l.bf16 %v3131_v8  ;;  %v3469_v6 = vmul.f32 %v8628_v43, %v3420_v36  ;;  %v3470_v35 = vmul.f32 %v8628_v43, %v3421_v14  ;;  %v4001_v8 = vld [vmem:[#allocation2 + $0x3ec] sm:$0x3] }
 0x3b0   : > { %v2794_v13 = vsel %vm1735_vm4, %v2792_v9, %v2793_v15  ;;  %v2890_v52 = vadd.f32 %v2793_v15, %v2682_v21  ;;  %v3228_v49 = vunpack.c.l.bf16 %v3132_v32  ;;  %v3471_v55 = vmul.f32 %v8628_v43, %v3422_v38 }
 0x3b1   : > { %v2889_v19 = vadd.f32 %v2794_v13, %v2681_v31  ;;  %v2936_v47 = vpack.c.bf16 %v2888_v57, %v2888_v57  ;;  %v3517_v41 = vpack.c.bf16 %v3469_v6, %v3469_v6  ;;  %v3518_v29 = vpack.c.bf16 %v3470_v35, %v3470_v35 }
 0x3b2   : > { %v2938_v7 = vpack.c.bf16 %v2890_v52, %v2890_v52  ;;  %v3519_v62 = vpack.c.bf16 %v3471_v55, %v3471_v55  ;;  %v7572_v50 = vunpack.c.l.bf16 %v7752_v27  ;;  %v7573_v24 = vunpack.c.h.bf16 %v7752_v27 }
 0x3b3   : > { %v2937_v46 = vpack.c.bf16 %v2889_v19, %v2889_v19  ;;  %v3178_v10 = vunpack.c.l.bf16 %v2936_v47  ;;  %v3695_v39 = vunpack.c.l.bf16 %v3517_v41  ;;  %v3696_v45 = vunpack.c.l.bf16 %v3518_v29 }
 0x3b4   : > { %v3180_v9 = vunpack.c.l.bf16 %v2938_v7  ;;  %v3617_v21 = vmul.f32 %v7572_v50, %v8622_v40  ;;  %v3618_v36 = vmul.f32 %v7573_v24, %v8622_v40  ;;  %v3697_v31 = vunpack.c.l.bf16 %v3519_v62 }
 0x3b5   : > { %v3179_v14 = vunpack.c.l.bf16 %v2937_v46  ;;  %v3274_v15 = vadd.f32 %v3226_v63, %v3178_v10  ;;  %v4051_v32 = vunpack.c.l.bf16 %v3999_v59  ;;  %v4052_v38 = vunpack.c.l.bf16 %v4000_v28  ;;  %v1020_v46 = vpop.f32.mrf.mxu0  ;;  %v5134_v10 = vpop.f32.mrf.mxu2 }
 0x3b6   : > { %v3276_v57 = vadd.f32 %v3228_v49, %v3180_v9  ;;  %v3649_v6 = vpack.c.bf16 %v3617_v21, %v3617_v21  ;;  %v3650_v35 = vpack.c.bf16 %v3618_v36, %v3618_v36  ;;  %v4053_v27 = vunpack.c.l.bf16 %v4001_v8  ;;  %v7375_v8 = vld [vmem:[#allocation7 + $0xb8] sm:$0xff] }
 0x3b7   : > { %v3275_v13 = vadd.f32 %v3227_v33, %v3179_v14  ;;  %v3322_v52 = vpack.c.bf16 %v3274_v15, %v3274_v15  ;;  %v4100_v55 = vmul.f32 %v8659_v11, %v4051_v32  ;;  %v4101_v19 = vmul.f32 %v8659_v11, %v4052_v38  ;;  %v7384_v9 = vld [vmem:[#allocation7 + $0xf8] sm:$0xff]  ;;  %6020 = vmatpush.bf16.msrb.mxu2 %v7375_v8 }
 0x3b8   : > { %v3324_v47 = vpack.c.bf16 %v3276_v57, %v3276_v57  ;;  %v3729_v41 = vunpack.c.l.bf16 %v3649_v6  ;;  %v3730_v29 = vunpack.c.l.bf16 %v3650_v35  ;;  %v4102_v7 = vmul.f32 %v8659_v11, %v4053_v27  ;;  %6711 = vmatpush.bf16.msrb.mxu3 %v7384_v9  ;;  %v9918_v9 = vld [vmem:[%s10747_s3] ss:$0 sm:$0xff] }
 0x3b9   : > { %v3323_v62 = vpack.c.bf16 %v3275_v13, %v3275_v13  ;;  %v4148_v50 = vpack.c.bf16 %v4100_v55, %v4100_v55  ;;  %v4149_v63 = vpack.c.bf16 %v4101_v19, %v4101_v19  ;;  %v4388_v49 = vunpack.c.l.bf16 %v2308_v23 }
 0x3ba   : > { %v3807_v24 = vrot.slane %v3729_v41, 4  ;;  %v3808_v59 = vrot.slane %v3730_v29, 4  ;;  %v4150_v33 = vpack.c.bf16 %v4102_v7, %v4102_v7  ;;  %v4389_v28 = vunpack.c.l.bf16 %v2309_v20 }
 0x3bb   : > { %v4244_v21 = vunpack.c.l.bf16 %v4148_v50  ;;  %v4245_v36 = vunpack.c.l.bf16 %v4149_v63  ;;  %v4390_v14 = vunpack.c.l.bf16 %v2310_v44  ;;  %v4436_v15 = vunpack.c.l.bf16 %v3322_v52  ;;  %v667_v50 = vld [vmem:[#allocation2 + $0x404] sm:$0xf] }
 0x3bc   : > { %v3809_v61 = vsel %vm1735_vm4, %v3807_v24, %v3808_v59  ;;  %v3903_v23 = vadd.f32 %v3807_v24, %v3695_v39  ;;  %v3905_v32 = vadd.f32 %v3808_v59, %v3697_v31  ;;  %v4246_v38 = vunpack.c.l.bf16 %v4150_v33 }
 0x3bd   : > { %v3904_v26 = vadd.f32 %v3809_v61, %v3696_v45  ;;  %v4437_v20 = vunpack.c.l.bf16 %v3323_v62  ;;  %v4438_v57 = vunpack.c.l.bf16 %v3324_v47  ;;  %v4484_v6 = vadd.f32 %v4436_v15, %v4388_v49  ;;  %v1340_v15 = vld [vmem:[#allocation2 + $0x1b8] sm:$0x3] }
 0x3be   : > { %v3951_v35 = vpack.c.bf16 %v3903_v23, %v3903_v23  ;;  %v3953_v27 = vpack.c.bf16 %v3905_v32, %v3905_v32  ;;  %v5253_v48 = vpack.c.bf16 %v5195_v16, %v5194_v12  ;;  %v1021_v44 = vadd.f32 %v9712_v34, %v1020_v46  ;;  %v1023_v12 = vpop.f32.mrf.mxu0  ;;  %v5136_v16 = vpop.f32.mrf.mxu2 }
 0x3bf   : > { %v3952_v13 = vpack.c.bf16 %v3904_v26, %v3904_v26  ;;  %v4485_v52 = vadd.f32 %v4437_v20, %v4389_v28  ;;  %v4486_v39 = vadd.f32 %v4438_v57, %v4390_v14  ;;  %v4532_v31 = vpack.c.bf16 %v4484_v6, %v4484_v6 }
 0x3c0   : > { %v4196_v55 = vunpack.c.l.bf16 %v3951_v35  ;;  %v4198_v19 = vunpack.c.l.bf16 %v3953_v27  ;;  %5362 = vmatmul.bf16.gmra.mxu3 %v5253_v48  ;;  %v1072_v45 = vmax.f32 %v1021_v44, 0.0  ;;  %v9904_v47 = vadd.f32 %v5134_v10, %v9367_v18 }
 0x3c1   : > { %v4197_v41 = vunpack.c.l.bf16 %v3952_v13  ;;  %v4533_v29 = vpack.c.bf16 %v4485_v52, %v4485_v52  ;;  %v4534_v7 = vpack.c.bf16 %v4486_v39, %v4486_v39  ;;  %v4580_v60 = vunpack.c.l.bf16 %v4532_v31 }
 0x3c2   : > { %v4292_v17 = vadd.f32 %v4244_v21, %v4196_v55  ;;  %v4294_v62 = vadd.f32 %v4246_v38, %v4198_v19  ;;  %v1094_v34 = vpack.c.bf16 %v1072_v45, %v1071_v5  ;;  %v5196_v59 = vmax.f32 %v9904_v47, 0.0  ;;  %v1339_v5 = vld [vmem:[#allocation2 + $0x1b4] sm:$0xf]  ;;  %v9929_v38 = vpop.f32.mrf.mxu1  ;;  %v9935_v19 = vld [vmem:[#allocation2 + $0x1b8] sm:$0xff]  }
 0x3c3   : > { %v4293_v63 = vadd.f32 %v4245_v36, %v4197_v41  ;;  %v4581_v49 = vunpack.c.l.bf16 %v4533_v29  ;;  %v4582_v24 = vunpack.c.l.bf16 %v4534_v7  ;;  %v9910_v46 = vadd.f32 %v5136_v16, %v9367_v18 }
 0x3c4   : > { %v4340_v33 = vpack.c.bf16 %v4292_v17, %v4292_v17  ;;  %v4342_v28 = vpack.c.bf16 %v4294_v62, %v4294_v62  ;;  %1218 = vmatmul.bf16.gmra.mxu1 %v1094_v34  ;;  %v5555_v10 = vmul.f32 %v7444_v1, %v9736_v42  ;;  %v9921_v21 = vadd.f32 %v9918_v9, %v1023_v12  ;;  %v1973_v17 = vld [vmem:[#allocation2 + $0x1bc] sm:$0xc] }
 0x3c5   : > { %v4341_v8 = vpack.c.bf16 %v4293_v63, %v4293_v63  ;;  %v5556_v36 = vmul.f32 %v7445_v58, %v9736_v42  ;;  %v668_v14 = vsel %vm8160_vm2, 0, %v667_v50  ;;  %v5197_v23 = vmax.f32 %v9910_v46, 0.0 }
 0x3c6   : > { %v4628_v1 = vunpack.c.l.bf16 %v4340_v33  ;;  %v4630_v61 = vunpack.c.l.bf16 %v4342_v28  ;;  %v5587_v32 = vpack.c.bf16 %v5555_v10, %v5555_v10  ;;  %669 = vst [vmem:[#allocation2 + $0x404] sm:$0xf] %v668_v14  ;;  %v1390_v57 = vunpack.c.l.bf16 %v1338_v54 }
 0x3c7   : > { %v4629_v26 = vunpack.c.l.bf16 %v4341_v8  ;;  %v5588_v20 = vpack.c.bf16 %v5556_v36, %v5556_v36  ;;  %v1391_v6 = vunpack.c.l.bf16 %v1339_v5  ;;  %v1392_v58 = vunpack.c.l.bf16 %v1340_v15  ;;  %v2359_v5 = vld [vmem:[#allocation2 + $0x2d0] sm:$0xc] }
 0x3c8   : > { %v4676_v35 = vadd.f32 %v4628_v1, %v4580_v60  ;;  %v4678_v27 = vadd.f32 %v4630_v61, %v4582_v24  ;;  %v5619_v3 = vunpack.c.l.bf16 %v5587_v32  ;;  %v1439_v44 = vmul.f32 %v8552_v2, %v1390_v57  ;;  %v1974_v24 = vld [vmem:[#allocation2 + $0x1c0] sm:$0xf] }
 0x3c9   : > { %v4677_v48 = vadd.f32 %v4629_v26, %v4581_v49  ;;  %v5620_v0 = vunpack.c.l.bf16 %v5588_v20  ;;  %v1440_v13 = vmul.f32 %v8552_v2, %v1391_v6  ;;  %v1441_v55 = vmul.f32 %v8552_v2, %v1392_v58  ;;  %v1975_v2 = vld [vmem:[#allocation2 + $0x1c4] sm:$0x3]  ;;  %v2360_v20 = vld [vmem:[#allocation2 + $0x2d4] sm:$0xf] }
 0x3ca   : > { %v4724_v52 = vpack.c.bf16 %v4676_v35, %v4676_v35  ;;  %v4726_v39 = vpack.c.bf16 %v4678_v27, %v4678_v27  ;;  %v5652_v31 = vadd.f32 %v8765_v56, %v5619_v3  ;;  %v1487_v29 = vpack.c.bf16 %v1439_v44, %v1439_v44  ;;  %v9948_v57 = vpop.f32.mrf.mxu1  ;;  %v2361_v44 = vld [vmem:[#allocation2 + $0x2d8] sm:$0x3] }
 0x3cb   : > { %v4725_v45 = vpack.c.bf16 %v4677_v48, %v4677_v48  ;;  %v5653_v41 = vadd.f32 %v8765_v56, %v5620_v0  ;;  %v1488_v7 = vpack.c.bf16 %v1440_v13, %v1440_v13  ;;  %v1489_v12 = vpack.c.bf16 %v1441_v55, %v1441_v55 }
 0x3cc   : > { %v7181_v62 = vrot.slane %v4724_v52, 10  ;;  %v4884_v60 = vrot.slane %v4726_v39, 6  ;;  %v5684_v34 = vmax.f32 %v5652_v31, 0.0  ;;  %v7448_v63 = vunpack.c.l.bf16 %v9935_v19 }
 0x3cd   : > { %v4881_v16 = vrot.slane %v4725_v45, 6  ;;  %v5685_v50 = vmax.f32 %v5653_v41, 0.0  ;;  %v7449_v49 = vunpack.c.h.bf16 %v9935_v19  ;;  %v1668_v33 = vunpack.c.l.bf16 %v1487_v29 }
 0x3ce   : > { %v1669_v28 = vunpack.c.l.bf16 %v1488_v7  ;;  %v1670_v10 = vunpack.c.l.bf16 %v1489_v12  ;;  %v2022_v54 = vunpack.c.l.bf16 %v1973_v17  ;;  %v1589_v15 = vmul.f32 %v7448_v63, %v8531_v53 }
 0x3cf   : > { %v4882_v8 = vsel %vm8788_vm7, %v7181_v62, %v4881_v16  ;;  %v4883_v36 = vrot.slane %v4881_v16, 4  ;;  %v5714_v14 = vpack.c.bf16 %v5685_v50, %v5684_v34  ;;  %v1590_v61 = vmul.f32 %v7449_v49, %v8531_v53 }
 0x3d0   : > { %v4953_v1 = vunpack.c.l.bf16 %v4882_v8  ;;  %v2023_v32 = vunpack.c.l.bf16 %v1974_v24  ;;  %v2024_v26 = vunpack.c.l.bf16 %v1975_v2  ;;  %v1621_v35 = vpack.c.bf16 %v1589_v15, %v1589_v15 }
 0x3d1   : > { %v4885_v6 = vsel %vm8788_vm7, %v4883_v36, %v4884_v60  ;;  %7243 = vmatmul.msk.bf16.gmra.mxu0 %vm915_vm3, %v5714_v14  ;;  %v2071_v27 = vmul.f32 %v8590_v51, %v2022_v54  ;;  %v2408_v3 = vunpack.c.l.bf16 %v2359_v5  ;;  %v1622_v0 = vpack.c.bf16 %v1590_v61, %v1590_v61  ;;  %v7737_v5 = vld [vmem:[#allocation2 + $0x2d8] sm:$0xff]  }
 0x3d2   : > { %v4954_v58 = vunpack.c.l.bf16 %v4885_v6  ;;  %v4986_v48 = vadd.f32 %v8759_v37, %v4953_v1  ;;  %v2072_v53 = vmul.f32 %v8590_v51, %v2023_v32  ;;  %v1701_v13 = vunpack.c.l.bf16 %v1621_v35 }
 0x3d3   : > { %v2073_v52 = vmul.f32 %v8590_v51, %v2024_v26  ;;  %v2119_v39 = vpack.c.bf16 %v2071_v27, %v2071_v27  ;;  %v2409_v31 = vunpack.c.l.bf16 %v2360_v20  ;;  %v1702_v41 = vunpack.c.l.bf16 %v1622_v0  ;;  %v2987_v20 = vld [vmem:[#allocation2 + $0x2dc] sm:$0xc] }
 0x3d4   : > { %v4987_v55 = vadd.f32 %v8759_v37, %v4954_v58  ;;  %v5018_v45 = vmax.f32 %v4986_v48, 0.0  ;;  %v2120_v29 = vpack.c.bf16 %v2072_v53, %v2072_v53  ;;  %v1781_v7 = vrot.slane %v1701_v13, 4  ;;  %v2989_v58 = vld [vmem:[#allocation2 + $0x2e4] sm:$0x3] }
 0x3d5   : > { %v2121_v17 = vpack.c.bf16 %v2073_v52, %v2073_v52  ;;  %v2215_v62 = vunpack.c.l.bf16 %v2119_v39  ;;  %v2410_v60 = vunpack.c.l.bf16 %v2361_v44  ;;  %v1782_v12 = vrot.slane %v1702_v41, 4 }
 0x3d6   : > { %v5019_v34 = vmax.f32 %v4987_v55, 0.0  ;;  %v2216_v16 = vunpack.c.l.bf16 %v2120_v29  ;;  %v2457_v50 = vmul.f32 %v8554_v4, %v2408_v3  ;;  %v1877_v24 = vadd.f32 %v1781_v7, %v1668_v33  ;;  %v2988_v3 = vld [vmem:[#allocation2 + $0x2e0] sm:$0xf] }
 0x3d7   : > { %v2217_v2 = vunpack.c.l.bf16 %v2121_v17  ;;  %v2458_v51 = vmul.f32 %v8554_v4, %v2409_v31  ;;  %v2459_v54 = vmul.f32 %v8554_v4, %v2410_v60  ;;  %v1783_v36 = vsel %vm1735_vm4, %v1781_v7, %v1782_v12  ;;  %v9963_v4 = vpop.f32.mrf.mxu1  ;;  %v3374_v60 = vld [vmem:[#allocation2 + $0x3f0] sm:$0xc] }
 0x3d8   : > { %v5036_v8 = vpack.c.bf16 %v5019_v34, %v5018_v45  ;;  %v1879_v14 = vadd.f32 %v1782_v12, %v1670_v10  ;;  %v2505_v15 = vpack.c.bf16 %v2457_v50, %v2457_v50  ;;  %v1878_v1 = vadd.f32 %v1783_v36, %v1669_v28 }
 0x3d9   : > { %v1925_v61 = vpack.c.bf16 %v1877_v24, %v1877_v24  ;;  %v2506_v32 = vpack.c.bf16 %v2458_v51, %v2458_v51  ;;  %v2507_v26 = vpack.c.bf16 %v2459_v54, %v2459_v54  ;;  %v7512_v33 = vunpack.c.l.bf16 %v7737_v5 }
 0x3da   : > { %7201 = vmatmul.msk.bf16.gmra.mxu2 %vm915_vm3, %v5036_v8  ;;  %v1927_v6 = vpack.c.bf16 %v1879_v14, %v1879_v14  ;;  %v7513_v35 = vunpack.c.h.bf16 %v7737_v5  ;;  %v2683_v27 = vunpack.c.l.bf16 %v2505_v15  ;;  %v1926_v48 = vpack.c.bf16 %v1878_v1, %v1878_v1  ;;  %v3376_v5 = vld [vmem:[#allocation2 + $0x3f8] sm:$0x3] }
 0x3db   : > { %v2167_v0 = vunpack.c.l.bf16 %v1925_v61  ;;  %v2684_v53 = vunpack.c.l.bf16 %v2506_v32  ;;  %v2685_v10 = vunpack.c.l.bf16 %v2507_v26  ;;  %v2604_v28 = vmul.f32 %v7512_v33, %v8579_v30  ;;  %v7753_v26 = vld [vmem:[#allocation2 + $0x3f8] sm:$0xff]  }
 0x3dc   : > { %v2169_v44 = vunpack.c.l.bf16 %v1927_v6  ;;  %v2605_v13 = vmul.f32 %v7513_v35, %v8579_v30  ;;  %v3036_v52 = vunpack.c.l.bf16 %v2987_v20  ;;  %v2168_v39 = vunpack.c.l.bf16 %v1926_v48 }
 0x3dd   : > { %v9967_v31 = vadd.f32 %v2215_v62, %v2167_v0  ;;  %v3037_v55 = vunpack.c.l.bf16 %v2988_v3  ;;  %v3038_v45 = vunpack.c.l.bf16 %v2989_v58  ;;  %v2636_v29 = vpack.c.bf16 %v2604_v28, %v2604_v28  ;;  %v3375_v62 = vld [vmem:[#allocation2 + $0x3f4] sm:$0xf] }
 0x3de   : > { %v9969_v41 = vadd.f32 %v2217_v2, %v2169_v44  ;;  %v2637_v7 = vpack.c.bf16 %v2605_v13, %v2605_v13  ;;  %v3085_v17 = vmul.f32 %v8614_v25, %v3036_v52  ;;  %v9972_v34 = vadd.f32 %v2216_v16, %v2168_v39 }
 0x3df   : > { %v2311_v12 = vpack.c.bf16 %v9967_v31, %v9967_v31  ;;  %v3086_v30 = vmul.f32 %v8614_v25, %v3037_v55  ;;  %v3087_v50 = vmul.f32 %v8614_v25, %v3038_v45  ;;  %v2716_v2 = vunpack.c.l.bf16 %v2636_v29  ;;  %v9985_v0 = vpop.f32.mrf.mxu1 }
 0x3e0   : > { %v2313_v24 = vpack.c.bf16 %v9969_v41, %v9969_v41  ;;  %v2717_v51 = vunpack.c.l.bf16 %v2637_v7  ;;  %v3133_v54 = vpack.c.bf16 %v3085_v17, %v3085_v17  ;;  %v2312_v8 = vpack.c.bf16 %v9972_v34, %v9972_v34  ;;  %v4002_v7 = vld [vmem:[#allocation2 + $0x3fc] sm:$0xc] }
 0x3e1   : > { %v3134_v16 = vpack.c.bf16 %v3086_v30, %v3086_v30  ;;  %v3135_v36 = vpack.c.bf16 %v3087_v50, %v3087_v50  ;;  %v3423_v14 = vunpack.c.l.bf16 %v3374_v60  ;;  %v2795_v15 = vrot.slane %v2716_v2, 4  ;;  %v4004_v2 = vld [vmem:[#allocation2 + $0x404] sm:$0x3] }
 0x3e2   : > { %v2796_v1 = vrot.slane %v2717_v51, 4  ;;  %v3229_v61 = vunpack.c.l.bf16 %v3133_v54  ;;  %v3424_v32 = vunpack.c.l.bf16 %v3375_v62  ;;  %v3425_v6 = vunpack.c.l.bf16 %v3376_v5 }
 0x3e3   : > { %v3230_v25 = vunpack.c.l.bf16 %v3134_v16  ;;  %v3231_v20 = vunpack.c.l.bf16 %v3135_v36  ;;  %v3472_v33 = vmul.f32 %v8628_v43, %v3423_v14  ;;  %v2891_v3 = vadd.f32 %v2795_v15, %v2683_v27 }
 0x3e4   : > { %v2797_v35 = vsel %vm1735_vm4, %v2795_v15, %v2796_v1  ;;  %v2893_v58 = vadd.f32 %v2796_v1, %v2685_v10  ;;  %v3473_v48 = vmul.f32 %v8628_v43, %v3424_v32  ;;  %v3474_v28 = vmul.f32 %v8628_v43, %v3425_v6  ;;  %v4003_v10 = vld [vmem:[#allocation2 + $0x400] sm:$0xf] }
 0x3e5   : > { %v2892_v44 = vadd.f32 %v2797_v35, %v2684_v53  ;;  %v3520_v13 = vpack.c.bf16 %v3472_v33, %v3472_v33  ;;  %v7576_v52 = vunpack.c.l.bf16 %v7753_v26  ;;  %v2939_v39 = vpack.c.bf16 %v2891_v3, %v2891_v3 }
 0x3e6   : > { %v2941_v55 = vpack.c.bf16 %v2893_v58, %v2893_v58  ;;  %v3521_v45 = vpack.c.bf16 %v3473_v48, %v3473_v48  ;;  %v7577_v29 = vunpack.c.h.bf16 %v7753_v26  ;;  %v3522_v60 = vpack.c.bf16 %v3474_v28, %v3474_v28 }
 0x3e7   : > { %v2940_v17 = vpack.c.bf16 %v2892_v44, %v2892_v44  ;;  %v3619_v34 = vmul.f32 %v7576_v52, %v8622_v40  ;;  %v3698_v27 = vunpack.c.l.bf16 %v3520_v13  ;;  %v3181_v30 = vunpack.c.l.bf16 %v2939_v39  ;;  %v1025_v52 = vpop.f32.mrf.mxu0  ;;  %v5139_v39 = vpop.f32.mrf.mxu2 }
 0x3e8   : > { %v3183_v50 = vunpack.c.l.bf16 %v2941_v55  ;;  %v3620_v62 = vmul.f32 %v7577_v29, %v8622_v40  ;;  %v3699_v53 = vunpack.c.l.bf16 %v3521_v45  ;;  %v3700_v54 = vunpack.c.l.bf16 %v3522_v60  ;;  %v7374_v55 = vld [vmem:[#allocation7 + $0xb0] sm:$0xff] }
 0x3e9   : > { %v3182_v43 = vunpack.c.l.bf16 %v2940_v17  ;;  %v3651_v51 = vpack.c.bf16 %v3619_v34, %v3619_v34  ;;  %v4054_v5 = vunpack.c.l.bf16 %v4002_v7  ;;  %v3277_v16 = vadd.f32 %v3229_v61, %v3181_v30  ;;  %v7383_v45 = vld [vmem:[#allocation7 + $0xf0] sm:$0xff]  ;;  %6021 = vmatpush.bf16.msrb.mxu2 %v7374_v55 }
 0x3ea   : > { %v3279_v36 = vadd.f32 %v3231_v20, %v3183_v50  ;;  %v3652_v14 = vpack.c.bf16 %v3620_v62, %v3620_v62  ;;  %v4055_v15 = vunpack.c.l.bf16 %v4003_v10  ;;  %v4056_v26 = vunpack.c.l.bf16 %v4004_v2  ;;  %6712 = vmatpush.bf16.msrb.mxu3 %v7383_v45 }
 0x3eb   : > { %v3278_v1 = vadd.f32 %v3230_v25, %v3182_v43  ;;  %v3731_v32 = vunpack.c.l.bf16 %v3651_v51  ;;  %v4103_v6 = vmul.f32 %v8659_v11, %v4054_v5  ;;  %v3325_v33 = vpack.c.bf16 %v3277_v16, %v3277_v16 }
 0x3ec   : > { %v3327_v35 = vpack.c.bf16 %v3279_v36, %v3279_v36  ;;  %v3732_v3 = vunpack.c.l.bf16 %v3652_v14  ;;  %v4104_v40 = vmul.f32 %v8659_v11, %v4055_v15  ;;  %v4105_v44 = vmul.f32 %v8659_v11, %v4056_v26  ;;  %v9999_v11 = vpop.f32.mrf.mxu1 }
 0x3ed   : > { %v3326_v58 = vpack.c.bf16 %v3278_v1, %v3278_v1  ;;  %v3810_v48 = vrot.slane %v3731_v32, 4  ;;  %v4151_v28 = vpack.c.bf16 %v4103_v6, %v4103_v6  ;;  %v4391_v25 = vunpack.c.l.bf16 %v2311_v12  ;;  %v10008_v6 = vpop.f32.mrf.mxu3 }
 0x3ee   : > { %v3811_v13 = vrot.slane %v3732_v3, 4  ;;  %v4152_v61 = vpack.c.bf16 %v4104_v40, %v4104_v40  ;;  %v4392_v20 = vunpack.c.l.bf16 %v2312_v8  ;;  %v4153_v7 = vpack.c.bf16 %v4105_v44, %v4105_v44 }
 0x3ef   : > { %v3906_v29 = vadd.f32 %v3810_v48, %v3698_v27  ;;  %v4247_v17 = vunpack.c.l.bf16 %v4151_v28  ;;  %v4393_v60 = vunpack.c.l.bf16 %v2313_v24  ;;  %v4439_v31 = vunpack.c.l.bf16 %v3325_v33  ;;  %v5141_v33 = vpop.f32.mrf.mxu2 }
 0x3f0   : > { %v3812_v34 = vsel %vm1735_vm4, %v3810_v48, %v3811_v13  ;;  %v3908_v10 = vadd.f32 %v3811_v13, %v3700_v54  ;;  %v4248_v30 = vunpack.c.l.bf16 %v4152_v61  ;;  %v4249_v50 = vunpack.c.l.bf16 %v4153_v7  ;;  %v10013_v48 = vld [vmem:[#allocation2 + $0x1d0] sm:$0xff]  }
 0x3f1   : > { %v3907_v12 = vadd.f32 %v3812_v34, %v3699_v53  ;;  %v3954_v8 = vpack.c.bf16 %v3906_v29, %v3906_v29  ;;  %v4440_v62 = vunpack.c.l.bf16 %v3326_v58  ;;  %v4441_v2 = vunpack.c.l.bf16 %v3327_v35 }
 0x3f2   : > { %v3956_v27 = vpack.c.bf16 %v3908_v10, %v3908_v10  ;;  %v4487_v43 = vadd.f32 %v4439_v31, %v4391_v25  ;;  %v5254_v41 = vpack.c.bf16 %v5197_v23, %v5196_v59  ;;  %v1026_v54 = vadd.f32 %v9918_v9, %v1025_v52  ;;  %v1028_v23 = vpop.f32.mrf.mxu0 }
 0x3f3   : > { %v3955_v24 = vpack.c.bf16 %v3907_v12, %v3907_v12  ;;  %v4199_v51 = vunpack.c.l.bf16 %v3954_v8  ;;  %v4488_v5 = vadd.f32 %v4440_v62, %v4392_v20  ;;  %v1073_v16 = vmax.f32 %v9921_v21, 0.0 }
 0x3f4   : > { %v4201_v36 = vunpack.c.l.bf16 %v3956_v27  ;;  %v4489_v53 = vadd.f32 %v4441_v2, %v4393_v60  ;;  %v4535_v14 = vpack.c.bf16 %v4487_v43, %v4487_v43  ;;  %5367 = vmatmul.bf16.gmra.mxu3 %v5254_v41  ;;  %v1074_v26 = vmax.f32 %v1026_v54, 0.0  ;;  %v10011_v58 = vpop.f32.mrf.mxu1 }
 0x3f5   : > { %v4200_v15 = vunpack.c.l.bf16 %v3955_v24  ;;  %v4295_v1 = vadd.f32 %v4247_v17, %v4199_v51  ;;  %v4536_v32 = vpack.c.bf16 %v4488_v5, %v4488_v5  ;;  %v5140_v59 = vadd.f32 %v5139_v39, %v9367_v18 }
 0x3f6   : > { %v4297_v47 = vadd.f32 %v4249_v50, %v4201_v36  ;;  %v4537_v46 = vpack.c.bf16 %v4489_v53, %v4489_v53  ;;  %v4583_v40 = vunpack.c.l.bf16 %v4535_v14  ;;  %v1095_v21 = vpack.c.bf16 %v1074_v26, %v1073_v16  ;;  %v10027_v50 = vpop.f32.mrf.mxu3 }
 0x3f7   : > { %v4296_v35 = vadd.f32 %v4248_v30, %v4200_v15  ;;  %v4343_v3 = vpack.c.bf16 %v4295_v1, %v4295_v1  ;;  %v4584_v28 = vunpack.c.l.bf16 %v4536_v32  ;;  %v5142_v61 = vadd.f32 %v5141_v33, %v9367_v18  ;;  %v5144_v43 = vpop.f32.mrf.mxu2 }
 0x3f8   : > { %v4345_v44 = vpack.c.bf16 %v4297_v47, %v4297_v47  ;;  %v4585_v13 = vunpack.c.l.bf16 %v4537_v46  ;;  %1223 = vmatmul.bf16.gmra.mxu1 %v1095_v21  ;;  %v5557_v52 = vmul.f32 %v7448_v63, %v9736_v42  ;;  %v5558_v39 = vmul.f32 %v7449_v49, %v9736_v42 }
 0x3f9   : > { %v4344_v25 = vpack.c.bf16 %v4296_v35, %v4296_v35  ;;  %v4631_v20 = vunpack.c.l.bf16 %v4343_v3  ;;  %v5198_v45 = vmax.f32 %v5140_v59, 0.0  ;;  %v10766_v29 = vunpack.c.l.bf16 %v10013_v48 }
 0x3fa   : > { %v4633_v55 = vunpack.c.l.bf16 %v4345_v44  ;;  %v5589_v60 = vpack.c.bf16 %v5557_v52, %v5557_v52  ;;  %v5590_v34 = vpack.c.bf16 %v5558_v39, %v5558_v39  ;;  %v5199_v30 = vmax.f32 %v5142_v61, 0.0  ;;  %v1030_v2 = vpop.f32.mrf.mxu0 }
 0x3fb   : > { %v4632_v7 = vunpack.c.l.bf16 %v4344_v25  ;;  %v4679_v17 = vadd.f32 %v4631_v20, %v4583_v40  ;;  %v10765_v31 = vunpack.c.h.bf16 %v10013_v48  ;;  %v5559_v63 = vmul.f32 %v10766_v29, %v9736_v42  ;;  %v7382_v25 = vld [vmem:[#allocation7 + $0xe8] sm:$0xff] }
 0x3fc   : > { %v4681_v10 = vadd.f32 %v4633_v55, %v4585_v13  ;;  %v5621_v19 = vunpack.c.l.bf16 %v5589_v60  ;;  %v5622_v49 = vunpack.c.l.bf16 %v5590_v34  ;;  %v1029_v27 = vadd.f32 %v9918_v9, %v1028_v23  ;;  %v10035_v16 = vpop.f32.mrf.mxu1  ;;  %v7373_v13 = vld [vmem:[#allocation7 + $0xa8] sm:$0xff]  ;;  %6713 = vmatpush.bf16.msrb.mxu3 %v7382_v25 }
 0x3fd   : > { %v4680_v12 = vadd.f32 %v4632_v7, %v4584_v28  ;;  %v4727_v8 = vpack.c.bf16 %v4679_v17, %v4679_v17  ;;  %v5560_v41 = vmul.f32 %v10765_v31, %v9736_v42  ;;  %v5255_v53 = vpack.c.bf16 %v5199_v30, %v5198_v45  ;;  %v10046_v45 = vld [vmem:[#allocation2 + $0x1e8] sm:$0xff]   ;;  %6022 = vmatpush.bf16.msrb.mxu2 %v7373_v13 }
 0x3fe   : > { %v4729_v62 = vpack.c.bf16 %v4681_v10, %v4681_v10  ;;  %v5654_v5 = vadd.f32 %v8765_v56, %v5621_v19  ;;  %v5655_v54 = vadd.f32 %v8765_v56, %v5622_v49  ;;  %v1031_v14 = vadd.f32 %v9918_v9, %v1030_v2  ;;  %v10043_v61 = vpop.f32.mrf.mxu3 }
 0x3ff   : > { %v4728_v24 = vpack.c.bf16 %v4680_v12, %v4680_v12  ;;  %v7182_v51 = vrot.slane %v4727_v8, 10  ;;  %v5591_v15 = vpack.c.bf16 %v5559_v63, %v5559_v63  ;;  %v5592_v47 = vpack.c.bf16 %v5560_v41, %v5560_v41  ;;  %v5146_v55 = vpop.f32.mrf.mxu2 }
 0x400   : > { %v4891_v36 = vrot.slane %v4729_v62, 6  ;;  %v5686_v32 = vmax.f32 %v5654_v5, 0.0  ;;  %v5687_v26 = vmax.f32 %v5655_v54, 0.0  ;;  %v1076_v46 = vmax.f32 %v1031_v14, 0.0 }
 0x401   : > { %v4888_v1 = vrot.slane %v4728_v24, 6  ;;  %v1075_v33 = vmax.f32 %v1029_v27, 0.0  ;;  %v5623_v44 = vunpack.c.l.bf16 %v5591_v15  ;;  %v5624_v28 = vunpack.c.l.bf16 %v5592_v47 }
 0x402   : > { %v5715_v35 = vpack.c.bf16 %v5687_v26, %v5686_v32  ;;  %v1033_v39 = vpop.f32.mrf.mxu0  ;;  %v5145_v60 = vadd.f32 %v5144_v43, %v9367_v18  ;;  %v5147_v34 = vadd.f32 %v5146_v55, %v9367_v18  ;;  %v10763_v63 = vunpack.c.l.bf16 %v10046_v45 }
 0x403   : > { %v4889_v59 = vsel %vm8788_vm7, %v7182_v51, %v4888_v1  ;;  %v4890_v23 = vrot.slane %v4888_v1, 4  ;;  %v1096_v21 = vpack.c.bf16 %v1076_v46, %v1075_v33  ;;  %v5656_v10 = vadd.f32 %v8765_v56, %v5623_v44 }
 0x404   : > { %v4955_v3 = vunpack.c.l.bf16 %v4889_v59  ;;  %5372 = vmatmul.bf16.gmra.mxu3 %v5255_v53  ;;  %7244 = vmatmul.msk.bf16.gmra.mxu0 %vm915_vm3, %v5715_v35  ;;  %v10048_v7 = vpop.f32.mrf.mxu1  ;;  %v5657_v30 = vadd.f32 %v8765_v56, %v5624_v28  ;;  %v10762_v12 = vunpack.c.h.bf16 %v10046_v45  ;;  %v5200_v49 = vmax.f32 %v5145_v60, 0.0 }
 0x405   : > { %v4892_v40 = vsel %vm8788_vm7, %v4890_v23, %v4891_v36  ;;  %v5201_v62 = vmax.f32 %v5147_v34, 0.0  ;;  %v5561_v2 = vmul.f32 %v10763_v63, %v9736_v42  ;;  %v1034_v5 = vadd.f32 %v9918_v9, %v1033_v39 }
 0x406   : > { %v4956_v20 = vunpack.c.l.bf16 %v4892_v40  ;;  %v4988_v52 = vadd.f32 %v8759_v37, %v4955_v3  ;;  %v5689_v27 = vmax.f32 %v5657_v30, 0.0  ;;  %v5562_v43 = vmul.f32 %v10762_v12, %v9736_v42  ;;  %v10063_v41 = vpop.f32.mrf.mxu3  ;;  %v10071_v3 = vld [vmem:[#allocation2 + $0x200] sm:$0xff]  }
 0x407   : > { %v5149_v51 = vpop.f32.mrf.mxu2  ;;  %v5256_v53 = vpack.c.bf16 %v5201_v62, %v5200_v49  ;;  %v5593_v1 = vpack.c.bf16 %v5561_v2, %v5561_v2  ;;  %v1077_v26 = vmax.f32 %v1034_v5, 0.0 }
 0x408   : > { %v4989_v22 = vadd.f32 %v8759_v37, %v4956_v20  ;;  %v5020_v17 = vmax.f32 %v4988_v52, 0.0  ;;  %1228 = vmatmul.bf16.gmra.mxu1 %v1096_v21  ;;  %v5688_v37 = vmax.f32 %v5656_v10, 0.0  ;;  %v5594_v32 = vpack.c.bf16 %v5562_v43, %v5562_v43 }
 0x409   : > { %v5625_v46 = vunpack.c.l.bf16 %v5593_v1  ;;  %v5150_v44 = vadd.f32 %v5149_v51, %v9367_v18  ;;  %v10761_v20 = vunpack.c.l.bf16 %v10071_v3  ;;  %v10759_v52 = vunpack.c.h.bf16 %v10071_v3 }
 0x40a   : > { %v5021_v8 = vmax.f32 %v4989_v22, 0.0  ;;  %v1035_v24 = vpop.f32.mrf.mxu0  ;;  %v5716_v14 = vpack.c.bf16 %v5689_v27, %v5688_v37  ;;  %v5626_v59 = vunpack.c.l.bf16 %v5594_v32 }
 0x40b   : > { %v1036_v54 = vadd.f32 %v9918_v9, %v1035_v24  ;;  %v5658_v13 = vadd.f32 %v8765_v56, %v5625_v46  ;;  %v5202_v39 = vmax.f32 %v5150_v44, 0.0  ;;  %v5564_v60 = vmul.f32 %v10759_v52, %v9736_v42 }
 0x40c   : > { %v5037_v19 = vpack.c.bf16 %v5021_v8, %v5020_v17  ;;  %v10068_v36 = vpop.f32.mrf.mxu1  ;;  %v5659_v25 = vadd.f32 %v8765_v56, %v5626_v59  ;;  %v5563_v17 = vmul.f32 %v10761_v20, %v9736_v42 }
 0x40d   : > { %v1078_v15 = vmax.f32 %v1036_v54, 0.0  ;;  %v5690_v22 = vmax.f32 %v5658_v13, 0.0  ;;  %v5596_v43 = vpack.c.bf16 %v5564_v60, %v5564_v60  ;;  %v7371_v13 = vld [vmem:[#allocation7 + $0x98] sm:$0xff] }
 0x40e   : > { %7202 = vmatmul.msk.bf16.gmra.mxu2 %vm915_vm3, %v5037_v19  ;;  %v5348_v23 = vpop.f32.mrf.mxu3  ;;  %v5595_v2 = vpack.c.bf16 %v5563_v17, %v5563_v17 }
 0x40f   : > { %v1097_v47 = vpack.c.bf16 %v1078_v15, %v1077_v26  ;;  %v5151_v35 = vpop.f32.mrf.mxu2  ;;  %v10074_v40 = vadd.f32 %v5348_v23, %v9999_v11  ;;  %v5691_v11 = vmax.f32 %v5659_v25, 0.0  ;;  %v5628_v54 = vunpack.c.l.bf16 %v5596_v43  ;;  %v7381_v15 = vld [vmem:[#allocation7 + $0xe0] sm:$0xff]  ;;  %v10097_v26 = vld [vmem:[#allocation2 + $0x218] sm:$0xff]  }
 0x410   : > { %v5152_v28 = vadd.f32 %v5151_v35, %v9367_v18  ;;  %v5627_v5 = vunpack.c.l.bf16 %v5595_v2  ;;  %6714 = vmatpush.bf16.msrb.mxu3 %v7381_v15  ;;  %v10758_v44 = vunpack.c.l.bf16 %v10097_v26 }
 0x411   : > { %v5717_v37 = vpack.c.bf16 %v5691_v11, %v5690_v22  ;;  %v5661_v35 = vadd.f32 %v8765_v56, %v5628_v54 }
 0x412   : > { %v1038_v33 = vpop.f32.mrf.mxu0  ;;  %v5203_v55 = vmax.f32 %v5152_v28, 0.0  ;;  %v10757_v28 = vunpack.c.h.bf16 %v10097_v26  ;;  %v5565_v22 = vmul.f32 %v10758_v44, %v9736_v42 }
 0x413   : > { %v1039_v8 = vadd.f32 %v9918_v9, %v1038_v33  ;;  %v5660_v33 = vadd.f32 %v8765_v56, %v5627_v5 }
 0x414   : > { %5377 = vmatmul.bf16.gmra.mxu3 %v5256_v53  ;;  %7245 = vmatmul.msk.bf16.gmra.mxu0 %vm915_vm3, %v5716_v14  ;;  %v10076_v21 = vpop.f32.mrf.mxu1  ;;  %v5257_v62 = vpack.c.bf16 %v5203_v55, %v5202_v39  ;;  %v7372_v53 = vld [vmem:[#allocation7 + $0xa0] sm:$0xff]  ;;  %v5693_v55 = vmax.f32 %v5661_v35, 0.0  ;;  %v5566_v11 = vmul.f32 %v10757_v28, %v9736_v42  ;;  %v5597_v2 = vpack.c.bf16 %v5565_v22, %v5565_v22 }
 0x415   : > { %v1079_v24 = vmax.f32 %v1039_v8, 0.0  ;;  %6023 = vmatpush.bf16.msrb.mxu2 %v7372_v53  ;;  %v5692_v39 = vmax.f32 %v5660_v33, 0.0 }
 0x416   : > { %v10090_v34 = vpop.f32.mrf.mxu3  ;;  %v5598_v43 = vpack.c.bf16 %v5566_v11, %v5566_v11  ;;  %v5629_v54 = vunpack.c.l.bf16 %v5597_v2  ;;  %v7770_v11 = vld [vmem:[#allocation2 + $0x170] sm:$0xff]  }
 0x417   : > { %v5154_v30 = vpop.f32.mrf.mxu2 }
 0x418   : > { %1233 = vmatmul.bf16.gmra.mxu1 %v1097_v47  ;;  %v5155_v59 = vadd.f32 %v5154_v30, %v9367_v18  ;;  %v5630_v53 = vunpack.c.l.bf16 %v5598_v43 }
 0x419   : > { %6024 = vmatpush.bf16.msrb.mxu2 %v7371_v13 }
 0x41a   : > { %v1040_v10 = vpop.f32.mrf.mxu0  ;;  %v5663_v22 = vadd.f32 %v8765_v56, %v5630_v53 }
 0x41b   : > { %v1041_v19 = vadd.f32 %v9918_v9, %v1040_v10 }
 0x41c   : > { %v10094_v49 = vpop.f32.mrf.mxu1 }
 0x41d   : > { %v1080_v27 = vmax.f32 %v1041_v19, 0.0 }
 0x41e   : > { %v5353_v14 = vpop.f32.mrf.mxu3 }
 0x41f   : > { %v1098_v51 = vpack.c.bf16 %v1080_v27, %v1079_v24  ;;  %v5156_v32 = vpop.f32.mrf.mxu2  ;;  %v10100_v47 = vadd.f32 %v5353_v14, %v10035_v16  ;;  %v5204_v16 = vmax.f32 %v5155_v59, 0.0  ;;  %v7370_v14 = vld [vmem:[#allocation7 + $0x90] sm:$0xff] }
 0x420   : > { %v5157_v23 = vadd.f32 %v5156_v32, %v9367_v18  ;;  %6025 = vmatpush.bf16.msrb.mxu2 %v7370_v14 }
 0x422   : > { %v1043_v1 = vpop.f32.mrf.mxu0  ;;  %v5205_v25 = vmax.f32 %v5157_v23, 0.0  ;;  %v1289_v23 = vld [vmem:[%s10748_s4 + $0x10] sm:$0xf] }
 0x423   : > { %v1044_v30 = vadd.f32 %v9918_v9, %v1043_v1 }
 0x424   : > { %5382 = vmatmul.bf16.gmra.mxu3 %v5257_v62  ;;  %7246 = vmatmul.msk.bf16.gmra.mxu0 %vm915_vm3, %v5717_v37  ;;  %v10102_v46 = vpop.f32.mrf.mxu1  ;;  %v5258_v62 = vpack.c.bf16 %v5205_v25, %v5204_v16  ;;  %v5718_v37 = vpack.c.bf16 %v5693_v55, %v5692_v39  ;;  %v7369_v16 = vld [vmem:[#allocation7 + $0x88] sm:$0xff]  ;;  %v6206_v55 = vpack.i.b16 %v1289_v23, %v1289_v23 }
 0x425   : > { %v1081_v24 = vmax.f32 %v1044_v30, 0.0  ;;  %6026 = vmatpush.bf16.msrb.mxu2 %v7369_v16 }
 0x426   : > { %v10116_v17 = vpop.f32.mrf.mxu3 }
 0x427   : > { %v5159_v10 = vpop.f32.mrf.mxu2 }
 0x428   : > { %1238 = vmatmul.bf16.gmra.mxu1 %v1098_v51  ;;  %v10122_v51 = vld [vmem:[#allocation2 + $0x230] sm:$0xff]   ;;  %v5160_v25 = vadd.f32 %v5159_v10, %v9367_v18 }
 0x429   : > { %v10756_v35 = vunpack.c.l.bf16 %v10122_v51  ;;  %v10755_v13 = vunpack.c.h.bf16 %v10122_v51  ;;  %v7368_v10 = vld [vmem:[#allocation7 + $0x80] sm:$0xff] }
 0x42a   : > { %v1045_v60 = vpop.f32.mrf.mxu0  ;;  %6027 = vmatpush.bf16.msrb.mxu2 %v7368_v10  ;;  %v7380_v10 = vld [vmem:[#allocation7 + $0xd8] sm:$0xff] }
 0x42b   : > { %v1046_v8 = vadd.f32 %v9918_v9, %v1045_v60  ;;  %v6208_v60 = vperm.slane %v6206_v55, 2  ;;  %v5567_v30 = vmul.f32 %v10756_v35, %v9736_v42  ;;  %6715 = vmatpush.bf16.msrb.mxu3 %v7380_v10 }
 0x42c   : > { %v10120_v19 = vpop.f32.mrf.mxu1 }
 0x42d   : > { %v1082_v27 = vmax.f32 %v1046_v8, 0.0  ;;  %v5568_v8 = vmul.f32 %v10755_v13, %v9736_v42  ;;  %v10145_v2 = vunpack.c.l.bf16 %v6208_v60  ;;  %v5599_v16 = vpack.c.bf16 %v5567_v30, %v5567_v30 }
 0x42e   : > { %v5358_v15 = vpop.f32.mrf.mxu3 }
 0x42f   : > { %v1099_v5 = vpack.c.bf16 %v1082_v27, %v1081_v24  ;;  %v5161_v32 = vpop.f32.mrf.mxu2  ;;  %v10126_v59 = vadd.f32 %v5358_v15, %v10068_v36  ;;  %v5662_v36 = vadd.f32 %v8765_v56, %v5629_v54  ;;  %v7644_v27 = vunpack.c.l.bf16 %v7770_v11 }
 0x430   : > { %v5162_v39 = vadd.f32 %v5161_v32, %v9367_v18  ;;  %v5695_v24 = vmax.f32 %v5663_v22, 0.0  ;;  %v5600_v55 = vpack.c.bf16 %v5568_v8, %v5568_v8  ;;  %v5631_v13 = vunpack.c.l.bf16 %v5599_v16 }
 0x431   : > { %v5694_v43 = vmax.f32 %v5662_v36, 0.0 }
 0x432   : > { %v1048_v1 = vpop.f32.mrf.mxu0  ;;  %v5632_v35 = vunpack.c.l.bf16 %v5600_v55 }
 0x433   : > { %v1049_v15 = vadd.f32 %v9918_v9, %v1048_v1  ;;  %v5719_v60 = vpack.c.bf16 %v5695_v24, %v5694_v43  ;;  %v10155_v1 = vld [vmem:[#allocation2 + $0x248] sm:$0xff]  }
 0x434   : > { %5387 = vmatmul.bf16.gmra.mxu3 %v5258_v62  ;;  %7247 = vmatmul.msk.bf16.gmra.mxu0 %vm915_vm3, %v5718_v37  ;;  %v10131_v33 = vpop.f32.mrf.mxu1  ;;  %v5206_v62 = vmax.f32 %v5160_v25, 0.0  ;;  %v5207_v37 = vmax.f32 %v5162_v39, 0.0  ;;  %v6242_v39 = vmul.f32 %v7644_v27, %v10145_v2  ;;  %v10760_v55 = vunpack.c.l.bf16 %v10155_v1 }
 0x436   : > { %v10147_v54 = vpop.f32.mrf.mxu3  ;;  %v5259_v25 = vpack.c.bf16 %v5207_v37, %v5206_v62  ;;  %v6274_v28 = vpack.c.bf16 %v6242_v39, %v6242_v39  ;;  %v7856_v62 = vld [vmem:[%s10749_s5] sm:$0x7] }
 0x437   : > { %v5164_v14 = vpop.f32.mrf.mxu2  ;;  %v10161_v37 = vperm.slane %v7856_v62, 2 }
 0x438   : > { %1243 = vmatmul.bf16.gmra.mxu1 %v1099_v5  ;;  %v7645_v5 = vunpack.c.h.bf16 %v7770_v11  ;;  %v1083_v11 = vmax.f32 %v1049_v15, 0.0  ;;  %v5664_v15 = vadd.f32 %v8765_v56, %v5631_v13  ;;  %v6306_v39 = vunpack.c.l.bf16 %v6274_v28 }
 0x43a   : > { %v1050_v53 = vpop.f32.mrf.mxu0  ;;  %v6243_v22 = vmul.f32 %v7645_v5, %v10145_v2  ;;  %v10169_v5 = vld [vmem:[%s10751_s7] sm:$0x7]  ;;  %v5696_v13 = vmax.f32 %v5664_v15, 0.0 }
 0x43b   : > { %v1051_v32 = vadd.f32 %v9918_v9, %v1050_v53  ;;  %v10172_v53 = vperm.slane %v10169_v5, 1 }
 0x43c   : > { %v10151_v23 = vpop.f32.mrf.mxu1  ;;  %v6275_v30 = vpack.c.bf16 %v6243_v22, %v6243_v22  ;;  %v7771_v22 = vld [vmem:[#allocation2 + $0x188] sm:$0xff]  }
 0x43d   : > { %10792 = vst [vmem:[#allocation15_spill] sm:$0xff] %v10151_v23  ;;  %v1084_v36 = vmax.f32 %v1051_v32, 0.0  ;;  %v5665_v32 = vadd.f32 %v8765_v56, %v5632_v35  ;;  %v5569_v35 = vmul.f32 %v10760_v55, %v9736_v42 }
 0x43f   : > { %v1100_v9 = vpack.c.bf16 %v1084_v36, %v1083_v11  ;;  %v5166_v27 = vpop.f32.mrf.mxu2  ;;  %v6307_v36 = vunpack.c.l.bf16 %v6275_v30  ;;  %v7648_v30 = vunpack.c.l.bf16 %v7771_v22  ;;  %v5601_v55 = vpack.c.bf16 %v5569_v35, %v5569_v35 }
 0x442   : > { %v5795_v43 = vpop.f32.mrf.mxu0 }
 0x443   : > { %v5363_v8 = vpop.f32.mrf.mxu3  ;;  %v5796_v11 = vadd.f32 %v5795_v43, %v10172_v53 }
 0x444   : > { %5392 = vmatmul.bf16.gmra.mxu3 %v5259_v25  ;;  %7248 = vmatmul.msk.bf16.gmra.mxu0 %vm915_vm3, %v5719_v60  ;;  %v10164_v24 = vadd.f32 %v5363_v8, %v10094_v49  ;;  %v10176_v16 = vpop.f32.mrf.mxu1  ;;  %v5165_v49 = vadd.f32 %v5164_v14, %v9367_v18  ;;  %v5167_v25 = vadd.f32 %v5166_v27, %v9367_v18  ;;  %v10764_v60 = vunpack.c.h.bf16 %v10155_v1 }
 0x445   : > { %10793 = vst [vmem:[#allocation16_spill] sm:$0xff] %v10176_v16  ;;  %v5697_v8 = vmax.f32 %v5665_v32, 0.0  ;;  %v6339_v14 = vadd.f32 %v10161_v37, %v6306_v39  ;;  %v7649_v27 = vunpack.c.h.bf16 %v7771_v22  ;;  %v5875_v15 = vmax.f32 %v5796_v11, 0.0  ;;  %v7378_v16 = vld [vmem:[#allocation7 + $0xc8] sm:$0xff] }
 0x446   : > { %v5208_v62 = vmax.f32 %v5165_v49, 0.0  ;;  %v5209_v10 = vmax.f32 %v5167_v25, 0.0  ;;  %v5570_v28 = vmul.f32 %v10764_v60, %v9736_v42  ;;  %v6244_v60 = vmul.f32 %v7648_v30, %v10145_v2 }
 0x447   : > { %v5169_v44 = vpop.f32.mrf.mxu2  ;;  %v5720_v49 = vpack.c.bf16 %v5697_v8, %v5696_v13  ;;  %v6371_v20 = vmax.f32 %v6339_v14, 0.0  ;;  %v5633_v22 = vunpack.c.l.bf16 %v5601_v55  ;;  %v10197_v13 = vld [vmem:[#allocation2 + $0x260] sm:$0xff]  }
 0x448   : > { %1248 = vmatmul.bf16.gmra.mxu1 %v1100_v9  ;;  %v6340_v9 = vadd.f32 %v10161_v37, %v6307_v36  ;;  %v5260_v25 = vpack.c.bf16 %v5209_v10, %v5208_v62  ;;  %v5602_v39 = vpack.c.bf16 %v5570_v28, %v5570_v28  ;;  %v6245_v36 = vmul.f32 %v7649_v27, %v10145_v2 }
 0x449   : > { %v5666_v10 = vadd.f32 %v8765_v56, %v5633_v22  ;;  %v5170_v14 = vadd.f32 %v5169_v44, %v9367_v18 }
 0x44a   : > { %v5797_v43 = vpop.f32.mrf.mxu0  ;;  %v6372_v63 = vmax.f32 %v6340_v9, 0.0  ;;  %v5634_v29 = vunpack.c.l.bf16 %v5602_v39  ;;  %v6277_v35 = vpack.c.bf16 %v6245_v36, %v6245_v36  ;;  %v10768_v9 = vunpack.c.l.bf16 %v10197_v13 }
 0x44b   : > { %v5798_v32 = vadd.f32 %v5797_v43, %v10172_v53  ;;  %v6276_v43 = vpack.c.bf16 %v6244_v60, %v6244_v60  ;;  %v5698_v30 = vmax.f32 %v5666_v10, 0.0  ;;  %v5210_v27 = vmax.f32 %v5170_v14, 0.0 }
 0x44c   : > { %v10192_v52 = vpop.f32.mrf.mxu1  ;;  %v6403_v11 = vpack.c.bf16 %v6372_v63, %v6371_v20  ;;  %v6309_v63 = vunpack.c.l.bf16 %v6277_v35  ;;  %v10767_v20 = vunpack.c.h.bf16 %v10197_v13 }
 0x44d   : > { %10794 = vst [vmem:[#allocation17_spill] sm:$0xff] %v10192_v52  ;;  %v5876_v12 = vmax.f32 %v5798_v32, 0.0  ;;  %v10279_v52 = vld [vmem:[#allocation2 + $0x2a8] sm:$0xff]  }
 0x44f   : > { %v5939_v31 = vpack.c.bf16 %v5876_v12, %v5875_v15  ;;  %v5171_v8 = vpop.f32.mrf.mxu2  ;;  %v5667_v12 = vadd.f32 %v8765_v56, %v5634_v29  ;;  %v5571_v29 = vmul.f32 %v10768_v9, %v9736_v42 }
 0x450   : > { %v5172_v28 = vadd.f32 %v5171_v8, %v9367_v18 }
 0x451   : > { %6028 = vmatmul.bf16.vlgmr.msrb.gmra.mxu2 %v5939_v31  ;;  %v6308_v31 = vunpack.c.l.bf16 %v6276_v43  ;;  %v5699_v44 = vmax.f32 %v5667_v12, 0.0  ;;  %v5603_v8 = vpack.c.bf16 %v5571_v29, %v5571_v29  ;;  %v7772_v29 = vld [vmem:[#allocation2 + $0x1a0] sm:$0xff]  }
 0x452   : > { %v5800_v62 = vpop.f32.mrf.mxu0  ;;  %v5211_v15 = vmax.f32 %v5172_v28, 0.0 }
 0x453   : > { %v5801_v60 = vadd.f32 %v5800_v62, %v10172_v53  ;;  %v6341_v32 = vadd.f32 %v10161_v37, %v6308_v31  ;;  %v5721_v43 = vpack.c.bf16 %v5699_v44, %v5698_v30 }
 0x454   : > { %5397 = vmatmul.bf16.gmra.mxu3 %v5260_v25  ;;  %7249 = vmatmul.msk.bf16.gmra.mxu0 %vm915_vm3, %v5720_v49  ;;  %v10203_v55 = vpop.f32.mrf.mxu1  ;;  %v6342_v49 = vadd.f32 %v10161_v37, %v6309_v63  ;;  %v5572_v25 = vmul.f32 %v10767_v20, %v9736_v42  ;;  %v5261_v35 = vpack.c.bf16 %v5211_v15, %v5210_v27  ;;  %v5635_v20 = vunpack.c.l.bf16 %v5603_v8  ;;  %v10231_v8 = vpop.f32.mrf.mxu3 }
 0x455   : > { %10795 = vst [vmem:[#allocation18_spill] sm:$0xff] %v10203_v55  ;;  %v5877_v22 = vmax.f32 %v5801_v60, 0.0  ;;  %v6373_v10 = vmax.f32 %v6341_v32, 0.0  ;;  %v7652_v32 = vunpack.c.l.bf16 %v7772_v29 }
 0x456   : > { %v6374_v14 = vmax.f32 %v6342_v49, 0.0  ;;  %v5604_v28 = vpack.c.bf16 %v5572_v25, %v5572_v25  ;;  %v5668_v15 = vadd.f32 %v8765_v56, %v5635_v20  ;;  %v7653_v49 = vunpack.c.h.bf16 %v7772_v29  ;;  %v10233_v20 = vld [vmem:[#allocation2 + $0x278] sm:$0xff]  }
 0x458   : > { %7295 = vmatmul.msk.bf16.vlgmr.msrb.gmra.mxu1 %vm915_vm3, %v6403_v11  ;;  %v6404_v63 = vpack.c.bf16 %v6374_v14, %v6373_v10  ;;  %v5636_v9 = vunpack.c.l.bf16 %v5604_v28  ;;  %v10769_v28 = vunpack.c.l.bf16 %v10233_v20 }
 0x45a   : > { %v5802_v36 = vpop.f32.mrf.mxu0  ;;  %v5669_v44 = vadd.f32 %v8765_v56, %v5636_v9 }
 0x45b   : > { %v5803_v11 = vadd.f32 %v5802_v36, %v10172_v53 }
 0x45c   : > { %v10218_v12 = vpop.f32.mrf.mxu1  ;;  %v5701_v10 = vmax.f32 %v5669_v44, 0.0 }
 0x45d   : > { %v5174_v39 = vpop.f32.mrf.mxu2  ;;  %v5878_v62 = vmax.f32 %v5803_v11, 0.0  ;;  %10796 = vst [vmem:[#allocation19_spill] sm:$0xff] %v10218_v12 }
 0x45e   : > { %v5175_v36 = vadd.f32 %v5174_v39, %v9367_v18  ;;  %v6247_v39 = vmul.f32 %v7653_v49, %v10145_v2 }
 0x45f   : > { %v5940_v31 = vpack.c.bf16 %v5878_v62, %v5877_v22  ;;  %v5700_v62 = vmax.f32 %v5668_v15, 0.0 }
 0x460   : > { %v5212_v25 = vmax.f32 %v5175_v36, 0.0  ;;  %v6279_v14 = vpack.c.bf16 %v6247_v39, %v6247_v39 }
 0x461   : > { %6033 = vmatmul.bf16.gmra.mxu2 %v5940_v31  ;;  %v10770_v31 = vunpack.c.h.bf16 %v10233_v20  ;;  %v5722_v44 = vpack.c.bf16 %v5701_v10, %v5700_v62 }
 0x462   : > { %v5805_v27 = vpop.f32.mrf.mxu0  ;;  %v6311_v36 = vunpack.c.l.bf16 %v6279_v14 }
 0x464   : > { %5402 = vmatmul.bf16.gmra.mxu3 %v5261_v35  ;;  %7250 = vmatmul.msk.bf16.gmra.mxu0 %vm915_vm3, %v5721_v43  ;;  %v10226_v11 = vpop.f32.mrf.mxu1  ;;  %v6246_v43 = vmul.f32 %v7652_v32, %v10145_v2  ;;  %v5806_v35 = vadd.f32 %v5805_v27, %v10172_v53  ;;  %v5574_v27 = vmul.f32 %v10770_v31, %v9736_v42 }
 0x465   : > { %v5176_v60 = vpop.f32.mrf.mxu2  ;;  %10797 = vst [vmem:[#allocation20_spill] sm:$0xff] %v10226_v11 }
 0x466   : > { %v5177_v30 = vadd.f32 %v5176_v60, %v9367_v18  ;;  %v6278_v9 = vpack.c.bf16 %v6246_v43, %v6246_v43  ;;  %v5879_v15 = vmax.f32 %v5806_v35, 0.0  ;;  %v6344_v43 = vadd.f32 %v10161_v37, %v6311_v36  ;;  %v7773_v36 = vld [vmem:[#allocation2 + $0x1b8] sm:$0xff]  }
 0x468   : > { %7296 = vmatmul.msk.bf16.gmra.mxu1 %vm915_vm3, %v6404_v63  ;;  %v5213_v22 = vmax.f32 %v5177_v30, 0.0  ;;  %v6310_v60 = vunpack.c.l.bf16 %v6278_v9  ;;  %v5573_v30 = vmul.f32 %v10769_v28, %v9736_v42  ;;  %v6376_v14 = vmax.f32 %v6344_v43, 0.0 }
 0x46a   : > { %v5262_v63 = vpack.c.bf16 %v5213_v22, %v5212_v25  ;;  %v5807_v29 = vpop.f32.mrf.mxu0  ;;  %v6343_v49 = vadd.f32 %v10161_v37, %v6310_v60  ;;  %v5605_v25 = vpack.c.bf16 %v5573_v30, %v5573_v30  ;;  %v5606_v22 = vpack.c.bf16 %v5574_v27, %v5574_v27 }
 0x46b   : > { %v5808_v32 = vadd.f32 %v5807_v29, %v10172_v53  ;;  %v7656_v30 = vunpack.c.l.bf16 %v7773_v36  ;;  %v7657_v27 = vunpack.c.h.bf16 %v7773_v36  ;;  %v10800_v36 = vunpack.c.l.bf16 %v10013_v48 }
 0x46c   : > { %v6375_v9 = vmax.f32 %v6343_v49, 0.0  ;;  %v5637_v28 = vunpack.c.l.bf16 %v5605_v25  ;;  %v5638_v11 = vunpack.c.l.bf16 %v5606_v22 }
 0x46d   : > { %v5880_v39 = vmax.f32 %v5808_v32, 0.0  ;;  %v6249_v29 = vmul.f32 %v7657_v27, %v10145_v2  ;;  %v10801_v27 = vunpack.c.h.bf16 %v10013_v48 }
 0x46e   : > { %v6405_v62 = vpack.c.bf16 %v6376_v14, %v6375_v9  ;;  %v5670_v60 = vadd.f32 %v8765_v56, %v5637_v28  ;;  %v7379_v9 = vld [vmem:[#allocation7 + $0xd0] sm:$0xff] }
 0x46f   : > { %v5941_v35 = vpack.c.bf16 %v5880_v39, %v5879_v15  ;;  %v10256_v15 = vld [vmem:[#allocation2 + $0x290] sm:$0xff]   ;;  %v6281_v22 = vpack.c.bf16 %v6249_v29, %v6249_v29  ;;  %6716 = vmatpush.bf16.msrb.mxu3 %v7379_v9 }
 0x470   : > { %v5702_v32 = vmax.f32 %v5670_v60, 0.0  ;;  %v10771_v39 = vunpack.c.l.bf16 %v10256_v15  ;;  %v10772_v28 = vunpack.c.h.bf16 %v10256_v15 }
 0x471   : > { %6038 = vmatmul.bf16.gmra.mxu2 %v5941_v35  ;;  %v6313_v35 = vunpack.c.l.bf16 %v6281_v22 }
 0x473   : > { %v6346_v22 = vadd.f32 %v10161_v37, %v6313_v35  ;;  %v10773_v35 = vunpack.c.l.bf16 %v10279_v52  ;;  %6717 = vmatpush.bf16.msrb.mxu3 %v7378_v16 }
 0x474   : > { %5407 = vmatmul.bf16.gmra.mxu3 %v5262_v63  ;;  %7251 = vmatmul.msk.bf16.gmra.mxu0 %vm915_vm3, %v5722_v44  ;;  %v5671_v63 = vadd.f32 %v8765_v56, %v5638_v11  ;;  %v6248_v44 = vmul.f32 %v7656_v30, %v10145_v2  ;;  %v6250_v30 = vmul.f32 %v10800_v36, %v10145_v2 }
 0x475   : > { %v10247_v31 = vpop.f32.mrf.mxu1 }
 0x476   : > { %v5703_v49 = vmax.f32 %v5671_v63, 0.0  ;;  %v6280_v25 = vpack.c.bf16 %v6248_v44, %v6248_v44  ;;  %v5576_v63 = vmul.f32 %v10772_v28, %v9736_v42  ;;  %v6251_v44 = vmul.f32 %v10801_v27, %v10145_v2 }
 0x477   : > { %v10249_v10 = vpop.f32.mrf.mxu3  ;;  %v6282_v12 = vpack.c.bf16 %v6250_v30, %v6250_v30 }
 0x478   : > { %7297 = vmatmul.msk.bf16.gmra.mxu1 %vm915_vm3, %v6405_v62  ;;  %v6312_v14 = vunpack.c.l.bf16 %v6280_v25  ;;  %v5575_v62 = vmul.f32 %v10771_v39, %v9736_v42  ;;  %v5723_v60 = vpack.c.bf16 %v5703_v49, %v5702_v32  ;;  %v5608_v32 = vpack.c.bf16 %v5576_v63, %v5576_v63 }
 0x479   : > { %v6283_v36 = vpack.c.bf16 %v6251_v44, %v6251_v44  ;;  %v10774_v63 = vunpack.c.h.bf16 %v10279_v52 }
 0x47a   : > { %v6345_v25 = vadd.f32 %v10161_v37, %v6312_v14  ;;  %v5607_v39 = vpack.c.bf16 %v5575_v62, %v5575_v62  ;;  %v5640_v55 = vunpack.c.l.bf16 %v5608_v32  ;;  %v6314_v62 = vunpack.c.l.bf16 %v6282_v12 }
 0x47b   : > { %v6315_v30 = vunpack.c.l.bf16 %v6283_v36  ;;  %v5578_v12 = vmul.f32 %v10774_v63, %v9736_v42 }
 0x47c   : > { %v6377_v49 = vmax.f32 %v6345_v25, 0.0  ;;  %v5639_v28 = vunpack.c.l.bf16 %v5607_v39 }
 0x47d   : > { %v10258_v43 = vpop.f32.mrf.mxu1 }
 0x47e   : > { %10798 = vst [vmem:[#allocation21_spill] sm:$0xff] %v10258_v43  ;;  %v6378_v43 = vmax.f32 %v6346_v22, 0.0  ;;  %v5672_v39 = vadd.f32 %v8765_v56, %v5639_v28  ;;  %v6347_v22 = vadd.f32 %v10161_v37, %v6314_v62 }
 0x47f   : > { %v10262_v11 = vpop.f32.mrf.mxu3 }
 0x480   : > { %10799 = vst [vmem:[#allocation22_spill] sm:$0xff] %v10262_v11  ;;  %v6406_v27 = vpack.c.bf16 %v6378_v43, %v6377_v49  ;;  %v5704_v49 = vmax.f32 %v5672_v39, 0.0  ;;  %v10805_v39 = vunpack.c.l.bf16 %v10046_v45 }
 0x481   : > { %v5810_v29 = vpop.f32.mrf.mxu0 }
 0x482   : > { %v5811_v9 = vadd.f32 %v5810_v29, %v10172_v53  ;;  %v5577_v29 = vmul.f32 %v10773_v35, %v9736_v42  ;;  %v5610_v35 = vpack.c.bf16 %v5578_v12, %v5578_v12 }
 0x484   : > { %7252 = vmatmul.msk.bf16.gmra.mxu0 %vm915_vm3, %v5723_v60  ;;  %v5673_v60 = vadd.f32 %v8765_v56, %v5640_v55  ;;  %v5881_v25 = vmax.f32 %v5811_v9, 0.0  ;;  %v6348_v55 = vadd.f32 %v10161_v37, %v6315_v30  ;;  %v10806_v30 = vunpack.c.h.bf16 %v10046_v45 }
 0x485   : > { %v10281_v48 = vpop.f32.mrf.mxu1  ;;  %v5642_v63 = vunpack.c.l.bf16 %v5610_v35 }
 0x486   : > { %v5705_v28 = vmax.f32 %v5673_v60, 0.0  ;;  %v6380_v11 = vmax.f32 %v6348_v55, 0.0  ;;  %v6252_v60 = vmul.f32 %v10805_v39, %v10145_v2 }
 0x487   : > { %v10284_v14 = vpop.f32.mrf.mxu3 }
 0x488   : > { %10802 = vst [vmem:[#allocation23_spill] sm:$0xff] %v10284_v14  ;;  %7298 = vmatmul.msk.bf16.gmra.mxu1 %vm915_vm3, %v6406_v27  ;;  %v6379_v14 = vmax.f32 %v6347_v22, 0.0  ;;  %v5724_v62 = vpack.c.bf16 %v5705_v28, %v5704_v49  ;;  %v6284_v22 = vpack.c.bf16 %v6252_v60, %v6252_v60 }
 0x489   : > { %v5812_v44 = vpop.f32.mrf.mxu0 }
 0x48a   : > { %v5813_v43 = vadd.f32 %v5812_v44, %v10172_v53  ;;  %v5609_v44 = vpack.c.bf16 %v5577_v29, %v5577_v29  ;;  %v6407_v29 = vpack.c.bf16 %v6380_v11, %v6379_v14 }
 0x48c   : > { %v5882_v32 = vmax.f32 %v5813_v43, 0.0  ;;  %v6253_v43 = vmul.f32 %v10806_v30, %v10145_v2 }
 0x48d   : > { %v10300_v36 = vpop.f32.mrf.mxu1 }
 0x48e   : > { %10803 = vst [vmem:[#allocation24_spill] sm:$0xff] %v10300_v36  ;;  %v5942_v27 = vpack.c.bf16 %v5882_v32, %v5881_v25  ;;  %v5641_v32 = vunpack.c.l.bf16 %v5609_v44  ;;  %v6285_v12 = vpack.c.bf16 %v6253_v43, %v6253_v43  ;;  %v5675_v44 = vadd.f32 %v8765_v56, %v5642_v63 }
 0x48f   : > { %v10302_v9 = vpop.f32.mrf.mxu3 }
 0x490   : > { %10804 = vst [vmem:[#allocation25_spill] sm:$0xff] %v10302_v9  ;;  %6043 = vmatmul.bf16.gmra.mxu2 %v5942_v27  ;;  %v10311_v27 = vld [vmem:[#allocation2 + $0x2c0] sm:$0xff]   ;;  %v5674_v45 = vadd.f32 %v8765_v56, %v5641_v32  ;;  %v6317_v39 = vunpack.c.l.bf16 %v6285_v12 }
 0x491   : > { %v5179_v23 = vpop.f32.mrf.mxu2  ;;  %v5815_v25 = vpop.f32.mrf.mxu0  ;;  %v10775_v35 = vunpack.c.l.bf16 %v10311_v27  ;;  %v10776_v11 = vunpack.c.h.bf16 %v10311_v27 }
 0x492   : > { %v5180_v16 = vadd.f32 %v5179_v23, %v9367_v18  ;;  %v5816_v28 = vadd.f32 %v5815_v25, %v10172_v53  ;;  %v5706_v36 = vmax.f32 %v5674_v45, 0.0 }
 0x493   : > { %v5579_v63 = vmul.f32 %v10775_v35, %v9736_v42 }
 0x494   : > { %7253 = vmatmul.msk.bf16.gmra.mxu0 %vm915_vm3, %v5724_v62  ;;  %v6316_v62 = vunpack.c.l.bf16 %v6284_v22  ;;  %v5214_v23 = vmax.f32 %v5180_v16, 0.0  ;;  %v5883_v43 = vmax.f32 %v5816_v28, 0.0 }
 0x495   : > { %v10314_v49 = vpop.f32.mrf.mxu1 }
 0x496   : > { %v6349_v12 = vadd.f32 %v10161_v37, %v6316_v62  ;;  %v10810_v62 = vunpack.c.h.bf16 %v10071_v3 }
 0x497   : > { %v10317_v55 = vpop.f32.mrf.mxu3 }
 0x498   : > { %10807 = vst [vmem:[#allocation26_spill] sm:$0xff] %v10317_v55  ;;  %7299 = vmatmul.msk.bf16.gmra.mxu1 %vm915_vm3, %v6407_v29  ;;  %v5707_v55 = vmax.f32 %v5675_v44, 0.0  ;;  %v5580_v29 = vmul.f32 %v10776_v11, %v9736_v42  ;;  %v6381_v35 = vmax.f32 %v6349_v12, 0.0 }
 0x499   : > { %v5181_v14 = vpop.f32.mrf.mxu2  ;;  %v5817_v30 = vpop.f32.mrf.mxu0 }
 0x49a   : > { %v5182_v60 = vadd.f32 %v5181_v14, %v9367_v18  ;;  %v5818_v25 = vadd.f32 %v5817_v30, %v10172_v53  ;;  %v6350_v18 = vadd.f32 %v10161_v37, %v6317_v39  ;;  %v5725_v44 = vpack.c.bf16 %v5707_v55, %v5706_v36 }
 0x49b   : > { %v5612_v30 = vpack.c.bf16 %v5580_v29, %v5580_v29  ;;  %v6255_v39 = vmul.f32 %v10810_v62, %v10145_v2 }
 0x49c   : > { %v5215_v32 = vmax.f32 %v5182_v60, 0.0  ;;  %v5884_v22 = vmax.f32 %v5818_v25, 0.0  ;;  %v5611_v60 = vpack.c.bf16 %v5579_v63, %v5579_v63  ;;  %v6382_v9 = vmax.f32 %v6350_v18, 0.0  ;;  %v10345_v63 = vld [vmem:[#allocation2 + $0x2d8] sm:$0xff]  }
 0x49d   : > { %v10334_v28 = vpop.f32.mrf.mxu1  ;;  %v10809_v25 = vunpack.c.l.bf16 %v10071_v3  ;;  %v6287_v55 = vpack.c.bf16 %v6255_v39, %v6255_v39 }
 0x49e   : > { %v5263_v16 = vpack.c.bf16 %v5215_v32, %v5214_v23  ;;  %10808 = vst [vmem:[#allocation27_spill] sm:$0xff] %v10334_v28  ;;  %v5943_v14 = vpack.c.bf16 %v5884_v22, %v5883_v43  ;;  %v5643_v32 = vunpack.c.l.bf16 %v5611_v60  ;;  %v5644_v43 = vunpack.c.l.bf16 %v5612_v30 }
 0x49f   : > { %v10336_v45 = vpop.f32.mrf.mxu3  ;;  %v6254_v11 = vmul.f32 %v10809_v25, %v10145_v2  ;;  %v6408_v22 = vpack.c.bf16 %v6382_v9, %v6381_v35  ;;  %v10778_v60 = vunpack.c.h.bf16 %v10345_v63  ;;  %v6319_v35 = vunpack.c.l.bf16 %v6287_v55 }
 0x4a0   : > { %5412 = vmatmul.bf16.gmra.mxu3 %v5263_v16  ;;  %6048 = vmatmul.bf16.gmra.mxu2 %v5943_v14  ;;  %v5676_v16 = vadd.f32 %v8765_v56, %v5643_v32  ;;  %v5677_v3 = vadd.f32 %v8765_v56, %v5644_v43  ;;  %v10777_v14 = vunpack.c.l.bf16 %v10345_v63 }
 0x4a1   : > { %v5820_v23 = vpop.f32.mrf.mxu0  ;;  %v6286_v36 = vpack.c.bf16 %v6254_v11, %v6254_v11 }
 0x4a2   : > { %v5821_v12 = vadd.f32 %v5820_v23, %v10172_v53  ;;  %v5708_v25 = vmax.f32 %v5676_v16, 0.0  ;;  %v5709_v62 = vmax.f32 %v5677_v3, 0.0  ;;  %v5581_v39 = vmul.f32 %v10777_v14, %v9736_v42  ;;  %v7377_v16 = vld [vmem:[#allocation7 + $0xc0] sm:$0xff] }
 0x4a3   : > { %v6318_v9 = vunpack.c.l.bf16 %v6286_v36  ;;  %v5582_v23 = vmul.f32 %v10778_v60, %v9736_v42  ;;  %6718 = vmatpush.bf16.msrb.mxu3 %v7377_v16  ;;  %v10812_v42 = vunpack.c.l.bf16 %v10097_v26 }
 0x4a4   : > { %7254 = vmatmul.msk.bf16.gmra.mxu0 %vm915_vm3, %v5725_v44  ;;  %v5885_v44 = vmax.f32 %v5821_v12, 0.0  ;;  %v5726_v3 = vpack.c.bf16 %v5709_v62, %v5708_v25 }
 0x4a5   : > { %v10347_v29 = vpop.f32.mrf.mxu1  ;;  %v6351_v43 = vadd.f32 %v10161_v37, %v6318_v9  ;;  %v5614_v28 = vpack.c.bf16 %v5582_v23, %v5582_v23  ;;  %v10813_v9 = vunpack.c.h.bf16 %v10097_v26 }
 0x4a7   : > { %v10350_v18 = vpop.f32.mrf.mxu3  ;;  %v6383_v14 = vmax.f32 %v6351_v43, 0.0 }
 0x4a8   : > { %10811 = vst [vmem:[#allocation28_spill] sm:$0xff] %v10350_v18  ;;  %7300 = vmatmul.msk.bf16.gmra.mxu1 %vm915_vm3, %v6408_v22  ;;  %v6352_v22 = vadd.f32 %v10161_v37, %v6319_v35  ;;  %v6257_v35 = vmul.f32 %v10813_v9, %v10145_v2 }
 0x4a9   : > { %v5822_v11 = vpop.f32.mrf.mxu0 }
 0x4aa   : > { %v5823_v30 = vadd.f32 %v5822_v11, %v10172_v53  ;;  %v5613_v11 = vpack.c.bf16 %v5581_v39, %v5581_v39  ;;  %v6384_v18 = vmax.f32 %v6352_v22, 0.0  ;;  %v6289_v39 = vpack.c.bf16 %v6257_v35, %v6257_v35 }
 0x4ac   : > { %v5886_v32 = vmax.f32 %v5823_v30, 0.0  ;;  %v6256_v30 = vmul.f32 %v10812_v42, %v10145_v2  ;;  %v6409_v25 = vpack.c.bf16 %v6384_v18, %v6383_v14 }
 0x4ad   : > { %v10366_v36 = vpop.f32.mrf.mxu1 }
 0x4ae   : > { %v5944_v55 = vpack.c.bf16 %v5886_v32, %v5885_v44  ;;  %v5645_v44 = vunpack.c.l.bf16 %v5613_v11  ;;  %v5646_v32 = vunpack.c.l.bf16 %v5614_v28  ;;  %v6288_v62 = vpack.c.bf16 %v6256_v30, %v6256_v30 }
 0x4af   : > { %v10368_v12 = vpop.f32.mrf.mxu3  ;;  %v6321_v11 = vunpack.c.l.bf16 %v6289_v39 }
 0x4b0   : > { %6053 = vmatmul.bf16.gmra.mxu2 %v5944_v55  ;;  %v5678_v16 = vadd.f32 %v8765_v56, %v5645_v44  ;;  %v5679_v26 = vadd.f32 %v8765_v56, %v5646_v32  ;;  %v6320_v28 = vunpack.c.l.bf16 %v6288_v62  ;;  %v10814_v62 = vunpack.c.l.bf16 %v10122_v51 }
 0x4b1   : > { %v5825_v60 = vpop.f32.mrf.mxu0 }
 0x4b2   : > { %v5826_v43 = vadd.f32 %v5825_v60, %v10172_v53  ;;  %v5710_v42 = vmax.f32 %v5678_v16, 0.0  ;;  %v5711_v30 = vmax.f32 %v5679_v26, 0.0  ;;  %v6353_v60 = vadd.f32 %v10161_v37, %v6320_v28 }
 0x4b3   : > { %v6258_v39 = vmul.f32 %v10814_v62, %v10145_v2 }
 0x4b4   : > { %7255 = vmatmul.msk.bf16.gmra.mxu0 %vm915_vm3, %v5726_v3  ;;  %v5887_v18 = vmax.f32 %v5826_v43, 0.0  ;;  %v5727_v56 = vpack.c.bf16 %v5711_v30, %v5710_v42  ;;  %v6385_v32 = vmax.f32 %v6353_v60, 0.0  ;;  %v10815_v43 = vunpack.c.h.bf16 %v10122_v51 }
 0x4b5   : > { %v10377_v23 = vpop.f32.mrf.mxu1 }
 0x4b6   : > { %v6259_v16 = vmul.f32 %v10815_v43, %v10145_v2 }
 0x4b7   : > { %v5388_v22 = vpop.f32.mrf.mxu3 }
 0x4b8   : > { %v10381_v55 = vadd.f32 %v5388_v22, %v10247_v31  ;;  %7301 = vmatmul.msk.bf16.gmra.mxu1 %vm915_vm3, %v6409_v25  ;;  %v6354_v31 = vadd.f32 %v10161_v37, %v6321_v11  ;;  %v6290_v11 = vpack.c.bf16 %v6258_v39, %v6258_v39 }
 0x4b9   : > { %v5827_v3 = vpop.f32.mrf.mxu0 }
 0x4ba   : > { %v5828_v14 = vadd.f32 %v5827_v3, %v10172_v53  ;;  %v6386_v25 = vmax.f32 %v6354_v31, 0.0  ;;  %v6291_v3 = vpack.c.bf16 %v6259_v16, %v6259_v16 }
 0x4bc   : > { %v5888_v9 = vmax.f32 %v5828_v14, 0.0  ;;  %v6410_v28 = vpack.c.bf16 %v6386_v25, %v6385_v32  ;;  %v6323_v60 = vunpack.c.l.bf16 %v6291_v3 }
 0x4bd   : > { %v10389_v35 = vpop.f32.mrf.mxu1 }
 0x4be   : > { %v5945_v44 = vpack.c.bf16 %v5888_v9, %v5887_v18  ;;  %v6322_v9 = vunpack.c.l.bf16 %v6290_v11  ;;  %v6356_v25 = vadd.f32 %v10161_v37, %v6323_v60  ;;  %v10818_v11 = vunpack.c.h.bf16 %v10155_v1 }
 0x4bf   : > { %v10391_v22 = vpop.f32.mrf.mxu3 }
 0x4c0   : > { %6058 = vmatmul.bf16.gmra.mxu2 %v5945_v44  ;;  %v6355_v32 = vadd.f32 %v10161_v37, %v6322_v9  ;;  %v6388_v16 = vmax.f32 %v6356_v25, 0.0  ;;  %v6261_v3 = vmul.f32 %v10818_v11, %v10145_v2  ;;  %v10427_v25 = vperm.slane %v10169_v5, 2 }
 0x4c1   : > { %v5830_v26 = vpop.f32.mrf.mxu0 }
 0x4c2   : > { %v5831_v14 = vadd.f32 %v5830_v26, %v10172_v53  ;;  %v10817_v26 = vunpack.c.l.bf16 %v10155_v1  ;;  %v6293_v60 = vpack.c.bf16 %v6261_v3, %v6261_v3 }
 0x4c4   : > { %7256 = vmatmul.msk.bf16.gmra.mxu0 %vm915_vm3, %v5727_v56  ;;  %v5889_v31 = vmax.f32 %v5831_v14, 0.0 }
 0x4c5   : > { %v10400_v18 = vpop.f32.mrf.mxu1 }
 0x4c7   : > { %v5393_v42 = vpop.f32.mrf.mxu3 }
 0x4c8   : > { %v10404_v30 = vadd.f32 %v5393_v42, %v10281_v48  ;;  %7302 = vmatmul.msk.bf16.gmra.mxu1 %vm915_vm3, %v6410_v28  ;;  %v6387_v48 = vmax.f32 %v6355_v32, 0.0  ;;  %v6260_v28 = vmul.f32 %v10817_v26, %v10145_v2 }
 0x4c9   : > { %v5832_v51 = vpop.f32.mrf.mxu0 }
 0x4ca   : > { %v5833_v44 = vadd.f32 %v5832_v51, %v10172_v53  ;;  %v6292_v42 = vpack.c.bf16 %v6260_v28, %v6260_v28  ;;  %v6411_v9 = vpack.c.bf16 %v6388_v16, %v6387_v48  ;;  %v6325_v48 = vunpack.c.l.bf16 %v6293_v60 }
 0x4cc   : > { %v5890_v56 = vmax.f32 %v5833_v44, 0.0  ;;  %v6324_v1 = vunpack.c.l.bf16 %v6292_v42  ;;  %v6358_v3 = vadd.f32 %v10161_v37, %v6325_v48  ;;  %v10820_v48 = vunpack.c.h.bf16 %v10197_v13 }
 0x4cd   : > { %v10410_v62 = vpop.f32.mrf.mxu1 }
 0x4ce   : > { %10816 = vst [vmem:[#allocation29_spill] sm:$0xff] %v10410_v62  ;;  %v5946_v39 = vpack.c.bf16 %v5890_v56, %v5889_v31  ;;  %v5418_v31 = vadd.f32 %v10008_v6, %v9929_v38  ;;  %v6357_v11 = vadd.f32 %v10161_v37, %v6324_v1 }
 0x4cf   : > { %v10412_v43 = vpop.f32.mrf.mxu3 }
 0x4d0   : > { %6063 = vmatmul.bf16.gmra.mxu2 %v5946_v39  ;;  %v6389_v60 = vmax.f32 %v6357_v11, 0.0  ;;  %v5420_v11 = vadd.f32 %v10043_v61, %v9963_v4 }
 0x4d1   : > { %v5835_v14 = vpop.f32.mrf.mxu0 }
 0x4d2   : > { %v5836_v44 = vadd.f32 %v5835_v14, %v10172_v53 }
 0x4d4   : > { %v6029_v39 = vpop.f32.mrf.mxu2  ;;  %v5891_v28 = vmax.f32 %v5836_v44, 0.0 }
 0x4d5   : > { %v6486_v51 = vpop.f32.mrf.mxu1  ;;  %v10430_v26 = vadd.f32 %v6029_v39, %v5418_v31  ;;  %v6390_v39 = vmax.f32 %v6358_v3, 0.0 }
 0x4d6   : > { %v6487_v6 = vadd.f32 %v6486_v51, %v10427_v25  ;;  %v10819_v51 = vunpack.c.l.bf16 %v10197_v13 }
 0x4d7   : > { %v5398_v56 = vpop.f32.mrf.mxu3 }
 0x4d8   : > { %v10424_v32 = vadd.f32 %v5398_v56, %v10314_v49  ;;  %7303 = vmatmul.msk.bf16.gmra.mxu1 %vm915_vm3, %v6411_v9  ;;  %v6566_v9 = vmax.f32 %v6487_v6, 0.0  ;;  %v6262_v1 = vmul.f32 %v10819_v51, %v10145_v2 }
 0x4d9   : > { %v5837_v16 = vpop.f32.mrf.mxu0 }
 0x4da   : > { %v5838_v38 = vadd.f32 %v5837_v16, %v10172_v53  ;;  %v6263_v16 = vmul.f32 %v10820_v48, %v10145_v2 }
 0x4dc   : > { %v5892_v49 = vmax.f32 %v5838_v38, 0.0  ;;  %v10439_v31 = vpop.f32.mrf.mxu2  ;;  %v6295_v6 = vpack.c.bf16 %v6263_v16, %v6263_v16 }
 0x4dd   : > { %v6488_v5 = vpop.f32.mrf.mxu1 }
 0x4de   : > { %v5947_v14 = vpack.c.bf16 %v5892_v49, %v5891_v28  ;;  %v6489_v42 = vadd.f32 %v6488_v5, %v10427_v25  ;;  %v6412_v49 = vpack.c.bf16 %v6390_v39, %v6389_v60  ;;  %v6294_v5 = vpack.c.bf16 %v6262_v1, %v6262_v1 }
 0x4df   : > { %v10436_v56 = vpop.f32.mrf.mxu3  ;;  %v6327_v60 = vunpack.c.l.bf16 %v6295_v6 }
 0x4e0   : > { %6068 = vmatmul.bf16.gmra.mxu2 %v5947_v14  ;;  %v6567_v44 = vmax.f32 %v6489_v42, 0.0 }
 0x4e1   : > { %v5840_v28 = vpop.f32.mrf.mxu0 }
 0x4e2   : > { %v6630_v38 = vpack.c.bf16 %v6567_v44, %v6566_v9  ;;  %v5841_v3 = vadd.f32 %v5840_v28, %v10172_v53  ;;  %v6326_v9 = vunpack.c.l.bf16 %v6294_v5  ;;  %v5421_v28 = vadd.f32 %v10063_v41, %v9985_v0 }
 0x4e4   : > { %6719 = vmatmul.bf16.vlgmr.msrb.gmra.mxu3 %v6630_v38  ;;  %v6034_v51 = vpop.f32.mrf.mxu2  ;;  %v5893_v39 = vmax.f32 %v5841_v3, 0.0  ;;  %v6359_v48 = vadd.f32 %v10161_v37, %v6326_v9 }
 0x4e5   : > { %v6491_v62 = vpop.f32.mrf.mxu1  ;;  %v10454_v13 = vadd.f32 %v6034_v51, %v5420_v11 }
 0x4e6   : > { %v6492_v4 = vadd.f32 %v6491_v62, %v10427_v25 }
 0x4e7   : > { %v5403_v14 = vpop.f32.mrf.mxu3 }
 0x4e8   : > { %v10451_v42 = vadd.f32 %v5403_v14, %v10347_v29  ;;  %7304 = vmatmul.msk.bf16.gmra.mxu1 %vm915_vm3, %v6412_v49  ;;  %v6360_v29 = vadd.f32 %v10161_v37, %v6327_v60  ;;  %v6568_v6 = vmax.f32 %v6492_v4, 0.0  ;;  %v6391_v14 = vmax.f32 %v6359_v48, 0.0 }
 0x4e9   : > { %v5842_v44 = vpop.f32.mrf.mxu0 }
 0x4ea   : > { %v5843_v1 = vadd.f32 %v5842_v44, %v10172_v53  ;;  %v6392_v51 = vmax.f32 %v6360_v29, 0.0 }
 0x4ec   : > { %v5894_v61 = vmax.f32 %v5843_v1, 0.0  ;;  %v6036_v62 = vpop.f32.mrf.mxu2  ;;  %v6413_v9 = vpack.c.bf16 %v6392_v51, %v6391_v14 }
 0x4ed   : > { %v6493_v16 = vpop.f32.mrf.mxu1  ;;  %v10469_v3 = vadd.f32 %v6036_v62, %v5421_v28  ;;  %v10821_v28 = vunpack.c.l.bf16 %v10233_v20 }
 0x4ee   : > { %v5948_v38 = vpack.c.bf16 %v5894_v61, %v5893_v39  ;;  %v6494_v5 = vadd.f32 %v6493_v16, %v10427_v25 }
 0x4ef   : > { %v10463_v49 = vpop.f32.mrf.mxu3 }
 0x4f0   : > { %6073 = vmatmul.bf16.gmra.mxu2 %v5948_v38  ;;  %v6569_v11 = vmax.f32 %v6494_v5, 0.0  ;;  %v6264_v38 = vmul.f32 %v10821_v28, %v10145_v2  ;;  %v10822_v5 = vunpack.c.h.bf16 %v10233_v20 }
 0x4f1   : > { %v5845_v0 = vpop.f32.mrf.mxu0 }
 0x4f2   : > { %v6631_v41 = vpack.c.bf16 %v6569_v11, %v6568_v6  ;;  %v5846_v44 = vadd.f32 %v5845_v0, %v10172_v53  ;;  %v6265_v6 = vmul.f32 %v10822_v5, %v10145_v2  ;;  %v6296_v14 = vpack.c.bf16 %v6264_v38, %v6264_v38 }
 0x4f4   : > { %6724 = vmatmul.bf16.gmra.mxu3 %v6631_v41  ;;  %v5895_v61 = vmax.f32 %v5846_v44, 0.0  ;;  %v6039_v29 = vpop.f32.mrf.mxu2  ;;  %v6297_v51 = vpack.c.bf16 %v6265_v6, %v6265_v6 }
 0x4f5   : > { %v6496_v60 = vpop.f32.mrf.mxu1  ;;  %v10482_v16 = vadd.f32 %v6039_v29, %v10074_v40 }
 0x4f6   : > { %v6497_v62 = vadd.f32 %v6496_v60, %v10427_v25  ;;  %v6329_v40 = vunpack.c.l.bf16 %v6297_v51 }
 0x4f7   : > { %v5408_v39 = vpop.f32.mrf.mxu3 }
 0x4f8   : > { %v10477_v1 = vadd.f32 %v5408_v39, %v10377_v23  ;;  %7305 = vmatmul.msk.bf16.gmra.mxu1 %vm915_vm3, %v6413_v9  ;;  %v6328_v9 = vunpack.c.l.bf16 %v6296_v14  ;;  %v6570_v44 = vmax.f32 %v6497_v62, 0.0  ;;  %v10823_v14 = vunpack.c.l.bf16 %v10256_v15 }
 0x4f9   : > { %v5847_v4 = vpop.f32.mrf.mxu0 }
 0x4fa   : > { %v5848_v48 = vadd.f32 %v5847_v4, %v10172_v53  ;;  %v5423_v4 = vadd.f32 %v10090_v34, %v10011_v58  ;;  %v6361_v20 = vadd.f32 %v10161_v37, %v6328_v9  ;;  %v6266_v51 = vmul.f32 %v10823_v14, %v10145_v2 }
 0x4fc   : > { %v5896_v23 = vmax.f32 %v5848_v48, 0.0  ;;  %v6362_v48 = vadd.f32 %v10161_v37, %v6329_v40  ;;  %v6041_v60 = vpop.f32.mrf.mxu2 }
 0x4fd   : > { %v6498_v11 = vpop.f32.mrf.mxu1  ;;  %v10496_v38 = vadd.f32 %v6041_v60, %v5423_v4 }
 0x4fe   : > { %v5949_v0 = vpack.c.bf16 %v5896_v23, %v5895_v61  ;;  %v6499_v41 = vadd.f32 %v6498_v11, %v10427_v25  ;;  %v6393_v61 = vmax.f32 %v6361_v20, 0.0  ;;  %v6394_v5 = vmax.f32 %v6362_v48, 0.0 }
 0x500   : > { %6078 = vmatmul.bf16.gmra.mxu2 %v5949_v0  ;;  %v6571_v39 = vmax.f32 %v6499_v41, 0.0  ;;  %v6414_v23 = vpack.c.bf16 %v6394_v5, %v6393_v61  ;;  %v10824_v0 = vunpack.c.h.bf16 %v10256_v15  ;;  %v10825_v5 = vunpack.c.l.bf16 %v10279_v52 }
 0x501   : > { %v5850_v29 = vpop.f32.mrf.mxu0  ;;  %v10826_v15 = vunpack.c.h.bf16 %v10279_v52 }
 0x502   : > { %v6632_v28 = vpack.c.bf16 %v6571_v39, %v6570_v44  ;;  %v5851_v62 = vadd.f32 %v5850_v29, %v10172_v53  ;;  %v6267_v41 = vmul.f32 %v10824_v0, %v10145_v2  ;;  %v6298_v39 = vpack.c.bf16 %v6266_v51, %v6266_v51 }
 0x504   : > { %6729 = vmatmul.bf16.gmra.mxu3 %v6632_v28  ;;  %v5897_v58 = vmax.f32 %v5851_v62, 0.0  ;;  %v6299_v4 = vpack.c.bf16 %v6267_v41, %v6267_v41  ;;  %v6330_v48 = vunpack.c.l.bf16 %v6298_v39  ;;  %v6269_v62 = vmul.f32 %v10826_v15, %v10145_v2 }
 0x505   : > { %v6501_v6 = vpop.f32.mrf.mxu1 }
 0x506   : > { %v6502_v40 = vadd.f32 %v6501_v6, %v10427_v25  ;;  %v6331_v60 = vunpack.c.l.bf16 %v6299_v4 }
 0x508   : > { %7306 = vmatmul.msk.bf16.gmra.mxu1 %vm915_vm3, %v6414_v23  ;;  %v6572_v28 = vmax.f32 %v6502_v40, 0.0  ;;  %v6268_v23 = vmul.f32 %v10825_v5, %v10145_v2  ;;  %v6301_v40 = vpack.c.bf16 %v6269_v62, %v6269_v62 }
 0x509   : > { %v5852_v11 = vpop.f32.mrf.mxu0 }
 0x50a   : > { %v5853_v34 = vadd.f32 %v5852_v11, %v10172_v53  ;;  %v6363_v11 = vadd.f32 %v10161_v37, %v6330_v48  ;;  %v6300_v41 = vpack.c.bf16 %v6268_v23, %v6268_v23  ;;  %v5425_v48 = vadd.f32 %v10116_v17, %v10048_v7 }
 0x50c   : > { %v5898_v9 = vmax.f32 %v5853_v34, 0.0  ;;  %v6395_v51 = vmax.f32 %v6363_v11, 0.0  ;;  %v6332_v4 = vunpack.c.l.bf16 %v6300_v41  ;;  %v10828_v41 = vunpack.c.h.bf16 %v10311_v27 }
 0x50d   : > { %v6503_v44 = vpop.f32.mrf.mxu1 }
 0x50e   : > { %v5950_v29 = vpack.c.bf16 %v5898_v9, %v5897_v58  ;;  %v6504_v20 = vadd.f32 %v6503_v44, %v10427_v25  ;;  %v6364_v58 = vadd.f32 %v10161_v37, %v6331_v60  ;;  %v6365_v5 = vadd.f32 %v10161_v37, %v6332_v4 }
 0x510   : > { %6083 = vmatmul.bf16.gmra.mxu2 %v5950_v29  ;;  %v6573_v61 = vmax.f32 %v6504_v20, 0.0  ;;  %v6396_v0 = vmax.f32 %v6364_v58, 0.0  ;;  %v6333_v29 = vunpack.c.l.bf16 %v6301_v40  ;;  %v6271_v40 = vmul.f32 %v10828_v41, %v10145_v2 }
 0x511   : > { %v5855_v6 = vpop.f32.mrf.mxu0 }
 0x512   : > { %v6633_v34 = vpack.c.bf16 %v6573_v61, %v6572_v28  ;;  %v6415_v39 = vpack.c.bf16 %v6396_v0, %v6395_v51  ;;  %v5856_v52 = vadd.f32 %v5855_v6, %v10172_v53  ;;  %v6366_v62 = vadd.f32 %v10161_v37, %v6333_v29 }
 0x513   : > { %v6044_v14 = vpop.f32.mrf.mxu2  ;;  %v10827_v51 = vunpack.c.l.bf16 %v10311_v27  ;;  %v6303_v29 = vpack.c.bf16 %v6271_v40, %v6271_v40  ;;  %v10830_v40 = vunpack.c.h.bf16 %v10345_v63 }
 0x514   : > { %v10518_v9 = vadd.f32 %v6044_v14, %v10100_v47  ;;  %6734 = vmatmul.bf16.gmra.mxu3 %v6633_v34  ;;  %v5899_v60 = vmax.f32 %v5856_v52, 0.0  ;;  %v6397_v14 = vmax.f32 %v6365_v5, 0.0  ;;  %v6398_v17 = vmax.f32 %v6366_v62, 0.0 }
 0x515   : > { %v6506_v44 = vpop.f32.mrf.mxu1  ;;  %v6270_v0 = vmul.f32 %v10827_v51, %v10145_v2 }
 0x516   : > { %v6507_v47 = vadd.f32 %v6506_v44, %v10427_v25  ;;  %v6416_v4 = vpack.c.bf16 %v6398_v17, %v6397_v14 }
 0x517   : > { %v6302_v52 = vpack.c.bf16 %v6270_v0, %v6270_v0  ;;  %v10829_v0 = vunpack.c.l.bf16 %v10345_v63 }
 0x518   : > { %7307 = vmatmul.msk.bf16.gmra.mxu1 %vm915_vm3, %v6415_v39  ;;  %v6574_v34 = vmax.f32 %v6507_v47, 0.0 }
 0x519   : > { %v5857_v20 = vpop.f32.mrf.mxu0  ;;  %v6272_v41 = vmul.f32 %v10829_v0, %v10145_v2 }
 0x51a   : > { %v5858_v28 = vadd.f32 %v5857_v20, %v10172_v53 }
 0x51b   : > { %v6046_v61 = vpop.f32.mrf.mxu2 }
 0x51c   : > { %v5900_v23 = vmax.f32 %v5858_v28, 0.0  ;;  %v10527_v15 = vadd.f32 %v6046_v61, %v5425_v48  ;;  %v6335_v28 = vunpack.c.l.bf16 %v6303_v29  ;;  %v6304_v29 = vpack.c.bf16 %v6272_v41, %v6272_v41 }
 0x51d   : > { %v6508_v6 = vpop.f32.mrf.mxu1 }
 0x51e   : > { %v5951_v11 = vpack.c.bf16 %v5900_v23, %v5899_v60  ;;  %v6509_v58 = vadd.f32 %v6508_v6, %v10427_v25  ;;  %v6334_v60 = vunpack.c.l.bf16 %v6302_v52  ;;  %v6368_v6 = vadd.f32 %v10161_v37, %v6335_v28 }
 0x51f   : > { %v6336_v28 = vunpack.c.l.bf16 %v6304_v29 }
 0x520   : > { %6088 = vmatmul.bf16.gmra.mxu2 %v5951_v11  ;;  %v6575_v7 = vmax.f32 %v6509_v58, 0.0  ;;  %v6367_v23 = vadd.f32 %v10161_v37, %v6334_v60  ;;  %v6400_v51 = vmax.f32 %v6368_v6, 0.0 }
 0x521   : > { %v5860_v44 = vpop.f32.mrf.mxu0  ;;  %v6369_v63 = vadd.f32 %v10161_v37, %v6336_v28 }
 0x522   : > { %v6634_v39 = vpack.c.bf16 %v6575_v7, %v6574_v34  ;;  %v5861_v48 = vadd.f32 %v5860_v44, %v10172_v53  ;;  %v6399_v7 = vmax.f32 %v6367_v23, 0.0  ;;  %v6273_v44 = vmul.f32 %v10830_v40, %v10145_v2 }
 0x524   : > { %6739 = vmatmul.bf16.gmra.mxu3 %v6634_v39  ;;  %v5901_v47 = vmax.f32 %v5861_v48, 0.0 }
 0x525   : > { %v6511_v20 = vpop.f32.mrf.mxu1 }
 0x526   : > { %v6512_v27 = vadd.f32 %v6511_v20, %v10427_v25  ;;  %v6305_v20 = vpack.c.bf16 %v6273_v44, %v6273_v44 }
 0x528   : > { %7308 = vmatmul.msk.bf16.gmra.mxu1 %vm915_vm3, %v6416_v4  ;;  %v6576_v14 = vmax.f32 %v6512_v27, 0.0  ;;  %v6417_v4 = vpack.c.bf16 %v6400_v51, %v6399_v7  ;;  %v6401_v7 = vmax.f32 %v6369_v63, 0.0 }
 0x529   : > { %v5862_v61 = vpop.f32.mrf.mxu0 }
 0x52a   : > { %v5863_v5 = vadd.f32 %v5862_v61, %v10172_v53  ;;  %v6337_v61 = vunpack.c.l.bf16 %v6305_v20 }
 0x52c   : > { %v5902_v62 = vmax.f32 %v5863_v5, 0.0 }
 0x52d   : > { %v6513_v11 = vpop.f32.mrf.mxu1 }
 0x52e   : > { %v5952_v58 = vpack.c.bf16 %v5902_v62, %v5901_v47  ;;  %v6514_v34 = vadd.f32 %v6513_v11, %v10427_v25  ;;  %v6370_v62 = vadd.f32 %v10161_v37, %v6337_v61 }
 0x530   : > { %6093 = vmatmul.bf16.gmra.mxu2 %v5952_v58  ;;  %v6577_v17 = vmax.f32 %v6514_v34, 0.0 }
 0x531   : > { %v5865_v39 = vpop.f32.mrf.mxu0 }
 0x532   : > { %v6635_v52 = vpack.c.bf16 %v6577_v17, %v6576_v14  ;;  %v5866_v60 = vadd.f32 %v5865_v39, %v10172_v53  ;;  %v6402_v17 = vmax.f32 %v6370_v62, 0.0 }
 0x534   : > { %6744 = vmatmul.bf16.gmra.mxu3 %v6635_v52  ;;  %v5903_v5 = vmax.f32 %v5866_v60, 0.0  ;;  %v6418_v41 = vpack.c.bf16 %v6402_v17, %v6401_v7 }
 0x535   : > { %v6516_v48 = vpop.f32.mrf.mxu1 }
 0x536   : > { %v6517_v2 = vadd.f32 %v6516_v48, %v10427_v25 }
 0x538   : > { %7309 = vmatmul.msk.bf16.gmra.mxu1 %vm915_vm3, %v6417_v4  ;;  %v6578_v34 = vmax.f32 %v6517_v2, 0.0  ;;  %v10560_v4 = vpop.f32.mrf.mxu3 }
 0x539   : > { %v5867_v47 = vpop.f32.mrf.mxu0 }
 0x53a   : > { %v5868_v27 = vadd.f32 %v5867_v47, %v10172_v53 }
 0x53c   : > { %v5904_v23 = vmax.f32 %v5868_v27, 0.0 }
 0x53d   : > { %v6518_v6 = vpop.f32.mrf.mxu1 }
 0x53e   : > { %v5953_v11 = vpack.c.bf16 %v5904_v23, %v5903_v5  ;;  %v6519_v58 = vadd.f32 %v6518_v6, %v10427_v25 }
 0x540   : > { %6098 = vmatmul.bf16.gmra.mxu2 %v5953_v11  ;;  %v6579_v14 = vmax.f32 %v6519_v58, 0.0  ;;  %v10564_v27 = vpop.f32.mrf.mxu3 }
 0x541   : > { %v5870_v51 = vpop.f32.mrf.mxu0 }
 0x542   : > { %v6636_v0 = vpack.c.bf16 %v6579_v14, %v6578_v34  ;;  %v5871_v44 = vadd.f32 %v5870_v51, %v10172_v53  ;;  %v10575_v14 = vld [vmem:[%s383_s11] ss:$0 sm:$0xff]  ;;  %s7938_s11 = scalar_lea.hbm %s10753_s9, 512 }
 0x543   : > { %p7940_p2 = scmp.lt.s32.totalorder %s7938_s11, %s7934_s22 }
 0x544   : > { %6749 = vmatmul.bf16.gmra.mxu3 %v6636_v0  ;;  %v5905_v37 = vmax.f32 %v5871_v44, 0.0  ;;  %v5419_v0 = vadd.f32 %v10027_v50, %v9948_v57 }
 0x545   : > { %v6521_v40 = vpop.f32.mrf.mxu1  ;;  %p7941_p10 = por %p7940_p2, %p7939_p9 }
 0x546   : > { %v6522_v20 = vadd.f32 %v6521_v40, %v10427_v25 }
 0x547   : > { %p7942_p12 = pnand %p7941_p10, %p7937_p11 }
 0x548   : > { %7310 = vmatmul.msk.bf16.gmra.mxu1 %vm915_vm3, %v6418_v41  ;;  %v6580_v61 = vmax.f32 %v6522_v20, 0.0  ;;  %v10568_v62 = vpop.f32.mrf.mxu3 }
 0x549   : > { %v5872_v39 = vpop.f32.mrf.mxu0 }
 0x54a   : > { %v5873_v52 = vadd.f32 %v5872_v39, %v10172_v53  ;;  %v6110_v39 = vadd.f32 %v10439_v31, %v5419_v0 }
 0x54c   : > { %v5906_v29 = vmax.f32 %v5873_v52, 0.0 }
 0x54d   : > { %v6523_v48 = vpop.f32.mrf.mxu1 }
 0x54e   : > { %v5954_v60 = vpack.c.bf16 %v5906_v29, %v5905_v37  ;;  %v6524_v28 = vadd.f32 %v6523_v48, %v10427_v25 }
 0x550   : > { %6103 = vmatmul.bf16.gmra.mxu2 %v5954_v60  ;;  %v6581_v47 = vmax.f32 %v6524_v28, 0.0  ;;  %v6049_v60 = vpop.f32.mrf.mxu2 }
 0x552   : > { %v6637_v5 = vpack.c.bf16 %v6581_v47, %v6580_v61 }
 0x554   : > { %6754 = vmatmul.bf16.gmra.mxu3 %v6637_v5 }
 0x555   : > { %v6526_v23 = vpop.f32.mrf.mxu1 }
 0x556   : > { %v6527_v53 = vadd.f32 %v6526_v23, %v10427_v25 }
 0x558   : > { %v6582_v6 = vmax.f32 %v6527_v53, 0.0 }
 0x55d   : > { %v6528_v2 = vpop.f32.mrf.mxu1 }
 0x55e   : > { %v6529_v63 = vadd.f32 %v6528_v2, %v10427_v25 }
 0x560   : > { %v6583_v11 = vmax.f32 %v6529_v63, 0.0  ;;  %v6051_v63 = vpop.f32.mrf.mxu2 }
 0x562   : > { %v6638_v58 = vpack.c.bf16 %v6583_v11, %v6582_v6 }
 0x564   : > { %6759 = vmatmul.bf16.gmra.mxu3 %v6638_v58 }
 0x565   : > { %v6531_v34 = vpop.f32.mrf.mxu1 }
 0x566   : > { %v6532_v41 = vadd.f32 %v6531_v34, %v10427_v25 }
 0x567   : > { %v6720_v7 = vpop.f32.mrf.mxu3 }
 0x568   : > { %v6800_v17 = vadd.f32 %v6720_v7, %v10430_v26  ;;  %v6584_v52 = vmax.f32 %v6532_v41, 0.0 }
 0x56a   : > { %v6900_v51 = vadd.f32 %v10575_v14, %v6800_v17 }
 0x56c   : > { %v6932_v40 = vmax.f32 %v6900_v51, 0.0 }
 0x56d   : > { %v6533_v44 = vpop.f32.mrf.mxu1 }
 0x56e   : > { %6964 = vst [vmem:[%s10585_s20] sm:$0xff] %v6932_v40  ;;  %v6534_v37 = vadd.f32 %v6533_v44, %v10427_v25  ;;  %v6054_v40 = vpop.f32.mrf.mxu2 }
 0x56f   : > { %v6722_v26 = vpop.f32.mrf.mxu3 }
 0x570   : > { %v6585_v29 = vmax.f32 %v6534_v37, 0.0  ;;  %v6801_v20 = vadd.f32 %v6722_v26, %v6110_v39 }
 0x572   : > { %v6639_v57 = vpack.c.bf16 %v6585_v29, %v6584_v52  ;;  %v6901_v50 = vadd.f32 %v10575_v14, %v6801_v20 }
 0x574   : > { %v6933_v48 = vmax.f32 %v6901_v50, 0.0  ;;  %6764 = vmatmul.bf16.gmra.mxu3 %v6639_v57 }
 0x575   : > { %v6536_v31 = vpop.f32.mrf.mxu1 }
 0x576   : > { %6965 = vst [vmem:[%s10585_s20 + $0x8] sm:$0xff] %v6933_v48  ;;  %v6537_v5 = vadd.f32 %v6536_v31, %v10427_v25  ;;  %v6056_v48 = vpop.f32.mrf.mxu2 }
 0x577   : > { %v6725_v28 = vpop.f32.mrf.mxu3 }
 0x578   : > { %v6802_v61 = vadd.f32 %v6725_v28, %v10454_v13  ;;  %v6586_v11 = vmax.f32 %v6537_v5, 0.0 }
 0x57a   : > { %v6902_v47 = vadd.f32 %v10575_v14, %v6802_v61 }
 0x57c   : > { %v6934_v23 = vmax.f32 %v6902_v47, 0.0 }
 0x57d   : > { %v6538_v53 = vpop.f32.mrf.mxu1 }
 0x57e   : > { %6966 = vst [vmem:[%s10585_s20 + $0x10] sm:$0xff] %v6934_v23  ;;  %v6539_v2 = vadd.f32 %v6538_v53, %v10427_v25 }
 0x57f   : > { %v6727_v6 = vpop.f32.mrf.mxu3 }
 0x580   : > { %v6587_v58 = vmax.f32 %v6539_v2, 0.0  ;;  %v6803_v34 = vadd.f32 %v6727_v6, %v10469_v3  ;;  %v6059_v2 = vpop.f32.mrf.mxu2 }
 0x582   : > { %v6640_v7 = vpack.c.bf16 %v6587_v58, %v6586_v11  ;;  %v6903_v13 = vadd.f32 %v10575_v14, %v6803_v34 }
 0x584   : > { %v6935_v17 = vmax.f32 %v6903_v13, 0.0  ;;  %6769 = vmatmul.bf16.gmra.mxu3 %v6640_v7 }
 0x585   : > { %v6541_v51 = vpop.f32.mrf.mxu1 }
 0x586   : > { %6967 = vst [vmem:[%s10585_s20 + $0x18] sm:$0xff] %v6935_v17  ;;  %v6542_v39 = vadd.f32 %v6541_v51, %v10427_v25 }
 0x587   : > { %v6730_v0 = vpop.f32.mrf.mxu3 }
 0x588   : > { %v6804_v41 = vadd.f32 %v6730_v0, %v10482_v16  ;;  %v6588_v29 = vmax.f32 %v6542_v39, 0.0  ;;  %v6117_v0 = vadd.f32 %v6049_v60, %v10126_v59 }
 0x58a   : > { %v6904_v44 = vadd.f32 %v10575_v14, %v6804_v41  ;;  %v6061_v41 = vpop.f32.mrf.mxu2 }
 0x58c   : > { %v6936_v37 = vmax.f32 %v6904_v44, 0.0 }
 0x58d   : > { %v6543_v26 = vpop.f32.mrf.mxu1 }
 0x58e   : > { %6968 = vst [vmem:[%s10585_s20 + $0x20] sm:$0xff] %v6936_v37  ;;  %v6544_v3 = vadd.f32 %v6543_v26, %v10427_v25  ;;  %v5427_v26 = vadd.f32 %v10147_v54, %v10076_v21  ;;  %v6119_v54 = vadd.f32 %v6054_v40, %v10164_v24 }
 0x58f   : > { %v6732_v52 = vpop.f32.mrf.mxu3 }
 0x590   : > { %v6589_v20 = vmax.f32 %v6544_v3, 0.0  ;;  %v6805_v57 = vadd.f32 %v6732_v52, %v10496_v38 }
 0x592   : > { %v6641_v50 = vpack.c.bf16 %v6589_v20, %v6588_v29  ;;  %v6905_v16 = vadd.f32 %v10575_v14, %v6805_v57  ;;  %v6118_v29 = vadd.f32 %v6051_v63, %v5427_v26  ;;  %v10831_v26 = vld [vmem:[#allocation22_spill] sm:$0xff] }
 0x594   : > { %v6937_v31 = vmax.f32 %v6905_v16, 0.0  ;;  %6774 = vmatmul.bf16.gmra.mxu3 %v6641_v50  ;;  %v6064_v16 = vpop.f32.mrf.mxu2 }
 0x595   : > { %v6546_v28 = vpop.f32.mrf.mxu1 }
 0x596   : > { %6969 = vst [vmem:[%s10585_s20 + $0x28] sm:$0xff] %v6937_v31  ;;  %v6547_v23 = vadd.f32 %v6546_v28, %v10427_v25 }
 0x597   : > { %v6735_v61 = vpop.f32.mrf.mxu3 }
 0x598   : > { %v6806_v47 = vadd.f32 %v6735_v61, %v10518_v9  ;;  %v6590_v58 = vmax.f32 %v6547_v23, 0.0 }
 0x59a   : > { %v6906_v5 = vadd.f32 %v10575_v14, %v6806_v47 }
 0x59c   : > { %v6938_v53 = vmax.f32 %v6906_v5, 0.0  ;;  %v6066_v23 = vpop.f32.mrf.mxu2 }
 0x59d   : > { %v6548_v6 = vpop.f32.mrf.mxu1 }
 0x59e   : > { %6970 = vst [vmem:[%s10585_s20 + $0x30] sm:$0xff] %v6938_v53  ;;  %v6549_v38 = vadd.f32 %v6548_v6, %v10427_v25  ;;  %v5429_v53 = vadd.f32 %v10231_v8, %v10102_v46  ;;  %v5430_v46 = vadd.f32 %v10249_v10, %v10120_v19 }
 0x59f   : > { %v6737_v11 = vpop.f32.mrf.mxu3 }
 0x5a0   : > { %v6591_v34 = vmax.f32 %v6549_v38, 0.0  ;;  %v6807_v7 = vadd.f32 %v6737_v11, %v10527_v15 }
 0x5a2   : > { %v6642_v13 = vpack.c.bf16 %v6591_v34, %v6590_v58  ;;  %v6907_v9 = vadd.f32 %v10575_v14, %v6807_v7  ;;  %v6120_v58 = vadd.f32 %v6056_v48, %v5429_v53  ;;  %v10835_v53 = vld [vmem:[#allocation25_spill] sm:$0xff] }
 0x5a4   : > { %v6939_v17 = vmax.f32 %v6907_v9, 0.0  ;;  %6779 = vmatmul.bf16.gmra.mxu3 %v6642_v13 }
 0x5a5   : > { %v6551_v51 = vpop.f32.mrf.mxu1 }
 0x5a6   : > { %6971 = vst [vmem:[%s10585_s20 + $0x38] sm:$0xff] %v6939_v17  ;;  %v6552_v15 = vadd.f32 %v6551_v51, %v10427_v25  ;;  %v6069_v51 = vpop.f32.mrf.mxu2 }
 0x5a7   : > { %v6740_v44 = vpop.f32.mrf.mxu3 }
 0x5a8   : > { %v6808_v39 = vadd.f32 %v6740_v44, %v6117_v0  ;;  %v6592_v59 = vmax.f32 %v6552_v15, 0.0  ;;  %v6121_v44 = vadd.f32 %v6059_v2, %v5430_v46  ;;  %v5431_v15 = vadd.f32 %v10831_v26, %v10131_v33  ;;  %v10833_v33 = vld [vmem:[#allocation23_spill] sm:$0xff] }
 0x5aa   : > { %v6908_v37 = vadd.f32 %v10575_v14, %v6808_v39 }
 0x5ac   : > { %v6940_v3 = vmax.f32 %v6908_v37, 0.0 }
 0x5ad   : > { %v6553_v52 = vpop.f32.mrf.mxu1 }
 0x5ae   : > { %6972 = vst [vmem:[%s10585_s20 + $0x40] sm:$0xff] %v6940_v3  ;;  %v6554_v20 = vadd.f32 %v6553_v52, %v10427_v25  ;;  %v6071_v10 = vpop.f32.mrf.mxu2 }
 0x5af   : > { %v6742_v57 = vpop.f32.mrf.mxu3 }
 0x5b0   : > { %v6593_v60 = vmax.f32 %v6554_v20, 0.0  ;;  %v6809_v50 = vadd.f32 %v6742_v57, %v6118_v29  ;;  %v6122_v20 = vadd.f32 %v6061_v41, %v5431_v15 }
 0x5b2   : > { %v6643_v31 = vpack.c.bf16 %v6593_v60, %v6592_v59  ;;  %v6909_v28 = vadd.f32 %v10575_v14, %v6809_v50 }
 0x5b4   : > { %v6941_v61 = vmax.f32 %v6909_v28, 0.0  ;;  %6784 = vmatmul.bf16.gmra.mxu3 %v6643_v31  ;;  %v10832_v28 = vld [vmem:[#allocation15_spill] sm:$0xff] }
 0x5b5   : > { %v6556_v21 = vpop.f32.mrf.mxu1 }
 0x5b6   : > { %6973 = vst [vmem:[%s10585_s20 + $0x48] sm:$0xff] %v6941_v61  ;;  %v6557_v6 = vadd.f32 %v6556_v21, %v10427_v25  ;;  %v5432_v61 = vadd.f32 %v10833_v33, %v10832_v28 }
 0x5b7   : > { %v6745_v47 = vpop.f32.mrf.mxu3 }
 0x5b8   : > { %v6810_v63 = vadd.f32 %v6745_v47, %v6119_v54  ;;  %v6594_v24 = vmax.f32 %v6557_v6, 0.0  ;;  %v6123_v54 = vadd.f32 %v6064_v16, %v5432_v61  ;;  %v10836_v16 = vld [vmem:[#allocation17_spill] sm:$0xff] }
 0x5ba   : > { %v6910_v5 = vadd.f32 %v10575_v14, %v6810_v63 }
 0x5bc   : > { %v6942_v38 = vmax.f32 %v6910_v5, 0.0  ;;  %v10834_v5 = vld [vmem:[#allocation16_spill] sm:$0xff] }
 0x5bd   : > { %v6558_v11 = vpop.f32.mrf.mxu1  ;;  %v5433_v6 = vadd.f32 %v10835_v53, %v10834_v5 }
 0x5be   : > { %6974 = vst [vmem:[%s10585_s20 + $0x50] sm:$0xff] %v6942_v38  ;;  %v6559_v34 = vadd.f32 %v6558_v11, %v10427_v25 }
 0x5bf   : > { %v6747_v7 = vpop.f32.mrf.mxu3  ;;  %v6124_v11 = vadd.f32 %v6066_v23, %v5433_v6 }
 0x5c0   : > { %v6595_v40 = vmax.f32 %v6559_v34, 0.0  ;;  %v6811_v13 = vadd.f32 %v6747_v7, %v6120_v58 }
 0x5c2   : > { %v6644_v9 = vpack.c.bf16 %v6595_v40, %v6594_v24  ;;  %v6911_v17 = vadd.f32 %v10575_v14, %v6811_v13  ;;  %v10837_v40 = vld [vmem:[#allocation26_spill] sm:$0xff] }
 0x5c3   : > { %v5434_v13 = vadd.f32 %v10837_v40, %v10836_v16 }
 0x5c4   : > { %v6943_v8 = vmax.f32 %v6911_v17, 0.0  ;;  %6789 = vmatmul.bf16.gmra.mxu3 %v6644_v9 }
 0x5c5   : > { %v6561_v0 = vpop.f32.mrf.mxu1  ;;  %v6125_v17 = vadd.f32 %v6069_v51, %v5434_v13  ;;  %v10840_v51 = vld [vmem:[#allocation28_spill] sm:$0xff] }
 0x5c6   : > { %6975 = vst [vmem:[%s10585_s20 + $0x58] sm:$0xff] %v6943_v8  ;;  %v6562_v3 = vadd.f32 %v6561_v0, %v10427_v25 }
 0x5c7   : > { %v6750_v48 = vpop.f32.mrf.mxu3 }
 0x5c8   : > { %v6812_v39 = vadd.f32 %v6750_v48, %v6121_v44  ;;  %v6596_v2 = vmax.f32 %v6562_v3, 0.0  ;;  %v10838_v44 = vld [vmem:[#allocation18_spill] sm:$0xff] }
 0x5c9   : > { %v5435_v23 = vadd.f32 %v10336_v45, %v10838_v44 }
 0x5ca   : > { %v6912_v37 = vadd.f32 %v10575_v14, %v6812_v39 }
 0x5cc   : > { %v6944_v52 = vmax.f32 %v6912_v37, 0.0  ;;  %v6126_v37 = vadd.f32 %v6071_v10, %v5435_v23 }
 0x5cd   : > { %v6563_v29 = vpop.f32.mrf.mxu1 }
 0x5ce   : > { %6976 = vst [vmem:[%s10585_s20 + $0x60] sm:$0xff] %v6944_v52  ;;  %v6564_v19 = vadd.f32 %v6563_v29, %v10427_v25  ;;  %v6074_v25 = vpop.f32.mrf.mxu2  ;;  %v10839_v52 = vld [vmem:[#allocation19_spill] sm:$0xff] }
 0x5cf   : > { %v6752_v57 = vpop.f32.mrf.mxu3  ;;  %v5436_v29 = vadd.f32 %v10840_v51, %v10839_v52 }
 0x5d0   : > { %v6597_v59 = vmax.f32 %v6564_v19, 0.0  ;;  %v6813_v60 = vadd.f32 %v6752_v57, %v6122_v20 }
 0x5d1   : > { %v6127_v19 = vadd.f32 %v6074_v25, %v5436_v29 }
 0x5d2   : > { %v6645_v50 = vpack.c.bf16 %v6597_v59, %v6596_v2  ;;  %v6913_v31 = vadd.f32 %v10575_v14, %v6813_v60  ;;  %v10841_v60 = vld [vmem:[#allocation20_spill] sm:$0xff] }
 0x5d3   : > { %v5437_v10 = vadd.f32 %v10368_v12, %v10841_v60  ;;  %v10842_v12 = vld [vmem:[#allocation21_spill] sm:$0xff] }
 0x5d4   : > { %v6945_v21 = vmax.f32 %v6913_v31, 0.0  ;;  %6794 = vmatmul.bf16.gmra.mxu3 %v6645_v50  ;;  %v5439_v53 = vadd.f32 %v10391_v22, %v10842_v12 }
 0x5d6   : > { %6977 = vst [vmem:[%s10585_s20 + $0x68] sm:$0xff] %v6945_v21  ;;  %v6076_v24 = vpop.f32.mrf.mxu2 }
 0x5d7   : > { %v6755_v41 = vpop.f32.mrf.mxu3  ;;  %v6128_v31 = vadd.f32 %v6076_v24, %v5437_v10 }
 0x5d8   : > { %v6814_v47 = vadd.f32 %v6755_v41, %v6123_v54 }
 0x5da   : > { %v6914_v63 = vadd.f32 %v10575_v14, %v6814_v47 }
 0x5dc   : > { %v6946_v38 = vmax.f32 %v6914_v63, 0.0 }
 0x5de   : > { %6978 = vst [vmem:[%s10585_s20 + $0x70] sm:$0xff] %v6946_v38  ;;  %v6079_v39 = vpop.f32.mrf.mxu2 }
 0x5df   : > { %v6757_v58 = vpop.f32.mrf.mxu3  ;;  %v6129_v41 = vadd.f32 %v6079_v39, %v10381_v55 }
 0x5e0   : > { %v6815_v34 = vadd.f32 %v6757_v58, %v6124_v11 }
 0x5e2   : > { %v6915_v7 = vadd.f32 %v10575_v14, %v6815_v34 }
 0x5e4   : > { %v6947_v9 = vmax.f32 %v6915_v7, 0.0 }
 0x5e6   : > { %6979 = vst [vmem:[%s10585_s20 + $0x78] sm:$0xff] %v6947_v9  ;;  %v6081_v57 = vpop.f32.mrf.mxu2  ;;  %v10843_v9 = vld [vmem:[#allocation24_spill] sm:$0xff] }
 0x5e7   : > { %v6760_v46 = vpop.f32.mrf.mxu3  ;;  %v6130_v38 = vadd.f32 %v6081_v57, %v5439_v53  ;;  %v5441_v22 = vadd.f32 %v10412_v43, %v10843_v9  ;;  %v10844_v43 = vld [vmem:[#allocation27_spill] sm:$0xff] }
 0x5e8   : > { %v6816_v8 = vadd.f32 %v6760_v46, %v6125_v17 }
 0x5ea   : > { %v6916_v0 = vadd.f32 %v10575_v14, %v6816_v8 }
 0x5ec   : > { %v6948_v48 = vmax.f32 %v6916_v0, 0.0 }
 0x5ee   : > { %6980 = vst [vmem:[%s10585_s20 + $0x80] sm:$0xff] %v6948_v48  ;;  %v6084_v61 = vpop.f32.mrf.mxu2 }
 0x5ef   : > { %v6762_v26 = vpop.f32.mrf.mxu3  ;;  %v6131_v24 = vadd.f32 %v6084_v61, %v10404_v30 }
 0x5f0   : > { %v6817_v15 = vadd.f32 %v6762_v26, %v6126_v37 }
 0x5f2   : > { %v6917_v3 = vadd.f32 %v10575_v14, %v6817_v15 }
 0x5f4   : > { %v6949_v20 = vmax.f32 %v6917_v3, 0.0  ;;  %v5443_v3 = vadd.f32 %v10436_v56, %v10844_v43  ;;  %v5445_v56 = vadd.f32 %v10463_v49, %v10366_v36  ;;  %v5447_v36 = vadd.f32 %v10560_v4, %v10389_v35 }
 0x5f6   : > { %6981 = vst [vmem:[%s10585_s20 + $0x88] sm:$0xff] %v6949_v20  ;;  %v6086_v5 = vpop.f32.mrf.mxu2 }
 0x5f7   : > { %v6765_v2 = vpop.f32.mrf.mxu3  ;;  %v6132_v46 = vadd.f32 %v6086_v5, %v5441_v22 }
 0x5f8   : > { %v6818_v59 = vadd.f32 %v6765_v2, %v6127_v19 }
 0x5fa   : > { %v6918_v45 = vadd.f32 %v10575_v14, %v6818_v59 }
 0x5fc   : > { %v6950_v50 = vmax.f32 %v6918_v45, 0.0 }
 0x5fe   : > { %6982 = vst [vmem:[%s10585_s20 + $0x90] sm:$0xff] %v6950_v50  ;;  %v6089_v55 = vpop.f32.mrf.mxu2 }
 0x5ff   : > { %v6767_v28 = vpop.f32.mrf.mxu3  ;;  %v6133_v30 = vadd.f32 %v6089_v55, %v10424_v32 }
 0x600   : > { %v6819_v33 = vadd.f32 %v6767_v28, %v6128_v31 }
 0x602   : > { %v6919_v21 = vadd.f32 %v10575_v14, %v6819_v33 }
 0x604   : > { %v6951_v54 = vmax.f32 %v6919_v21, 0.0 }
 0x606   : > { %6983 = vst [vmem:[%s10585_s20 + $0x98] sm:$0xff] %v6951_v54  ;;  %v6091_v8 = vpop.f32.mrf.mxu2 }
 0x607   : > { %v6770_v47 = vpop.f32.mrf.mxu3  ;;  %v6134_v51 = vadd.f32 %v6091_v8, %v5443_v3 }
 0x608   : > { %v6820_v25 = vadd.f32 %v6770_v47, %v6129_v41 }
 0x60a   : > { %v6920_v63 = vadd.f32 %v10575_v14, %v6820_v25 }
 0x60c   : > { %v6952_v6 = vmax.f32 %v6920_v63, 0.0 }
 0x60e   : > { %6984 = vst [vmem:[%s10585_s20 + $0xa0] sm:$0xff] %v6952_v6  ;;  %v6094_v26 = vpop.f32.mrf.mxu2  ;;  %v5448_v6 = vadd.f32 %v10564_v27, %v10400_v18 }
 0x60f   : > { %v6772_v11 = vpop.f32.mrf.mxu3  ;;  %v6135_v2 = vadd.f32 %v6094_v26, %v10451_v42 }
 0x610   : > { %v6821_v58 = vadd.f32 %v6772_v11, %v6130_v38 }
 0x612   : > { %v6921_v34 = vadd.f32 %v10575_v14, %v6821_v58 }
 0x614   : > { %v6953_v7 = vmax.f32 %v6921_v34, 0.0 }
 0x616   : > { %6985 = vst [vmem:[%s10585_s20 + $0xa8] sm:$0xff] %v6953_v7  ;;  %v6096_v57 = vpop.f32.mrf.mxu2  ;;  %v10845_v7 = vld [vmem:[#allocation29_spill] sm:$0xff] }
 0x617   : > { %v6775_v16 = vpop.f32.mrf.mxu3  ;;  %v6136_v31 = vadd.f32 %v6096_v57, %v5445_v56  ;;  %v5449_v55 = vadd.f32 %v10568_v62, %v10845_v7 }
 0x618   : > { %v6822_v40 = vadd.f32 %v6775_v16, %v6131_v24 }
 0x61a   : > { %v6922_v13 = vadd.f32 %v10575_v14, %v6822_v40 }
 0x61c   : > { %v6954_v17 = vmax.f32 %v6922_v13, 0.0 }
 0x61e   : > { %6986 = vst [vmem:[%s10585_s20 + $0xb0] sm:$0xff] %v6954_v17  ;;  %v6099_v50 = vpop.f32.mrf.mxu2 }
 0x61f   : > { %v6777_v0 = vpop.f32.mrf.mxu3  ;;  %v6137_v42 = vadd.f32 %v6099_v50, %v10477_v1 }
 0x620   : > { %v6823_v44 = vadd.f32 %v6777_v0, %v6132_v46 }
 0x622   : > { %v6923_v23 = vadd.f32 %v10575_v14, %v6823_v44 }
 0x624   : > { %v6955_v48 = vmax.f32 %v6923_v23, 0.0 }
 0x626   : > { %6987 = vst [vmem:[%s10585_s20 + $0xb8] sm:$0xff] %v6955_v48  ;;  %v6101_v54 = vpop.f32.mrf.mxu2 }
 0x627   : > { %v6780_v39 = vpop.f32.mrf.mxu3  ;;  %v6138_v63 = vadd.f32 %v6101_v54, %v5447_v36 }
 0x628   : > { %v6824_v37 = vadd.f32 %v6780_v39, %v6133_v30 }
 0x62a   : > { %v6924_v15 = vadd.f32 %v10575_v14, %v6824_v37 }
 0x62c   : > { %v6956_v52 = vmax.f32 %v6924_v15, 0.0 }
 0x62e   : > { %6988 = vst [vmem:[%s10585_s20 + $0xc0] sm:$0xff] %v6956_v52  ;;  %v6104_v53 = vpop.f32.mrf.mxu2 }
 0x62f   : > { %v6782_v29 = vpop.f32.mrf.mxu3  ;;  %v6139_v11 = vadd.f32 %v6104_v53, %v5448_v6 }
 0x630   : > { %v6825_v20 = vadd.f32 %v6782_v29, %v6134_v51 }
 0x632   : > { %v6925_v19 = vadd.f32 %v10575_v14, %v6825_v20 }
 0x634   : > { %v6957_v32 = vmax.f32 %v6925_v19, 0.0 }
 0x636   : > { %6989 = vst [vmem:[%s10585_s20 + $0xc8] sm:$0xff] %v6957_v32  ;;  %v6106_v4 = vpop.f32.mrf.mxu2 }
 0x637   : > { %v6785_v59 = vpop.f32.mrf.mxu3  ;;  %v6140_v18 = vadd.f32 %v6106_v4, %v5449_v55 }
 0x638   : > { %v6826_v45 = vadd.f32 %v6785_v59, %v6135_v2 }
 0x63a   : > { %v6926_v60 = vadd.f32 %v10575_v14, %v6826_v45 }
 0x63c   : > { %v6958_v10 = vmax.f32 %v6926_v60, 0.0 }
 0x63e   : > { %6990 = vst [vmem:[%s10585_s20 + $0xd0] sm:$0xff] %v6958_v10 }
 0x63f   : > { %v6787_v28 = vpop.f32.mrf.mxu3 }
 0x640   : > { %v6827_v33 = vadd.f32 %v6787_v28, %v6136_v31 }
 0x642   : > { %v6927_v61 = vadd.f32 %v10575_v14, %v6827_v33 }
 0x644   : > { %v6959_v21 = vmax.f32 %v6927_v61, 0.0 }
 0x646   : > { %6991 = vst [vmem:[%s10585_s20 + $0xd8] sm:$0xff] %v6959_v21 }
 0x647   : > { %v6790_v41 = vpop.f32.mrf.mxu3 }
 0x648   : > { %v6828_v47 = vadd.f32 %v6790_v41, %v6137_v42 }
 0x64a   : > { %v6928_v25 = vadd.f32 %v10575_v14, %v6828_v47 }
 0x64c   : > { %v6960_v49 = vmax.f32 %v6928_v25, 0.0 }
 0x64e   : > { %6992 = vst [vmem:[%s10585_s20 + $0xe0] sm:$0xff] %v6960_v49 }
 0x64f   : > { %v6792_v5 = vpop.f32.mrf.mxu3 }
 0x650   : > { %v6829_v12 = vadd.f32 %v6792_v5, %v6138_v63 }
 0x652   : > { %v6929_v1 = vadd.f32 %v10575_v14, %v6829_v12 }
 0x654   : > { %v6961_v38 = vmax.f32 %v6929_v1, 0.0 }
 0x656   : > { %6993 = vst [vmem:[%s10585_s20 + $0xe8] sm:$0xff] %v6961_v38 }
 0x657   : > { %v6795_v58 = vpop.f32.mrf.mxu3 }
 0x658   : > { %v6830_v34 = vadd.f32 %v6795_v58, %v6139_v11 }
 0x65a   : > { %v6930_v35 = vadd.f32 %v10575_v14, %v6830_v34 }
 0x65c   : > { %v6962_v24 = vmax.f32 %v6930_v35, 0.0 }
 0x65e   : > { %6994 = vst [vmem:[%s10585_s20 + $0xf0] sm:$0xff] %v6962_v24 }
 0x65f   : > { %v6797_v27 = vpop.f32.mrf.mxu3 }
 0x660   : > { %v6831_v16 = vadd.f32 %v6797_v27, %v6140_v18 }
 0x662   : > { %v6931_v40 = vadd.f32 %v10575_v14, %v6831_v16 }
 0x664   : > { %v6963_v13 = vmax.f32 %v6931_v40, 0.0 }
 0x666   : > { %6995 = vst [vmem:[%s10585_s20 + $0xf8] sm:$0xff] %v6963_v13 }
 0x667   : > { %7945 = shalt.err (!%p7942_p12)
}
 0x668   : > { %s7996_s17 = smov 128   ;;  %s7997_s20 = smov 8  }
 0x669   : > { %7792 = dma.vmem_to_hbm [thread:$0]  (%p8115_p7), %s7010_s18, 4096, %s7012_s21, %s6997_s13, %s7996_s17, %s7996_s17, %s7997_s20  }
 0x66a PF: > { %s7026_s28 = sand.u32 1, %s7976_s30   ;;  %p10846_p13 = scmp.ge.s32.totalorder %s7988_s12, 2 }
 0x66b   : > { %s7027_s24 = scalar_lea.sflag [#allocation6], %s7026_s28 }
 0x66c   : > { %p7803_p0 = pnand %p10846_p13, %p8083_p6 }
 0x66e   : > { %p7804_p3 = pneg %p7803_p0 }
 0x670   : > { %7971 = dma.done.wait (%p7804_p3), %s7027_s24, 4096  }
 0x671   : > { %7973 = vsyncadd (%p7804_p3), %s7027_s24, 4294963200  ;;  %s10847_s26 = sld [smem:[#allocation13_spill]]  ;;  %p23_p5 = scmp.ge.s32.totalorder %s8101_s23, 4  }
 0x672   : > { %s10848_s11 = sld [smem:[#allocation14_spill]]  ;;  %s10849_s30 = smov %s7980_s10 }
 0x673   : > { %s10851_s12 = smov %s8101_s23  ;;  %25 = sbr.rel (!%p23_p5) target bundleno = 8 (0x8), region = 117 }
 0x677   : > { %s10850_s10 = smov %s10847_s26 }
 0x678   :  { %7033 = vsyncpa [#allocation5], 1 }
 0x679   :  { %7035 = vsyncpa [#allocation5 + $0x1], 1 }
 0x67a   :  { %7036 = vsyncpa [#allocation8], 1 }
 0x67b   :  { %7037 = vsyncpa [#allocation6], 1 }
 0x67c   :  { %7039 = vsyncpa [#allocation6 + $0x1], 1 }

</bundles_post_ra>
